<compile_context>
chip_gen: v7x
topology: tpu7x:2x2x1
jax: 0.10.0
libtpu: 0.0.40
codegen_flags: <defaults>
</compile_context>

<pallas_src>
import functools

import numpy as np
import jax
import jax.numpy as jnp
from jax.experimental import pallas as pl
from jax.experimental.pallas import tpu as pltpu

NODE_DIM = 128                 # config.node_encode_dim
REL_DIM = 404                  # relation embedding dim == GRU hidden size
GRU_IN = 3 * NODE_DIM          # 384
FA_IN = NODE_DIM + REL_DIM     # 532
FP_IN = 2 * NODE_DIM           # 256

REL_PAD = 512                  # 404 padded to 4*128 lanes
HID_PAD = 512                  # GRU hidden padded
GATE_PAD = 3 * HID_PAD         # 1536 (r|z|n gate columns, each 512 wide)
NBR_PAD = NODE_DIM + REL_PAD   # 640 = 5*128, fused [node | rel] neighbor row


# --------------------------------------------------------------------------
# Fused kernel: the whole walk in one invocation.
#   init:          qt <- GRU(cat(0,0,emb0), q_rel)      (only last 128 x-cols)
#   t in [0,T-1):  hnts <- FA(nbr[t]); hAt <- masked col max; hat <- row act[t]
#                  qt <- GRU(cat(hAt,hat,nxt[t]), qt)
#   t = T-1:       hSt <- FS(qt); u0 <- FP(cat(hSt,hAt)); uks <- hSt@hnts^T
#                  out <- sigmoid(cat(u0, uks))
# --------------------------------------------------------------------------
def _qnet_kernel(counts_ref, acts_ref,                       # scalar prefetch (SMEM)
                 qrel_ref, emb0_ref, nxt_ref, nbr_ref,       # activations
                 wi_ref, wh_ref, bi_ref, bh_ref,             # GRU (bf16 W, f32 b)
                 wa_ref, ba_ref, ws_ref, bs_ref, wp_ref, bp_ref,
                 out_ref):                                   # (1, out_pad) f32
    T = nbr_ref.shape[0]
    nb_pad = nbr_ref.shape[1]
    out_ref[...] = jnp.zeros_like(out_ref)                   # deterministic pad lanes

    def gru_from_gates(gx, gh, h):
        # PyTorch GRUCell gate order (r, z, n); padded hidden lanes stay exactly 0.
        r = jax.nn.sigmoid(gx[:, 0:HID_PAD] + gh[:, 0:HID_PAD])
        z = jax.nn.sigmoid(gx[:, HID_PAD:2 * HID_PAD] + gh[:, HID_PAD:2 * HID_PAD])
        n = jnp.tanh(gx[:, 2 * HID_PAD:] + r * gh[:, 2 * HID_PAD:])
        return (1.0 - z) * n + z * h

    def h_gates(h):
        return (jnp.dot(h.astype(jnp.bfloat16), wh_ref[...],
                        preferred_element_type=jnp.float32) + bh_ref[...])

    def fa_and_max(t):
        # Fused FA: single (nb_pad,640)@(640,128) bf16 matmul, f32 accumulation.
        hnts = (jnp.dot(nbr_ref[t], wa_ref[...],
                        preferred_element_type=jnp.float32) + ba_ref[...])   # (nb_pad,128)
        row = jax.lax.broadcasted_iota(jnp.int32, (nb_pad, 1), 0)
        # TODO(synk): a step with zero real neighbors would give hAt = -inf (the
        # original PyTorch code also fails there); qnet_forward asserts >= 1.
        hAt = jnp.max(jnp.where(row < counts_ref[t], hnts, -jnp.inf),
                      axis=0, keepdims=True)                                  # (1,128)
        return hnts, row, hAt

    # ---- init: x0 = cat(0, 0, emb0) -> only the last 128 input rows of W_ih matter.
    h0 = qrel_ref[...]
    gx0 = (jnp.dot(emb0_ref[...].astype(jnp.bfloat16), wi_ref[2 * NODE_DIM:, :],
                   preferred_element_type=jnp.float32) + bi_ref[...])
    qt0 = gru_from_gates(gx0, h_gates(h0), h0)

    # ---- steps 0 .. T-2: FA / masked max / action-row gather / GRU update.
    def body(t, qt):
        hnts, row, hAt = fa_and_max(t)
        hat = jnp.sum(jnp.where(row == acts_ref[t], hnts, 0.0),
                      axis=0, keepdims=True)                                  # (1,128)
        nxt = nxt_ref[pl.ds(t, 1), :]                                         # (1,128)
        x = jnp.concatenate([hAt, hat, nxt], axis=1).astype(jnp.bfloat16)     # (1,384)
        gx = (jnp.dot(x, wi_ref[...], preferred_element_type=jnp.float32)
              + bi_ref[...])
        return gru_from_gates(gx, h_gates(qt), qt)

    qt = jax.lax.fori_loop(0, T - 1, body, qt0, unroll=True)

    # ---- last step: FS / FP head + per-candidate scores.
    hnts, _, hAt = fa_and_max(T - 1)
    hSt = (jnp.dot(qt.astype(jnp.bfloat16), ws_ref[...],
                   preferred_element_type=jnp.float32) + bs_ref[...])         # (1,128)
    sp = jnp.concatenate([hSt, hAt], axis=1)                                  # (1,256)
    u0 = jnp.sum(sp * wp_ref[...], axis=1, keepdims=True) + bp_ref[...]       # (1,1) VPU+XLU
    uks = jax.lax.dot_general(hSt, hnts, (((1,), (1,)), ((), ())),
                              preferred_element_type=jnp.float32)             # (1,nb_pad)
    out_ref[:, :1 + nb_pad] = jax.nn.sigmoid(jnp.concatenate([u0, uks], axis=1))


@functools.lru_cache(maxsize=None)
def _build_qnet_call(num_steps, nb_pad, out_pad):
    c2 = lambda i, c, a: (0, 0)
    c3 = lambda i, c, a: (0, 0, 0)
    grid_spec = pltpu.PrefetchScalarGridSpec(
        num_scalar_prefetch=2,            # counts, action row indices -> SMEM
        grid=(1,),                        # single grid point; walk loops in-kernel
        in_specs=[
            pl.BlockSpec((1, REL_PAD), c2),                    # q_rel (padded)
            pl.BlockSpec((1, NODE_DIM), c2),                   # emb of first node
            pl.BlockSpec((num_steps, NODE_DIM), c2),           # next-node emb per step
            pl.BlockSpec((num_steps, nb_pad, NBR_PAD), c3),    # fused neighbor slab (bf16)
            pl.BlockSpec((GRU_IN, GATE_PAD), c2),              # W_i  (384,1536) bf16
            pl.BlockSpec((HID_PAD, GATE_PAD), c2),             # W_h  (512,1536) bf16
            pl.BlockSpec((1, GATE_PAD), c2),                   # b_ih (f32)
            pl.BlockSpec((1, GATE_PAD), c2),                   # b_hh (f32)
            pl.BlockSpec((NBR_PAD, NODE_DIM), c2),             # FA fused weight bf16
            pl.BlockSpec((1, NODE_DIM), c2),                   # FA bias
            pl.BlockSpec((HID_PAD, NODE_DIM), c2),             # FS weight bf16
            pl.BlockSpec((1, NODE_DIM), c2),                   # FS bias
            pl.BlockSpec((1, FP_IN), c2),                      # FP weight row (1,256)
            pl.BlockSpec((1, 1), c2),                          # FP bias
        ],
        out_specs=pl.BlockSpec((1, out_pad), c2),
    )
    return pl.pallas_call(
        _qnet_kernel,
        grid_spec=grid_spec,
        out_shape=jax.ShapeDtypeStruct((1, out_pad), jnp.float32),
        compiler_params=pltpu.CompilerParams(
            dimension_semantics=("arbitrary",),
            vmem_limit_bytes=32 * 1024 * 1024),
    )


# --------------------------------------------------------------------------
# Parameters: raw PyTorch-layout tensors + packing into the fused/padded layout.
# --------------------------------------------------------------------------
def init_params(key):
    ks = jax.random.split(key, 10)
    s = 0.1
    H = REL_DIM
    return dict(
        w_ih=jax.random.normal(ks[0], (3 * H, GRU_IN), jnp.float32) * s,   # GRUCell.weight_ih
        w_hh=jax.random.normal(ks[1], (3 * H, H), jnp.float32) * s,        # GRUCell.weight_hh
        b_ih=jax.random.normal(ks[2], (3 * H,), jnp.float32) * s,
        b_hh=jax.random.normal(ks[3], (3 * H,), jnp.float32) * s,
        wa=jax.random.normal(ks[4], (NODE_DIM, FA_IN), jnp.float32) * s,   # FA = Linear(532,128)
        ba=jax.random.normal(ks[5], (NODE_DIM,), jnp.float32) * s,
        ws=jax.random.normal(ks[6], (NODE_DIM, REL_DIM), jnp.float32) * s, # FS = Linear(404,128)
        bs=jax.random.normal(ks[7], (NODE_DIM,), jnp.float32) * s,
        wp=jax.random.normal(ks[8], (1, FP_IN), jnp.float32) * s,          # FP = Linear(256,1)
        bp=jax.random.normal(ks[9], (1,), jnp.float32) * s,
    )


def pack_params(raw):
    H = REL_DIM

    def pad_gate_cols(m):      # (rows, 3H) -> (rows, 3*HID_PAD), per-gate zero pad
        return jnp.concatenate(
            [jnp.pad(m[:, g * H:(g + 1) * H], ((0, 0), (0, HID_PAD - H)))
             for g in range(3)], axis=1)

    def pad_gate_vec(v):       # (3H,) -> (1, 3*HID_PAD)
        return jnp.concatenate(
            [jnp.pad(v[g * H:(g + 1) * H], (0, HID_PAD - H)) for g in range(3)]
        ).reshape(1, GATE_PAD)

    wi = pad_gate_cols(raw['w_ih'].T)                                       # (384, 1536)
    wh = jnp.pad(pad_gate_cols(raw['w_hh'].T), ((0, HID_PAD - H), (0, 0)))  # (512, 1536)
    bi = pad_gate_vec(raw['b_ih'])
    bh = pad_gate_vec(raw['b_hh'])

    # Fused FA weight: rows [0,128) node part, [128,532) rel part, rest zero.
    wa = jnp.zeros((NBR_PAD, NODE_DIM), jnp.float32)
    wa = wa.at[:NODE_DIM].set(raw['wa'][:, :NODE_DIM].T)
    wa = wa.at[NODE_DIM:NODE_DIM + REL_DIM].set(raw['wa'][:, NODE_DIM:].T)
    ba = raw['ba'].reshape(1, NODE_DIM)
    ws = jnp.pad(raw['ws'].T, ((0, HID_PAD - REL_DIM), (0, 0)))             # (512, 128)
    bs = raw['bs'].reshape(1, NODE_DIM)
    wp = raw['wp'].reshape(1, FP_IN)                                        # row form (1,256)
    bp = raw['bp'].reshape(1, 1)

    bf = lambda m: m.astype(jnp.bfloat16)
    return dict(wi=bf(wi), wh=bf(wh), bi=bi, bh=bh, wa=bf(wa), ba=ba,
                ws=bf(ws), bs=bs, wp=wp, bp=bp)


# --------------------------------------------------------------------------
# analysis_state equivalent (host-side glue: builds dataX from the graph walk)
# --------------------------------------------------------------------------
def analysis_state(state_tup, graph, node_emb, rel_emb):
    dataX = [np.asarray(rel_emb[state_tup[0]], np.float32).reshape(1, -1)]   # (1, 404)
    node_index, action_index, action_candidate = [], [], [-1]
    for i in range(1, len(state_tup)):
        node_index.append(len(dataX))
        dataX.append(np.asarray(node_emb[state_tup[i]], np.float32).reshape(1, -1))
        for node, rel in graph[state_tup[i]]:
            if i < len(state_tup) - 1 and node == state_tup[i + 1]:
                action_index.append(len(dataX))
            dataX.append(np.concatenate(
                [np.asarray(node_emb[node], np.float32).reshape(1, -1),
                 np.asarray(rel_emb[rel], np.float32).reshape(1, -1)], axis=1))  # (1, 532)
            if i == len(state_tup) - 1:
                action_candidate.append(node)
    return dataX, node_index, action_index, action_candidate


# --------------------------------------------------------------------------
# QNet.forward: numpy marshaling into padded tensors (one device transfer
# each), then a single fused pallas_call for the whole walk.
# --------------------------------------------------------------------------
def qnet_forward(dataX, node_index, action_index, kparams):
    T = len(node_index)
    bounds = list(node_index) + [len(dataX)]
    nb_counts = [bounds[t + 1] - bounds[t] - 1 for t in range(T)]
    assert min(nb_counts) >= 1, "every path node needs at least one neighbor"
    max_nb = max(nb_counts)
    nb_pad = max(8, 1 << (max_nb - 1).bit_length())          # power-of-two bucket
    out_pad = pl.cdiv(nb_pad + 1, 128) * 128

    nbr = np.zeros((T, nb_pad, NBR_PAD), np.float32)          # [node 128 | rel 404 | 0]
    nxt = np.zeros((T, NODE_DIM), np.float32)
    for t in range(T):
        rows = np.concatenate([np.asarray(dataX[j], np.float32)
                               for j in range(bounds[t] + 1, bounds[t + 1])], axis=0)
        nbr[t, :rows.shape[0], :NODE_DIM] = rows[:, :NODE_DIM]
        nbr[t, :rows.shape[0], NODE_DIM:NODE_DIM + REL_DIM] = rows[:, NODE_DIM:]
        if t < T - 1:
            nxt[t] = np.asarray(dataX[node_index[t + 1]], np.float32)[0]

    counts = np.asarray(nb_counts, np.int32)
    acts = np.asarray([action_index[t] - node_index[t] - 1 for t in range(T - 1)]
                      + [0], np.int32)
    qrel = np.zeros((1, REL_PAD), np.float32)
    qrel[0, :REL_DIM] = np.asarray(dataX[0], np.float32)[0]
    emb0 = np.asarray(dataX[node_index[0]], np.float32)

    out_full = _build_qnet_call(T, nb_pad, out_pad)(
        jnp.asarray(counts), jnp.asarray(acts),
        jnp.asarray(qrel), jnp.asarray(emb0), jnp.asarray(nxt),
        jnp.asarray(nbr).astype(jnp.bfloat16),
        kparams['wi'], kparams['wh'], kparams['bi'], kparams['bh'],
        kparams['wa'], kparams['ba'], kparams['ws'], kparams['bs'],
        kparams['wp'], kparams['bp'])
    return out_full[:, :nb_counts[-1] + 1]


# --------------------------------------------------------------------------
# Pure-JAX f32 reference (PyTorch semantics) for numerical verification.
# --------------------------------------------------------------------------
def ref_forward(dataX, node_index, action_index, raw):
    H = REL_DIM
    wi_t, wh_t = raw['w_ih'].T, raw['w_hh'].T
    bi, bh = raw['b_ih'], raw['b_hh']

    def gru(x, h):
        gx = x @ wi_t + bi
        gh = h @ wh_t + bh
        r = jax.nn.sigmoid(gx[:, :H] + gh[:, :H])
        z = jax.nn.sigmoid(gx[:, H:2 * H] + gh[:, H:2 * H])
        n = jnp.tanh(gx[:, 2 * H:] + r * gh[:, 2 * H:])
        return (1.0 - z) * n + z * h

    fa = lambda m: m @ raw['wa'].T + raw['ba']
    zeros = jnp.zeros((1, NODE_DIM), jnp.float32)
    qt = gru(jnp.concatenate([zeros, zeros, jnp.asarray(dataX[1])], axis=1),
             jnp.asarray(dataX[0]))
    for i in range(len(node_index) - 1):
        n1, n2 = node_index[i], node_index[i + 1]
        aid = action_index[i]
        neighbor = jnp.concatenate([jnp.asarray(dataX[j]) for j in range(n1 + 1, n2)],
                                   axis=0)
        hnts = fa(neighbor)
        hAt_ = jnp.max(hnts, axis=0, keepdims=True)
        hat_ = hnts[aid - n1 - 1].reshape(1, -1)
        qt = gru(jnp.concatenate([hAt_, hat_, jnp.asarray(dataX[n2])], axis=1), qt)
    hSt = qt @ raw['ws'].T + raw['bs']
    neighbor = jnp.concatenate(
        [jnp.asarray(dataX[j]) for j in range(node_index[-1] + 1, len(dataX))], axis=0)
    hnts = fa(neighbor)
    hAt = jnp.max(hnts, axis=0, keepdims=True)
    u0 = jnp.concatenate([hSt, hAt], axis=1) @ raw['wp'].T + raw['bp']
    uks = hSt @ hnts.T
    return jax.nn.sigmoid(jnp.concatenate([u0, uks], axis=1))


if __name__ == "__main__":
    key = jax.random.PRNGKey(0)
    k_node, k_rel, k_param = jax.random.split(key, 3)

    # Small synthetic knowledge graph.
    num_nodes, num_rels = 10, 5
    node_emb = np.asarray(
        jax.random.normal(k_node, (num_nodes, NODE_DIM), jnp.float32) * 0.1)
    rel_emb = np.asarray(
        jax.random.normal(k_rel, (num_rels, REL_DIM), jnp.float32) * 0.1)
    raw_params = init_params(k_param)
    kparams = pack_params(raw_params)

    # adjacency: node -> list of (neighbor_node, relation_id); path 0 -> 3 -> 7
    graph = {
        0: [(1, 1), (3, 2), (5, 0), (8, 3)],
        3: [(2, 4), (7, 1), (9, 0), (4, 2)],
        7: [(0, 3), (6, 2), (1, 4), (5, 1)],
    }
    state_tup = (0, 0, 3, 7)   # (query relation, node path...)

    dataX, node_index, action_index, action_candidate = analysis_state(
        state_tup, graph, node_emb, rel_emb)

    qsa = qnet_forward(dataX, node_index, action_index, kparams)
    qsa = jax.block_until_ready(qsa)

    # Verify against the pure-f32 JAX reference (kernel uses bf16 matmul
    # operands with f32 accumulation, hence the slightly relaxed tolerance).
    qsa_ref = ref_forward(dataX, node_index, action_index, raw_params)
    assert qsa.shape == (1, len(action_candidate)), (qsa.shape, len(action_candidate))
    max_err = float(jnp.max(jnp.abs(qsa - qsa_ref)))
    assert jnp.allclose(qsa, qsa_ref, atol=2e-2, rtol=2e-2), max_err

    print("KERNEL_OK")
</pallas_src>

<mosaic_0001>
module attributes {stable_mosaic.version = 11 : i64} {
  func.func @_qnet_kernel(%arg0: i32, %arg1: memref<3xi32, #tpu.memory_space<smem>>, %arg2: memref<3xi32, #tpu.memory_space<smem>>, %arg3: memref<1x512xf32, #tpu.memory_space<vmem>>, %arg4: memref<1x128xf32, #tpu.memory_space<vmem>>, %arg5: memref<3x128xf32, #tpu.memory_space<vmem>>, %arg6: memref<3x8x640xbf16, #tpu.memory_space<vmem>>, %arg7: memref<384x1536xbf16, #tpu.memory_space<vmem>>, %arg8: memref<512x1536xbf16, #tpu.memory_space<vmem>>, %arg9: memref<1x1536xf32, #tpu.memory_space<vmem>>, %arg10: memref<1x1536xf32, #tpu.memory_space<vmem>>, %arg11: memref<640x128xbf16, #tpu.memory_space<vmem>>, %arg12: memref<1x128xf32, #tpu.memory_space<vmem>>, %arg13: memref<512x128xbf16, #tpu.memory_space<vmem>>, %arg14: memref<1x128xf32, #tpu.memory_space<vmem>>, %arg15: memref<1x256xf32, #tpu.memory_space<vmem>>, %arg16: memref<1x1xf32, #tpu.memory_space<vmem>>, %arg17: memref<1x128xf32, #tpu.memory_space<vmem>>) attributes {dimension_semantics = [#tpu.dimension_semantics<arbitrary>], iteration_bounds = array<i64: 1>, scalar_prefetch = 2 : i64, scratch_operands = 0 : i64, tpu.core_type = #tpu.core_type<tc>, window_params = [{pipeline_mode = #tpu.pipeline_mode<synchronous>, transform_indices = @transform_0, window_bounds = array<i64: 1, 512>}, {pipeline_mode = #tpu.pipeline_mode<synchronous>, transform_indices = @transform_1, window_bounds = array<i64: 1, 128>}, {pipeline_mode = #tpu.pipeline_mode<synchronous>, transform_indices = @transform_2, window_bounds = array<i64: 3, 128>}, {pipeline_mode = #tpu.pipeline_mode<synchronous>, transform_indices = @transform_3, window_bounds = array<i64: 3, 8, 640>}, {pipeline_mode = #tpu.pipeline_mode<synchronous>, transform_indices = @transform_4, window_bounds = array<i64: 384, 1536>}, {pipeline_mode = #tpu.pipeline_mode<synchronous>, transform_indices = @transform_5, window_bounds = array<i64: 512, 1536>}, {pipeline_mode = #tpu.pipeline_mode<synchronous>, transform_indices = @transform_6, window_bounds = array<i64: 1, 1536>}, {pipeline_mode = #tpu.pipeline_mode<synchronous>, transform_indices = @transform_7, window_bounds = array<i64: 1, 1536>}, {pipeline_mode = #tpu.pipeline_mode<synchronous>, transform_indices = @transform_8, window_bounds = array<i64: 640, 128>}, {pipeline_mode = #tpu.pipeline_mode<synchronous>, transform_indices = @transform_9, window_bounds = array<i64: 1, 128>}, {pipeline_mode = #tpu.pipeline_mode<synchronous>, transform_indices = @transform_10, window_bounds = array<i64: 512, 128>}, {pipeline_mode = #tpu.pipeline_mode<synchronous>, transform_indices = @transform_11, window_bounds = array<i64: 1, 128>}, {pipeline_mode = #tpu.pipeline_mode<synchronous>, transform_indices = @transform_12, window_bounds = array<i64: 1, 256>}, {pipeline_mode = #tpu.pipeline_mode<synchronous>, transform_indices = @transform_13, window_bounds = array<i64: 1, 1>}, {pipeline_mode = #tpu.pipeline_mode<synchronous>, transform_indices = @transform_14, window_bounds = array<i64: 1, 128>}]} {
    %cst = arith.constant 0.000000e+00 : f32
    %0 = vector.broadcast %cst : f32 to vector<1x128xf32>
    %c0 = arith.constant 0 : index
    %c0_0 = arith.constant 0 : index
    %1 = vector.load %arg17[%c0, %c0_0] : memref<1x128xf32, #tpu.memory_space<vmem>>, vector<1x128xf32>
    tpu.vector_store %arg17[%c0, %c0_0], %0 {strides = array<i32>} : memref<1x128xf32, #tpu.memory_space<vmem>>, vector<1x128xf32>,
    %c0_1 = arith.constant 0 : index
    %c0_2 = arith.constant 0 : index
    %2 = vector.load %arg3[%c0_1, %c0_2] : memref<1x512xf32, #tpu.memory_space<vmem>>, vector<1x512xf32>
    %c0_3 = arith.constant 0 : index
    %c0_4 = arith.constant 0 : index
    %3 = vector.load %arg4[%c0_3, %c0_4] : memref<1x128xf32, #tpu.memory_space<vmem>>, vector<1x128xf32>
    %4 = arith.truncf %3 : vector<1x128xf32> to vector<1x128xbf16>
    %c256 = arith.constant 256 : index
    %c0_5 = arith.constant 0 : index
    %5 = vector.load %arg7[%c256, %c0_5] : memref<384x1536xbf16, #tpu.memory_space<vmem>>, vector<128x1536xbf16>
    %cst_6 = arith.constant dense<0.000000e+00> : vector<1x1536xf32>
    %6 = tpu.matmul %4, %5, %cst_6 {dimension_numbers = #tpu.dot_dimension_numbers<[1], [0], [0], [1], [0, 0, 1, 1], [], []>} : vector<1x128xbf16>, vector<128x1536xbf16>, vector<1x1536xf32> -> vector<1x1536xf32>
    %c0_7 = arith.constant 0 : index
    %c0_8 = arith.constant 0 : index
    %7 = vector.load %arg9[%c0_7, %c0_8] : memref<1x1536xf32, #tpu.memory_space<vmem>>, vector<1x1536xf32>
    %8 = arith.addf %6, %7 : vector<1x1536xf32>
    %9 = arith.truncf %2 : vector<1x512xf32> to vector<1x512xbf16>
    %c0_9 = arith.constant 0 : index
    %c0_10 = arith.constant 0 : index
    %10 = vector.load %arg8[%c0_9, %c0_10] : memref<512x1536xbf16, #tpu.memory_space<vmem>>, vector<512x1536xbf16>
    %cst_11 = arith.constant dense<0.000000e+00> : vector<1x1536xf32>
    %11 = tpu.matmul %9, %10, %cst_11 {dimension_numbers = #tpu.dot_dimension_numbers<[1], [0], [0], [1], [0, 0, 1, 1], [], []>} : vector<1x512xbf16>, vector<512x1536xbf16>, vector<1x1536xf32> -> vector<1x1536xf32>
    %c0_12 = arith.constant 0 : index
    %c0_13 = arith.constant 0 : index
    %12 = vector.load %arg10[%c0_12, %c0_13] : memref<1x1536xf32, #tpu.memory_space<vmem>>, vector<1x1536xf32>
    %13 = arith.addf %11, %12 : vector<1x1536xf32>
    %14 = vector.extract_strided_slice %8 {offsets = [0, 0], sizes = [1, 512], strides = [1, 1]} : vector<1x1536xf32> to vector<1x512xf32>
    %15 = vector.extract_strided_slice %13 {offsets = [0, 0], sizes = [1, 512], strides = [1, 1]} : vector<1x1536xf32> to vector<1x512xf32>
    %16 = arith.addf %14, %15 : vector<1x512xf32>
    %17 = arith.negf %16 : vector<1x512xf32>
    %18 = math.exp %17 : vector<1x512xf32>
    %cst_14 = arith.constant 1.000000e+00 : f32
    %19 = vector.broadcast %cst_14 : f32 to vector<1x512xf32>
    %20 = arith.addf %19, %18 : vector<1x512xf32>
    %21 = arith.divf %19, %20 : vector<1x512xf32>
    %22 = vector.extract_strided_slice %8 {offsets = [0, 512], sizes = [1, 512], strides = [1, 1]} : vector<1x1536xf32> to vector<1x512xf32>
    %23 = vector.extract_strided_slice %13 {offsets = [0, 512], sizes = [1, 512], strides = [1, 1]} : vector<1x1536xf32> to vector<1x512xf32>
    %24 = arith.addf %22, %23 : vector<1x512xf32>
    %25 = arith.negf %24 : vector<1x512xf32>
    %26 = math.exp %25 : vector<1x512xf32>
    %cst_15 = arith.constant 1.000000e+00 : f32
    %27 = vector.broadcast %cst_15 : f32 to vector<1x512xf32>
    %28 = arith.addf %27, %26 : vector<1x512xf32>
    %29 = arith.divf %27, %28 : vector<1x512xf32>
    %30 = vector.extract_strided_slice %8 {offsets = [0, 1024], sizes = [1, 512], strides = [1, 1]} : vector<1x1536xf32> to vector<1x512xf32>
    %31 = vector.extract_strided_slice %13 {offsets = [0, 1024], sizes = [1, 512], strides = [1, 1]} : vector<1x1536xf32> to vector<1x512xf32>
    %32 = arith.mulf %21, %31 : vector<1x512xf32>
    %33 = arith.addf %30, %32 : vector<1x512xf32>
    %34 = math.tanh %33 : vector<1x512xf32>
    %cst_16 = arith.constant 1.000000e+00 : f32
    %35 = vector.broadcast %cst_16 : f32 to vector<1x512xf32>
    %36 = arith.subf %35, %29 : vector<1x512xf32>
    %37 = arith.mulf %36, %34 : vector<1x512xf32>
    %38 = arith.mulf %29, %2 : vector<1x512xf32>
    %39 = arith.addf %37, %38 : vector<1x512xf32>
    %c0_i32 = arith.constant 0 : i32
    %40 = arith.index_cast %c0_i32 : i32 to index
    %c0_17 = arith.constant 0 : index
    %c0_18 = arith.constant 0 : index
    %41 = vector.load %arg6[%40, %c0_17, %c0_18] : memref<3x8x640xbf16, #tpu.memory_space<vmem>>, vector<1x8x640xbf16>
    %42 = vector.shape_cast %41 : vector<1x8x640xbf16> to vector<8x640xbf16>
    %c0_19 = arith.constant 0 : index
    %c0_20 = arith.constant 0 : index
    %43 = vector.load %arg11[%c0_19, %c0_20] : memref<640x128xbf16, #tpu.memory_space<vmem>>, vector<640x128xbf16>
    %cst_21 = arith.constant dense<0.000000e+00> : vector<8x128xf32>
    %44 = tpu.matmul %42, %43, %cst_21 {dimension_numbers = #tpu.dot_dimension_numbers<[1], [0], [0], [1], [0, 0, 1, 1], [], []>} : vector<8x640xbf16>, vector<640x128xbf16>, vector<8x128xf32> -> vector<8x128xf32>
    %c0_22 = arith.constant 0 : index
    %c0_23 = arith.constant 0 : index
    %45 = vector.load %arg12[%c0_22, %c0_23] : memref<1x128xf32, #tpu.memory_space<vmem>>, vector<1x128xf32>
    %46 = vector.broadcast %45 : vector<1x128xf32> to vector<8x128xf32>
    %47 = arith.addf %44, %46 : vector<8x128xf32>
    %48 = tpu.iota {dimensions = array<i32: 0>} : vector<8x1xi32>
    %49 = arith.index_cast %c0_i32 : i32 to index
    %50 = memref.load %arg1[%49] : memref<3xi32, #tpu.memory_space<smem>>
    %51 = vector.broadcast %50 : i32 to vector<8x1xi32>
    %52 = arith.cmpi slt, %48, %51 : vector<8x1xi32>
    %cst_24 = arith.constant 0xFF800000 : f32
    %53 = vector.shape_cast %52 : vector<8x1xi1> to vector<8x1xi1>
    %54 = vector.broadcast %53 : vector<8x1xi1> to vector<8x128xi1>
    %55 = vector.broadcast %cst_24 : f32 to vector<8x128xf32>
    %56 = arith.select %54, %47, %55 : vector<8x128xi1>, vector<8x128xf32>
    %cst_25 = arith.constant dense<0xFF800000> : vector<128xf32>
    %57 = vector.multi_reduction <maximumf>, %56, %cst_25 [0] : vector<8x128xf32> to vector<128xf32>
    %58 = vector.shape_cast %57 : vector<128xf32> to vector<1x128xf32>
    %59 = arith.index_cast %c0_i32 : i32 to index
    %60 = memref.load %arg2[%59] : memref<3xi32, #tpu.memory_space<smem>>
    %61 = vector.broadcast %60 : i32 to vector<8x1xi32>
    %62 = arith.cmpi eq, %48, %61 : vector<8x1xi32>
    %cst_26 = arith.constant 0.000000e+00 : f32
    %63 = vector.shape_cast %62 : vector<8x1xi1> to vector<8x1xi1>
    %64 = vector.broadcast %63 : vector<8x1xi1> to vector<8x128xi1>
    %65 = vector.broadcast %cst_26 : f32 to vector<8x128xf32>
    %66 = arith.select %64, %47, %65 : vector<8x128xi1>, vector<8x128xf32>
    %cst_27 = arith.constant dense<0.000000e+00> : vector<128xf32>
    %67 = vector.multi_reduction <add>, %66, %cst_27 [0] : vector<8x128xf32> to vector<128xf32>
    %68 = vector.shape_cast %67 : vector<128xf32> to vector<1x128xf32>
    %69 = arith.index_cast %c0_i32 : i32 to index
    %c0_28 = arith.constant 0 : index
    %70 = vector.load %arg5[%69, %c0_28] : memref<3x128xf32, #tpu.memory_space<vmem>>, vector<1x128xf32>
    %71 = tpu.concatenate %58, %68, %70 in 1 : vector<1x128xf32>, vector<1x128xf32>, vector<1x128xf32> -> vector<1x384xf32>
    %72 = arith.truncf %71 : vector<1x384xf32> to vector<1x384xbf16>
    %c0_29 = arith.constant 0 : index
    %c0_30 = arith.constant 0 : index
    %73 = vector.load %arg7[%c0_29, %c0_30] : memref<384x1536xbf16, #tpu.memory_space<vmem>>, vector<384x1536xbf16>
    %cst_31 = arith.constant dense<0.000000e+00> : vector<1x1536xf32>
    %74 = tpu.matmul %72, %73, %cst_31 {dimension_numbers = #tpu.dot_dimension_numbers<[1], [0], [0], [1], [0, 0, 1, 1], [], []>} : vector<1x384xbf16>, vector<384x1536xbf16>, vector<1x1536xf32> -> vector<1x1536xf32>
    %c0_32 = arith.constant 0 : index
    %c0_33 = arith.constant 0 : index
    %75 = vector.load %arg9[%c0_32, %c0_33] : memref<1x1536xf32, #tpu.memory_space<vmem>>, vector<1x1536xf32>
    %76 = arith.addf %74, %75 : vector<1x1536xf32>
    %77 = arith.truncf %39 : vector<1x512xf32> to vector<1x512xbf16>
    %c0_34 = arith.constant 0 : index
    %c0_35 = arith.constant 0 : index
    %78 = vector.load %arg8[%c0_34, %c0_35] : memref<512x1536xbf16, #tpu.memory_space<vmem>>, vector<512x1536xbf16>
    %cst_36 = arith.constant dense<0.000000e+00> : vector<1x1536xf32>
    %79 = tpu.matmul %77, %78, %cst_36 {dimension_numbers = #tpu.dot_dimension_numbers<[1], [0], [0], [1], [0, 0, 1, 1], [], []>} : vector<1x512xbf16>, vector<512x1536xbf16>, vector<1x1536xf32> -> vector<1x1536xf32>
    %c0_37 = arith.constant 0 : index
    %c0_38 = arith.constant 0 : index
    %80 = vector.load %arg10[%c0_37, %c0_38] : memref<1x1536xf32, #tpu.memory_space<vmem>>, vector<1x1536xf32>
    %81 = arith.addf %79, %80 : vector<1x1536xf32>
    %82 = vector.extract_strided_slice %76 {offsets = [0, 0], sizes = [1, 512], strides = [1, 1]} : vector<1x1536xf32> to vector<1x512xf32>
    %83 = vector.extract_strided_slice %81 {offsets = [0, 0], sizes = [1, 512], strides = [1, 1]} : vector<1x1536xf32> to vector<1x512xf32>
    %84 = arith.addf %82, %83 : vector<1x512xf32>
    %85 = arith.negf %84 : vector<1x512xf32>
    %86 = math.exp %85 : vector<1x512xf32>
    %cst_39 = arith.constant 1.000000e+00 : f32
    %87 = vector.broadcast %cst_39 : f32 to vector<1x512xf32>
    %88 = arith.addf %87, %86 : vector<1x512xf32>
    %89 = arith.divf %87, %88 : vector<1x512xf32>
    %90 = vector.extract_strided_slice %76 {offsets = [0, 512], sizes = [1, 512], strides = [1, 1]} : vector<1x1536xf32> to vector<1x512xf32>
    %91 = vector.extract_strided_slice %81 {offsets = [0, 512], sizes = [1, 512], strides = [1, 1]} : vector<1x1536xf32> to vector<1x512xf32>
    %92 = arith.addf %90, %91 : vector<1x512xf32>
    %93 = arith.negf %92 : vector<1x512xf32>
    %94 = math.exp %93 : vector<1x512xf32>
    %cst_40 = arith.constant 1.000000e+00 : f32
    %95 = vector.broadcast %cst_40 : f32 to vector<1x512xf32>
    %96 = arith.addf %95, %94 : vector<1x512xf32>
    %97 = arith.divf %95, %96 : vector<1x512xf32>
    %98 = vector.extract_strided_slice %76 {offsets = [0, 1024], sizes = [1, 512], strides = [1, 1]} : vector<1x1536xf32> to vector<1x512xf32>
    %99 = vector.extract_strided_slice %81 {offsets = [0, 1024], sizes = [1, 512], strides = [1, 1]} : vector<1x1536xf32> to vector<1x512xf32>
    %100 = arith.mulf %89, %99 : vector<1x512xf32>
    %101 = arith.addf %98, %100 : vector<1x512xf32>
    %102 = math.tanh %101 : vector<1x512xf32>
    %cst_41 = arith.constant 1.000000e+00 : f32
    %103 = vector.broadcast %cst_41 : f32 to vector<1x512xf32>
    %104 = arith.subf %103, %97 : vector<1x512xf32>
    %105 = arith.mulf %104, %102 : vector<1x512xf32>
    %106 = arith.mulf %97, %39 : vector<1x512xf32>
    %107 = arith.addf %105, %106 : vector<1x512xf32>
    %c1_i32 = arith.constant 1 : i32
    %108 = arith.index_cast %c1_i32 : i32 to index
    %c0_42 = arith.constant 0 : index
    %c0_43 = arith.constant 0 : index
    %109 = vector.load %arg6[%108, %c0_42, %c0_43] : memref<3x8x640xbf16, #tpu.memory_space<vmem>>, vector<1x8x640xbf16>
    %110 = vector.shape_cast %109 : vector<1x8x640xbf16> to vector<8x640xbf16>
    %c0_44 = arith.constant 0 : index
    %c0_45 = arith.constant 0 : index
    %111 = vector.load %arg11[%c0_44, %c0_45] : memref<640x128xbf16, #tpu.memory_space<vmem>>, vector<640x128xbf16>
    %cst_46 = arith.constant dense<0.000000e+00> : vector<8x128xf32>
    %112 = tpu.matmul %110, %111, %cst_46 {dimension_numbers = #tpu.dot_dimension_numbers<[1], [0], [0], [1], [0, 0, 1, 1], [], []>} : vector<8x640xbf16>, vector<640x128xbf16>, vector<8x128xf32> -> vector<8x128xf32>
    %c0_47 = arith.constant 0 : index
    %c0_48 = arith.constant 0 : index
    %113 = vector.load %arg12[%c0_47, %c0_48] : memref<1x128xf32, #tpu.memory_space<vmem>>, vector<1x128xf32>
    %114 = vector.broadcast %113 : vector<1x128xf32> to vector<8x128xf32>
    %115 = arith.addf %112, %114 : vector<8x128xf32>
    %116 = tpu.iota {dimensions = array<i32: 0>} : vector<8x1xi32>
    %117 = arith.index_cast %c1_i32 : i32 to index
    %118 = memref.load %arg1[%117] : memref<3xi32, #tpu.memory_space<smem>>
    %119 = vector.broadcast %118 : i32 to vector<8x1xi32>
    %120 = arith.cmpi slt, %116, %119 : vector<8x1xi32>
    %cst_49 = arith.constant 0xFF800000 : f32
    %121 = vector.shape_cast %120 : vector<8x1xi1> to vector<8x1xi1>
    %122 = vector.broadcast %121 : vector<8x1xi1> to vector<8x128xi1>
    %123 = vector.broadcast %cst_49 : f32 to vector<8x128xf32>
    %124 = arith.select %122, %115, %123 : vector<8x128xi1>, vector<8x128xf32>
    %cst_50 = arith.constant dense<0xFF800000> : vector<128xf32>
    %125 = vector.multi_reduction <maximumf>, %124, %cst_50 [0] : vector<8x128xf32> to vector<128xf32>
    %126 = vector.shape_cast %125 : vector<128xf32> to vector<1x128xf32>
    %127 = arith.index_cast %c1_i32 : i32 to index
    %128 = memref.load %arg2[%127] : memref<3xi32, #tpu.memory_space<smem>>
    %129 = vector.broadcast %128 : i32 to vector<8x1xi32>
    %130 = arith.cmpi eq, %116, %129 : vector<8x1xi32>
    %cst_51 = arith.constant 0.000000e+00 : f32
    %131 = vector.shape_cast %130 : vector<8x1xi1> to vector<8x1xi1>
    %132 = vector.broadcast %131 : vector<8x1xi1> to vector<8x128xi1>
    %133 = vector.broadcast %cst_51 : f32 to vector<8x128xf32>
    %134 = arith.select %132, %115, %133 : vector<8x128xi1>, vector<8x128xf32>
    %cst_52 = arith.constant dense<0.000000e+00> : vector<128xf32>
    %135 = vector.multi_reduction <add>, %134, %cst_52 [0] : vector<8x128xf32> to vector<128xf32>
    %136 = vector.shape_cast %135 : vector<128xf32> to vector<1x128xf32>
    %137 = arith.index_cast %c1_i32 : i32 to index
    %c0_53 = arith.constant 0 : index
    %138 = vector.load %arg5[%137, %c0_53] : memref<3x128xf32, #tpu.memory_space<vmem>>, vector<1x128xf32>
    %139 = tpu.concatenate %126, %136, %138 in 1 : vector<1x128xf32>, vector<1x128xf32>, vector<1x128xf32> -> vector<1x384xf32>
    %140 = arith.truncf %139 : vector<1x384xf32> to vector<1x384xbf16>
    %c0_54 = arith.constant 0 : index
    %c0_55 = arith.constant 0 : index
    %141 = vector.load %arg7[%c0_54, %c0_55] : memref<384x1536xbf16, #tpu.memory_space<vmem>>, vector<384x1536xbf16>
    %cst_56 = arith.constant dense<0.000000e+00> : vector<1x1536xf32>
    %142 = tpu.matmul %140, %141, %cst_56 {dimension_numbers = #tpu.dot_dimension_numbers<[1], [0], [0], [1], [0, 0, 1, 1], [], []>} : vector<1x384xbf16>, vector<384x1536xbf16>, vector<1x1536xf32> -> vector<1x1536xf32>
    %c0_57 = arith.constant 0 : index
    %c0_58 = arith.constant 0 : index
    %143 = vector.load %arg9[%c0_57, %c0_58] : memref<1x1536xf32, #tpu.memory_space<vmem>>, vector<1x1536xf32>
    %144 = arith.addf %142, %143 : vector<1x1536xf32>
    %145 = arith.truncf %107 : vector<1x512xf32> to vector<1x512xbf16>
    %c0_59 = arith.constant 0 : index
    %c0_60 = arith.constant 0 : index
    %146 = vector.load %arg8[%c0_59, %c0_60] : memref<512x1536xbf16, #tpu.memory_space<vmem>>, vector<512x1536xbf16>
    %cst_61 = arith.constant dense<0.000000e+00> : vector<1x1536xf32>
    %147 = tpu.matmul %145, %146, %cst_61 {dimension_numbers = #tpu.dot_dimension_numbers<[1], [0], [0], [1], [0, 0, 1, 1], [], []>} : vector<1x512xbf16>, vector<512x1536xbf16>, vector<1x1536xf32> -> vector<1x1536xf32>
    %c0_62 = arith.constant 0 : index
    %c0_63 = arith.constant 0 : index
    %148 = vector.load %arg10[%c0_62, %c0_63] : memref<1x1536xf32, #tpu.memory_space<vmem>>, vector<1x1536xf32>
    %149 = arith.addf %147, %148 : vector<1x1536xf32>
    %150 = vector.extract_strided_slice %144 {offsets = [0, 0], sizes = [1, 512], strides = [1, 1]} : vector<1x1536xf32> to vector<1x512xf32>
    %151 = vector.extract_strided_slice %149 {offsets = [0, 0], sizes = [1, 512], strides = [1, 1]} : vector<1x1536xf32> to vector<1x512xf32>
    %152 = arith.addf %150, %151 : vector<1x512xf32>
    %153 = arith.negf %152 : vector<1x512xf32>
    %154 = math.exp %153 : vector<1x512xf32>
    %cst_64 = arith.constant 1.000000e+00 : f32
    %155 = vector.broadcast %cst_64 : f32 to vector<1x512xf32>
    %156 = arith.addf %155, %154 : vector<1x512xf32>
    %157 = arith.divf %155, %156 : vector<1x512xf32>
    %158 = vector.extract_strided_slice %144 {offsets = [0, 512], sizes = [1, 512], strides = [1, 1]} : vector<1x1536xf32> to vector<1x512xf32>
    %159 = vector.extract_strided_slice %149 {offsets = [0, 512], sizes = [1, 512], strides = [1, 1]} : vector<1x1536xf32> to vector<1x512xf32>
    %160 = arith.addf %158, %159 : vector<1x512xf32>
    %161 = arith.negf %160 : vector<1x512xf32>
    %162 = math.exp %161 : vector<1x512xf32>
    %cst_65 = arith.constant 1.000000e+00 : f32
    %163 = vector.broadcast %cst_65 : f32 to vector<1x512xf32>
    %164 = arith.addf %163, %162 : vector<1x512xf32>
    %165 = arith.divf %163, %164 : vector<1x512xf32>
    %166 = vector.extract_strided_slice %144 {offsets = [0, 1024], sizes = [1, 512], strides = [1, 1]} : vector<1x1536xf32> to vector<1x512xf32>
    %167 = vector.extract_strided_slice %149 {offsets = [0, 1024], sizes = [1, 512], strides = [1, 1]} : vector<1x1536xf32> to vector<1x512xf32>
    %168 = arith.mulf %157, %167 : vector<1x512xf32>
    %169 = arith.addf %166, %168 : vector<1x512xf32>
    %170 = math.tanh %169 : vector<1x512xf32>
    %cst_66 = arith.constant 1.000000e+00 : f32
    %171 = vector.broadcast %cst_66 : f32 to vector<1x512xf32>
    %172 = arith.subf %171, %165 : vector<1x512xf32>
    %173 = arith.mulf %172, %170 : vector<1x512xf32>
    %174 = arith.mulf %165, %107 : vector<1x512xf32>
    %175 = arith.addf %173, %174 : vector<1x512xf32>
    %c2_i32 = arith.constant 2 : i32
    %c2 = arith.constant 2 : index
    %c0_67 = arith.constant 0 : index
    %c0_68 = arith.constant 0 : index
    %176 = vector.load %arg6[%c2, %c0_67, %c0_68] : memref<3x8x640xbf16, #tpu.memory_space<vmem>>, vector<1x8x640xbf16>
    %177 = vector.shape_cast %176 : vector<1x8x640xbf16> to vector<8x640xbf16>
    %c0_69 = arith.constant 0 : index
    %c0_70 = arith.constant 0 : index
    %178 = vector.load %arg11[%c0_69, %c0_70] : memref<640x128xbf16, #tpu.memory_space<vmem>>, vector<640x128xbf16>
    %cst_71 = arith.constant dense<0.000000e+00> : vector<8x128xf32>
    %179 = tpu.matmul %177, %178, %cst_71 {dimension_numbers = #tpu.dot_dimension_numbers<[1], [0], [0], [1], [0, 0, 1, 1], [], []>} : vector<8x640xbf16>, vector<640x128xbf16>, vector<8x128xf32> -> vector<8x128xf32>
    %c0_72 = arith.constant 0 : index
    %c0_73 = arith.constant 0 : index
    %180 = vector.load %arg12[%c0_72, %c0_73] : memref<1x128xf32, #tpu.memory_space<vmem>>, vector<1x128xf32>
    %181 = vector.broadcast %180 : vector<1x128xf32> to vector<8x128xf32>
    %182 = arith.addf %179, %181 : vector<8x128xf32>
    %183 = tpu.iota {dimensions = array<i32: 0>} : vector<8x1xi32>
    %c2_74 = arith.constant 2 : index
    %184 = memref.load %arg1[%c2_74] : memref<3xi32, #tpu.memory_space<smem>>
    %185 = vector.broadcast %184 : i32 to vector<8x1xi32>
    %186 = arith.cmpi slt, %183, %185 : vector<8x1xi32>
    %cst_75 = arith.constant 0xFF800000 : f32
    %187 = vector.shape_cast %186 : vector<8x1xi1> to vector<8x1xi1>
    %188 = vector.broadcast %187 : vector<8x1xi1> to vector<8x128xi1>
    %189 = vector.broadcast %cst_75 : f32 to vector<8x128xf32>
    %190 = arith.select %188, %182, %189 : vector<8x128xi1>, vector<8x128xf32>
    %cst_76 = arith.constant dense<0xFF800000> : vector<128xf32>
    %191 = vector.multi_reduction <maximumf>, %190, %cst_76 [0] : vector<8x128xf32> to vector<128xf32>
    %192 = vector.shape_cast %191 : vector<128xf32> to vector<1x128xf32>
    %193 = arith.truncf %175 : vector<1x512xf32> to vector<1x512xbf16>
    %c0_77 = arith.constant 0 : index
    %c0_78 = arith.constant 0 : index
    %194 = vector.load %arg13[%c0_77, %c0_78] : memref<512x128xbf16, #tpu.memory_space<vmem>>, vector<512x128xbf16>
    %cst_79 = arith.constant dense<0.000000e+00> : vector<1x128xf32>
    %195 = tpu.matmul %193, %194, %cst_79 {dimension_numbers = #tpu.dot_dimension_numbers<[1], [0], [0], [1], [0, 0, 1, 1], [], []>} : vector<1x512xbf16>, vector<512x128xbf16>, vector<1x128xf32> -> vector<1x128xf32>
    %c0_80 = arith.constant 0 : index
    %c0_81 = arith.constant 0 : index
    %196 = vector.load %arg14[%c0_80, %c0_81] : memref<1x128xf32, #tpu.memory_space<vmem>>, vector<1x128xf32>
    %197 = arith.addf %195, %196 : vector<1x128xf32>
    %198 = tpu.concatenate %197, %192 in 1 : vector<1x128xf32>, vector<1x128xf32> -> vector<1x256xf32>
    %c0_82 = arith.constant 0 : index
    %c0_83 = arith.constant 0 : index
    %199 = vector.load %arg15[%c0_82, %c0_83] : memref<1x256xf32, #tpu.memory_space<vmem>>, vector<1x256xf32>
    %200 = arith.mulf %198, %199 : vector<1x256xf32>
    %cst_84 = arith.constant dense<0.000000e+00> : vector<1xf32>
    %201 = vector.multi_reduction <add>, %200, %cst_84 [1] : vector<1x256xf32> to vector<1xf32>
    %202 = vector.shape_cast %201 : vector<1xf32> to vector<1x1xf32>
    %c0_85 = arith.constant 0 : index
    %c0_86 = arith.constant 0 : index
    %203 = vector.load %arg16[%c0_85, %c0_86] : memref<1x1xf32, #tpu.memory_space<vmem>>, vector<1x1xf32>
    %204 = arith.addf %202, %203 : vector<1x1xf32>
    %cst_87 = arith.constant dense<0.000000e+00> : vector<1x8xf32>
    %205 = tpu.matmul %197, %182, %cst_87 {dimension_numbers = #tpu.dot_dimension_numbers<[1], [1], [0], [0], [0, 0, 1, 0], [], []>} : vector<1x128xf32>, vector<8x128xf32>, vector<1x8xf32> -> vector<1x8xf32>
    %206 = tpu.concatenate %204, %205 in 1 : vector<1x1xf32>, vector<1x8xf32> -> vector<1x9xf32>
    %207 = arith.negf %206 : vector<1x9xf32>
    %208 = math.exp %207 : vector<1x9xf32>
    %cst_88 = arith.constant 1.000000e+00 : f32
    %209 = vector.broadcast %cst_88 : f32 to vector<1x9xf32>
    %210 = arith.addf %209, %208 : vector<1x9xf32>
    %211 = arith.divf %209, %210 : vector<1x9xf32>
    %c0_89 = arith.constant 0 : index
    %c0_90 = arith.constant 0 : index
    %212 = vector.load %arg17[%c0_89, %c0_90] : memref<1x128xf32, #tpu.memory_space<vmem>>, vector<1x9xf32>
    tpu.vector_store %arg17[%c0_89, %c0_90], %211 {strides = array<i32>} : memref<1x128xf32, #tpu.memory_space<vmem>>, vector<1x9xf32>,
    return
  }
  func.func @transform_0(%arg0: i32, %arg1: memref<3xi32, #tpu.memory_space<smem>>, %arg2: memref<3xi32, #tpu.memory_space<smem>>) -> (i32, i32) {
    %c0_i32 = arith.constant 0 : i32
    %c0_i32_0 = arith.constant 0 : i32
    %c0_i32_1 = arith.constant 0 : i32
    return %c0_i32, %c0_i32_0 : i32, i32
  }
  func.func @transform_1(%arg0: i32, %arg1: memref<3xi32, #tpu.memory_space<smem>>, %arg2: memref<3xi32, #tpu.memory_space<smem>>) -> (i32, i32) {
    %c0_i32 = arith.constant 0 : i32
    %c0_i32_0 = arith.constant 0 : i32
    %c0_i32_1 = arith.constant 0 : i32
    return %c0_i32, %c0_i32_0 : i32, i32
  }
  func.func @transform_2(%arg0: i32, %arg1: memref<3xi32, #tpu.memory_space<smem>>, %arg2: memref<3xi32, #tpu.memory_space<smem>>) -> (i32, i32) {
    %c0_i32 = arith.constant 0 : i32
    %c0_i32_0 = arith.constant 0 : i32
    %c0_i32_1 = arith.constant 0 : i32
    return %c0_i32, %c0_i32_0 : i32, i32
  }
  func.func @transform_3(%arg0: i32, %arg1: memref<3xi32, #tpu.memory_space<smem>>, %arg2: memref<3xi32, #tpu.memory_space<smem>>) -> (i32, i32, i32) {
    %c0_i32 = arith.constant 0 : i32
    %c0_i32_0 = arith.constant 0 : i32
    %c0_i32_1 = arith.constant 0 : i32
    %c0_i32_2 = arith.constant 0 : i32
    return %c0_i32, %c0_i32_0, %c0_i32_1 : i32, i32, i32
  }
  func.func @transform_4(%arg0: i32, %arg1: memref<3xi32, #tpu.memory_space<smem>>, %arg2: memref<3xi32, #tpu.memory_space<smem>>) -> (i32, i32) {
    %c0_i32 = arith.constant 0 : i32
    %c0_i32_0 = arith.constant 0 : i32
    %c0_i32_1 = arith.constant 0 : i32
    return %c0_i32, %c0_i32_0 : i32, i32
  }
  func.func @transform_5(%arg0: i32, %arg1: memref<3xi32, #tpu.memory_space<smem>>, %arg2: memref<3xi32, #tpu.memory_space<smem>>) -> (i32, i32) {
    %c0_i32 = arith.constant 0 : i32
    %c0_i32_0 = arith.constant 0 : i32
    %c0_i32_1 = arith.constant 0 : i32
    return %c0_i32, %c0_i32_0 : i32, i32
  }
  func.func @transform_6(%arg0: i32, %arg1: memref<3xi32, #tpu.memory_space<smem>>, %arg2: memref<3xi32, #tpu.memory_space<smem>>) -> (i32, i32) {
    %c0_i32 = arith.constant 0 : i32
    %c0_i32_0 = arith.constant 0 : i32
    %c0_i32_1 = arith.constant 0 : i32
    return %c0_i32, %c0_i32_0 : i32, i32
  }
  func.func @transform_7(%arg0: i32, %arg1: memref<3xi32, #tpu.memory_space<smem>>, %arg2: memref<3xi32, #tpu.memory_space<smem>>) -> (i32, i32) {
    %c0_i32 = arith.constant 0 : i32
    %c0_i32_0 = arith.constant 0 : i32
    %c0_i32_1 = arith.constant 0 : i32
    return %c0_i32, %c0_i32_0 : i32, i32
  }
  func.func @transform_8(%arg0: i32, %arg1: memref<3xi32, #tpu.memory_space<smem>>, %arg2: memref<3xi32, #tpu.memory_space<smem>>) -> (i32, i32) {
    %c0_i32 = arith.constant 0 : i32
    %c0_i32_0 = arith.constant 0 : i32
    %c0_i32_1 = arith.constant 0 : i32
    return %c0_i32, %c0_i32_0 : i32, i32
  }
  func.func @transform_9(%arg0: i32, %arg1: memref<3xi32, #tpu.memory_space<smem>>, %arg2: memref<3xi32, #tpu.memory_space<smem>>) -> (i32, i32) {
    %c0_i32 = arith.constant 0 : i32
    %c0_i32_0 = arith.constant 0 : i32
    %c0_i32_1 = arith.constant 0 : i32
    return %c0_i32, %c0_i32_0 : i32, i32
  }
  func.func @transform_10(%arg0: i32, %arg1: memref<3xi32, #tpu.memory_space<smem>>, %arg2: memref<3xi32, #tpu.memory_space<smem>>) -> (i32, i32) {
    %c0_i32 = arith.constant 0 : i32
    %c0_i32_0 = arith.constant 0 : i32
    %c0_i32_1 = arith.constant 0 : i32
    return %c0_i32, %c0_i32_0 : i32, i32
  }
  func.func @transform_11(%arg0: i32, %arg1: memref<3xi32, #tpu.memory_space<smem>>, %arg2: memref<3xi32, #tpu.memory_space<smem>>) -> (i32, i32) {
    %c0_i32 = arith.constant 0 : i32
    %c0_i32_0 = arith.constant 0 : i32
    %c0_i32_1 = arith.constant 0 : i32
    return %c0_i32, %c0_i32_0 : i32, i32
  }
  func.func @transform_12(%arg0: i32, %arg1: memref<3xi32, #tpu.memory_space<smem>>, %arg2: memref<3xi32, #tpu.memory_space<smem>>) -> (i32, i32) {
    %c0_i32 = arith.constant 0 : i32
    %c0_i32_0 = arith.constant 0 : i32
    %c0_i32_1 = arith.constant 0 : i32
    return %c0_i32, %c0_i32_0 : i32, i32
  }
  func.func @transform_13(%arg0: i32, %arg1: memref<3xi32, #tpu.memory_space<smem>>, %arg2: memref<3xi32, #tpu.memory_space<smem>>) -> (i32, i32) {
    %c0_i32 = arith.constant 0 : i32
    %c0_i32_0 = arith.constant 0 : i32
    %c0_i32_1 = arith.constant 0 : i32
    return %c0_i32, %c0_i32_0 : i32, i32
  }
  func.func @transform_14(%arg0: i32, %arg1: memref<3xi32, #tpu.memory_space<smem>>, %arg2: memref<3xi32, #tpu.memory_space<smem>>) -> (i32, i32) {
    %c0_i32 = arith.constant 0 : i32
    %c0_i32_0 = arith.constant 0 : i32
    %c0_i32_1 = arith.constant 0 : i32
    return %c0_i32, %c0_i32_0 : i32, i32
  }
}

</mosaic_0001>

<bundles_post_ra>
// kernel: tpu_custom_call.1
= control target key start
LH: loop header
LB: loop body
LE: loop exit
PB: predicated region body
PF: predicated region fallthrough
CT: control target
= control target key end

     0   :  { %s13629_s0 = inlined_call_operand.hbm [shape: s32[3], index: 0, kind: input, shape index: {}]   ;;  %s13630_s2 = inlined_call_operand.hbm [shape: f32[1,512], index: 2, kind: input, shape index: {}]   ;;  %s13631_s3 = inlined_call_operand.hbm [shape: f32[1,128], index: 3, kind: input, shape index: {}]   ;;  %s13632_s4 = inlined_call_operand.hbm [shape: f32[3,128], index: 4, kind: input, shape index: {}]   ;;  %s13633_s5 = inlined_call_operand.hbm [shape: bf16[3,8,640], index: 5, kind: input, shape index: {}]   ;;  %s13634_s6 = inlined_call_operand.hbm [shape: bf16[384,1536], index: 6, kind: input, shape index: {}]   ;;  %s13635_s7 = inlined_call_operand.hbm [shape: bf16[512,1536], index: 7, kind: input, shape index: {}]   ;;  %s13636_s8 = inlined_call_operand.hbm [shape: f32[1,1536], index: 8, kind: input, shape index: {}]   ;;  %s13637_s9 = inlined_call_operand.hbm [shape: f32[1,1536], index: 9, kind: input, shape index: {}]   ;;  %s13638_s10 = inlined_call_operand.hbm [shape: bf16[640,128], index: 10, kind: input, shape index: {}]   ;;  %s13639_s11 = inlined_call_operand.hbm [shape: f32[1,128], index: 11, kind: input, shape index: {}]   ;;  %s13640_s12 = inlined_call_operand.hbm [shape: bf16[512,128], index: 12, kind: input, shape index: {}]   ;;  %s13641_s13 = inlined_call_operand.hbm [shape: f32[1,128], index: 13, kind: input, shape index: {}]   ;;  %s13642_s14 = inlined_call_operand.hbm [shape: f32[1,256], index: 14, kind: input, shape index: {}]   ;;  %s13643_s16 = inlined_call_operand.hbm [shape: f32[1,128], index: 16, kind: output, shape index: {}]   ;;  %s13644_s1 = inlined_call_operand.hbm [shape: s32[3], index: 1, kind: input, shape index: {}]   ;;  %s13645_s15 = inlined_call_operand.<no memory space> [shape: f32[1,1], index: 15, kind: input, shape index: {}]  }
   0x1   :  { %13648 = sst [smem:[#allocation37_spill]] %s13629_s0 }
   0x2   :  { %13649 = sst [smem:[#allocation38_spill]] %s13638_s10  ;;  %s13650_s23 = sld [smem:[#allocation37_spill]] }
   0x8   :  { %s12413_s10 = scalar_lea.hbm %s13650_s23, 16 }
   0x9   :  { %p12414_p0 = scmp.ne.s32.totalorder %s13650_s23, %s12413_s10  ;;  %p12417_p1 = scmp.lt.u32.totalorder %s12413_s10, %s13650_s23 }
   0xb   :  { %p12419_p2 = pnand %p12417_p1, %p12414_p0 }
   0xd   :  { %12422 = shalt.err (!%p12419_p2)  }
   0xe   :  { %s12759_s28 = smov [#allocation3]   ;;  %v25_v0 = vstv %s13645_s15  ;;  %s12423_s20 = scalar_lea.hbm %s13644_s1, 16 }
   0xf   :  { %22 = dma.hbm_to_smem %s13650_s23, 16, %s12759_s28, [#allocation2] }
  0x10   :  { %p12424_p3 = scmp.ne.s32.totalorder %s13644_s1, %s12423_s20  ;;  %p12427_p4 = scmp.lt.u32.totalorder %s12423_s20, %s13644_s1 }
  0x12   :  { %p12429_p5 = pnand %p12427_p4, %p12424_p3 }
  0x14   :  { %12432 = shalt.err (!%p12429_p5)  }
  0x15   :  { %s12760_s25 = smov [#allocation4]   ;;  %26 = vst [vmem:[#allocation5] sm:$0x1] %v25_v0 }
  0x16   :  { %24 = dma.hbm_to_smem %s13644_s1, 16, %s12760_s25, [#allocation2] }
  0x17   :  { %12741 = dma.done.wait [#allocation2], 32 }
  0x18   :  { %12742 = vsyncadd [#allocation2], 4294967264 }
  0x19   :  { %28 = sfence }
  0x1a   :  { %29 = vsyncpa [#allocation7], 0 }
  0x1b   :  { %30 = vsyncpa [#allocation10], 0 }
  0x1c   :  { %31 = vsyncpa [#allocation13], 0 }
  0x1d   :  { %32 = vsyncpa [#allocation16], 0 }
  0x1e   :  { %33 = vsyncpa [#allocation19], 0 }
  0x1f   :  { %34 = vsyncpa [#allocation22], 0 }
  0x20   :  { %35 = vsyncpa [#allocation25], 0 }
  0x21   :  { %36 = vsyncpa [#allocation8], 0  ;;  %s12761_s15 = smov [#allocation9]   ;;  %s12762_s28 = smov [#allocation12]  }
  0x22   :  { %s53_s27 = sshll.u32 %s12761_s15, 4  ;;  %s72_s29 = sshll.u32 %s12762_s28, 4  ;;  %s54_s27 = int_to_ptr.vmem [resolvable:$true] %s53_s27  ;;  %s12897_s29 = int_to_ptr.vmem [resolvable:$true] %s72_s29 }
  0x23   :  { %s12433_s0 = scalar_lea.hbm %s13631_s3, 16 }
  0x24   :  { %p12434_p6 = scmp.ne.s32.totalorder %s13631_s3, %s12433_s0  ;;  %p12437_p7 = scmp.lt.u32.totalorder %s12433_s0, %s13631_s3 }
  0x26   :  { %p12439_p8 = pnand %p12437_p7, %p12434_p6 }
  0x28   :  { %12442 = shalt.err (!%p12439_p8)
}
  0x29   :  { %s12443_s21 = scalar_lea.vmem %s54_s27, 16  ;;  %s12447_s22 = scalar_lea.vmem %s54_s27, 32 }
  0x2a   :  { %p12444_p9 = scmp.ne.s32.totalorder %s54_s27, %s12443_s21  ;;  %p12448_p10 = scmp.lt.s32.totalorder %s54_s27, %s54_s27 }
  0x2b   :  { %p12449_p11 = scmp.lt.s32.totalorder %s12447_s22, %s12443_s21 }
  0x2d   :  { %p12450_p12 = por %p12449_p11, %p12448_p10 }
  0x2f   :  { %p12451_p13 = pnand %p12450_p12, %p12444_p9 }
  0x31   :  { %12454 = shalt.err (!%p12451_p13)
}
  0x32   :  { %56 = dma.hbm_to_vmem [thread:$0]  %s13631_s3, 16, %s54_s27, [#allocation10]  }
  0x33   :  { %s12455_s26 = scalar_lea.hbm %s13633_s5, 960 }
  0x34   :  { %p12456_p0 = scmp.ne.s32.totalorder %s13633_s5, %s12455_s26  ;;  %p12459_p1 = scmp.lt.u32.totalorder %s12455_s26, %s13633_s5 }
  0x36   :  { %p12461_p2 = pnand %p12459_p1, %p12456_p0 }
  0x38   :  { %12464 = shalt.err (!%p12461_p2)
}
  0x39   :  { %s12465_s0 = scalar_lea.vmem %s12897_s29, 960  ;;  %p12470_p4 = scmp.lt.s32.totalorder %s12897_s29, %s12897_s29 }
  0x3a   :  { %p12466_p3 = scmp.ne.s32.totalorder %s12897_s29, %s12465_s0  ;;  %p12471_p5 = scmp.lt.s32.totalorder %s12465_s0, %s12465_s0 }
  0x3c   :  { %p12472_p6 = por %p12471_p5, %p12470_p4 }
  0x3e   :  { %p12473_p7 = pnand %p12472_p6, %p12466_p3 }
  0x40   :  { %12476 = shalt.err (!%p12473_p7)
}
  0x41   :  { %s12763_s3 = smov 320   ;;  %s12764_s27 = smov 20  }
  0x42   :  { %78 = dma.hbm_to_vmem [thread:$0]  %s13633_s5, 960, %s12897_s29, [#allocation13], %s12763_s3, %s12763_s3, %s12764_s27  }
  0x43   :  { %s12765_s19 = smov [#allocation15]   ;;  %s12766_s21 = smov [#allocation18]  }
  0x44   :  { %s96_s20 = sshll.u32 %s12765_s19, 4  ;;  %s119_s22 = sshll.u32 %s12766_s21, 4  ;;  %s97_s20 = int_to_ptr.vmem [resolvable:$true] %s96_s20  ;;  %s120_s22 = int_to_ptr.vmem [resolvable:$true] %s119_s22 }
  0x45   :  { %s12477_s25 = scalar_lea.hbm %s13635_s7, 49152 }
  0x46   :  { %p12478_p8 = scmp.ne.s32.totalorder %s13635_s7, %s12477_s25  ;;  %p12481_p9 = scmp.lt.u32.totalorder %s12477_s25, %s13635_s7 }
  0x48   :  { %p12483_p10 = pnand %p12481_p9, %p12478_p8 }
  0x4a   :  { %12486 = shalt.err (!%p12483_p10)
}
  0x4b   :  { %s12487_s5 = scalar_lea.vmem %s97_s20, 49152  ;;  %p12492_p12 = scmp.lt.s32.totalorder %s97_s20, %s97_s20 }
  0x4c   :  { %p12488_p11 = scmp.ne.s32.totalorder %s97_s20, %s12487_s5  ;;  %p12493_p13 = scmp.lt.s32.totalorder %s12487_s5, %s12487_s5 }
  0x4e   :  { %p12494_p0 = por %p12493_p13, %p12492_p12 }
  0x50   :  { %p12495_p1 = pnand %p12494_p0, %p12488_p11 }
  0x52   :  { %12498 = shalt.err (!%p12495_p1)
}
  0x53   :  { %s12767_s29 = smov 768   ;;  %s12768_s1 = smov 48  }
  0x54   :  { %102 = dma.hbm_to_vmem [thread:$0]  %s13635_s7, 49152, %s97_s20, [#allocation16], %s12767_s29, %s12767_s29, %s12768_s1  }
  0x55   :  { %s12499_s17 = scalar_lea.hbm %s13637_s9, 192 }
  0x56   :  { %p12500_p2 = scmp.ne.s32.totalorder %s13637_s9, %s12499_s17  ;;  %p12503_p3 = scmp.lt.u32.totalorder %s12499_s17, %s13637_s9 }
  0x58   :  { %p12505_p4 = pnand %p12503_p3, %p12500_p2 }
  0x5a   :  { %12508 = shalt.err (!%p12505_p4)
}
  0x5b   :  { %s12509_s24 = scalar_lea.vmem %s120_s22, 192  ;;  %p12514_p6 = scmp.lt.s32.totalorder %s120_s22, %s120_s22 }
  0x5c   :  { %p12510_p5 = scmp.ne.s32.totalorder %s120_s22, %s12509_s24  ;;  %p12515_p7 = scmp.lt.s32.totalorder %s12509_s24, %s12509_s24 }
  0x5e   :  { %p12516_p8 = por %p12515_p7, %p12514_p6 }
  0x60   :  { %p12517_p9 = pnand %p12516_p8, %p12510_p5 }
  0x62   :  { %12520 = shalt.err (!%p12517_p9)
}
  0x63   :  { %122 = dma.hbm_to_vmem [thread:$0]  %s13637_s9, 192, %s120_s22, [#allocation19]  }
  0x64   :  { %s12769_s25 = smov [#allocation21]   ;;  %s12770_s26 = smov [#allocation24]  }
  0x65   :  { %s141_s23 = sshll.u32 %s12769_s25, 4  ;;  %s163_s15 = sshll.u32 %s12770_s26, 4  ;;  %s142_s23 = int_to_ptr.vmem [resolvable:$true] %s141_s23  ;;  %s164_s15 = int_to_ptr.vmem [resolvable:$true] %s163_s15 }
  0x66   :  { %s12521_s30 = scalar_lea.hbm %s13639_s11, 16 }
  0x67   :  { %p12522_p10 = scmp.ne.s32.totalorder %s13639_s11, %s12521_s30  ;;  %p12525_p11 = scmp.lt.u32.totalorder %s12521_s30, %s13639_s11 }
  0x69   :  { %p12527_p12 = pnand %p12525_p11, %p12522_p10 }
  0x6b   :  { %12530 = shalt.err (!%p12527_p12)
}
  0x6c   :  { %s12531_s9 = scalar_lea.vmem %s142_s23, 16  ;;  %s12535_s22 = scalar_lea.vmem %s142_s23, 32 }
  0x6d   :  { %p12532_p13 = scmp.ne.s32.totalorder %s142_s23, %s12531_s9  ;;  %p12536_p0 = scmp.lt.s32.totalorder %s142_s23, %s142_s23 }
  0x6e   :  { %p12537_p1 = scmp.lt.s32.totalorder %s12535_s22, %s12531_s9 }
  0x70   :  { %p12538_p2 = por %p12537_p1, %p12536_p0 }
  0x72   :  { %p12539_p3 = pnand %p12538_p2, %p12532_p13 }
  0x74   :  { %12542 = shalt.err (!%p12539_p3)
}
  0x75   :  { %144 = dma.hbm_to_vmem [thread:$0]  %s13639_s11, 16, %s142_s23, [#allocation22]  }
  0x76   :  { %s12543_s24 = scalar_lea.hbm %s13641_s13, 16 }
  0x77   :  { %p12544_p4 = scmp.ne.s32.totalorder %s13641_s13, %s12543_s24  ;;  %p12547_p5 = scmp.lt.u32.totalorder %s12543_s24, %s13641_s13 }
  0x79   :  { %p12549_p6 = pnand %p12547_p5, %p12544_p4 }
  0x7b   :  { %12552 = shalt.err (!%p12549_p6)
}
  0x7c   :  { %s12553_s28 = scalar_lea.vmem %s164_s15, 16  ;;  %s12557_s5 = scalar_lea.vmem %s164_s15, 32 }
  0x7d   :  { %p12554_p7 = scmp.ne.s32.totalorder %s164_s15, %s12553_s28  ;;  %p12558_p8 = scmp.lt.s32.totalorder %s164_s15, %s164_s15 }
  0x7e   :  { %p12559_p9 = scmp.lt.s32.totalorder %s12557_s5, %s12553_s28 }
  0x80   :  { %p12560_p10 = por %p12559_p9, %p12558_p8 }
  0x82   :  { %p12561_p11 = pnand %p12560_p10, %p12554_p7 }
  0x84   :  { %12564 = shalt.err (!%p12561_p11)
}
  0x85   :  { %166 = dma.hbm_to_vmem [thread:$0]  %s13641_s13, 16, %s164_s15, [#allocation25]  }
  0x86   :  { %s12771_s30 = smov [#allocation6]   ;;  %s12772_s3 = smov [#allocation11]  }
  0x87   :  { %s43_s0 = sshll.u32 %s12771_s30, 4  ;;  %s63_s27 = sshll.u32 %s12772_s3, 4  ;;  %s44_s0 = int_to_ptr.vmem [resolvable:$true] %s43_s0  ;;  %s64_s27 = int_to_ptr.vmem [resolvable:$true] %s63_s27 }
  0x88   :  { %s12565_s22 = scalar_lea.hbm %s13630_s2, 64 }
  0x89   :  { %p12566_p12 = scmp.ne.s32.totalorder %s13630_s2, %s12565_s22  ;;  %p12569_p13 = scmp.lt.u32.totalorder %s12565_s22, %s13630_s2 }
  0x8b   :  { %p12571_p0 = pnand %p12569_p13, %p12566_p12 }
  0x8d   :  { %12574 = shalt.err (!%p12571_p0)
}
  0x8e   :  { %s12575_s13 = scalar_lea.vmem %s44_s0, 64  ;;  %p12580_p2 = scmp.lt.s32.totalorder %s44_s0, %s44_s0 }
  0x8f   :  { %p12576_p1 = scmp.ne.s32.totalorder %s44_s0, %s12575_s13  ;;  %p12581_p3 = scmp.lt.s32.totalorder %s12575_s13, %s12575_s13 }
  0x91   :  { %p12582_p4 = por %p12581_p3, %p12580_p2 }
  0x93   :  { %p12583_p5 = pnand %p12582_p4, %p12576_p1 }
  0x95   :  { %12586 = shalt.err (!%p12583_p5)
}
  0x96   :  { %46 = dma.hbm_to_vmem [thread:$0]  %s13630_s2, 64, %s44_s0, [#allocation7]  }
  0x97   :  { %s12587_s25 = scalar_lea.hbm %s13632_s4, 64 }
  0x98   :  { %p12588_p6 = scmp.ne.s32.totalorder %s13632_s4, %s12587_s25  ;;  %p12591_p7 = scmp.lt.u32.totalorder %s12587_s25, %s13632_s4 }
  0x9a   :  { %p12593_p8 = pnand %p12591_p7, %p12588_p6 }
  0x9c   :  { %12596 = shalt.err (!%p12593_p8)
}
  0x9d   :  { %s12597_s23 = scalar_lea.vmem %s64_s27, 64  ;;  %p12602_p10 = scmp.lt.s32.totalorder %s64_s27, %s64_s27 }
  0x9e   :  { %p12598_p9 = scmp.ne.s32.totalorder %s64_s27, %s12597_s23  ;;  %p12603_p11 = scmp.lt.s32.totalorder %s12597_s23, %s12597_s23 }
  0xa0   :  { %p12604_p12 = por %p12603_p11, %p12602_p10 }
  0xa2   :  { %p12605_p13 = pnand %p12604_p12, %p12598_p9 }
  0xa4   :  { %12608 = shalt.err (!%p12605_p13)
}
  0xa5   :  { %66 = dma.hbm_to_vmem [thread:$0]  %s13632_s4, 64, %s64_s27, [#allocation10]  }
  0xa6   :  { %s12773_s0 = smov [#allocation14]   ;;  %s12774_s17 = smov [#allocation17]  }
  0xa7   :  { %s84_s3 = sshll.u32 %s12773_s0, 4  ;;  %s109_s9 = sshll.u32 %s12774_s17, 4  ;;  %s85_s3 = int_to_ptr.vmem [resolvable:$true] %s84_s3  ;;  %s110_s9 = int_to_ptr.vmem [resolvable:$true] %s109_s9 }
  0xa8   :  { %s12609_s19 = scalar_lea.hbm %s13634_s6, 36864 }
  0xa9   :  { %p12610_p0 = scmp.ne.s32.totalorder %s13634_s6, %s12609_s19  ;;  %p12613_p1 = scmp.lt.u32.totalorder %s12609_s19, %s13634_s6 }
  0xab   :  { %p12615_p2 = pnand %p12613_p1, %p12610_p0 }
  0xad   :  { %12618 = shalt.err (!%p12615_p2)
}
  0xae   :  { %s12619_s4 = scalar_lea.vmem %s85_s3, 36864  ;;  %p12624_p4 = scmp.lt.s32.totalorder %s85_s3, %s85_s3 }
  0xaf   :  { %p12620_p3 = scmp.ne.s32.totalorder %s85_s3, %s12619_s4  ;;  %p12625_p5 = scmp.lt.s32.totalorder %s12619_s4, %s12619_s4 }
  0xb1   :  { %p12626_p6 = por %p12625_p5, %p12624_p4 }
  0xb3   :  { %p12627_p7 = pnand %p12626_p6, %p12620_p3 }
  0xb5   :  { %12630 = shalt.err (!%p12627_p7)
}
  0xb6   :  { %90 = dma.hbm_to_vmem [thread:$0]  %s13634_s6, 36864, %s85_s3, [#allocation13], %s12767_s29, %s12767_s29, %s12768_s1  }
  0xb7   :  { %s12631_s25 = scalar_lea.hbm %s13636_s8, 192 }
  0xb8   :  { %p12632_p8 = scmp.ne.s32.totalorder %s13636_s8, %s12631_s25  ;;  %p12635_p9 = scmp.lt.u32.totalorder %s12631_s25, %s13636_s8 }
  0xba   :  { %p12637_p10 = pnand %p12635_p9, %p12632_p8 }
  0xbc   :  { %12640 = shalt.err (!%p12637_p10)
}
  0xbd   :  { %s12641_s23 = scalar_lea.vmem %s110_s9, 192  ;;  %p12646_p12 = scmp.lt.s32.totalorder %s110_s9, %s110_s9 }
  0xbe   :  { %p12642_p11 = scmp.ne.s32.totalorder %s110_s9, %s12641_s23  ;;  %p12647_p13 = scmp.lt.s32.totalorder %s12641_s23, %s12641_s23 }
  0xc0   :  { %p12648_p0 = por %p12647_p13, %p12646_p12 }
  0xc2   :  { %p12649_p1 = pnand %p12648_p0, %p12642_p11 }
  0xc4   :  { %12652 = shalt.err (!%p12649_p1)
}
  0xc5   :  { %112 = dma.hbm_to_vmem [thread:$0]  %s13636_s8, 192, %s110_s9, [#allocation16]  }
  0xc6   :  { %s12775_s1 = smov [#allocation20]   ;;  %s13651_s3 = sld [smem:[#allocation38_spill]] }
  0xc7   :  { %s128_s2 = sshll.u32 %s12775_s1, 4  ;;  %s129_s2 = int_to_ptr.vmem [resolvable:$true] %s128_s2 }
  0xcc   :  { %s12653_s17 = scalar_lea.hbm %s13651_s3, 5120 }
  0xcd   :  { %p12654_p2 = scmp.ne.s32.totalorder %s13651_s3, %s12653_s17  ;;  %p12657_p3 = scmp.lt.u32.totalorder %s12653_s17, %s13651_s3 }
  0xcf   :  { %p12659_p4 = pnand %p12657_p3, %p12654_p2 }
  0xd1   :  { %12662 = shalt.err (!%p12659_p4)
}
  0xd2   :  { %s12663_s10 = scalar_lea.vmem %s129_s2, 5120  ;;  %p12668_p6 = scmp.lt.s32.totalorder %s129_s2, %s129_s2 }
  0xd3   :  { %p12664_p5 = scmp.ne.s32.totalorder %s129_s2, %s12663_s10  ;;  %p12669_p7 = scmp.lt.s32.totalorder %s12663_s10, %s12663_s10 }
  0xd5   :  { %p12670_p8 = por %p12669_p7, %p12668_p6 }
  0xd7   :  { %p12671_p9 = pnand %p12670_p8, %p12664_p5 }
  0xd9   :  { %12674 = shalt.err (!%p12671_p9)
}
  0xda   :  { %s12776_s8 = smov 64   ;;  %s12777_s9 = smov 4  }
  0xdb   :  { %134 = dma.hbm_to_vmem [thread:$0]  %s13651_s3, 5120, %s129_s2, [#allocation19], %s12776_s8, %s12776_s8, %s12777_s9  }
  0xdc   :  { %s12778_s4 = smov [#allocation23]   ;;  %s12779_s24 = smov [#allocation26]  }
  0xdd   :  { %s150_s27 = sshll.u32 %s12778_s4, 4  ;;  %s173_s7 = sshll.u32 %s12779_s24, 4  ;;  %s151_s27 = int_to_ptr.vmem [resolvable:$true] %s150_s27  ;;  %s174_s7 = int_to_ptr.vmem [resolvable:$true] %s173_s7 }
  0xde   :  { %s12675_s26 = scalar_lea.hbm %s13640_s12, 4096 }
  0xdf   :  { %p12676_p10 = scmp.ne.s32.totalorder %s13640_s12, %s12675_s26  ;;  %p12679_p11 = scmp.lt.u32.totalorder %s12675_s26, %s13640_s12 }
  0xe1   :  { %p12681_p12 = pnand %p12679_p11, %p12676_p10 }
  0xe3   :  { %12684 = shalt.err (!%p12681_p12)
}
  0xe4   :  { %s12685_s6 = scalar_lea.vmem %s151_s27, 4096  ;;  %p12690_p0 = scmp.lt.s32.totalorder %s151_s27, %s151_s27 }
  0xe5   :  { %p12686_p13 = scmp.ne.s32.totalorder %s151_s27, %s12685_s6  ;;  %p12691_p1 = scmp.lt.s32.totalorder %s12685_s6, %s12685_s6 }
  0xe7   :  { %p12692_p2 = por %p12691_p1, %p12690_p0 }
  0xe9   :  { %p12693_p3 = pnand %p12692_p2, %p12686_p13 }
  0xeb   :  { %12696 = shalt.err (!%p12693_p3)
}
  0xec   :  { %156 = dma.hbm_to_vmem [thread:$0]  %s13640_s12, 4096, %s151_s27, [#allocation22], %s12776_s8, %s12776_s8, %s12777_s9  }
  0xed   :  { %s12697_s0 = scalar_lea.hbm %s13642_s14, 32 }
  0xee   :  { %p12698_p4 = scmp.ne.s32.totalorder %s13642_s14, %s12697_s0  ;;  %p12701_p5 = scmp.lt.u32.totalorder %s12697_s0, %s13642_s14 }
  0xf0   :  { %p12703_p6 = pnand %p12701_p5, %p12698_p4 }
  0xf2   :  { %12706 = shalt.err (!%p12703_p6)
}
  0xf3   :  { %s12707_s19 = scalar_lea.vmem %s174_s7, 32  ;;  %p12712_p8 = scmp.lt.s32.totalorder %s174_s7, %s174_s7 }
  0xf4   :  { %p12708_p7 = scmp.ne.s32.totalorder %s174_s7, %s12707_s19  ;;  %p12713_p9 = scmp.lt.s32.totalorder %s12707_s19, %s12707_s19 }
  0xf6   :  { %p12714_p10 = por %p12713_p9, %p12712_p8 }
  0xf8   :  { %p12715_p11 = pnand %p12714_p10, %p12708_p7 }
  0xfa   :  { %12718 = shalt.err (!%p12715_p11)
}
  0xfb   :  { %176 = dma.hbm_to_vmem [thread:$0]  %s13642_s14, 32, %s174_s7, [#allocation25]  }
  0xfc   :  { %12743 = dma.done.wait [#allocation7], 64  }
  0xfd   :  { %12744 = vsyncadd [#allocation7], 4294967232 }
  0xfe   :  { %12745 = dma.done.wait [#allocation10], 80  }
  0xff   :  { %12746 = vsyncadd [#allocation10], 4294967216 }
 0x100   :  { %12747 = dma.done.wait [#allocation13], 37824  }
 0x101   :  { %12748 = vsyncadd [#allocation13], 4294929472 }
 0x102   :  { %12749 = dma.done.wait [#allocation16], 49344  }
 0x103   :  { %12750 = vsyncadd [#allocation16], 4294917952 }
 0x104   :  { %12751 = dma.done.wait [#allocation19], 5312  }
 0x105   :  { %12752 = vsyncadd [#allocation19], 4294961984 }
 0x106   :  { %12753 = dma.done.wait [#allocation22], 4112  }
 0x107   :  { %12754 = vsyncadd [#allocation22], 4294963184 }
 0x108   :  { %12755 = dma.done.wait [#allocation25], 48  }
 0x109   :  { %12756 = vsyncadd [#allocation25], 4294967248  ;;  %v12780_v1 = vmov 0   ;;  %v9960_v2 = vld [vmem:[#allocation14 + $0x604] ss:$48 sps:$4 sm:$0xff]   ;;  %vm12782_vm0 = vmmov 0  }
 0x10a   :  { %895 = vmatprep.mubr.bf16.mxu0 %v12780_v1  ;;  %936 = vmatprep.mubr.bf16.mxu1 %v12780_v1  ;;  %v9962_v3 = vld [vmem:[#allocation14 + $0x60c] ss:$48 sps:$4 sm:$0xff]   ;;  %v9964_v4 = vld [vmem:[#allocation14 + $0x600] ss:$48 sps:$4 sm:$0xff]   ;;  %v9965_v5 = vld [vmem:[#allocation14 + $0x608] ss:$48 sps:$4 sm:$0xff]  }
 0x10b   :  { %863 = vmatprep.subr.bf16.mxu0 %v9960_v2  ;;  %904 = vmatprep.subr.bf16.mxu1 %v9962_v3  ;;  %v9966_v6 = vld [vmem:[#allocation14 + $0x664] ss:$48 sps:$4 sm:$0xff]   ;;  %v9968_v7 = vld [vmem:[#allocation14 + $0x66c] ss:$48 sps:$4 sm:$0xff]   ;;  %v9970_v8 = vld [vmem:[#allocation14 + $0x660] ss:$48 sps:$4 sm:$0xff]  }
 0x10c   :  { %864 = vmatpush1.bf16.msra.mxu0 %v9964_v4  ;;  %905 = vmatpush1.bf16.msra.mxu1 %v9965_v5  ;;  %v9971_v9 = vld [vmem:[#allocation14 + $0x668] ss:$48 sps:$4 sm:$0xff]   ;;  %v9972_v10 = vld [vmem:[#allocation14 + $0x6c4] ss:$48 sps:$4 sm:$0xff]   ;;  %v9974_v11 = vld [vmem:[#allocation14 + $0x6cc] ss:$48 sps:$4 sm:$0xff]  }
 0x10d   :  { %865 = vmatprep.subr.bf16.mxu0 %v9966_v6  ;;  %906 = vmatprep.subr.bf16.mxu1 %v9968_v7  ;;  %v9976_v12 = vld [vmem:[#allocation14 + $0x6c0] ss:$48 sps:$4 sm:$0xff]   ;;  %v9977_v13 = vld [vmem:[#allocation14 + $0x6c8] ss:$48 sps:$4 sm:$0xff]   ;;  %v9978_v14 = vld [vmem:[#allocation14 + $0x724] ss:$48 sps:$4 sm:$0xff]  }
 0x10e   :  { %v9980_v15 = vld [vmem:[#allocation14 + $0x72c] ss:$48 sps:$4 sm:$0xff]   ;;  %v9982_v16 = vld [vmem:[#allocation14 + $0x720] ss:$48 sps:$4 sm:$0xff]   ;;  %v9983_v17 = vld [vmem:[#allocation14 + $0x728] ss:$48 sps:$4 sm:$0xff]  }
 0x10f   :  { %v9984_v18 = vld [vmem:[#allocation14 + $0x784] ss:$48 sps:$4 sm:$0xff]   ;;  %v9986_v19 = vld [vmem:[#allocation14 + $0x78c] ss:$48 sps:$4 sm:$0xff]   ;;  %v9988_v20 = vld [vmem:[#allocation14 + $0x780] ss:$48 sps:$4 sm:$0xff]  }
 0x110   :  { %866 = vmatpush1.bf16.msra.mxu0 %v9970_v8  ;;  %907 = vmatpush1.bf16.msra.mxu1 %v9971_v9  ;;  %v9989_v21 = vld [vmem:[#allocation14 + $0x788] ss:$48 sps:$4 sm:$0xff]   ;;  %v9990_v22 = vld [vmem:[#allocation14 + $0x7e4] ss:$48 sps:$4 sm:$0xff]   ;;  %v9992_v23 = vld [vmem:[#allocation14 + $0x7ec] ss:$48 sps:$4 sm:$0xff]  }
 0x111   :  { %867 = vmatprep.subr.bf16.mxu0 %v9972_v10  ;;  %908 = vmatprep.subr.bf16.mxu1 %v9974_v11  ;;  %v9994_v24 = vld [vmem:[#allocation14 + $0x7e0] ss:$48 sps:$4 sm:$0xff]   ;;  %v9995_v25 = vld [vmem:[#allocation14 + $0x7e8] ss:$48 sps:$4 sm:$0xff]   ;;  %v9996_v26 = vld [vmem:[#allocation14 + $0x844] ss:$48 sps:$4 sm:$0xff]  }
 0x112   :  { %v9998_v27 = vld [vmem:[#allocation14 + $0x84c] ss:$48 sps:$4 sm:$0xff]   ;;  %v10000_v28 = vld [vmem:[#allocation14 + $0x840] ss:$48 sps:$4 sm:$0xff]   ;;  %v10001_v29 = vld [vmem:[#allocation14 + $0x848] ss:$48 sps:$4 sm:$0xff]  }
 0x113   :  { %v10002_v30 = vld [vmem:[#allocation14 + $0x8a4] ss:$48 sps:$4 sm:$0xff]   ;;  %v10004_v31 = vld [vmem:[#allocation14 + $0x8ac] ss:$48 sps:$4 sm:$0xff]   ;;  %v10006_v32 = vld [vmem:[#allocation14 + $0x8a0] ss:$48 sps:$4 sm:$0xff]  }
 0x114   :  { %868 = vmatpush1.bf16.msra.mxu0 %v9976_v12  ;;  %909 = vmatpush1.bf16.msra.mxu1 %v9977_v13  ;;  %v10007_v33 = vld [vmem:[#allocation14 + $0x8a8] ss:$48 sps:$4 sm:$0xff]   ;;  %v221_v34 = vld [vmem:[#allocation9] sm:$0x1]  ;;  %v10010_v35 = vld [vmem:[#allocation14 + $0x614] ss:$48 sps:$4 sm:$0xff]  }
 0x115   :  { %869 = vmatprep.subr.bf16.mxu0 %v9978_v14  ;;  %910 = vmatprep.subr.bf16.mxu1 %v9980_v15  ;;  %v10013_v36 = vld [vmem:[#allocation14 + $0x61c] ss:$48 sps:$4 sm:$0xff]   ;;  %v10008_v37 = vld [vmem:[#allocation14 + $0x610] ss:$48 sps:$4 sm:$0xff]   ;;  %v13068_v38 = vpack.c.bf16 %v221_v34, %v221_v34  ;;  %v10011_v39 = vld [vmem:[#allocation14 + $0x618] ss:$48 sps:$4 sm:$0xff]  }
 0x116   :  { %v10016_v40 = vld [vmem:[#allocation14 + $0x674] ss:$48 sps:$4 sm:$0xff]   ;;  %v10019_v41 = vld [vmem:[#allocation14 + $0x67c] ss:$48 sps:$4 sm:$0xff]   ;;  %v10014_v42 = vld [vmem:[#allocation14 + $0x670] ss:$48 sps:$4 sm:$0xff]  }
 0x117   :  { %v10017_v43 = vld [vmem:[#allocation14 + $0x678] ss:$48 sps:$4 sm:$0xff]   ;;  %v10022_v44 = vld [vmem:[#allocation14 + $0x6d4] ss:$48 sps:$4 sm:$0xff]   ;;  %v10025_v45 = vld [vmem:[#allocation14 + $0x6dc] ss:$48 sps:$4 sm:$0xff]  }
 0x118   :  { %870 = vmatpush1.bf16.msra.mxu0 %v9982_v16  ;;  %911 = vmatpush1.bf16.msra.mxu1 %v9983_v17  ;;  %v10020_v46 = vld [vmem:[#allocation14 + $0x6d0] ss:$48 sps:$4 sm:$0xff]   ;;  %v10023_v47 = vld [vmem:[#allocation14 + $0x6d8] ss:$48 sps:$4 sm:$0xff]   ;;  %v10028_v48 = vld [vmem:[#allocation14 + $0x734] ss:$48 sps:$4 sm:$0xff]  }
 0x119   :  { %871 = vmatprep.subr.bf16.mxu0 %v9984_v18  ;;  %912 = vmatprep.subr.bf16.mxu1 %v9986_v19  ;;  %v10031_v49 = vld [vmem:[#allocation14 + $0x73c] ss:$48 sps:$4 sm:$0xff]   ;;  %v10026_v50 = vld [vmem:[#allocation14 + $0x730] ss:$48 sps:$4 sm:$0xff]   ;;  %v10029_v51 = vld [vmem:[#allocation14 + $0x738] ss:$48 sps:$4 sm:$0xff]  }
 0x11a   :  { %v10034_v52 = vld [vmem:[#allocation14 + $0x794] ss:$48 sps:$4 sm:$0xff]   ;;  %v10037_v53 = vld [vmem:[#allocation14 + $0x79c] ss:$48 sps:$4 sm:$0xff]   ;;  %v10032_v54 = vld [vmem:[#allocation14 + $0x790] ss:$48 sps:$4 sm:$0xff]  }
 0x11b   :  { %v10035_v55 = vld [vmem:[#allocation14 + $0x798] ss:$48 sps:$4 sm:$0xff]   ;;  %v10040_v56 = vld [vmem:[#allocation14 + $0x7f4] ss:$48 sps:$4 sm:$0xff]   ;;  %v10043_v57 = vld [vmem:[#allocation14 + $0x7fc] ss:$48 sps:$4 sm:$0xff]  }
 0x11c   :  { %872 = vmatpush1.bf16.msra.mxu0 %v9988_v20  ;;  %913 = vmatpush1.bf16.msra.mxu1 %v9989_v21  ;;  %v10038_v58 = vld [vmem:[#allocation14 + $0x7f0] ss:$48 sps:$4 sm:$0xff]   ;;  %v10041_v59 = vld [vmem:[#allocation14 + $0x7f8] ss:$48 sps:$4 sm:$0xff]   ;;  %v10046_v60 = vld [vmem:[#allocation14 + $0x854] ss:$48 sps:$4 sm:$0xff]  }
 0x11d   :  { %873 = vmatprep.subr.bf16.mxu0 %v9990_v22  ;;  %914 = vmatprep.subr.bf16.mxu1 %v9992_v23  ;;  %v10049_v61 = vld [vmem:[#allocation14 + $0x85c] ss:$48 sps:$4 sm:$0xff]   ;;  %v10044_v62 = vld [vmem:[#allocation14 + $0x850] ss:$48 sps:$4 sm:$0xff]   ;;  %v10047_v63 = vld [vmem:[#allocation14 + $0x858] ss:$48 sps:$4 sm:$0xff]  }
 0x11e   :  { %v10052_v0 = vld [vmem:[#allocation14 + $0x8b4] ss:$48 sps:$4 sm:$0xff]   ;;  %v10055_v2 = vld [vmem:[#allocation14 + $0x8bc] ss:$48 sps:$4 sm:$0xff]   ;;  %v10050_v3 = vld [vmem:[#allocation14 + $0x8b0] ss:$48 sps:$4 sm:$0xff]  }
 0x11f   :  { %v10053_v4 = vld [vmem:[#allocation14 + $0x8b8] ss:$48 sps:$4 sm:$0xff]   ;;  %v10058_v5 = vld [vmem:[#allocation14 + $0x624] ss:$48 sps:$4 sm:$0xff]   ;;  %v10061_v6 = vld [vmem:[#allocation14 + $0x62c] ss:$48 sps:$4 sm:$0xff]  }
 0x120   :  { %874 = vmatpush1.bf16.msra.mxu0 %v9994_v24  ;;  %915 = vmatpush1.bf16.msra.mxu1 %v9995_v25  ;;  %v10056_v7 = vld [vmem:[#allocation14 + $0x620] ss:$48 sps:$4 sm:$0xff]   ;;  %v10059_v8 = vld [vmem:[#allocation14 + $0x628] ss:$48 sps:$4 sm:$0xff]   ;;  %v10064_v9 = vld [vmem:[#allocation14 + $0x684] ss:$48 sps:$4 sm:$0xff]  }
 0x121   :  { %875 = vmatprep.subr.bf16.mxu0 %v9996_v26  ;;  %916 = vmatprep.subr.bf16.mxu1 %v9998_v27  ;;  %v10067_v10 = vld [vmem:[#allocation14 + $0x68c] ss:$48 sps:$4 sm:$0xff]   ;;  %v10062_v11 = vld [vmem:[#allocation14 + $0x680] ss:$48 sps:$4 sm:$0xff]   ;;  %v10065_v12 = vld [vmem:[#allocation14 + $0x688] ss:$48 sps:$4 sm:$0xff]  }
 0x122   :  { %v10070_v13 = vld [vmem:[#allocation14 + $0x6e4] ss:$48 sps:$4 sm:$0xff]   ;;  %v10073_v14 = vld [vmem:[#allocation14 + $0x6ec] ss:$48 sps:$4 sm:$0xff]   ;;  %v10068_v15 = vld [vmem:[#allocation14 + $0x6e0] ss:$48 sps:$4 sm:$0xff]  }
 0x123   :  { %v10071_v16 = vld [vmem:[#allocation14 + $0x6e8] ss:$48 sps:$4 sm:$0xff]   ;;  %v10076_v17 = vld [vmem:[#allocation14 + $0x744] ss:$48 sps:$4 sm:$0xff]   ;;  %v10079_v18 = vld [vmem:[#allocation14 + $0x74c] ss:$48 sps:$4 sm:$0xff]  }
 0x124   :  { %876 = vmatpush1.bf16.msra.mxu0 %v10000_v28  ;;  %917 = vmatpush1.bf16.msra.mxu1 %v10001_v29  ;;  %v10074_v19 = vld [vmem:[#allocation14 + $0x740] ss:$48 sps:$4 sm:$0xff]   ;;  %v10077_v20 = vld [vmem:[#allocation14 + $0x748] ss:$48 sps:$4 sm:$0xff]   ;;  %v10082_v21 = vld [vmem:[#allocation14 + $0x7a4] ss:$48 sps:$4 sm:$0xff]  }
 0x125   :  { %877 = vmatprep.subr.bf16.mxu0 %v10002_v30  ;;  %918 = vmatprep.subr.bf16.mxu1 %v10004_v31  ;;  %v10085_v22 = vld [vmem:[#allocation14 + $0x7ac] ss:$48 sps:$4 sm:$0xff]   ;;  %v10080_v23 = vld [vmem:[#allocation14 + $0x7a0] ss:$48 sps:$4 sm:$0xff]   ;;  %v10083_v24 = vld [vmem:[#allocation14 + $0x7a8] ss:$48 sps:$4 sm:$0xff]  }
 0x126   :  { %v10088_v25 = vld [vmem:[#allocation14 + $0x804] ss:$48 sps:$4 sm:$0xff]   ;;  %v10091_v26 = vld [vmem:[#allocation14 + $0x80c] ss:$48 sps:$4 sm:$0xff]   ;;  %v10086_v27 = vld [vmem:[#allocation14 + $0x800] ss:$48 sps:$4 sm:$0xff]  }
 0x127   :  { %v10089_v28 = vld [vmem:[#allocation14 + $0x808] ss:$48 sps:$4 sm:$0xff]   ;;  %v10094_v29 = vld [vmem:[#allocation14 + $0x864] ss:$48 sps:$4 sm:$0xff]   ;;  %v10097_v30 = vld [vmem:[#allocation14 + $0x86c] ss:$48 sps:$4 sm:$0xff]  }
 0x128   :  { %878 = vmatpush1.bf16.msra.mxu0 %v10006_v32  ;;  %919 = vmatpush1.bf16.msra.mxu1 %v10007_v33  ;;  %v10092_v31 = vld [vmem:[#allocation14 + $0x860] ss:$48 sps:$4 sm:$0xff]   ;;  %v10095_v32 = vld [vmem:[#allocation14 + $0x868] ss:$48 sps:$4 sm:$0xff]   ;;  %v10100_v33 = vld [vmem:[#allocation14 + $0x8c4] ss:$48 sps:$4 sm:$0xff]  }
 0x129   :  { %945 = vmatprep.subr.bf16.mxu0 %v10010_v35  ;;  %986 = vmatprep.subr.bf16.mxu1 %v10013_v36  ;;  %v10103_v34 = vld [vmem:[#allocation14 + $0x8cc] ss:$48 sps:$4 sm:$0xff]   ;;  %v10098_v35 = vld [vmem:[#allocation14 + $0x8c0] ss:$48 sps:$4 sm:$0xff]   ;;  %v10101_v36 = vld [vmem:[#allocation14 + $0x8c8] ss:$48 sps:$4 sm:$0xff]  }
 0x12a   :  { %s4548_s14 = sld [smem:[#allocation3]]  ;;  %s9403_s8 = sld [smem:[#allocation3 + $0x1]]  ;;  %vm8551_vm6 = vcmask 1040384   ;;  %vm8633_vm7 = vcmask 7168   ;;  %vm8641_vm8 = vcmask 65536  }
 0x12b   :  { %896 = vmatmul.mubr.bf16.vlgmr.msra.gmra.mrb[0].mxu0 %v13068_v38  ;;  %937 = vmatmul.mubr.bf16.vlgmr.msra.gmra.mrb[0].mxu1 %v13068_v38  ;;  %s4560_s10 = sld [smem:[#allocation4]]  ;;  %s9404_s9 = sld [smem:[#allocation4 + $0x1]] }
 0x12c   :  { %946 = vmatpush1.bf16.msra.mxu0 %v10008_v37  ;;  %987 = vmatpush1.bf16.msra.mxu1 %v10011_v39  ;;  %v10106_v37 = vld [vmem:[#allocation15 + $0x4] ss:$48 sps:$4 sm:$0xff]   ;;  %v10109_v39 = vld [vmem:[#allocation15 + $0xc] ss:$48 sps:$4 sm:$0xff]   ;;  %s9418_s13 = sld [smem:[#allocation3 + $0x2]]  ;;  %s12783_s15 = smov 1  }
 0x12d   :  { %947 = vmatprep.subr.bf16.mxu0 %v10016_v40  ;;  %988 = vmatprep.subr.bf16.mxu1 %v10019_v41  ;;  %v10104_v40 = vld [vmem:[#allocation15] ss:$48 sps:$4 sm:$0xff]   ;;  %v10107_v41 = vld [vmem:[#allocation15 + $0x8] ss:$48 sps:$4 sm:$0xff]   ;;  %s12784_s4 = smov [#allocation27]  }
 0x12e   :  { %977 = vmatprep.mubr.bf16.mxu0 %v12780_v1  ;;  %1018 = vmatprep.mubr.bf16.mxu1 %v12780_v1  ;;  %s8649_s27 = sshll.u32 %s12784_s4, 4  ;;  %s8650_s27 = int_to_ptr.vmem [resolvable:$true] %s8649_s27 }
 0x12f   :  { %s12719_s24 = scalar_lea.vmem %s8650_s27, 16  ;;  %s12723_s7 = scalar_lea.vmem %s8650_s27, 32 }
 0x130   :  { %948 = vmatpush1.bf16.msra.mxu0 %v10014_v42  ;;  %989 = vmatpush1.bf16.msra.mxu1 %v10017_v43  ;;  %v803_v42 = vlaneseq  ;;  %v10112_v43 = vld [vmem:[#allocation15 + $0x64] ss:$48 sps:$4 sm:$0xff]   ;;  %p12720_p12 = scmp.ne.s32.totalorder %s8650_s27, %s12719_s24  ;;  %p12724_p13 = scmp.lt.s32.totalorder %s8650_s27, %s8650_s27 }
 0x131   :  { %949 = vmatprep.subr.bf16.mxu0 %v10022_v44  ;;  %990 = vmatprep.subr.bf16.mxu1 %v10025_v45  ;;  %v10115_v44 = vld [vmem:[#allocation15 + $0x6c] ss:$48 sps:$4 sm:$0xff]   ;;  %v10110_v45 = vld [vmem:[#allocation15 + $0x60] ss:$48 sps:$4 sm:$0xff]   ;;  %p12725_p0 = scmp.lt.s32.totalorder %s12723_s7, %s12719_s24 }
 0x133   :  { %p12726_p1 = por %p12725_p0, %p12724_p13 }
 0x134   :  { %950 = vmatpush1.bf16.msra.mxu0 %v10020_v46  ;;  %991 = vmatpush1.bf16.msra.mxu1 %v10023_v47  ;;  %v10113_v46 = vld [vmem:[#allocation15 + $0x68] ss:$48 sps:$4 sm:$0xff]   ;;  %v13080_v47 = vshrl.u32 %v803_v42, 7  ;;  %v10196_v42 = vld [vmem:[#allocation15 + $0x5a4] ss:$48 sps:$4 sm:$0xff]  }
 0x135   :  { %951 = vmatprep.subr.bf16.mxu0 %v10028_v48  ;;  %992 = vmatprep.subr.bf16.mxu1 %v10031_v49  ;;  %v10118_v48 = vld [vmem:[#allocation15 + $0xc4] ss:$48 sps:$4 sm:$0xff]   ;;  %v10121_v49 = vld [vmem:[#allocation15 + $0xcc] ss:$48 sps:$4 sm:$0xff]   ;;  %p12727_p2 = pnand %p12726_p1, %p12720_p12 }
 0x138   :  { %952 = vmatpush1.bf16.msra.mxu0 %v10026_v50  ;;  %993 = vmatpush1.bf16.msra.mxu1 %v10029_v51  ;;  %v10116_v50 = vld [vmem:[#allocation15 + $0xc0] ss:$48 sps:$4 sm:$0xff]   ;;  %v10119_v51 = vld [vmem:[#allocation15 + $0xc8] ss:$48 sps:$4 sm:$0xff]  }
 0x139   :  { %953 = vmatprep.subr.bf16.mxu0 %v10034_v52  ;;  %994 = vmatprep.subr.bf16.mxu1 %v10037_v53  ;;  %v13083_v52 = vsub.s32 1, %v13080_v47  ;;  %v10127_v53 = vld [vmem:[#allocation15 + $0x12c] ss:$48 sps:$4 sm:$0xff]  }
 0x13c   :  { %954 = vmatpush1.bf16.msra.mxu0 %v10032_v54  ;;  %995 = vmatpush1.bf16.msra.mxu1 %v10035_v55  ;;  %v13085_v54 = vld [vmem:[#allocation6] sm:$0xf]  ;;  %v10122_v55 = vld [vmem:[#allocation15 + $0x120] ss:$48 sps:$4 sm:$0xff]  }
 0x13d   :  { %955 = vmatprep.subr.bf16.mxu0 %v10040_v56  ;;  %996 = vmatprep.subr.bf16.mxu1 %v10043_v57  ;;  %v10125_v56 = vld [vmem:[#allocation15 + $0x128] ss:$48 sps:$4 sm:$0xff]   ;;  %v13089_v57 = vrot.slane %v13085_v54, %v13083_v52 }
 0x140   :  { %956 = vmatpush1.bf16.msra.mxu0 %v10038_v58  ;;  %997 = vmatpush1.bf16.msra.mxu1 %v10041_v59  ;;  %v10130_v58 = vld [vmem:[#allocation15 + $0x184] ss:$48 sps:$4 sm:$0xff]   ;;  %v10133_v59 = vld [vmem:[#allocation15 + $0x18c] ss:$48 sps:$4 sm:$0xff]  }
 0x141   :  { %957 = vmatprep.subr.bf16.mxu0 %v10046_v60  ;;  %998 = vmatprep.subr.bf16.mxu1 %v10049_v61  ;;  %v13093_v60 = vpack.c.bf16 %v13089_v57, %v13089_v57  ;;  %v10128_v61 = vld [vmem:[#allocation15 + $0x180] ss:$48 sps:$4 sm:$0xff]  }
 0x144   :  { %958 = vmatpush1.bf16.msra.mxu0 %v10044_v62  ;;  %999 = vmatpush1.bf16.msra.mxu1 %v10047_v63  ;;  %v10131_v62 = vld [vmem:[#allocation15 + $0x188] ss:$48 sps:$4 sm:$0xff]   ;;  %v10136_v63 = vld [vmem:[#allocation15 + $0x1e4] ss:$48 sps:$4 sm:$0xff]  }
 0x145   :  { %959 = vmatprep.subr.bf16.mxu0 %v10052_v0  ;;  %1000 = vmatprep.subr.bf16.mxu1 %v10055_v2  ;;  %v10139_v0 = vld [vmem:[#allocation15 + $0x1ec] ss:$48 sps:$4 sm:$0xff]   ;;  %v10134_v2 = vld [vmem:[#allocation15 + $0x1e0] ss:$48 sps:$4 sm:$0xff]  }
 0x148   :  { %960 = vmatpush1.bf16.msra.mxu0 %v10050_v3  ;;  %1001 = vmatpush1.bf16.msra.mxu1 %v10053_v4  ;;  %v10137_v3 = vld [vmem:[#allocation15 + $0x1e8] ss:$48 sps:$4 sm:$0xff]   ;;  %v10142_v4 = vld [vmem:[#allocation15 + $0x244] ss:$48 sps:$4 sm:$0xff]  }
 0x149   :  { %1027 = vmatprep.subr.bf16.mxu0 %v10058_v5  ;;  %1068 = vmatprep.subr.bf16.mxu1 %v10061_v6  ;;  %v10145_v5 = vld [vmem:[#allocation15 + $0x24c] ss:$48 sps:$4 sm:$0xff]   ;;  %v10140_v6 = vld [vmem:[#allocation15 + $0x240] ss:$48 sps:$4 sm:$0xff]  }
 0x14b   :  { %978 = vmatmul.mubr.bf16.vlgmr.msra.gmra.mrb[4].mxu0 %v13068_v38  ;;  %1019 = vmatmul.mubr.bf16.vlgmr.msra.gmra.mrb[4].mxu1 %v13068_v38 }
 0x14c   :  { %1028 = vmatpush1.bf16.msra.mxu0 %v10056_v7  ;;  %1069 = vmatpush1.bf16.msra.mxu1 %v10059_v8  ;;  %v10143_v7 = vld [vmem:[#allocation15 + $0x248] ss:$48 sps:$4 sm:$0xff]   ;;  %v10148_v8 = vld [vmem:[#allocation15 + $0x2a4] ss:$48 sps:$4 sm:$0xff]  }
 0x14d   :  { %1029 = vmatprep.subr.bf16.mxu0 %v10064_v9  ;;  %1070 = vmatprep.subr.bf16.mxu1 %v10067_v10  ;;  %v10151_v9 = vld [vmem:[#allocation15 + $0x2ac] ss:$48 sps:$4 sm:$0xff]   ;;  %v10146_v10 = vld [vmem:[#allocation15 + $0x2a0] ss:$48 sps:$4 sm:$0xff]  }
 0x14e   :  { %1059 = vmatprep.mubr.bf16.mxu0 %v12780_v1  ;;  %1100 = vmatprep.mubr.bf16.mxu1 %v12780_v1 }
 0x150   :  { %1030 = vmatpush1.bf16.msra.mxu0 %v10062_v11  ;;  %1071 = vmatpush1.bf16.msra.mxu1 %v10065_v12  ;;  %v10149_v11 = vld [vmem:[#allocation15 + $0x2a8] ss:$48 sps:$4 sm:$0xff]   ;;  %v10154_v12 = vld [vmem:[#allocation15 + $0x304] ss:$48 sps:$4 sm:$0xff]  }
 0x151   :  { %1031 = vmatprep.subr.bf16.mxu0 %v10070_v13  ;;  %1072 = vmatprep.subr.bf16.mxu1 %v10073_v14  ;;  %v10157_v13 = vld [vmem:[#allocation15 + $0x30c] ss:$48 sps:$4 sm:$0xff]   ;;  %v10152_v14 = vld [vmem:[#allocation15 + $0x300] ss:$48 sps:$4 sm:$0xff]  }
 0x154   :  { %1032 = vmatpush1.bf16.msra.mxu0 %v10068_v15  ;;  %1073 = vmatpush1.bf16.msra.mxu1 %v10071_v16  ;;  %v10155_v15 = vld [vmem:[#allocation15 + $0x308] ss:$48 sps:$4 sm:$0xff]   ;;  %v10160_v16 = vld [vmem:[#allocation15 + $0x364] ss:$48 sps:$4 sm:$0xff]  }
 0x155   :  { %1033 = vmatprep.subr.bf16.mxu0 %v10076_v17  ;;  %1074 = vmatprep.subr.bf16.mxu1 %v10079_v18  ;;  %v10163_v17 = vld [vmem:[#allocation15 + $0x36c] ss:$48 sps:$4 sm:$0xff]   ;;  %v10158_v18 = vld [vmem:[#allocation15 + $0x360] ss:$48 sps:$4 sm:$0xff]  }
 0x158   :  { %1034 = vmatpush1.bf16.msra.mxu0 %v10074_v19  ;;  %1075 = vmatpush1.bf16.msra.mxu1 %v10077_v20  ;;  %v10161_v19 = vld [vmem:[#allocation15 + $0x368] ss:$48 sps:$4 sm:$0xff]   ;;  %v10166_v20 = vld [vmem:[#allocation15 + $0x3c4] ss:$48 sps:$4 sm:$0xff]  }
 0x159   :  { %1035 = vmatprep.subr.bf16.mxu0 %v10082_v21  ;;  %1076 = vmatprep.subr.bf16.mxu1 %v10085_v22  ;;  %v10169_v21 = vld [vmem:[#allocation15 + $0x3cc] ss:$48 sps:$4 sm:$0xff]   ;;  %v10164_v22 = vld [vmem:[#allocation15 + $0x3c0] ss:$48 sps:$4 sm:$0xff]  }
 0x15c   :  { %1036 = vmatpush1.bf16.msra.mxu0 %v10080_v23  ;;  %1077 = vmatpush1.bf16.msra.mxu1 %v10083_v24  ;;  %v10167_v23 = vld [vmem:[#allocation15 + $0x3c8] ss:$48 sps:$4 sm:$0xff]   ;;  %v10172_v24 = vld [vmem:[#allocation15 + $0x424] ss:$48 sps:$4 sm:$0xff]  }
 0x15d   :  { %1037 = vmatprep.subr.bf16.mxu0 %v10088_v25  ;;  %1078 = vmatprep.subr.bf16.mxu1 %v10091_v26  ;;  %v10175_v25 = vld [vmem:[#allocation15 + $0x42c] ss:$48 sps:$4 sm:$0xff]   ;;  %v10170_v26 = vld [vmem:[#allocation15 + $0x420] ss:$48 sps:$4 sm:$0xff]  }
 0x160   :  { %1038 = vmatpush1.bf16.msra.mxu0 %v10086_v27  ;;  %1079 = vmatpush1.bf16.msra.mxu1 %v10089_v28  ;;  %v10173_v27 = vld [vmem:[#allocation15 + $0x428] ss:$48 sps:$4 sm:$0xff]   ;;  %v10178_v28 = vld [vmem:[#allocation15 + $0x484] ss:$48 sps:$4 sm:$0xff]  }
 0x161   :  { %1039 = vmatprep.subr.bf16.mxu0 %v10094_v29  ;;  %1080 = vmatprep.subr.bf16.mxu1 %v10097_v30  ;;  %v10181_v29 = vld [vmem:[#allocation15 + $0x48c] ss:$48 sps:$4 sm:$0xff]   ;;  %v10176_v30 = vld [vmem:[#allocation15 + $0x480] ss:$48 sps:$4 sm:$0xff]  }
 0x164   :  { %1040 = vmatpush1.bf16.msra.mxu0 %v10092_v31  ;;  %1081 = vmatpush1.bf16.msra.mxu1 %v10095_v32  ;;  %v10179_v31 = vld [vmem:[#allocation15 + $0x488] ss:$48 sps:$4 sm:$0xff]   ;;  %v10184_v32 = vld [vmem:[#allocation15 + $0x4e4] ss:$48 sps:$4 sm:$0xff]  }
 0x165   :  { %1041 = vmatprep.subr.bf16.mxu0 %v10100_v33  ;;  %1082 = vmatprep.subr.bf16.mxu1 %v10103_v34  ;;  %v10187_v33 = vld [vmem:[#allocation15 + $0x4ec] ss:$48 sps:$4 sm:$0xff]   ;;  %v10182_v34 = vld [vmem:[#allocation15 + $0x4e0] ss:$48 sps:$4 sm:$0xff]  }
 0x168   :  { %1042 = vmatpush1.bf16.msra.mxu0 %v10098_v35  ;;  %1083 = vmatpush1.bf16.msra.mxu1 %v10101_v36  ;;  %v10185_v35 = vld [vmem:[#allocation15 + $0x4e8] ss:$48 sps:$4 sm:$0xff]   ;;  %v10190_v36 = vld [vmem:[#allocation15 + $0x544] ss:$48 sps:$4 sm:$0xff]  }
 0x169   :  { %3502 = vmatprep.subr.bf16.mxu0 %v10106_v37  ;;  %3584 = vmatprep.subr.bf16.mxu1 %v10109_v39  ;;  %v10193_v37 = vld [vmem:[#allocation15 + $0x54c] ss:$48 sps:$4 sm:$0xff]   ;;  %v13098_v39 = vsub.s32 0, %v13080_v47 }
 0x16b   :  { %1060 = vmatmul.mubr.bf16.vlgmr.msra.gmra.mrb[8].mxu0 %v13068_v38  ;;  %1101 = vmatmul.mubr.bf16.vlgmr.msra.gmra.mrb[8].mxu1 %v13068_v38  ;;  %v10124_v38 = vld [vmem:[#allocation15 + $0x124] ss:$48 sps:$4 sm:$0xff]  }
 0x16c   :  { %3503 = vmatpush1.bf16.msra.mxu0 %v10104_v40  ;;  %3585 = vmatpush1.bf16.msra.mxu1 %v10107_v41  ;;  %v10188_v40 = vld [vmem:[#allocation15 + $0x540] ss:$48 sps:$4 sm:$0xff]   ;;  %v10191_v41 = vld [vmem:[#allocation15 + $0x548] ss:$48 sps:$4 sm:$0xff]  }
 0x16d   :  { %3504 = vmatprep.subr.bf16.mxu0 %v10112_v43  ;;  %3586 = vmatprep.subr.bf16.mxu1 %v10115_v44  ;;  %v10199_v43 = vld [vmem:[#allocation15 + $0x5ac] ss:$48 sps:$4 sm:$0xff]   ;;  %v13101_v44 = vsub.s32 3, %v13080_v47 }
 0x16e   :  { %3534 = vmatprep.mubr.bf16.mxu0 %v13093_v60  ;;  %3616 = vmatprep.mubr.bf16.mxu1 %v13093_v60 }
 0x170   :  { %3505 = vmatpush1.bf16.msra.mxu0 %v10110_v45  ;;  %3587 = vmatpush1.bf16.msra.mxu1 %v10113_v46  ;;  %v13105_v45 = vrot.slane %v13085_v54, %v13098_v39  ;;  %v10194_v46 = vld [vmem:[#allocation15 + $0x5a0] ss:$48 sps:$4 sm:$0xff]  }
 0x171   :  { %3506 = vmatprep.subr.bf16.mxu0 %v10118_v48  ;;  %3588 = vmatprep.subr.bf16.mxu1 %v10121_v49  ;;  %v10197_v48 = vld [vmem:[#allocation15 + $0x5a8] ss:$48 sps:$4 sm:$0xff]   ;;  %v10202_v49 = vld [vmem:[#allocation15 + $0x604] ss:$48 sps:$4 sm:$0xff]  }
 0x174   :  { %3507 = vmatpush1.bf16.msra.mxu0 %v10116_v50  ;;  %3589 = vmatpush1.bf16.msra.mxu1 %v10119_v51  ;;  %v10205_v50 = vld [vmem:[#allocation15 + $0x60c] ss:$48 sps:$4 sm:$0xff]   ;;  %v13109_v51 = vrot.slane %v13085_v54, %v13101_v44 }
 0x175   :  { %3508 = vmatprep.subr.bf16.mxu0 %v10124_v38  ;;  %3590 = vmatprep.subr.bf16.mxu1 %v10127_v53  ;;  %v13113_v38 = vpack.c.bf16 %v13105_v45, %v13105_v45  ;;  %v10200_v53 = vld [vmem:[#allocation15 + $0x600] ss:$48 sps:$4 sm:$0xff]  }
 0x178   :  { %3509 = vmatpush1.bf16.msra.mxu0 %v10122_v55  ;;  %3591 = vmatpush1.bf16.msra.mxu1 %v10125_v56  ;;  %v10203_v55 = vld [vmem:[#allocation15 + $0x608] ss:$48 sps:$4 sm:$0xff]   ;;  %v10208_v56 = vld [vmem:[#allocation15 + $0x664] ss:$48 sps:$4 sm:$0xff]  }
 0x179   :  { %3510 = vmatprep.subr.bf16.mxu0 %v10130_v58  ;;  %3592 = vmatprep.subr.bf16.mxu1 %v10133_v59  ;;  %v10211_v58 = vld [vmem:[#allocation15 + $0x66c] ss:$48 sps:$4 sm:$0xff]   ;;  %v13117_v59 = vpack.c.bf16 %v13109_v51, %v13109_v51 }
 0x17c   :  { %3511 = vmatpush1.bf16.msra.mxu0 %v10128_v61  ;;  %3593 = vmatpush1.bf16.msra.mxu1 %v10131_v62  ;;  %v10206_v61 = vld [vmem:[#allocation15 + $0x660] ss:$48 sps:$4 sm:$0xff]   ;;  %v10209_v62 = vld [vmem:[#allocation15 + $0x668] ss:$48 sps:$4 sm:$0xff]  }
 0x17d   :  { %3512 = vmatprep.subr.bf16.mxu0 %v10136_v63  ;;  %3594 = vmatprep.subr.bf16.mxu1 %v10139_v0  ;;  %v10214_v63 = vld [vmem:[#allocation15 + $0x6c4] ss:$48 sps:$4 sm:$0xff]   ;;  %v10217_v0 = vld [vmem:[#allocation15 + $0x6cc] ss:$48 sps:$4 sm:$0xff]  }
 0x180   :  { %3513 = vmatpush1.bf16.msra.mxu0 %v10134_v2  ;;  %3595 = vmatpush1.bf16.msra.mxu1 %v10137_v3  ;;  %v10212_v2 = vld [vmem:[#allocation15 + $0x6c0] ss:$48 sps:$4 sm:$0xff]   ;;  %v10215_v3 = vld [vmem:[#allocation15 + $0x6c8] ss:$48 sps:$4 sm:$0xff]  }
 0x181   :  { %3514 = vmatprep.subr.bf16.mxu0 %v10142_v4  ;;  %3596 = vmatprep.subr.bf16.mxu1 %v10145_v5  ;;  %v10220_v4 = vld [vmem:[#allocation15 + $0x724] ss:$48 sps:$4 sm:$0xff]   ;;  %v10223_v5 = vld [vmem:[#allocation15 + $0x72c] ss:$48 sps:$4 sm:$0xff]  }
 0x184   :  { %3515 = vmatpush1.bf16.msra.mxu0 %v10140_v6  ;;  %3597 = vmatpush1.bf16.msra.mxu1 %v10143_v7  ;;  %v10218_v6 = vld [vmem:[#allocation15 + $0x720] ss:$48 sps:$4 sm:$0xff]   ;;  %v10221_v7 = vld [vmem:[#allocation15 + $0x728] ss:$48 sps:$4 sm:$0xff]  }
 0x185   :  { %3516 = vmatprep.subr.bf16.mxu0 %v10148_v8  ;;  %3598 = vmatprep.subr.bf16.mxu1 %v10151_v9  ;;  %v10226_v8 = vld [vmem:[#allocation15 + $0x784] ss:$48 sps:$4 sm:$0xff]   ;;  %v10229_v9 = vld [vmem:[#allocation15 + $0x78c] ss:$48 sps:$4 sm:$0xff]  }
 0x188   :  { %3517 = vmatpush1.bf16.msra.mxu0 %v10146_v10  ;;  %3599 = vmatpush1.bf16.msra.mxu1 %v10149_v11  ;;  %v10224_v10 = vld [vmem:[#allocation15 + $0x780] ss:$48 sps:$4 sm:$0xff]   ;;  %v10227_v11 = vld [vmem:[#allocation15 + $0x788] ss:$48 sps:$4 sm:$0xff]  }
 0x189   :  { %3518 = vmatprep.subr.bf16.mxu0 %v10154_v12  ;;  %3600 = vmatprep.subr.bf16.mxu1 %v10157_v13  ;;  %v10232_v12 = vld [vmem:[#allocation15 + $0x7e4] ss:$48 sps:$4 sm:$0xff]   ;;  %v10235_v13 = vld [vmem:[#allocation15 + $0x7ec] ss:$48 sps:$4 sm:$0xff]  }
 0x18c   :  { %3519 = vmatpush1.bf16.msra.mxu0 %v10152_v14  ;;  %3601 = vmatpush1.bf16.msra.mxu1 %v10155_v15  ;;  %v10230_v14 = vld [vmem:[#allocation15 + $0x7e0] ss:$48 sps:$4 sm:$0xff]   ;;  %v10233_v15 = vld [vmem:[#allocation15 + $0x7e8] ss:$48 sps:$4 sm:$0xff]  }
 0x18d   :  { %3520 = vmatprep.subr.bf16.mxu0 %v10160_v16  ;;  %3602 = vmatprep.subr.bf16.mxu1 %v10163_v17  ;;  %v10238_v16 = vld [vmem:[#allocation15 + $0x844] ss:$48 sps:$4 sm:$0xff]   ;;  %v10241_v17 = vld [vmem:[#allocation15 + $0x84c] ss:$48 sps:$4 sm:$0xff]  }
 0x190   :  { %3521 = vmatpush1.bf16.msra.mxu0 %v10158_v18  ;;  %3603 = vmatpush1.bf16.msra.mxu1 %v10161_v19  ;;  %v10236_v18 = vld [vmem:[#allocation15 + $0x840] ss:$48 sps:$4 sm:$0xff]   ;;  %v10239_v19 = vld [vmem:[#allocation15 + $0x848] ss:$48 sps:$4 sm:$0xff]  }
 0x191   :  { %3522 = vmatprep.subr.bf16.mxu0 %v10166_v20  ;;  %3604 = vmatprep.subr.bf16.mxu1 %v10169_v21  ;;  %v10244_v20 = vld [vmem:[#allocation15 + $0x8a4] ss:$48 sps:$4 sm:$0xff]   ;;  %v10247_v21 = vld [vmem:[#allocation15 + $0x8ac] ss:$48 sps:$4 sm:$0xff]  }
 0x194   :  { %3523 = vmatpush1.bf16.msra.mxu0 %v10164_v22  ;;  %3605 = vmatpush1.bf16.msra.mxu1 %v10167_v23  ;;  %v10242_v22 = vld [vmem:[#allocation15 + $0x8a0] ss:$48 sps:$4 sm:$0xff]   ;;  %v10245_v23 = vld [vmem:[#allocation15 + $0x8a8] ss:$48 sps:$4 sm:$0xff]  }
 0x195   :  { %3524 = vmatprep.subr.bf16.mxu0 %v10172_v24  ;;  %3606 = vmatprep.subr.bf16.mxu1 %v10175_v25  ;;  %v10250_v24 = vld [vmem:[#allocation15 + $0x904] ss:$48 sps:$4 sm:$0xff]   ;;  %v10253_v25 = vld [vmem:[#allocation15 + $0x90c] ss:$48 sps:$4 sm:$0xff]  }
 0x198   :  { %3525 = vmatpush1.bf16.msra.mxu0 %v10170_v26  ;;  %3607 = vmatpush1.bf16.msra.mxu1 %v10173_v27  ;;  %v10248_v26 = vld [vmem:[#allocation15 + $0x900] ss:$48 sps:$4 sm:$0xff]   ;;  %v10251_v27 = vld [vmem:[#allocation15 + $0x908] ss:$48 sps:$4 sm:$0xff]  }
 0x199   :  { %3526 = vmatprep.subr.bf16.mxu0 %v10178_v28  ;;  %3608 = vmatprep.subr.bf16.mxu1 %v10181_v29  ;;  %v10256_v28 = vld [vmem:[#allocation15 + $0x964] ss:$48 sps:$4 sm:$0xff]   ;;  %v10259_v29 = vld [vmem:[#allocation15 + $0x96c] ss:$48 sps:$4 sm:$0xff]  }
 0x19c   :  { %3527 = vmatpush1.bf16.msra.mxu0 %v10176_v30  ;;  %3609 = vmatpush1.bf16.msra.mxu1 %v10179_v31  ;;  %v10254_v30 = vld [vmem:[#allocation15 + $0x960] ss:$48 sps:$4 sm:$0xff]   ;;  %v10257_v31 = vld [vmem:[#allocation15 + $0x968] ss:$48 sps:$4 sm:$0xff]  }
 0x19d   :  { %3528 = vmatprep.subr.bf16.mxu0 %v10184_v32  ;;  %3610 = vmatprep.subr.bf16.mxu1 %v10187_v33  ;;  %v10262_v32 = vld [vmem:[#allocation15 + $0x9c4] ss:$48 sps:$4 sm:$0xff]   ;;  %v10265_v33 = vld [vmem:[#allocation15 + $0x9cc] ss:$48 sps:$4 sm:$0xff]  }
 0x1a0   :  { %3529 = vmatpush1.bf16.msra.mxu0 %v10182_v34  ;;  %3611 = vmatpush1.bf16.msra.mxu1 %v10185_v35  ;;  %v10260_v34 = vld [vmem:[#allocation15 + $0x9c0] ss:$48 sps:$4 sm:$0xff]   ;;  %v10263_v35 = vld [vmem:[#allocation15 + $0x9c8] ss:$48 sps:$4 sm:$0xff]  }
 0x1a1   :  { %3530 = vmatprep.subr.bf16.mxu0 %v10190_v36  ;;  %3612 = vmatprep.subr.bf16.mxu1 %v10193_v37  ;;  %v10268_v36 = vld [vmem:[#allocation15 + $0xa24] ss:$48 sps:$4 sm:$0xff]   ;;  %v10271_v37 = vld [vmem:[#allocation15 + $0xa2c] ss:$48 sps:$4 sm:$0xff]  }
 0x1a4   :  { %3531 = vmatpush1.bf16.msra.mxu0 %v10188_v40  ;;  %3613 = vmatpush1.bf16.msra.mxu1 %v10191_v41  ;;  %v10266_v40 = vld [vmem:[#allocation15 + $0xa20] ss:$48 sps:$4 sm:$0xff]   ;;  %v10269_v41 = vld [vmem:[#allocation15 + $0xa28] ss:$48 sps:$4 sm:$0xff]  }
 0x1a5   :  { %3532 = vmatprep.subr.bf16.mxu0 %v10196_v42  ;;  %3614 = vmatprep.subr.bf16.mxu1 %v10199_v43  ;;  %v10274_v42 = vld [vmem:[#allocation15 + $0xa84] ss:$48 sps:$4 sm:$0xff]   ;;  %v10277_v43 = vld [vmem:[#allocation15 + $0xa8c] ss:$48 sps:$4 sm:$0xff]  }
 0x1a8   :  { %3533 = vmatpush1.bf16.msra.mxu0 %v10194_v46  ;;  %3615 = vmatpush1.bf16.msra.mxu1 %v10197_v48  ;;  %v10272_v46 = vld [vmem:[#allocation15 + $0xa80] ss:$48 sps:$4 sm:$0xff]   ;;  %v10275_v48 = vld [vmem:[#allocation15 + $0xa88] ss:$48 sps:$4 sm:$0xff]  }
 0x1a9   :  { %3543 = vmatprep.subr.bf16.mxu0 %v10202_v49  ;;  %3625 = vmatprep.subr.bf16.mxu1 %v10205_v50  ;;  %v10280_v49 = vld [vmem:[#allocation15 + $0xae4] ss:$48 sps:$4 sm:$0xff]   ;;  %v10283_v50 = vld [vmem:[#allocation15 + $0xaec] ss:$48 sps:$4 sm:$0xff]  }
 0x1ab   :  { %3535 = vmatmul.mubr.bf16.vlgmr.msra.gmra.mrb[0].mxu0 %v13113_v38  ;;  %3617 = vmatmul.mubr.bf16.vlgmr.msra.gmra.mrb[0].mxu1 %v13113_v38 }
 0x1ac   :  { %3544 = vmatpush1.bf16.msra.mxu0 %v10200_v53  ;;  %3626 = vmatpush1.bf16.msra.mxu1 %v10203_v55  ;;  %v10278_v53 = vld [vmem:[#allocation15 + $0xae0] ss:$48 sps:$4 sm:$0xff]   ;;  %v10281_v55 = vld [vmem:[#allocation15 + $0xae8] ss:$48 sps:$4 sm:$0xff]  }
 0x1ad   :  { %3545 = vmatprep.subr.bf16.mxu0 %v10208_v56  ;;  %3627 = vmatprep.subr.bf16.mxu1 %v10211_v58  ;;  %v10286_v56 = vld [vmem:[#allocation15 + $0xb44] ss:$48 sps:$4 sm:$0xff]   ;;  %v10289_v58 = vld [vmem:[#allocation15 + $0xb4c] ss:$48 sps:$4 sm:$0xff]  }
 0x1ae   :  { %3575 = vmatprep.mubr.bf16.mxu0 %v13117_v59  ;;  %3657 = vmatprep.mubr.bf16.mxu1 %v13117_v59 }
 0x1b0   :  { %3546 = vmatpush1.bf16.msra.mxu0 %v10206_v61  ;;  %3628 = vmatpush1.bf16.msra.mxu1 %v10209_v62  ;;  %v10284_v61 = vld [vmem:[#allocation15 + $0xb40] ss:$48 sps:$4 sm:$0xff]   ;;  %v13124_v62 = vsub.s32 2, %v13080_v47 }
 0x1b1   :  { %3547 = vmatprep.subr.bf16.mxu0 %v10214_v63  ;;  %3629 = vmatprep.subr.bf16.mxu1 %v10217_v0  ;;  %v10287_v63 = vld [vmem:[#allocation15 + $0xb48] ss:$48 sps:$4 sm:$0xff]   ;;  %v10292_v0 = vld [vmem:[#allocation15 + $0xba4] ss:$48 sps:$4 sm:$0xff]  }
 0x1b4   :  { %3548 = vmatpush1.bf16.msra.mxu0 %v10212_v2  ;;  %3630 = vmatpush1.bf16.msra.mxu1 %v10215_v3  ;;  %v10295_v2 = vld [vmem:[#allocation15 + $0xbac] ss:$48 sps:$4 sm:$0xff]   ;;  %v10290_v3 = vld [vmem:[#allocation15 + $0xba0] ss:$48 sps:$4 sm:$0xff]  }
 0x1b5   :  { %3549 = vmatprep.subr.bf16.mxu0 %v10220_v4  ;;  %3631 = vmatprep.subr.bf16.mxu1 %v10223_v5  ;;  %v13128_v4 = vrot.slane %v13085_v54, %v13124_v62  ;;  %v10293_v5 = vld [vmem:[#allocation15 + $0xba8] ss:$48 sps:$4 sm:$0xff]   ;;  %v10307_v54 = vld [vmem:[#allocation15 + $0x7c] ss:$48 sps:$4 sm:$0xff]  }
 0x1b8   :  { %3550 = vmatpush1.bf16.msra.mxu0 %v10218_v6  ;;  %3632 = vmatpush1.bf16.msra.mxu1 %v10221_v7  ;;  %v10298_v6 = vld [vmem:[#allocation15 + $0x14] ss:$48 sps:$4 sm:$0xff]   ;;  %v10301_v7 = vld [vmem:[#allocation15 + $0x1c] ss:$48 sps:$4 sm:$0xff]  }
 0x1b9   :  { %3551 = vmatprep.subr.bf16.mxu0 %v10226_v8  ;;  %3633 = vmatprep.subr.bf16.mxu1 %v10229_v9  ;;  %v13132_v8 = vpack.c.bf16 %v13128_v4, %v13128_v4  ;;  %v10296_v9 = vld [vmem:[#allocation15 + $0x10] ss:$48 sps:$4 sm:$0xff]  }
 0x1bc   :  { %3552 = vmatpush1.bf16.msra.mxu0 %v10224_v10  ;;  %3634 = vmatpush1.bf16.msra.mxu1 %v10227_v11  ;;  %v10299_v10 = vld [vmem:[#allocation15 + $0x18] ss:$48 sps:$4 sm:$0xff]   ;;  %v10304_v11 = vld [vmem:[#allocation15 + $0x74] ss:$48 sps:$4 sm:$0xff]  }
 0x1bd   :  { %3553 = vmatprep.subr.bf16.mxu0 %v10232_v12  ;;  %3635 = vmatprep.subr.bf16.mxu1 %v10235_v13  ;;  %v10302_v12 = vld [vmem:[#allocation15 + $0x70] ss:$48 sps:$4 sm:$0xff]   ;;  %v10305_v13 = vld [vmem:[#allocation15 + $0x78] ss:$48 sps:$4 sm:$0xff]  }
 0x1c0   :  { %3554 = vmatpush1.bf16.msra.mxu0 %v10230_v14  ;;  %3636 = vmatpush1.bf16.msra.mxu1 %v10233_v15  ;;  %v10310_v14 = vld [vmem:[#allocation15 + $0xd4] ss:$48 sps:$4 sm:$0xff]   ;;  %v10313_v15 = vld [vmem:[#allocation15 + $0xdc] ss:$48 sps:$4 sm:$0xff]  }
 0x1c1   :  { %3555 = vmatprep.subr.bf16.mxu0 %v10238_v16  ;;  %3637 = vmatprep.subr.bf16.mxu1 %v10241_v17  ;;  %v10308_v16 = vld [vmem:[#allocation15 + $0xd0] ss:$48 sps:$4 sm:$0xff]   ;;  %v10311_v17 = vld [vmem:[#allocation15 + $0xd8] ss:$48 sps:$4 sm:$0xff]  }
 0x1c4   :  { %3556 = vmatpush1.bf16.msra.mxu0 %v10236_v18  ;;  %3638 = vmatpush1.bf16.msra.mxu1 %v10239_v19  ;;  %v10316_v18 = vld [vmem:[#allocation15 + $0x134] ss:$48 sps:$4 sm:$0xff]   ;;  %v10319_v19 = vld [vmem:[#allocation15 + $0x13c] ss:$48 sps:$4 sm:$0xff]  }
 0x1c5   :  { %3557 = vmatprep.subr.bf16.mxu0 %v10244_v20  ;;  %3639 = vmatprep.subr.bf16.mxu1 %v10247_v21  ;;  %v10314_v20 = vld [vmem:[#allocation15 + $0x130] ss:$48 sps:$4 sm:$0xff]   ;;  %v10317_v21 = vld [vmem:[#allocation15 + $0x138] ss:$48 sps:$4 sm:$0xff]  }
 0x1c8   :  { %3558 = vmatpush1.bf16.msra.mxu0 %v10242_v22  ;;  %3640 = vmatpush1.bf16.msra.mxu1 %v10245_v23  ;;  %v10322_v22 = vld [vmem:[#allocation15 + $0x194] ss:$48 sps:$4 sm:$0xff]   ;;  %v10325_v23 = vld [vmem:[#allocation15 + $0x19c] ss:$48 sps:$4 sm:$0xff]  }
 0x1c9   :  { %3559 = vmatprep.subr.bf16.mxu0 %v10250_v24  ;;  %3641 = vmatprep.subr.bf16.mxu1 %v10253_v25  ;;  %v10320_v24 = vld [vmem:[#allocation15 + $0x190] ss:$48 sps:$4 sm:$0xff]   ;;  %v10323_v25 = vld [vmem:[#allocation15 + $0x198] ss:$48 sps:$4 sm:$0xff]  }
 0x1cc   :  { %3560 = vmatpush1.bf16.msra.mxu0 %v10248_v26  ;;  %3642 = vmatpush1.bf16.msra.mxu1 %v10251_v27  ;;  %v10328_v26 = vld [vmem:[#allocation15 + $0x1f4] ss:$48 sps:$4 sm:$0xff]   ;;  %v10331_v27 = vld [vmem:[#allocation15 + $0x1fc] ss:$48 sps:$4 sm:$0xff]  }
 0x1cd   :  { %3561 = vmatprep.subr.bf16.mxu0 %v10256_v28  ;;  %3643 = vmatprep.subr.bf16.mxu1 %v10259_v29  ;;  %v10326_v28 = vld [vmem:[#allocation15 + $0x1f0] ss:$48 sps:$4 sm:$0xff]   ;;  %v10329_v29 = vld [vmem:[#allocation15 + $0x1f8] ss:$48 sps:$4 sm:$0xff]  }
 0x1d0   :  { %3562 = vmatpush1.bf16.msra.mxu0 %v10254_v30  ;;  %3644 = vmatpush1.bf16.msra.mxu1 %v10257_v31  ;;  %v10334_v30 = vld [vmem:[#allocation15 + $0x254] ss:$48 sps:$4 sm:$0xff]   ;;  %v10337_v31 = vld [vmem:[#allocation15 + $0x25c] ss:$48 sps:$4 sm:$0xff]  }
 0x1d1   :  { %3563 = vmatprep.subr.bf16.mxu0 %v10262_v32  ;;  %3645 = vmatprep.subr.bf16.mxu1 %v10265_v33  ;;  %v10332_v32 = vld [vmem:[#allocation15 + $0x250] ss:$48 sps:$4 sm:$0xff]   ;;  %v10335_v33 = vld [vmem:[#allocation15 + $0x258] ss:$48 sps:$4 sm:$0xff]  }
 0x1d4   :  { %3564 = vmatpush1.bf16.msra.mxu0 %v10260_v34  ;;  %3646 = vmatpush1.bf16.msra.mxu1 %v10263_v35  ;;  %v10340_v34 = vld [vmem:[#allocation15 + $0x2b4] ss:$48 sps:$4 sm:$0xff]   ;;  %v10343_v35 = vld [vmem:[#allocation15 + $0x2bc] ss:$48 sps:$4 sm:$0xff]  }
 0x1d5   :  { %3565 = vmatprep.subr.bf16.mxu0 %v10268_v36  ;;  %3647 = vmatprep.subr.bf16.mxu1 %v10271_v37  ;;  %v10338_v36 = vld [vmem:[#allocation15 + $0x2b0] ss:$48 sps:$4 sm:$0xff]   ;;  %v10341_v37 = vld [vmem:[#allocation15 + $0x2b8] ss:$48 sps:$4 sm:$0xff]  }
 0x1d8   :  { %3566 = vmatpush1.bf16.msra.mxu0 %v10266_v40  ;;  %3648 = vmatpush1.bf16.msra.mxu1 %v10269_v41  ;;  %v10346_v40 = vld [vmem:[#allocation15 + $0x314] ss:$48 sps:$4 sm:$0xff]   ;;  %v10349_v41 = vld [vmem:[#allocation15 + $0x31c] ss:$48 sps:$4 sm:$0xff]  }
 0x1d9   :  { %3567 = vmatprep.subr.bf16.mxu0 %v10274_v42  ;;  %3649 = vmatprep.subr.bf16.mxu1 %v10277_v43  ;;  %v10344_v42 = vld [vmem:[#allocation15 + $0x310] ss:$48 sps:$4 sm:$0xff]   ;;  %v10347_v43 = vld [vmem:[#allocation15 + $0x318] ss:$48 sps:$4 sm:$0xff]  }
 0x1dc   :  { %3568 = vmatpush1.bf16.msra.mxu0 %v10272_v46  ;;  %3650 = vmatpush1.bf16.msra.mxu1 %v10275_v48  ;;  %v10352_v46 = vld [vmem:[#allocation15 + $0x374] ss:$48 sps:$4 sm:$0xff]   ;;  %v10355_v48 = vld [vmem:[#allocation15 + $0x37c] ss:$48 sps:$4 sm:$0xff]  }
 0x1dd   :  { %3569 = vmatprep.subr.bf16.mxu0 %v10280_v49  ;;  %3651 = vmatprep.subr.bf16.mxu1 %v10283_v50  ;;  %v10350_v49 = vld [vmem:[#allocation15 + $0x370] ss:$48 sps:$4 sm:$0xff]   ;;  %v10353_v50 = vld [vmem:[#allocation15 + $0x378] ss:$48 sps:$4 sm:$0xff]  }
 0x1e0   :  { %3570 = vmatpush1.bf16.msra.mxu0 %v10278_v53  ;;  %3652 = vmatpush1.bf16.msra.mxu1 %v10281_v55  ;;  %v10358_v53 = vld [vmem:[#allocation15 + $0x3d4] ss:$48 sps:$4 sm:$0xff]   ;;  %v10361_v55 = vld [vmem:[#allocation15 + $0x3dc] ss:$48 sps:$4 sm:$0xff]  }
 0x1e1   :  { %3571 = vmatprep.subr.bf16.mxu0 %v10286_v56  ;;  %3653 = vmatprep.subr.bf16.mxu1 %v10289_v58  ;;  %v10356_v56 = vld [vmem:[#allocation15 + $0x3d0] ss:$48 sps:$4 sm:$0xff]   ;;  %v10359_v58 = vld [vmem:[#allocation15 + $0x3d8] ss:$48 sps:$4 sm:$0xff]  }
 0x1e4   :  { %3572 = vmatpush1.bf16.msra.mxu0 %v10284_v61  ;;  %3654 = vmatpush1.bf16.msra.mxu1 %v10287_v63  ;;  %v10364_v61 = vld [vmem:[#allocation15 + $0x434] ss:$48 sps:$4 sm:$0xff]   ;;  %v10367_v63 = vld [vmem:[#allocation15 + $0x43c] ss:$48 sps:$4 sm:$0xff]  }
 0x1e5   :  { %3573 = vmatprep.subr.bf16.mxu0 %v10292_v0  ;;  %3655 = vmatprep.subr.bf16.mxu1 %v10295_v2  ;;  %v10362_v0 = vld [vmem:[#allocation15 + $0x430] ss:$48 sps:$4 sm:$0xff]   ;;  %v10365_v2 = vld [vmem:[#allocation15 + $0x438] ss:$48 sps:$4 sm:$0xff]  }
 0x1e8   :  { %3574 = vmatpush1.bf16.msra.mxu0 %v10290_v3  ;;  %3656 = vmatpush1.bf16.msra.mxu1 %v10293_v5  ;;  %v10370_v3 = vld [vmem:[#allocation15 + $0x494] ss:$48 sps:$4 sm:$0xff]   ;;  %v10373_v5 = vld [vmem:[#allocation15 + $0x49c] ss:$48 sps:$4 sm:$0xff]  }
 0x1e9   :  { %3666 = vmatprep.subr.bf16.mxu0 %v10298_v6  ;;  %3748 = vmatprep.subr.bf16.mxu1 %v10301_v7  ;;  %v10368_v6 = vld [vmem:[#allocation15 + $0x490] ss:$48 sps:$4 sm:$0xff]   ;;  %v10371_v7 = vld [vmem:[#allocation15 + $0x498] ss:$48 sps:$4 sm:$0xff]  }
 0x1eb   :  { %3576 = vmatmul.mubr.bf16.vlgmr.msra.gmra.mrb[0].mxu0 %v13132_v8  ;;  %3658 = vmatmul.mubr.bf16.vlgmr.msra.gmra.mrb[0].mxu1 %v13132_v8 }
 0x1ec   :  { %3667 = vmatpush1.bf16.msra.mxu0 %v10296_v9  ;;  %3749 = vmatpush1.bf16.msra.mxu1 %v10299_v10  ;;  %v10376_v9 = vld [vmem:[#allocation15 + $0x4f4] ss:$48 sps:$4 sm:$0xff]   ;;  %v10379_v10 = vld [vmem:[#allocation15 + $0x4fc] ss:$48 sps:$4 sm:$0xff]  }
 0x1ed   :  { %3668 = vmatprep.subr.bf16.mxu0 %v10304_v11  ;;  %3750 = vmatprep.subr.bf16.mxu1 %v10307_v54  ;;  %v10374_v11 = vld [vmem:[#allocation15 + $0x4f0] ss:$48 sps:$4 sm:$0xff]   ;;  %v10377_v54 = vld [vmem:[#allocation15 + $0x4f8] ss:$48 sps:$4 sm:$0xff]  }
 0x1ee   :  { %3698 = vmatprep.mubr.bf16.mxu0 %v13093_v60  ;;  %3780 = vmatprep.mubr.bf16.mxu1 %v13093_v60 }
 0x1f0   :  { %3669 = vmatpush1.bf16.msra.mxu0 %v10302_v12  ;;  %3751 = vmatpush1.bf16.msra.mxu1 %v10305_v13  ;;  %v10382_v12 = vld [vmem:[#allocation15 + $0x554] ss:$48 sps:$4 sm:$0xff]   ;;  %v10385_v13 = vld [vmem:[#allocation15 + $0x55c] ss:$48 sps:$4 sm:$0xff]  }
 0x1f1   :  { %3670 = vmatprep.subr.bf16.mxu0 %v10310_v14  ;;  %3752 = vmatprep.subr.bf16.mxu1 %v10313_v15  ;;  %v10380_v14 = vld [vmem:[#allocation15 + $0x550] ss:$48 sps:$4 sm:$0xff]   ;;  %v10383_v15 = vld [vmem:[#allocation15 + $0x558] ss:$48 sps:$4 sm:$0xff]  }
 0x1f4   :  { %3671 = vmatpush1.bf16.msra.mxu0 %v10308_v16  ;;  %3753 = vmatpush1.bf16.msra.mxu1 %v10311_v17  ;;  %v10388_v16 = vld [vmem:[#allocation15 + $0x5b4] ss:$48 sps:$4 sm:$0xff]   ;;  %v10391_v17 = vld [vmem:[#allocation15 + $0x5bc] ss:$48 sps:$4 sm:$0xff]  }
 0x1f5   :  { %3672 = vmatprep.subr.bf16.mxu0 %v10316_v18  ;;  %3754 = vmatprep.subr.bf16.mxu1 %v10319_v19  ;;  %v10386_v18 = vld [vmem:[#allocation15 + $0x5b0] ss:$48 sps:$4 sm:$0xff]   ;;  %v10389_v19 = vld [vmem:[#allocation15 + $0x5b8] ss:$48 sps:$4 sm:$0xff]  }
 0x1f8   :  { %3673 = vmatpush1.bf16.msra.mxu0 %v10314_v20  ;;  %3755 = vmatpush1.bf16.msra.mxu1 %v10317_v21  ;;  %v10394_v20 = vld [vmem:[#allocation15 + $0x614] ss:$48 sps:$4 sm:$0xff]   ;;  %v10397_v21 = vld [vmem:[#allocation15 + $0x61c] ss:$48 sps:$4 sm:$0xff]  }
 0x1f9   :  { %3674 = vmatprep.subr.bf16.mxu0 %v10322_v22  ;;  %3756 = vmatprep.subr.bf16.mxu1 %v10325_v23  ;;  %v10392_v22 = vld [vmem:[#allocation15 + $0x610] ss:$48 sps:$4 sm:$0xff]   ;;  %v10395_v23 = vld [vmem:[#allocation15 + $0x618] ss:$48 sps:$4 sm:$0xff]  }
 0x1fc   :  { %3675 = vmatpush1.bf16.msra.mxu0 %v10320_v24  ;;  %3757 = vmatpush1.bf16.msra.mxu1 %v10323_v25  ;;  %v10400_v24 = vld [vmem:[#allocation15 + $0x674] ss:$48 sps:$4 sm:$0xff]   ;;  %v10403_v25 = vld [vmem:[#allocation15 + $0x67c] ss:$48 sps:$4 sm:$0xff]  }
 0x1fd   :  { %3676 = vmatprep.subr.bf16.mxu0 %v10328_v26  ;;  %3758 = vmatprep.subr.bf16.mxu1 %v10331_v27  ;;  %v10398_v26 = vld [vmem:[#allocation15 + $0x670] ss:$48 sps:$4 sm:$0xff]   ;;  %v10401_v27 = vld [vmem:[#allocation15 + $0x678] ss:$48 sps:$4 sm:$0xff]  }
 0x200   :  { %3677 = vmatpush1.bf16.msra.mxu0 %v10326_v28  ;;  %3759 = vmatpush1.bf16.msra.mxu1 %v10329_v29  ;;  %v10406_v28 = vld [vmem:[#allocation15 + $0x6d4] ss:$48 sps:$4 sm:$0xff]   ;;  %v10409_v29 = vld [vmem:[#allocation15 + $0x6dc] ss:$48 sps:$4 sm:$0xff]  }
 0x201   :  { %3678 = vmatprep.subr.bf16.mxu0 %v10334_v30  ;;  %3760 = vmatprep.subr.bf16.mxu1 %v10337_v31  ;;  %v10404_v30 = vld [vmem:[#allocation15 + $0x6d0] ss:$48 sps:$4 sm:$0xff]   ;;  %v10407_v31 = vld [vmem:[#allocation15 + $0x6d8] ss:$48 sps:$4 sm:$0xff]  }
 0x204   :  { %3679 = vmatpush1.bf16.msra.mxu0 %v10332_v32  ;;  %3761 = vmatpush1.bf16.msra.mxu1 %v10335_v33  ;;  %v10412_v32 = vld [vmem:[#allocation15 + $0x734] ss:$48 sps:$4 sm:$0xff]   ;;  %v10415_v33 = vld [vmem:[#allocation15 + $0x73c] ss:$48 sps:$4 sm:$0xff]  }
 0x205   :  { %3680 = vmatprep.subr.bf16.mxu0 %v10340_v34  ;;  %3762 = vmatprep.subr.bf16.mxu1 %v10343_v35  ;;  %v10410_v34 = vld [vmem:[#allocation15 + $0x730] ss:$48 sps:$4 sm:$0xff]   ;;  %v10413_v35 = vld [vmem:[#allocation15 + $0x738] ss:$48 sps:$4 sm:$0xff]  }
 0x208   :  { %3681 = vmatpush1.bf16.msra.mxu0 %v10338_v36  ;;  %3763 = vmatpush1.bf16.msra.mxu1 %v10341_v37  ;;  %v10418_v36 = vld [vmem:[#allocation15 + $0x794] ss:$48 sps:$4 sm:$0xff]   ;;  %v10421_v37 = vld [vmem:[#allocation15 + $0x79c] ss:$48 sps:$4 sm:$0xff]  }
 0x209   :  { %3682 = vmatprep.subr.bf16.mxu0 %v10346_v40  ;;  %3764 = vmatprep.subr.bf16.mxu1 %v10349_v41  ;;  %v10416_v40 = vld [vmem:[#allocation15 + $0x790] ss:$48 sps:$4 sm:$0xff]   ;;  %v10419_v41 = vld [vmem:[#allocation15 + $0x798] ss:$48 sps:$4 sm:$0xff]  }
 0x20c   :  { %3683 = vmatpush1.bf16.msra.mxu0 %v10344_v42  ;;  %3765 = vmatpush1.bf16.msra.mxu1 %v10347_v43  ;;  %v10424_v42 = vld [vmem:[#allocation15 + $0x7f4] ss:$48 sps:$4 sm:$0xff]   ;;  %v10427_v43 = vld [vmem:[#allocation15 + $0x7fc] ss:$48 sps:$4 sm:$0xff]  }
 0x20d   :  { %3684 = vmatprep.subr.bf16.mxu0 %v10352_v46  ;;  %3766 = vmatprep.subr.bf16.mxu1 %v10355_v48  ;;  %v10422_v46 = vld [vmem:[#allocation15 + $0x7f0] ss:$48 sps:$4 sm:$0xff]   ;;  %v10425_v48 = vld [vmem:[#allocation15 + $0x7f8] ss:$48 sps:$4 sm:$0xff]  }
 0x210   :  { %3685 = vmatpush1.bf16.msra.mxu0 %v10350_v49  ;;  %3767 = vmatpush1.bf16.msra.mxu1 %v10353_v50  ;;  %v10430_v49 = vld [vmem:[#allocation15 + $0x854] ss:$48 sps:$4 sm:$0xff]   ;;  %v10433_v50 = vld [vmem:[#allocation15 + $0x85c] ss:$48 sps:$4 sm:$0xff]  }
 0x211   :  { %3686 = vmatprep.subr.bf16.mxu0 %v10358_v53  ;;  %3768 = vmatprep.subr.bf16.mxu1 %v10361_v55 }
 0x214   :  { %3687 = vmatpush1.bf16.msra.mxu0 %v10356_v56  ;;  %3769 = vmatpush1.bf16.msra.mxu1 %v10359_v58  ;;  %v10428_v58 = vld [vmem:[#allocation15 + $0x850] ss:$48 sps:$4 sm:$0xff]  }
 0x215   :  { %3688 = vmatprep.subr.bf16.mxu0 %v10364_v61  ;;  %3770 = vmatprep.subr.bf16.mxu1 %v10367_v63  ;;  %v10431_v61 = vld [vmem:[#allocation15 + $0x858] ss:$48 sps:$4 sm:$0xff]  }
 0x218   :  { %3689 = vmatpush1.bf16.msra.mxu0 %v10362_v0  ;;  %3771 = vmatpush1.bf16.msra.mxu1 %v10365_v2  ;;  %v10436_v2 = vld [vmem:[#allocation15 + $0x8b4] ss:$48 sps:$4 sm:$0xff]  }
 0x219   :  { %3690 = vmatprep.subr.bf16.mxu0 %v10370_v3  ;;  %3772 = vmatprep.subr.bf16.mxu1 %v10373_v5  ;;  %v10439_v3 = vld [vmem:[#allocation15 + $0x8bc] ss:$48 sps:$4 sm:$0xff]  }
 0x21c   :  { %3691 = vmatpush1.bf16.msra.mxu0 %v10368_v6  ;;  %3773 = vmatpush1.bf16.msra.mxu1 %v10371_v7 }
 0x21d   :  { %3692 = vmatprep.subr.bf16.mxu0 %v10376_v9  ;;  %3774 = vmatprep.subr.bf16.mxu1 %v10379_v10  ;;  %v10434_v9 = vld [vmem:[#allocation15 + $0x8b0] ss:$48 sps:$4 sm:$0xff]   ;;  %v10437_v10 = vld [vmem:[#allocation15 + $0x8b8] ss:$48 sps:$4 sm:$0xff]  }
 0x220   :  { %3693 = vmatpush1.bf16.msra.mxu0 %v10374_v11  ;;  %3775 = vmatpush1.bf16.msra.mxu1 %v10377_v54  ;;  %v10442_v11 = vld [vmem:[#allocation15 + $0x914] ss:$48 sps:$4 sm:$0xff]   ;;  %v10445_v54 = vld [vmem:[#allocation15 + $0x91c] ss:$48 sps:$4 sm:$0xff]  }
 0x221   :  { %3694 = vmatprep.subr.bf16.mxu0 %v10382_v12  ;;  %3776 = vmatprep.subr.bf16.mxu1 %v10385_v13  ;;  %v10440_v12 = vld [vmem:[#allocation15 + $0x910] ss:$48 sps:$4 sm:$0xff]   ;;  %v10443_v13 = vld [vmem:[#allocation15 + $0x918] ss:$48 sps:$4 sm:$0xff]  }
 0x224   :  { %3695 = vmatpush1.bf16.msra.mxu0 %v10380_v14  ;;  %3777 = vmatpush1.bf16.msra.mxu1 %v10383_v15  ;;  %v10448_v14 = vld [vmem:[#allocation15 + $0x974] ss:$48 sps:$4 sm:$0xff]   ;;  %v10451_v15 = vld [vmem:[#allocation15 + $0x97c] ss:$48 sps:$4 sm:$0xff]  }
 0x225   :  { %3696 = vmatprep.subr.bf16.mxu0 %v10388_v16  ;;  %3778 = vmatprep.subr.bf16.mxu1 %v10391_v17  ;;  %v10446_v16 = vld [vmem:[#allocation15 + $0x970] ss:$48 sps:$4 sm:$0xff]   ;;  %v10449_v17 = vld [vmem:[#allocation15 + $0x978] ss:$48 sps:$4 sm:$0xff]  }
 0x228   :  { %3697 = vmatpush1.bf16.msra.mxu0 %v10386_v18  ;;  %3779 = vmatpush1.bf16.msra.mxu1 %v10389_v19  ;;  %v10454_v18 = vld [vmem:[#allocation15 + $0x9d4] ss:$48 sps:$4 sm:$0xff]   ;;  %v10457_v19 = vld [vmem:[#allocation15 + $0x9dc] ss:$48 sps:$4 sm:$0xff]  }
 0x229   :  { %3707 = vmatprep.subr.bf16.mxu0 %v10394_v20  ;;  %3789 = vmatprep.subr.bf16.mxu1 %v10397_v21  ;;  %v10452_v20 = vld [vmem:[#allocation15 + $0x9d0] ss:$48 sps:$4 sm:$0xff]   ;;  %v10455_v21 = vld [vmem:[#allocation15 + $0x9d8] ss:$48 sps:$4 sm:$0xff]  }
 0x22b   :  { %3699 = vmatmul.mubr.bf16.vlgmr.msra.gmra.mrb[4].mxu0 %v13113_v38  ;;  %3781 = vmatmul.mubr.bf16.vlgmr.msra.gmra.mrb[4].mxu1 %v13113_v38 }
 0x22c   :  { %3708 = vmatpush1.bf16.msra.mxu0 %v10392_v22  ;;  %3790 = vmatpush1.bf16.msra.mxu1 %v10395_v23  ;;  %v10460_v22 = vld [vmem:[#allocation15 + $0xa34] ss:$48 sps:$4 sm:$0xff]   ;;  %v10463_v23 = vld [vmem:[#allocation15 + $0xa3c] ss:$48 sps:$4 sm:$0xff]  }
 0x22d   :  { %3709 = vmatprep.subr.bf16.mxu0 %v10400_v24  ;;  %3791 = vmatprep.subr.bf16.mxu1 %v10403_v25  ;;  %v10458_v24 = vld [vmem:[#allocation15 + $0xa30] ss:$48 sps:$4 sm:$0xff]   ;;  %v10461_v25 = vld [vmem:[#allocation15 + $0xa38] ss:$48 sps:$4 sm:$0xff]  }
 0x22e   :  { %3739 = vmatprep.mubr.bf16.mxu0 %v13117_v59  ;;  %3821 = vmatprep.mubr.bf16.mxu1 %v13117_v59 }
 0x230   :  { %3710 = vmatpush1.bf16.msra.mxu0 %v10398_v26  ;;  %3792 = vmatpush1.bf16.msra.mxu1 %v10401_v27  ;;  %v10466_v26 = vld [vmem:[#allocation15 + $0xa94] ss:$48 sps:$4 sm:$0xff]   ;;  %v10469_v27 = vld [vmem:[#allocation15 + $0xa9c] ss:$48 sps:$4 sm:$0xff]  }
 0x231   :  { %3711 = vmatprep.subr.bf16.mxu0 %v10406_v28  ;;  %3793 = vmatprep.subr.bf16.mxu1 %v10409_v29  ;;  %v10464_v28 = vld [vmem:[#allocation15 + $0xa90] ss:$48 sps:$4 sm:$0xff]   ;;  %v10467_v29 = vld [vmem:[#allocation15 + $0xa98] ss:$48 sps:$4 sm:$0xff]  }
 0x234   :  { %3712 = vmatpush1.bf16.msra.mxu0 %v10404_v30  ;;  %3794 = vmatpush1.bf16.msra.mxu1 %v10407_v31  ;;  %v10472_v30 = vld [vmem:[#allocation15 + $0xaf4] ss:$48 sps:$4 sm:$0xff]   ;;  %v10475_v31 = vld [vmem:[#allocation15 + $0xafc] ss:$48 sps:$4 sm:$0xff]  }
 0x235   :  { %3713 = vmatprep.subr.bf16.mxu0 %v10412_v32  ;;  %3795 = vmatprep.subr.bf16.mxu1 %v10415_v33  ;;  %v10470_v32 = vld [vmem:[#allocation15 + $0xaf0] ss:$48 sps:$4 sm:$0xff]   ;;  %v10473_v33 = vld [vmem:[#allocation15 + $0xaf8] ss:$48 sps:$4 sm:$0xff]  }
 0x238   :  { %3714 = vmatpush1.bf16.msra.mxu0 %v10410_v34  ;;  %3796 = vmatpush1.bf16.msra.mxu1 %v10413_v35  ;;  %v10478_v34 = vld [vmem:[#allocation15 + $0xb54] ss:$48 sps:$4 sm:$0xff]   ;;  %v10481_v35 = vld [vmem:[#allocation15 + $0xb5c] ss:$48 sps:$4 sm:$0xff]  }
 0x239   :  { %3715 = vmatprep.subr.bf16.mxu0 %v10418_v36  ;;  %3797 = vmatprep.subr.bf16.mxu1 %v10421_v37  ;;  %v10476_v36 = vld [vmem:[#allocation15 + $0xb50] ss:$48 sps:$4 sm:$0xff]   ;;  %v10479_v37 = vld [vmem:[#allocation15 + $0xb58] ss:$48 sps:$4 sm:$0xff]  }
 0x23c   :  { %3716 = vmatpush1.bf16.msra.mxu0 %v10416_v40  ;;  %3798 = vmatpush1.bf16.msra.mxu1 %v10419_v41  ;;  %v10484_v40 = vld [vmem:[#allocation15 + $0xbb4] ss:$48 sps:$4 sm:$0xff]   ;;  %v10487_v41 = vld [vmem:[#allocation15 + $0xbbc] ss:$48 sps:$4 sm:$0xff]  }
 0x23d   :  { %3717 = vmatprep.subr.bf16.mxu0 %v10424_v42  ;;  %3799 = vmatprep.subr.bf16.mxu1 %v10427_v43  ;;  %v10482_v42 = vld [vmem:[#allocation15 + $0xbb0] ss:$48 sps:$4 sm:$0xff]   ;;  %v10485_v43 = vld [vmem:[#allocation15 + $0xbb8] ss:$48 sps:$4 sm:$0xff]  }
 0x23e   :  { %v13142_v53 = vpop.f32.mrb[8].mxu0  ;;  %v13144_v55 = vpop.f32.mrb[8].mxu1 }
 0x23f   :  { %v13146_v56 = vpop.f32.mrb[9].mxu0  ;;  %v13148_v63 = vpop.f32.mrb[9].mxu1 }
 0x240   :  { %v1065_v0 = vpop.f32.mrb[10].mxu0  ;;  %3718 = vmatpush1.bf16.msra.mxu0 %v10422_v46  ;;  %3800 = vmatpush1.bf16.msra.mxu1 %v10425_v48  ;;  %v1106_v5 = vpop.f32.mrb[10].mxu1  ;;  %v10490_v46 = vld [vmem:[#allocation15 + $0x24] ss:$48 sps:$4 sm:$0xff]   ;;  %v10493_v48 = vld [vmem:[#allocation15 + $0x2c] ss:$48 sps:$4 sm:$0xff]  }
 0x241   :  { %v1066_v6 = vpop.f32.mrb[11].mxu0  ;;  %3719 = vmatprep.subr.bf16.mxu0 %v10430_v49  ;;  %3801 = vmatprep.subr.bf16.mxu1 %v10433_v50  ;;  %v1107_v7 = vpop.f32.mrb[11].mxu1  ;;  %v10488_v49 = vld [vmem:[#allocation15 + $0x20] ss:$48 sps:$4 sm:$0xff]   ;;  %v10491_v50 = vld [vmem:[#allocation15 + $0x28] ss:$48 sps:$4 sm:$0xff]  }
 0x242   :  { %v10494_v0 = vld [vmem:[#allocation15 + $0x80] ss:$48 sps:$4 sm:$0xff]   ;;  %v10505_v5 = vld [vmem:[#allocation15 + $0xec] ss:$48 sps:$4 sm:$0xff]   ;;  %v10503_v7 = vld [vmem:[#allocation15 + $0xe8] ss:$48 sps:$4 sm:$0xff]  }
 0x243   :  { %v10500_v6 = vld [vmem:[#allocation15 + $0xe0] ss:$48 sps:$4 sm:$0xff]  }
 0x244   :  { %3720 = vmatpush1.bf16.msra.mxu0 %v10428_v58  ;;  %3802 = vmatpush1.bf16.msra.mxu1 %v10431_v61  ;;  %v10496_v58 = vld [vmem:[#allocation15 + $0x84] ss:$48 sps:$4 sm:$0xff]   ;;  %v10499_v61 = vld [vmem:[#allocation15 + $0x8c] ss:$48 sps:$4 sm:$0xff]  }
 0x245   :  { %3721 = vmatprep.subr.bf16.mxu0 %v10436_v2  ;;  %3803 = vmatprep.subr.bf16.mxu1 %v10439_v3  ;;  %v10497_v2 = vld [vmem:[#allocation15 + $0x88] ss:$48 sps:$4 sm:$0xff]   ;;  %v10502_v3 = vld [vmem:[#allocation15 + $0xe4] ss:$48 sps:$4 sm:$0xff]  }
 0x248   :  { %3722 = vmatpush1.bf16.msra.mxu0 %v10434_v9  ;;  %3804 = vmatpush1.bf16.msra.mxu1 %v10437_v10  ;;  %v10508_v9 = vld [vmem:[#allocation15 + $0x144] ss:$48 sps:$4 sm:$0xff]   ;;  %v10511_v10 = vld [vmem:[#allocation15 + $0x14c] ss:$48 sps:$4 sm:$0xff]  }
 0x249   :  { %3723 = vmatprep.subr.bf16.mxu0 %v10442_v11  ;;  %3805 = vmatprep.subr.bf16.mxu1 %v10445_v54  ;;  %v10506_v11 = vld [vmem:[#allocation15 + $0x140] ss:$48 sps:$4 sm:$0xff]   ;;  %v10509_v54 = vld [vmem:[#allocation15 + $0x148] ss:$48 sps:$4 sm:$0xff]  }
 0x24c   :  { %3724 = vmatpush1.bf16.msra.mxu0 %v10440_v12  ;;  %3806 = vmatpush1.bf16.msra.mxu1 %v10443_v13  ;;  %v10514_v12 = vld [vmem:[#allocation15 + $0x1a4] ss:$48 sps:$4 sm:$0xff]   ;;  %v10517_v13 = vld [vmem:[#allocation15 + $0x1ac] ss:$48 sps:$4 sm:$0xff]  }
 0x24d   :  { %3725 = vmatprep.subr.bf16.mxu0 %v10448_v14  ;;  %3807 = vmatprep.subr.bf16.mxu1 %v10451_v15  ;;  %v10512_v14 = vld [vmem:[#allocation15 + $0x1a0] ss:$48 sps:$4 sm:$0xff]   ;;  %v10520_v15 = vld [vmem:[#allocation15 + $0x204] ss:$48 sps:$4 sm:$0xff]  }
 0x250   :  { %3726 = vmatpush1.bf16.msra.mxu0 %v10446_v16  ;;  %3808 = vmatpush1.bf16.msra.mxu1 %v10449_v17  ;;  %v10523_v16 = vld [vmem:[#allocation15 + $0x20c] ss:$48 sps:$4 sm:$0xff]   ;;  %v10518_v17 = vld [vmem:[#allocation15 + $0x200] ss:$48 sps:$4 sm:$0xff]  }
 0x251   :  { %3727 = vmatprep.subr.bf16.mxu0 %v10454_v18  ;;  %3809 = vmatprep.subr.bf16.mxu1 %v10457_v19  ;;  %v10521_v18 = vld [vmem:[#allocation15 + $0x208] ss:$48 sps:$4 sm:$0xff]   ;;  %v10526_v19 = vld [vmem:[#allocation15 + $0x264] ss:$48 sps:$4 sm:$0xff]  }
 0x254   :  { %3728 = vmatpush1.bf16.msra.mxu0 %v10452_v20  ;;  %3810 = vmatpush1.bf16.msra.mxu1 %v10455_v21  ;;  %v10529_v20 = vld [vmem:[#allocation15 + $0x26c] ss:$48 sps:$4 sm:$0xff]   ;;  %v10524_v21 = vld [vmem:[#allocation15 + $0x260] ss:$48 sps:$4 sm:$0xff]  }
 0x255   :  { %3729 = vmatprep.subr.bf16.mxu0 %v10460_v22  ;;  %3811 = vmatprep.subr.bf16.mxu1 %v10463_v23  ;;  %v10527_v22 = vld [vmem:[#allocation15 + $0x268] ss:$48 sps:$4 sm:$0xff]   ;;  %v10532_v23 = vld [vmem:[#allocation15 + $0x2c4] ss:$48 sps:$4 sm:$0xff]  }
 0x258   :  { %3730 = vmatpush1.bf16.msra.mxu0 %v10458_v24  ;;  %3812 = vmatpush1.bf16.msra.mxu1 %v10461_v25  ;;  %v10535_v24 = vld [vmem:[#allocation15 + $0x2cc] ss:$48 sps:$4 sm:$0xff]   ;;  %v10530_v25 = vld [vmem:[#allocation15 + $0x2c0] ss:$48 sps:$4 sm:$0xff]  }
 0x259   :  { %3731 = vmatprep.subr.bf16.mxu0 %v10466_v26  ;;  %3813 = vmatprep.subr.bf16.mxu1 %v10469_v27  ;;  %v10533_v26 = vld [vmem:[#allocation15 + $0x2c8] ss:$48 sps:$4 sm:$0xff]   ;;  %v10538_v27 = vld [vmem:[#allocation15 + $0x324] ss:$48 sps:$4 sm:$0xff]  }
 0x25c   :  { %3732 = vmatpush1.bf16.msra.mxu0 %v10464_v28  ;;  %3814 = vmatpush1.bf16.msra.mxu1 %v10467_v29  ;;  %v10541_v28 = vld [vmem:[#allocation15 + $0x32c] ss:$48 sps:$4 sm:$0xff]   ;;  %v10536_v29 = vld [vmem:[#allocation15 + $0x320] ss:$48 sps:$4 sm:$0xff]  }
 0x25d   :  { %3733 = vmatprep.subr.bf16.mxu0 %v10472_v30  ;;  %3815 = vmatprep.subr.bf16.mxu1 %v10475_v31  ;;  %v10539_v30 = vld [vmem:[#allocation15 + $0x328] ss:$48 sps:$4 sm:$0xff]   ;;  %v10544_v31 = vld [vmem:[#allocation15 + $0x384] ss:$48 sps:$4 sm:$0xff]  }
 0x260   :  { %3734 = vmatpush1.bf16.msra.mxu0 %v10470_v32  ;;  %3816 = vmatpush1.bf16.msra.mxu1 %v10473_v33  ;;  %v10547_v32 = vld [vmem:[#allocation15 + $0x38c] ss:$48 sps:$4 sm:$0xff]   ;;  %v10542_v33 = vld [vmem:[#allocation15 + $0x380] ss:$48 sps:$4 sm:$0xff]  }
 0x261   :  { %3735 = vmatprep.subr.bf16.mxu0 %v10478_v34  ;;  %3817 = vmatprep.subr.bf16.mxu1 %v10481_v35  ;;  %v10545_v34 = vld [vmem:[#allocation15 + $0x388] ss:$48 sps:$4 sm:$0xff]   ;;  %v10550_v35 = vld [vmem:[#allocation15 + $0x3e4] ss:$48 sps:$4 sm:$0xff]  }
 0x264   :  { %3736 = vmatpush1.bf16.msra.mxu0 %v10476_v36  ;;  %3818 = vmatpush1.bf16.msra.mxu1 %v10479_v37  ;;  %v12781_v36 = vmov 0.0   ;;  %v10553_v37 = vld [vmem:[#allocation15 + $0x3ec] ss:$48 sps:$4 sm:$0xff]  }
 0x265   :  { %3737 = vmatprep.subr.bf16.mxu0 %v10484_v40  ;;  %3819 = vmatprep.subr.bf16.mxu1 %v10487_v41  ;;  %219 = vst [vmem:[#allocation27] sm:$0x1] %v12781_v36  ;;  %v10548_v40 = vld [vmem:[#allocation15 + $0x3e0] ss:$48 sps:$4 sm:$0xff]   ;;  %v10551_v41 = vld [vmem:[#allocation15 + $0x3e8] ss:$48 sps:$4 sm:$0xff]  }
 0x268   :  { %3738 = vmatpush1.bf16.msra.mxu0 %v10482_v42  ;;  %3820 = vmatpush1.bf16.msra.mxu1 %v10485_v43  ;;  %v10556_v42 = vld [vmem:[#allocation15 + $0x444] ss:$48 sps:$4 sm:$0xff]   ;;  %v10559_v43 = vld [vmem:[#allocation15 + $0x44c] ss:$48 sps:$4 sm:$0xff]  }
 0x269   :  { %3830 = vmatprep.subr.bf16.mxu0 %v10490_v46  ;;  %3912 = vmatprep.subr.bf16.mxu1 %v10493_v48  ;;  %v10554_v46 = vld [vmem:[#allocation15 + $0x440] ss:$48 sps:$4 sm:$0xff]   ;;  %v10557_v48 = vld [vmem:[#allocation15 + $0x448] ss:$48 sps:$4 sm:$0xff]  }
 0x26b   :  { %3740 = vmatmul.mubr.bf16.vlgmr.msra.gmra.mrb[4].mxu0 %v13132_v8  ;;  %3822 = vmatmul.mubr.bf16.vlgmr.msra.gmra.mrb[4].mxu1 %v13132_v8 }
 0x26c   :  { %3831 = vmatpush1.bf16.msra.mxu0 %v10488_v49  ;;  %3913 = vmatpush1.bf16.msra.mxu1 %v10491_v50  ;;  %v10562_v49 = vld [vmem:[#allocation15 + $0x4a4] ss:$48 sps:$4 sm:$0xff]   ;;  %v10565_v50 = vld [vmem:[#allocation15 + $0x4ac] ss:$48 sps:$4 sm:$0xff]  }
 0x26d   :  { %3832 = vmatprep.subr.bf16.mxu0 %v10496_v58  ;;  %3914 = vmatprep.subr.bf16.mxu1 %v10499_v61  ;;  %v10560_v58 = vld [vmem:[#allocation15 + $0x4a0] ss:$48 sps:$4 sm:$0xff]   ;;  %v10563_v61 = vld [vmem:[#allocation15 + $0x4a8] ss:$48 sps:$4 sm:$0xff]  }
 0x26e   :  { %3862 = vmatprep.mubr.bf16.mxu0 %v13093_v60  ;;  %3944 = vmatprep.mubr.bf16.mxu1 %v13093_v60  ;;  %v10515_v60 = vld [vmem:[#allocation15 + $0x1a8] ss:$48 sps:$4 sm:$0xff]  }
 0x270   :  { %3833 = vmatpush1.bf16.msra.mxu0 %v10494_v0  ;;  %3915 = vmatpush1.bf16.msra.mxu1 %v10497_v2  ;;  %v10568_v0 = vld [vmem:[#allocation15 + $0x504] ss:$48 sps:$4 sm:$0xff]   ;;  %v10571_v2 = vld [vmem:[#allocation15 + $0x50c] ss:$48 sps:$4 sm:$0xff]  }
 0x271   :  { %3834 = vmatprep.subr.bf16.mxu0 %v10502_v3  ;;  %3916 = vmatprep.subr.bf16.mxu1 %v10505_v5  ;;  %v10566_v3 = vld [vmem:[#allocation15 + $0x500] ss:$48 sps:$4 sm:$0xff]   ;;  %v10569_v5 = vld [vmem:[#allocation15 + $0x508] ss:$48 sps:$4 sm:$0xff]  }
 0x274   :  { %3835 = vmatpush1.bf16.msra.mxu0 %v10500_v6  ;;  %3917 = vmatpush1.bf16.msra.mxu1 %v10503_v7  ;;  %v10574_v6 = vld [vmem:[#allocation15 + $0x564] ss:$48 sps:$4 sm:$0xff]   ;;  %v10577_v7 = vld [vmem:[#allocation15 + $0x56c] ss:$48 sps:$4 sm:$0xff]  }
 0x275   :  { %3836 = vmatprep.subr.bf16.mxu0 %v10508_v9  ;;  %3918 = vmatprep.subr.bf16.mxu1 %v10511_v10  ;;  %v10572_v9 = vld [vmem:[#allocation15 + $0x560] ss:$48 sps:$4 sm:$0xff]   ;;  %v10575_v10 = vld [vmem:[#allocation15 + $0x568] ss:$48 sps:$4 sm:$0xff]  }
 0x278   :  { %3837 = vmatpush1.bf16.msra.mxu0 %v10506_v11  ;;  %3919 = vmatpush1.bf16.msra.mxu1 %v10509_v54  ;;  %v10580_v11 = vld [vmem:[#allocation15 + $0x5c4] ss:$48 sps:$4 sm:$0xff]   ;;  %v10583_v54 = vld [vmem:[#allocation15 + $0x5cc] ss:$48 sps:$4 sm:$0xff]  }
 0x279   :  { %3838 = vmatprep.subr.bf16.mxu0 %v10514_v12  ;;  %3920 = vmatprep.subr.bf16.mxu1 %v10517_v13  ;;  %v10578_v12 = vld [vmem:[#allocation15 + $0x5c0] ss:$48 sps:$4 sm:$0xff]   ;;  %v10581_v13 = vld [vmem:[#allocation15 + $0x5c8] ss:$48 sps:$4 sm:$0xff]  }
 0x27c   :  { %3839 = vmatpush1.bf16.msra.mxu0 %v10512_v14  ;;  %3921 = vmatpush1.bf16.msra.mxu1 %v10515_v60  ;;  %v10586_v14 = vld [vmem:[#allocation15 + $0x624] ss:$48 sps:$4 sm:$0xff]   ;;  %v10589_v60 = vld [vmem:[#allocation15 + $0x62c] ss:$48 sps:$4 sm:$0xff]  }
 0x27d   :  { %3840 = vmatprep.subr.bf16.mxu0 %v10520_v15  ;;  %3922 = vmatprep.subr.bf16.mxu1 %v10523_v16  ;;  %v10584_v15 = vld [vmem:[#allocation15 + $0x620] ss:$48 sps:$4 sm:$0xff]   ;;  %v10587_v16 = vld [vmem:[#allocation15 + $0x628] ss:$48 sps:$4 sm:$0xff]  }
 0x280   :  { %3841 = vmatpush1.bf16.msra.mxu0 %v10518_v17  ;;  %3923 = vmatpush1.bf16.msra.mxu1 %v10521_v18  ;;  %v10592_v17 = vld [vmem:[#allocation15 + $0x684] ss:$48 sps:$4 sm:$0xff]   ;;  %v10595_v18 = vld [vmem:[#allocation15 + $0x68c] ss:$48 sps:$4 sm:$0xff]  }
 0x281   :  { %3842 = vmatprep.subr.bf16.mxu0 %v10526_v19  ;;  %3924 = vmatprep.subr.bf16.mxu1 %v10529_v20  ;;  %v10590_v19 = vld [vmem:[#allocation15 + $0x680] ss:$48 sps:$4 sm:$0xff]   ;;  %v10593_v20 = vld [vmem:[#allocation15 + $0x688] ss:$48 sps:$4 sm:$0xff]  }
 0x284   :  { %3843 = vmatpush1.bf16.msra.mxu0 %v10524_v21  ;;  %3925 = vmatpush1.bf16.msra.mxu1 %v10527_v22  ;;  %v10598_v21 = vld [vmem:[#allocation15 + $0x6e4] ss:$48 sps:$4 sm:$0xff]   ;;  %v10601_v22 = vld [vmem:[#allocation15 + $0x6ec] ss:$48 sps:$4 sm:$0xff]  }
 0x285   :  { %3844 = vmatprep.subr.bf16.mxu0 %v10532_v23  ;;  %3926 = vmatprep.subr.bf16.mxu1 %v10535_v24  ;;  %v10596_v23 = vld [vmem:[#allocation15 + $0x6e0] ss:$48 sps:$4 sm:$0xff]   ;;  %v10599_v24 = vld [vmem:[#allocation15 + $0x6e8] ss:$48 sps:$4 sm:$0xff]  }
 0x288   :  { %3845 = vmatpush1.bf16.msra.mxu0 %v10530_v25  ;;  %3927 = vmatpush1.bf16.msra.mxu1 %v10533_v26  ;;  %v10604_v25 = vld [vmem:[#allocation15 + $0x744] ss:$48 sps:$4 sm:$0xff]   ;;  %v10607_v26 = vld [vmem:[#allocation15 + $0x74c] ss:$48 sps:$4 sm:$0xff]  }
 0x289   :  { %3846 = vmatprep.subr.bf16.mxu0 %v10538_v27  ;;  %3928 = vmatprep.subr.bf16.mxu1 %v10541_v28  ;;  %v10602_v27 = vld [vmem:[#allocation15 + $0x740] ss:$48 sps:$4 sm:$0xff]   ;;  %v10610_v28 = vld [vmem:[#allocation15 + $0x7a4] ss:$48 sps:$4 sm:$0xff]  }
 0x28c   :  { %3847 = vmatpush1.bf16.msra.mxu0 %v10536_v29  ;;  %3929 = vmatpush1.bf16.msra.mxu1 %v10539_v30  ;;  %v10613_v29 = vld [vmem:[#allocation15 + $0x7ac] ss:$48 sps:$4 sm:$0xff]   ;;  %v10608_v30 = vld [vmem:[#allocation15 + $0x7a0] ss:$48 sps:$4 sm:$0xff]  }
 0x28d   :  { %3848 = vmatprep.subr.bf16.mxu0 %v10544_v31  ;;  %3930 = vmatprep.subr.bf16.mxu1 %v10547_v32  ;;  %v10611_v31 = vld [vmem:[#allocation15 + $0x7a8] ss:$48 sps:$4 sm:$0xff]   ;;  %v10616_v32 = vld [vmem:[#allocation15 + $0x804] ss:$48 sps:$4 sm:$0xff]  }
 0x290   :  { %3849 = vmatpush1.bf16.msra.mxu0 %v10542_v33  ;;  %3931 = vmatpush1.bf16.msra.mxu1 %v10545_v34  ;;  %v10619_v33 = vld [vmem:[#allocation15 + $0x80c] ss:$48 sps:$4 sm:$0xff]   ;;  %v10617_v34 = vld [vmem:[#allocation15 + $0x808] ss:$48 sps:$4 sm:$0xff]  }
 0x291   :  { %3850 = vmatprep.subr.bf16.mxu0 %v10550_v35  ;;  %3932 = vmatprep.subr.bf16.mxu1 %v10553_v37  ;;  %v10622_v35 = vld [vmem:[#allocation15 + $0x864] ss:$48 sps:$4 sm:$0xff]   ;;  %v10625_v37 = vld [vmem:[#allocation15 + $0x86c] ss:$48 sps:$4 sm:$0xff]  }
 0x294   :  { %3851 = vmatpush1.bf16.msra.mxu0 %v10548_v40  ;;  %3933 = vmatpush1.bf16.msra.mxu1 %v10551_v41 }
 0x295   :  { %3852 = vmatprep.subr.bf16.mxu0 %v10556_v42  ;;  %3934 = vmatprep.subr.bf16.mxu1 %v10559_v43  ;;  %v10620_v42 = vld [vmem:[#allocation15 + $0x860] ss:$48 sps:$4 sm:$0xff]   ;;  %v10623_v43 = vld [vmem:[#allocation15 + $0x868] ss:$48 sps:$4 sm:$0xff]  }
 0x298   :  { %3853 = vmatpush1.bf16.msra.mxu0 %v10554_v46  ;;  %3935 = vmatpush1.bf16.msra.mxu1 %v10557_v48 }
 0x299   :  { %3854 = vmatprep.subr.bf16.mxu0 %v10562_v49  ;;  %3936 = vmatprep.subr.bf16.mxu1 %v10565_v50 }
 0x29c   :  { %3855 = vmatpush1.bf16.msra.mxu0 %v10560_v58  ;;  %3937 = vmatpush1.bf16.msra.mxu1 %v10563_v61 }
 0x29d   :  { %3856 = vmatprep.subr.bf16.mxu0 %v10568_v0  ;;  %3938 = vmatprep.subr.bf16.mxu1 %v10571_v2  ;;  %v10628_v0 = vld [vmem:[#allocation15 + $0x8c4] ss:$48 sps:$4 sm:$0xff]   ;;  %v10631_v2 = vld [vmem:[#allocation15 + $0x8cc] ss:$48 sps:$4 sm:$0xff]  }
 0x2a0   :  { %3857 = vmatpush1.bf16.msra.mxu0 %v10566_v3  ;;  %3939 = vmatpush1.bf16.msra.mxu1 %v10569_v5  ;;  %v10626_v3 = vld [vmem:[#allocation15 + $0x8c0] ss:$48 sps:$4 sm:$0xff]   ;;  %v10629_v5 = vld [vmem:[#allocation15 + $0x8c8] ss:$48 sps:$4 sm:$0xff]  }
 0x2a1   :  { %3858 = vmatprep.subr.bf16.mxu0 %v10574_v6  ;;  %3940 = vmatprep.subr.bf16.mxu1 %v10577_v7  ;;  %v10634_v6 = vld [vmem:[#allocation15 + $0x924] ss:$48 sps:$4 sm:$0xff]   ;;  %v10637_v7 = vld [vmem:[#allocation15 + $0x92c] ss:$48 sps:$4 sm:$0xff]  }
 0x2a4   :  { %3859 = vmatpush1.bf16.msra.mxu0 %v10572_v9  ;;  %3941 = vmatpush1.bf16.msra.mxu1 %v10575_v10  ;;  %v10632_v9 = vld [vmem:[#allocation15 + $0x920] ss:$48 sps:$4 sm:$0xff]   ;;  %v10635_v10 = vld [vmem:[#allocation15 + $0x928] ss:$48 sps:$4 sm:$0xff]  }
 0x2a5   :  { %3860 = vmatprep.subr.bf16.mxu0 %v10580_v11  ;;  %3942 = vmatprep.subr.bf16.mxu1 %v10583_v54  ;;  %v10640_v11 = vld [vmem:[#allocation15 + $0x984] ss:$48 sps:$4 sm:$0xff]   ;;  %v10643_v54 = vld [vmem:[#allocation15 + $0x98c] ss:$48 sps:$4 sm:$0xff]  }
 0x2a8   :  { %3861 = vmatpush1.bf16.msra.mxu0 %v10578_v12  ;;  %3943 = vmatpush1.bf16.msra.mxu1 %v10581_v13  ;;  %v10638_v12 = vld [vmem:[#allocation15 + $0x980] ss:$48 sps:$4 sm:$0xff]   ;;  %v10641_v13 = vld [vmem:[#allocation15 + $0x988] ss:$48 sps:$4 sm:$0xff]  }
 0x2a9   :  { %3871 = vmatprep.subr.bf16.mxu0 %v10586_v14  ;;  %3953 = vmatprep.subr.bf16.mxu1 %v10589_v60  ;;  %v10646_v14 = vld [vmem:[#allocation15 + $0x9e4] ss:$48 sps:$4 sm:$0xff]   ;;  %v10649_v60 = vld [vmem:[#allocation15 + $0x9ec] ss:$48 sps:$4 sm:$0xff]  }
 0x2ab   :  { %3863 = vmatmul.mubr.bf16.vlgmr.msra.gmra.mrb[12].mxu0 %v13113_v38  ;;  %3945 = vmatmul.mubr.bf16.vlgmr.msra.gmra.mrb[12].mxu1 %v13113_v38  ;;  %v10605_v38 = vld [vmem:[#allocation15 + $0x748] ss:$48 sps:$4 sm:$0xff]  }
 0x2ac   :  { %3872 = vmatpush1.bf16.msra.mxu0 %v10584_v15  ;;  %3954 = vmatpush1.bf16.msra.mxu1 %v10587_v16  ;;  %v10644_v15 = vld [vmem:[#allocation15 + $0x9e0] ss:$48 sps:$4 sm:$0xff]   ;;  %v10647_v16 = vld [vmem:[#allocation15 + $0x9e8] ss:$48 sps:$4 sm:$0xff]  }
 0x2ad   :  { %3873 = vmatprep.subr.bf16.mxu0 %v10592_v17  ;;  %3955 = vmatprep.subr.bf16.mxu1 %v10595_v18  ;;  %v10652_v17 = vld [vmem:[#allocation15 + $0xa44] ss:$48 sps:$4 sm:$0xff]   ;;  %v10655_v18 = vld [vmem:[#allocation15 + $0xa4c] ss:$48 sps:$4 sm:$0xff]  }
 0x2ae   :  { %3903 = vmatprep.mubr.bf16.mxu0 %v13117_v59  ;;  %3985 = vmatprep.mubr.bf16.mxu1 %v13117_v59  ;;  %v10614_v59 = vld [vmem:[#allocation15 + $0x800] ss:$48 sps:$4 sm:$0xff]  }
 0x2b0   :  { %3874 = vmatpush1.bf16.msra.mxu0 %v10590_v19  ;;  %3956 = vmatpush1.bf16.msra.mxu1 %v10593_v20  ;;  %v10650_v19 = vld [vmem:[#allocation15 + $0xa40] ss:$48 sps:$4 sm:$0xff]   ;;  %v10653_v20 = vld [vmem:[#allocation15 + $0xa48] ss:$48 sps:$4 sm:$0xff]  }
 0x2b1   :  { %3875 = vmatprep.subr.bf16.mxu0 %v10598_v21  ;;  %3957 = vmatprep.subr.bf16.mxu1 %v10601_v22  ;;  %v10658_v21 = vld [vmem:[#allocation15 + $0xaa4] ss:$48 sps:$4 sm:$0xff]   ;;  %v10661_v22 = vld [vmem:[#allocation15 + $0xaac] ss:$48 sps:$4 sm:$0xff]  }
 0x2b4   :  { %3876 = vmatpush1.bf16.msra.mxu0 %v10596_v23  ;;  %3958 = vmatpush1.bf16.msra.mxu1 %v10599_v24  ;;  %v10656_v23 = vld [vmem:[#allocation15 + $0xaa0] ss:$48 sps:$4 sm:$0xff]   ;;  %v10659_v24 = vld [vmem:[#allocation15 + $0xaa8] ss:$48 sps:$4 sm:$0xff]  }
 0x2b5   :  { %3877 = vmatprep.subr.bf16.mxu0 %v10604_v25  ;;  %3959 = vmatprep.subr.bf16.mxu1 %v10607_v26  ;;  %v10664_v25 = vld [vmem:[#allocation15 + $0xb04] ss:$48 sps:$4 sm:$0xff]   ;;  %v10667_v26 = vld [vmem:[#allocation15 + $0xb0c] ss:$48 sps:$4 sm:$0xff]  }
 0x2b8   :  { %3878 = vmatpush1.bf16.msra.mxu0 %v10602_v27  ;;  %3960 = vmatpush1.bf16.msra.mxu1 %v10605_v38  ;;  %v10662_v27 = vld [vmem:[#allocation15 + $0xb00] ss:$48 sps:$4 sm:$0xff]   ;;  %v10665_v38 = vld [vmem:[#allocation15 + $0xb08] ss:$48 sps:$4 sm:$0xff]  }
 0x2b9   :  { %3879 = vmatprep.subr.bf16.mxu0 %v10610_v28  ;;  %3961 = vmatprep.subr.bf16.mxu1 %v10613_v29  ;;  %v10670_v28 = vld [vmem:[#allocation15 + $0xb64] ss:$48 sps:$4 sm:$0xff]   ;;  %v10673_v29 = vld [vmem:[#allocation15 + $0xb6c] ss:$48 sps:$4 sm:$0xff]  }
 0x2bc   :  { %3880 = vmatpush1.bf16.msra.mxu0 %v10608_v30  ;;  %3962 = vmatpush1.bf16.msra.mxu1 %v10611_v31  ;;  %v10668_v30 = vld [vmem:[#allocation15 + $0xb60] ss:$48 sps:$4 sm:$0xff]   ;;  %v10671_v31 = vld [vmem:[#allocation15 + $0xb68] ss:$48 sps:$4 sm:$0xff]  }
 0x2bd   :  { %3881 = vmatprep.subr.bf16.mxu0 %v10616_v32  ;;  %3963 = vmatprep.subr.bf16.mxu1 %v10619_v33  ;;  %v10676_v32 = vld [vmem:[#allocation15 + $0xbc4] ss:$48 sps:$4 sm:$0xff]   ;;  %v10679_v33 = vld [vmem:[#allocation15 + $0xbcc] ss:$48 sps:$4 sm:$0xff]  }
 0x2be   :  { %v13159_v40 = vpop.f32.mrb[0].mxu0  ;;  %v13161_v41 = vpop.f32.mrb[0].mxu1 }
 0x2bf   :  { %v13163_v46 = vpop.f32.mrb[1].mxu0  ;;  %v13165_v48 = vpop.f32.mrb[1].mxu1 }
 0x2c0   :  { %v3581_v49 = vpop.f32.mrb[2].mxu0  ;;  %v3663_v50 = vpop.f32.mrb[2].mxu1  ;;  %3882 = vmatpush1.bf16.msra.mxu0 %v10614_v59  ;;  %3964 = vmatpush1.bf16.msra.mxu1 %v10617_v34  ;;  %v10674_v59 = vld [vmem:[#allocation15 + $0xbc0] ss:$48 sps:$4 sm:$0xff]   ;;  %v10677_v34 = vld [vmem:[#allocation15 + $0xbc8] ss:$48 sps:$4 sm:$0xff]  }
 0x2c1   :  { %v3582_v58 = vpop.f32.mrb[3].mxu0  ;;  %v3664_v61 = vpop.f32.mrb[3].mxu1  ;;  %3883 = vmatprep.subr.bf16.mxu0 %v10622_v35  ;;  %3965 = vmatprep.subr.bf16.mxu1 %v10625_v37  ;;  %v10680_v35 = vld [vmem:[#allocation20 + $0x40] sm:$0xff]  }
 0x2c2   :  { %v10682_v37 = vld [vmem:[#allocation20 + $0xc0] sm:$0xff]   ;;  %v10684_v58 = vld [vmem:[#allocation20 + $0x48] sm:$0xff]  }
 0x2c3   :  { %v10681_v49 = vld [vmem:[#allocation20] sm:$0xff]   ;;  %v10686_v61 = vld [vmem:[#allocation20 + $0xc8] sm:$0xff]  }
 0x2c4   :  { %3884 = vmatpush1.bf16.msra.mxu0 %v10620_v42  ;;  %3966 = vmatpush1.bf16.msra.mxu1 %v10623_v43  ;;  %v13167_v42 = vld [vmem:[#allocation12] sm:$0xff]  ;;  %v13169_v43 = vld [vmem:[#allocation12 + $0x8] sm:$0xff]  ;;  %v10683_v50 = vld [vmem:[#allocation20 + $0x80] sm:$0xff]  }
 0x2c5   :  { %3885 = vmatprep.subr.bf16.mxu0 %v10628_v0  ;;  %3967 = vmatprep.subr.bf16.mxu1 %v10631_v2  ;;  %v9154_v0 = vcombine.high %v13167_v42, %v13167_v42  ;;  %v9156_v2 = vcombine.high %v13169_v43, %v13169_v43 }
 0x2c8   :  { %3886 = vmatpush1.bf16.msra.mxu0 %v10626_v3  ;;  %3968 = vmatpush1.bf16.msra.mxu1 %v10629_v5  ;;  %v10685_v3 = vld [vmem:[#allocation20 + $0x8] sm:$0xff]  }
 0x2c9   :  { %3887 = vmatprep.subr.bf16.mxu0 %v10634_v6  ;;  %3969 = vmatprep.subr.bf16.mxu1 %v10637_v7  ;;  %v10687_v5 = vld [vmem:[#allocation20 + $0x88] sm:$0xff]   ;;  %v10688_v6 = vld [vmem:[#allocation20 + $0x50] sm:$0xff]  }
 0x2ca   :  { %v10690_v7 = vld [vmem:[#allocation20 + $0xd0] sm:$0xff]  }
 0x2cc   :  { %3888 = vmatpush1.bf16.msra.mxu0 %v10632_v9  ;;  %3970 = vmatpush1.bf16.msra.mxu1 %v10635_v10  ;;  %v10689_v9 = vld [vmem:[#allocation20 + $0x10] sm:$0xff]  }
 0x2cd   :  { %3889 = vmatprep.subr.bf16.mxu0 %v10640_v11  ;;  %3971 = vmatprep.subr.bf16.mxu1 %v10643_v54  ;;  %v10691_v10 = vld [vmem:[#allocation20 + $0x90] sm:$0xff]   ;;  %v10692_v11 = vld [vmem:[#allocation20 + $0x58] sm:$0xff]  }
 0x2ce   :  { %v10694_v54 = vld [vmem:[#allocation20 + $0xd8] sm:$0xff]  }
 0x2d0   :  { %3890 = vmatpush1.bf16.msra.mxu0 %v10638_v12  ;;  %3972 = vmatpush1.bf16.msra.mxu1 %v10641_v13  ;;  %v10695_v12 = vld [vmem:[#allocation20 + $0x98] sm:$0xff]   ;;  %v10696_v13 = vld [vmem:[#allocation20 + $0x60] sm:$0xff]  }
 0x2d1   :  { %3891 = vmatprep.subr.bf16.mxu0 %v10646_v14  ;;  %3973 = vmatprep.subr.bf16.mxu1 %v10649_v60  ;;  %v10698_v14 = vld [vmem:[#allocation20 + $0xe0] sm:$0xff]  }
 0x2d2   :  { %v10697_v60 = vld [vmem:[#allocation20 + $0x20] sm:$0xff]  }
 0x2d4   :  { %3892 = vmatpush1.bf16.msra.mxu0 %v10644_v15  ;;  %3974 = vmatpush1.bf16.msra.mxu1 %v10647_v16  ;;  %v10699_v15 = vld [vmem:[#allocation20 + $0xa0] sm:$0xff]   ;;  %v10700_v16 = vld [vmem:[#allocation20 + $0x68] sm:$0xff]  }
 0x2d5   :  { %3893 = vmatprep.subr.bf16.mxu0 %v10652_v17  ;;  %3975 = vmatprep.subr.bf16.mxu1 %v10655_v18  ;;  %v10702_v17 = vld [vmem:[#allocation20 + $0xe8] sm:$0xff]  }
 0x2d6   :  { %v10701_v18 = vld [vmem:[#allocation20 + $0x28] sm:$0xff]  }
 0x2d8   :  { %3894 = vmatpush1.bf16.msra.mxu0 %v10650_v19  ;;  %3976 = vmatpush1.bf16.msra.mxu1 %v10653_v20  ;;  %v10703_v19 = vld [vmem:[#allocation20 + $0xa8] sm:$0xff]   ;;  %v10704_v20 = vld [vmem:[#allocation20 + $0x70] sm:$0xff]  }
 0x2d9   :  { %3895 = vmatprep.subr.bf16.mxu0 %v10658_v21  ;;  %3977 = vmatprep.subr.bf16.mxu1 %v10661_v22  ;;  %v10706_v21 = vld [vmem:[#allocation20 + $0xf0] sm:$0xff]  }
 0x2da   :  { %v10705_v22 = vld [vmem:[#allocation20 + $0x30] sm:$0xff]  }
 0x2dc   :  { %3896 = vmatpush1.bf16.msra.mxu0 %v10656_v23  ;;  %3978 = vmatpush1.bf16.msra.mxu1 %v10659_v24  ;;  %v10707_v23 = vld [vmem:[#allocation20 + $0xb0] sm:$0xff]   ;;  %v10708_v24 = vld [vmem:[#allocation20 + $0x78] sm:$0xff]  }
 0x2dd   :  { %3897 = vmatprep.subr.bf16.mxu0 %v10664_v25  ;;  %3979 = vmatprep.subr.bf16.mxu1 %v10667_v26  ;;  %v10710_v25 = vld [vmem:[#allocation20 + $0xf8] sm:$0xff]  }
 0x2de   :  { %v10709_v26 = vld [vmem:[#allocation20 + $0x38] sm:$0xff]  }
 0x2e0   :  { %3898 = vmatpush1.bf16.msra.mxu0 %v10662_v27  ;;  %3980 = vmatpush1.bf16.msra.mxu1 %v10665_v38  ;;  %v10713_v27 = vld [vmem:[#allocation20 + $0xb8] sm:$0xff]   ;;  %v9153_v38 = vcombine.low %v13167_v42, %v13167_v42 }
 0x2e1   :  { %3899 = vmatprep.subr.bf16.mxu0 %v10670_v28  ;;  %3981 = vmatprep.subr.bf16.mxu1 %v10673_v29  ;;  %v9155_v28 = vcombine.low %v13169_v43, %v13169_v43  ;;  %v10716_v29 = vld [vmem:[#allocation20 + $0x100] sm:$0xff]  }
 0x2e4   :  { %3900 = vmatpush1.bf16.msra.mxu0 %v10668_v30  ;;  %3982 = vmatpush1.bf16.msra.mxu1 %v10671_v31  ;;  %v10717_v30 = vld [vmem:[#allocation20 + $0x108] sm:$0xff]   ;;  %v10718_v31 = vld [vmem:[#allocation20 + $0x110] sm:$0xff]  }
 0x2e5   :  { %3901 = vmatprep.subr.bf16.mxu0 %v10676_v32  ;;  %3983 = vmatprep.subr.bf16.mxu1 %v10679_v33  ;;  %v10719_v32 = vld [vmem:[#allocation20 + $0x118] sm:$0xff]   ;;  %v10720_v33 = vld [vmem:[#allocation20 + $0x120] sm:$0xff]  }
 0x2e8   :  { %3902 = vmatpush1.bf16.msra.mxu0 %v10674_v59  ;;  %3984 = vmatpush1.bf16.msra.mxu1 %v10677_v34  ;;  %v10721_v59 = vld [vmem:[#allocation20 + $0x128] sm:$0xff]   ;;  %v10722_v34 = vld [vmem:[#allocation20 + $0x130] sm:$0xff]  }
 0x2e9   :  { %9452 = vmatprep.subr.bf16.mxu0 %v10680_v35  ;;  %9474 = vmatprep.subr.bf16.mxu1 %v10682_v37  ;;  %v10723_v35 = vld [vmem:[#allocation20 + $0x138] sm:$0xff]  }
 0x2ea   :  { %v10724_v37 = vld [vmem:[#allocation12 + $0x10] ss:$0 sps:$4 sm:$0xff]  }
 0x2eb   :  { %3904 = vmatmul.mubr.bf16.vlgmr.msra.gmra.mrb[12].mxu0 %v13132_v8  ;;  %3986 = vmatmul.mubr.bf16.vlgmr.msra.gmra.mrb[12].mxu1 %v13132_v8  ;;  %v10693_v8 = vld [vmem:[#allocation20 + $0x18] sm:$0xff]  }
 0x2ec   :  { %9453 = vmatpush3.bf16.msra.mxu0 %v10681_v49  ;;  %9475 = vmatpush3.bf16.msra.mxu1 %v10683_v50 }
 0x2ed   :  { %9454 = vmatprep.subr.bf16.mxu0 %v10684_v58  ;;  %9476 = vmatprep.subr.bf16.mxu1 %v10686_v61 }
 0x2ee   :  { %4458 = vmatprep.mubr.bf16.mxu0 %v9154_v0  ;;  %4498 = vmatprep.mubr.bf16.mxu1 %v9156_v2 }
 0x2f0   :  { %9455 = vmatpush3.bf16.msra.mxu0 %v10685_v3  ;;  %9477 = vmatpush3.bf16.msra.mxu1 %v10687_v5  ;;  %v10727_v3 = vld [vmem:[#allocation14 + $0x4] ss:$48 sps:$4 sm:$0xff]   ;;  %v10730_v5 = vld [vmem:[#allocation14 + $0xc] ss:$48 sps:$4 sm:$0xff]  }
 0x2f1   :  { %9456 = vmatprep.subr.bf16.mxu0 %v10688_v6  ;;  %9478 = vmatprep.subr.bf16.mxu1 %v10690_v7  ;;  %v10725_v6 = vld [vmem:[#allocation14] ss:$48 sps:$4 sm:$0xff]   ;;  %v10728_v7 = vld [vmem:[#allocation14 + $0x8] ss:$48 sps:$4 sm:$0xff]  }
 0x2f4   :  { %9457 = vmatpush3.bf16.msra.mxu0 %v10689_v9  ;;  %9479 = vmatpush3.bf16.msra.mxu1 %v10691_v10  ;;  %v10733_v9 = vld [vmem:[#allocation14 + $0x64] ss:$48 sps:$4 sm:$0xff]   ;;  %v10736_v10 = vld [vmem:[#allocation14 + $0x6c] ss:$48 sps:$4 sm:$0xff]  }
 0x2f5   :  { %9458 = vmatprep.subr.bf16.mxu0 %v10692_v11  ;;  %9480 = vmatprep.subr.bf16.mxu1 %v10694_v54  ;;  %v10731_v11 = vld [vmem:[#allocation14 + $0x60] ss:$48 sps:$4 sm:$0xff]   ;;  %v10734_v54 = vld [vmem:[#allocation14 + $0x68] ss:$48 sps:$4 sm:$0xff]  }
 0x2f8   :  { %9459 = vmatpush3.bf16.msra.mxu0 %v10693_v8  ;;  %9481 = vmatpush3.bf16.msra.mxu1 %v10695_v12  ;;  %v10739_v8 = vld [vmem:[#allocation14 + $0xc4] ss:$48 sps:$4 sm:$0xff]   ;;  %v10742_v12 = vld [vmem:[#allocation14 + $0xcc] ss:$48 sps:$4 sm:$0xff]  }
 0x2f9   :  { %9460 = vmatprep.subr.bf16.mxu0 %v10696_v13  ;;  %9482 = vmatprep.subr.bf16.mxu1 %v10698_v14  ;;  %v10737_v13 = vld [vmem:[#allocation14 + $0xc0] ss:$48 sps:$4 sm:$0xff]   ;;  %v10740_v14 = vld [vmem:[#allocation14 + $0xc8] ss:$48 sps:$4 sm:$0xff]  }
 0x2fc   :  { %9461 = vmatpush3.bf16.msra.mxu0 %v10697_v60  ;;  %9483 = vmatpush3.bf16.msra.mxu1 %v10699_v15  ;;  %v10745_v60 = vld [vmem:[#allocation14 + $0x124] ss:$48 sps:$4 sm:$0xff]   ;;  %v10748_v15 = vld [vmem:[#allocation14 + $0x12c] ss:$48 sps:$4 sm:$0xff]  }
 0x2fd   :  { %9462 = vmatprep.subr.bf16.mxu0 %v10700_v16  ;;  %9484 = vmatprep.subr.bf16.mxu1 %v10702_v17  ;;  %v10743_v16 = vld [vmem:[#allocation14 + $0x120] ss:$48 sps:$4 sm:$0xff]   ;;  %v10746_v17 = vld [vmem:[#allocation14 + $0x128] ss:$48 sps:$4 sm:$0xff]  }
 0x300   :  { %9463 = vmatpush3.bf16.msra.mxu0 %v10701_v18  ;;  %9485 = vmatpush3.bf16.msra.mxu1 %v10703_v19  ;;  %v10751_v18 = vld [vmem:[#allocation14 + $0x184] ss:$48 sps:$4 sm:$0xff]   ;;  %v10754_v19 = vld [vmem:[#allocation14 + $0x18c] ss:$48 sps:$4 sm:$0xff]  }
 0x301   :  { %9464 = vmatprep.subr.bf16.mxu0 %v10704_v20  ;;  %9486 = vmatprep.subr.bf16.mxu1 %v10706_v21  ;;  %v10749_v20 = vld [vmem:[#allocation14 + $0x180] ss:$48 sps:$4 sm:$0xff]   ;;  %v10752_v21 = vld [vmem:[#allocation14 + $0x188] ss:$48 sps:$4 sm:$0xff]  }
 0x304   :  { %9465 = vmatpush3.bf16.msra.mxu0 %v10705_v22  ;;  %9487 = vmatpush3.bf16.msra.mxu1 %v10707_v23  ;;  %v10757_v22 = vld [vmem:[#allocation14 + $0x1e4] ss:$48 sps:$4 sm:$0xff]   ;;  %v10755_v23 = vld [vmem:[#allocation14 + $0x1e0] ss:$48 sps:$4 sm:$0xff]  }
 0x305   :  { %9466 = vmatprep.subr.bf16.mxu0 %v10708_v24  ;;  %9488 = vmatprep.subr.bf16.mxu1 %v10710_v25  ;;  %v10758_v24 = vld [vmem:[#allocation14 + $0x1e8] ss:$48 sps:$4 sm:$0xff]   ;;  %v10760_v25 = vld [vmem:[#allocation14 + $0x1ec] ss:$48 sps:$4 sm:$0xff]  }
 0x308   :  { %9467 = vmatpush3.bf16.msra.mxu0 %v10709_v26  ;;  %9489 = vmatpush3.bf16.msra.mxu1 %v10713_v27  ;;  %v10763_v26 = vld [vmem:[#allocation14 + $0x244] ss:$48 sps:$4 sm:$0xff]   ;;  %v10766_v27 = vld [vmem:[#allocation14 + $0x24c] ss:$48 sps:$4 sm:$0xff]  }
 0x309   :  { %9657 = vmatprep.subr.bf16.mxu0 %v12781_v36  ;;  %5728 = vmatprep.subr.bf16.mxu1 %v10727_v3  ;;  %v10790_v3 = vld [vmem:[#allocation14 + $0x3cc] ss:$48 sps:$4 sm:$0xff]  }
 0x30b   :  { %4459 = vmatmul.mubr.bf16.vlgmr.msra.gmra.mrb[16].mxu0 %v9153_v38  ;;  %4499 = vmatmul.mubr.bf16.vlgmr.msra.gmra.mrb[16].mxu1 %v9155_v28  ;;  %v10761_v38 = vld [vmem:[#allocation14 + $0x240] ss:$48 sps:$4 sm:$0xff]   ;;  %v10764_v28 = vld [vmem:[#allocation14 + $0x248] ss:$48 sps:$4 sm:$0xff]  }
 0x30c   :  { %9658 = vmatpush3.bf16.msra.mxu0 %v10716_v29  ;;  %9673 = vmatprep.mubr.msk.bf16.mxu0 %vm12782_vm0, %v12781_v36  ;;  %v10769_v29 = vld [vmem:[#allocation14 + $0x2a4] ss:$48 sps:$4 sm:$0xff]  }
 0x30d   :  { %9659 = vmatprep.subr.bf16.mxu0 %v12781_v36  ;;  %5729 = vmatpush1.bf16.msra.mxu1 %v10725_v6  ;;  %v10788_v6 = vld [vmem:[#allocation14 + $0x3c8] ss:$48 sps:$4 sm:$0xff]  }
 0x30e   :  { %5730 = vmatprep.subr.bf16.mxu1 %v10733_v9  ;;  %v10796_v9 = vld [vmem:[#allocation14 + $0x42c] ss:$48 sps:$4 sm:$0xff]  }
 0x310   :  { %9660 = vmatpush3.bf16.msra.mxu0 %v10717_v30  ;;  %v10772_v30 = vld [vmem:[#allocation14 + $0x2ac] ss:$48 sps:$4 sm:$0xff]  }
 0x311   :  { %9661 = vmatprep.subr.bf16.mxu0 %v12781_v36  ;;  %5731 = vmatpush1.bf16.msra.mxu1 %v10731_v11  ;;  %v10794_v11 = vld [vmem:[#allocation14 + $0x428] ss:$48 sps:$4 sm:$0xff]  }
 0x312   :  { %5732 = vmatprep.subr.bf16.mxu1 %v10739_v8  ;;  %v10802_v8 = vld [vmem:[#allocation14 + $0x48c] ss:$48 sps:$4 sm:$0xff]  }
 0x314   :  { %9662 = vmatpush3.bf16.msra.mxu0 %v10718_v31  ;;  %v10767_v31 = vld [vmem:[#allocation14 + $0x2a0] ss:$48 sps:$4 sm:$0xff]  }
 0x315   :  { %9663 = vmatprep.subr.bf16.mxu0 %v12781_v36  ;;  %5733 = vmatpush1.bf16.msra.mxu1 %v10737_v13  ;;  %v10800_v13 = vld [vmem:[#allocation14 + $0x488] ss:$48 sps:$4 sm:$0xff]  }
 0x316   :  { %5734 = vmatprep.subr.bf16.mxu1 %v10745_v60  ;;  %v10808_v60 = vld [vmem:[#allocation14 + $0x4ec] ss:$48 sps:$4 sm:$0xff]  }
 0x318   :  { %9664 = vmatpush3.bf16.msra.mxu0 %v10719_v32  ;;  %v10770_v32 = vld [vmem:[#allocation14 + $0x2a8] ss:$48 sps:$4 sm:$0xff]  }
 0x319   :  { %9665 = vmatprep.subr.bf16.mxu0 %v12781_v36  ;;  %5735 = vmatpush1.bf16.msra.mxu1 %v10743_v16  ;;  %v10806_v16 = vld [vmem:[#allocation14 + $0x4e8] ss:$48 sps:$4 sm:$0xff]  }
 0x31a   :  { %5736 = vmatprep.subr.bf16.mxu1 %v10751_v18  ;;  %v10814_v18 = vld [vmem:[#allocation14 + $0x54c] ss:$48 sps:$4 sm:$0xff]  }
 0x31c   :  { %9666 = vmatpush3.bf16.msra.mxu0 %v10720_v33  ;;  %v10775_v33 = vld [vmem:[#allocation14 + $0x304] ss:$48 sps:$4 sm:$0xff]  }
 0x31d   :  { %9667 = vmatprep.subr.bf16.mxu0 %v12781_v36  ;;  %5737 = vmatpush1.bf16.msra.mxu1 %v10749_v20  ;;  %v10812_v20 = vld [vmem:[#allocation14 + $0x548] ss:$48 sps:$4 sm:$0xff]  }
 0x31e   :  { %5738 = vmatprep.subr.bf16.mxu1 %v10757_v22  ;;  %v10820_v22 = vld [vmem:[#allocation14 + $0x5ac] ss:$48 sps:$4 sm:$0xff]  }
 0x320   :  { %9668 = vmatpush3.bf16.msra.mxu0 %v10721_v59  ;;  %v10778_v59 = vld [vmem:[#allocation14 + $0x30c] ss:$48 sps:$4 sm:$0xff]  }
 0x321   :  { %9669 = vmatprep.subr.bf16.mxu0 %v12781_v36  ;;  %5739 = vmatpush1.bf16.msra.mxu1 %v10755_v23  ;;  %v10815_v23 = vld [vmem:[#allocation14 + $0x5a0] ss:$48 sps:$4 sm:$0xff]  }
 0x322   :  { %5740 = vmatprep.subr.bf16.mxu1 %v10763_v26  ;;  %v1518_v26 = vld [vmem:[#allocation18] sm:$0xff] }
 0x324   :  { %9670 = vmatpush3.bf16.msra.mxu0 %v10722_v34  ;;  %v10773_v34 = vld [vmem:[#allocation14 + $0x300] ss:$48 sps:$4 sm:$0xff]  }
 0x325   :  { %9671 = vmatprep.subr.bf16.mxu0 %v12781_v36  ;;  %5741 = vmatpush1.bf16.msra.mxu1 %v10761_v38  ;;  %v11180_v38 = vld [vmem:[#allocation14 + $0x60c] ss:$48 sps:$4 sm:$0xff]  }
 0x326   :  { %5742 = vmatprep.subr.bf16.mxu1 %v10769_v29  ;;  %v3445_v29 = vrot.slane %v1518_v26, %v13098_v39 }
 0x328   :  { %9672 = vmatpush3.bf16.msra.mxu0 %v10723_v35  ;;  %v10776_v35 = vld [vmem:[#allocation14 + $0x308] ss:$48 sps:$4 sm:$0xff]  }
 0x329   :  { %5810 = vmatprep.subr.bf16.mxu0 %v10730_v5  ;;  %5743 = vmatpush1.bf16.msra.mxu1 %v10767_v31  ;;  %v10785_v5 = vld [vmem:[#allocation14 + $0x3c0] ss:$48 sps:$4 sm:$0xff]   ;;  %v3453_v31 = vrot.slane %v1518_v26, %v13124_v62 }
 0x32a   :  { %5744 = vmatprep.subr.bf16.mxu1 %v10775_v33  ;;  %v3449_v33 = vrot.slane %v1518_v26, %v13083_v52 }
 0x32b   :  { %9674 = vmatmul.mubr.bf16.vlgmr.msra.gmra.mrb[20].mxu0 %v10724_v37  ;;  %v10781_v37 = vld [vmem:[#allocation14 + $0x364] ss:$48 sps:$4 sm:$0xff]  }
 0x32c   :  { %5811 = vmatpush1.bf16.msra.mxu0 %v10728_v7  ;;  %v10793_v7 = vld [vmem:[#allocation14 + $0x424] ss:$48 sps:$4 sm:$0xff]  }
 0x32d   :  { %5812 = vmatprep.subr.bf16.mxu0 %v10736_v10  ;;  %5745 = vmatpush1.bf16.msra.mxu1 %v10773_v34  ;;  %v10791_v10 = vld [vmem:[#allocation14 + $0x420] ss:$48 sps:$4 sm:$0xff]   ;;  %v3457_v34 = vrot.slane %v1518_v26, %v13101_v44 }
 0x32e   :  { %5746 = vmatprep.subr.bf16.mxu1 %v10781_v37 }
 0x330   :  { %5813 = vmatpush1.bf16.msra.mxu0 %v10734_v54  ;;  %v10799_v54 = vld [vmem:[#allocation14 + $0x484] ss:$48 sps:$4 sm:$0xff]  }
 0x331   :  { %5814 = vmatprep.subr.bf16.mxu0 %v10742_v12  ;;  %v10797_v12 = vld [vmem:[#allocation14 + $0x480] ss:$48 sps:$4 sm:$0xff]  }
 0x334   :  { %5815 = vmatpush1.bf16.msra.mxu0 %v10740_v14  ;;  %v10805_v14 = vld [vmem:[#allocation14 + $0x4e4] ss:$48 sps:$4 sm:$0xff]  }
 0x335   :  { %5816 = vmatprep.subr.bf16.mxu0 %v10748_v15  ;;  %v10803_v15 = vld [vmem:[#allocation14 + $0x4e0] ss:$48 sps:$4 sm:$0xff]  }
 0x338   :  { %5817 = vmatpush1.bf16.msra.mxu0 %v10746_v17  ;;  %v10811_v17 = vld [vmem:[#allocation14 + $0x544] ss:$48 sps:$4 sm:$0xff]  }
 0x339   :  { %5818 = vmatprep.subr.bf16.mxu0 %v10754_v19  ;;  %v10809_v19 = vld [vmem:[#allocation14 + $0x540] ss:$48 sps:$4 sm:$0xff]  }
 0x33c   :  { %5819 = vmatpush1.bf16.msra.mxu0 %v10752_v21  ;;  %v10817_v21 = vld [vmem:[#allocation14 + $0x5a4] ss:$48 sps:$4 sm:$0xff]  }
 0x33d   :  { %5820 = vmatprep.subr.bf16.mxu0 %v10760_v25  ;;  %v319_v25 = vld [vmem:[#allocation17] sm:$0xff] }
 0x33e   :  { %v13191_v42 = vpop.f32.mrb[4].mxu0  ;;  %v13193_v43 = vpop.f32.mrb[4].mxu1 }
 0x33f   :  { %v13195_v49 = vpop.f32.mrb[5].mxu0  ;;  %v13197_v50 = vpop.f32.mrb[5].mxu1 }
 0x340   :  { %v3745_v58 = vpop.f32.mrb[6].mxu0  ;;  %v3827_v61 = vpop.f32.mrb[6].mxu1  ;;  %5821 = vmatpush1.bf16.msra.mxu0 %v10758_v24  ;;  %v10818_v24 = vld [vmem:[#allocation14 + $0x5a8] ss:$48 sps:$4 sm:$0xff]  }
 0x341   :  { %v3746_v0 = vpop.f32.mrb[7].mxu0  ;;  %v3828_v2 = vpop.f32.mrb[7].mxu1  ;;  %5822 = vmatprep.subr.bf16.mxu0 %v10766_v27  ;;  %v10784_v58 = vld [vmem:[#allocation14 + $0x36c] ss:$48 sps:$4 sm:$0xff]   ;;  %v10779_v61 = vld [vmem:[#allocation14 + $0x360] ss:$48 sps:$4 sm:$0xff]  }
 0x342   :  { %v10782_v0 = vld [vmem:[#allocation14 + $0x368] ss:$48 sps:$4 sm:$0xff]   ;;  %v10787_v2 = vld [vmem:[#allocation14 + $0x3c4] ss:$48 sps:$4 sm:$0xff]   ;;  %5747 = vmatpush1.bf16.msra.mxu1 %v10779_v61 }
 0x343   :  { %5748 = vmatprep.subr.bf16.mxu1 %v10787_v2  ;;  %v11179_v27 = vld [vmem:[#allocation14 + $0x604] ss:$48 sps:$4 sm:$0xff]  }
 0x344   :  { %5823 = vmatpush1.bf16.msra.mxu0 %v10764_v28  ;;  %v806_v28 = vrot.slane %v319_v25, %v13098_v39 }
 0x345   :  { %5824 = vmatprep.subr.bf16.mxu0 %v10772_v30  ;;  %v814_v30 = vrot.slane %v319_v25, %v13124_v62 }
 0x346   :  { %5749 = vmatpush1.bf16.msra.mxu1 %v10785_v5 }
 0x347   :  { %5750 = vmatprep.subr.bf16.mxu1 %v10793_v7  ;;  %v13209_v37 = vadd.f32 %v3453_v31, %v814_v30 }
 0x348   :  { %5825 = vmatpush1.bf16.msra.mxu0 %v10770_v32  ;;  %v810_v32 = vrot.slane %v319_v25, %v13083_v52 }
 0x349   :  { %5826 = vmatprep.subr.bf16.mxu0 %v10778_v59  ;;  %v818_v59 = vrot.slane %v319_v25, %v13101_v44  ;;  %v9727_v2 = vadd.f32 %v13209_v37, %v13161_v41 }
 0x34a   :  { %5751 = vmatpush1.bf16.msra.mxu1 %v10791_v10 }
 0x34b   :  { %5752 = vmatprep.subr.bf16.mxu1 %v10799_v54  ;;  %v13213_v61 = vadd.f32 %v3457_v34, %v818_v59  ;;  %v9146_v54 = vmul.f32 -1.442695, %v9727_v2 }
 0x34c   :  { %5827 = vmatpush1.bf16.msra.mxu0 %v10776_v35  ;;  %v13207_v35 = vadd.f32 %v3445_v29, %v806_v28 }
 0x34d   :  { %5828 = vmatprep.subr.bf16.mxu0 %v10784_v58  ;;  %v13211_v58 = vadd.f32 %v3449_v33, %v810_v32  ;;  %v9729_v7 = vadd.f32 %v13213_v61, %v13165_v48 }
 0x34e   :  { %5753 = vmatpush1.bf16.msra.mxu1 %v10797_v12 }
 0x34f   :  { %5754 = vmatprep.subr.bf16.mxu1 %v10805_v14  ;;  %v9725_v5 = vadd.f32 %v13211_v58, %v13163_v46  ;;  %v9147_v14 = vmul.f32 -1.442695, %v9729_v7 }
 0x350   :  { %5829 = vmatpush1.bf16.msra.mxu0 %v10782_v0  ;;  %v9723_v0 = vadd.f32 %v13207_v35, %v13159_v40 }
 0x351   :  { %5830 = vmatprep.subr.bf16.mxu0 %v10790_v3  ;;  %v821_v3 = vsub.s32 4, %v13080_v47  ;;  %v9145_v12 = vmul.f32 -1.442695, %v9725_v5 }
 0x352   :  { %5755 = vmatpush1.bf16.msra.mxu1 %v10803_v15  ;;  %v9144_v10 = vmul.f32 -1.442695, %v9723_v0 }
 0x353   :  { %5756 = vmatprep.subr.bf16.mxu1 %v10811_v17  ;;  %v822_v40 = vrot.slane %v319_v25, %v821_v3 }
 0x354   :  { %5831 = vmatpush1.bf16.msra.mxu0 %v10788_v6  ;;  %v829_v6 = vsub.s32 6, %v13080_v47  ;;  %11055 = vpow2.f32 %v9144_v10 }
 0x355   :  { %5832 = vmatprep.subr.bf16.mxu0 %v10796_v9  ;;  %v825_v9 = vsub.s32 5, %v13080_v47  ;;  %11057 = vpow2.f32 %v9146_v54 }
 0x356   :  { %5757 = vmatpush1.bf16.msra.mxu1 %v10809_v19  ;;  %v830_v41 = vrot.slane %v319_v25, %v829_v6  ;;  %11059 = vpow2.f32 %v9145_v12 }
 0x357   :  { %5758 = vmatprep.subr.bf16.mxu1 %v10817_v21  ;;  %v3465_v15 = vrot.slane %v1518_v26, %v825_v9  ;;  %11061 = vpow2.f32 %v9147_v14 }
 0x358   :  { %5833 = vmatpush1.bf16.msra.mxu0 %v10794_v11  ;;  %v833_v11 = vsub.s32 7, %v13080_v47 }
 0x359   :  { %5834 = vmatprep.subr.bf16.mxu0 %v10802_v8  ;;  %v3461_v8 = vrot.slane %v1518_v26, %v821_v3 }
 0x35a   :  { %5759 = vmatpush1.bf16.msra.mxu1 %v10815_v23  ;;  %v834_v46 = vrot.slane %v319_v25, %v833_v11 }
 0x35b   :  { %5769 = vmatprep.subr.bf16.mxu1 %v11179_v27  ;;  %v13227_v17 = vadd.f32 %v3461_v8, %v822_v40 }
 0x35c   :  { %5835 = vmatpush1.bf16.msra.mxu0 %v10800_v13  ;;  %v3469_v13 = vrot.slane %v1518_v26, %v829_v6 }
 0x35d   :  { %5836 = vmatprep.subr.bf16.mxu0 %v10808_v60  ;;  %v826_v60 = vrot.slane %v319_v25, %v825_v9 }
 0x35e   :  { %v13229_v48 = vadd.f32 %v3469_v13, %v830_v41  ;;  %v11056_v25 = vpop.eup %11055 }
 0x35f   :  { %v11058_v27 = vpop.eup %11057  ;;  %v4010_v31 = vadd.f32 1.0, %v11056_v25 }
 0x360   :  { %5837 = vmatpush1.bf16.msra.mxu0 %v10806_v16  ;;  %v3473_v16 = vrot.slane %v1518_v26, %v833_v11  ;;  %v9735_v21 = vadd.f32 %v13229_v48, %v13193_v43  ;;  %v11060_v28 = vpop.eup %11059 }
 0x361   :  { %5838 = vmatprep.subr.bf16.mxu0 %v10814_v18  ;;  %v13231_v18 = vadd.f32 %v3465_v15, %v826_v60  ;;  %v11062_v30 = vpop.eup %11061  ;;  %v4011_v32 = vadd.f32 1.0, %v11060_v28 }
 0x362   :  { %v13233_v19 = vadd.f32 %v3473_v16, %v834_v46  ;;  %v9150_v26 = vmul.f32 -1.442695, %v9735_v21  ;;  %v4013_v43 = vadd.f32 1.0, %v11062_v30 }
 0x364   :  { %5839 = vmatpush1.bf16.msra.mxu0 %v10812_v20  ;;  %v9731_v20 = vadd.f32 %v13227_v17, %v13191_v42  ;;  %v9737_v23 = vadd.f32 %v13233_v19, %v13197_v50  ;;  %v4012_v42 = vadd.f32 1.0, %v11058_v27  ;;  %v1519_v50 = vld [vmem:[#allocation18 + $0x8] sm:$0xf] }
 0x365   :  { %5840 = vmatprep.subr.bf16.mxu0 %v10820_v22  ;;  %v9733_v22 = vadd.f32 %v13231_v18, %v13195_v49  ;;  %v320_v49 = vld [vmem:[#allocation17 + $0x8] sm:$0xf]  ;;  %v13247_v0 = vrot.slane %v1519_v50, %v13098_v39  ;;  %v13250_v2 = vrot.slane %v1519_v50, %v13124_v62  ;;  %v13256_v6 = vrot.slane %v1519_v50, %v13083_v52 }
 0x366   :  { %v9151_v29 = vmul.f32 -1.442695, %v9737_v23  ;;  %v13244_v34 = vrot.slane %v320_v49, %v13098_v39  ;;  %v13253_v5 = vrot.slane %v320_v49, %v13124_v62  ;;  %v13259_v7 = vrot.slane %v1519_v50, %v13101_v44 }
 0x367   :  { %v13262_v10 = vrot.slane %v320_v49, %v13083_v52  ;;  %v13265_v40 = vrot.slane %v320_v49, %v13101_v44 }
 0x368   :  { %5841 = vmatpush1.bf16.msra.mxu0 %v10818_v24  ;;  %v9148_v24 = vmul.f32 -1.442695, %v9731_v20  ;;  %v1062_v13 = vadd.f32 %v13142_v53, %v13244_v34  ;;  %v1103_v21 = vadd.f32 %v13144_v55, %v13253_v5 }
 0x369   :  { %5851 = vmatprep.subr.bf16.mxu0 %v11180_v38  ;;  %v9149_v38 = vmul.f32 -1.442695, %v9733_v22  ;;  %v1064_v53 = vadd.f32 %v13146_v56, %v13262_v10  ;;  %v1105_v30 = vadd.f32 %v13148_v63, %v13265_v40 }
 0x36a   :  { %11063 = vpow2.f32 %v9148_v24 }
 0x36b   :  { %11065 = vpow2.f32 %v9150_v26 }
 0x36c   :  { %11067 = vpow2.f32 %v9149_v38 }
 0x36d   :  { %11069 = vpow2.f32 %v9151_v29 }
 0x36e   :  { %11071 = vrcp.f32 %v4010_v31 }
 0x36f   :  { %11073 = vrcp.f32 %v4012_v42 }
 0x370   :  { %11075 = vrcp.f32 %v4011_v32 }
 0x371   :  { %11077 = vrcp.f32 %v4013_v43 }
 0x374   :  { %v11064_v33 = vpop.eup %11063 }
 0x375   :  { %v11066_v59 = vpop.eup %11065  ;;  %v4038_v11 = vadd.f32 1.0, %v11064_v33 }
 0x376   :  { %v11068_v3 = vpop.eup %11067  ;;  %v4040_v8 = vadd.f32 1.0, %v11066_v59 }
 0x377   :  { %v11070_v9 = vpop.eup %11069  ;;  %v4039_v14 = vadd.f32 1.0, %v11068_v3  ;;  %11079 = vrcp.f32 %v4038_v11 }
 0x378   :  { %v11072_v54 = vpop.eup %11071  ;;  %v4041_v44 = vadd.f32 1.0, %v11070_v9  ;;  %11081 = vrcp.f32 %v4040_v8 }
 0x379   :  { %v11074_v62 = vpop.eup %11073  ;;  %11083 = vrcp.f32 %v4039_v14 }
 0x37a   :  { %v11076_v20 = vpop.eup %11075  ;;  %11085 = vrcp.f32 %v4041_v44 }
 0x37b   :  { %v11078_v26 = vpop.eup %11077 }
 0x381   :  { %v11080_v56 = vpop.eup %11079 }
 0x382   :  { %v11082_v50 = vpop.eup %11081  ;;  %v4062_v3 = vsub.f32 1.0, %v11080_v56 }
 0x383   :  { %v11084_v33 = vpop.eup %11083  ;;  %v4064_v63 = vsub.f32 1.0, %v11082_v50 }
 0x384   :  { %v11086_v59 = vpop.eup %11085  ;;  %v4063_v8 = vsub.f32 1.0, %v11084_v33 }
 0x3be   :  { %v3905_v12 = vpop.f32.mrb[12].mxu0  ;;  %v3987_v41 = vpop.f32.mrb[12].mxu1 }
 0x3bf   :  { %v9738_v60 = vadd.f32 %v3905_v12, %v13247_v0  ;;  %v9740_v15 = vadd.f32 %v3987_v41, %v13250_v2  ;;  %v3907_v46 = vpop.f32.mrb[13].mxu0  ;;  %v3989_v16 = vpop.f32.mrb[13].mxu1 }
 0x3c0   :  { %v9739_v22 = vadd.f32 %v3907_v46, %v13256_v6  ;;  %v9741_v23 = vadd.f32 %v3989_v16, %v13259_v7  ;;  %v3909_v24 = vpop.f32.mrb[14].mxu0  ;;  %v3991_v25 = vpop.f32.mrb[14].mxu1 }
 0x3c1   :  { %v4050_v27 = vmul.f32 %v11072_v54, %v9738_v60  ;;  %v4052_v38 = vmul.f32 %v11074_v62, %v9740_v15  ;;  %v3910_v28 = vpop.f32.mrb[15].mxu0  ;;  %v3992_v29 = vpop.f32.mrb[15].mxu1  ;;  %v4070_v54 = vmul.f32 %v11080_v56, %v13105_v45  ;;  %v4072_v62 = vmul.f32 %v11082_v50, %v13128_v4  ;;  %v9152_v4 = vld [vmem:[#allocation21] ss:$0 sm:$0xff] }
 0x3c2   :  { %v4051_v55 = vmul.f32 %v11076_v20, %v9739_v22  ;;  %v4053_v31 = vmul.f32 %v11078_v26, %v9741_v23  ;;  %v4071_v15 = vmul.f32 %v11084_v33, %v13089_v57  ;;  %v4073_v20 = vmul.f32 %v11086_v59, %v13109_v51 }
 0x3c3   :  { %v4054_v42 = vadd.f32 %v4050_v27, %v1062_v13  ;;  %v4056_v32 = vadd.f32 %v4052_v38, %v1103_v21  ;;  %v4065_v13 = vsub.f32 1.0, %v11086_v59 }
 0x3c4   :  { %v4055_v43 = vadd.f32 %v4051_v55, %v1064_v53  ;;  %v4057_v49 = vadd.f32 %v4053_v31, %v1105_v30  ;;  %v4549_v55 = vstv %s4548_s14  ;;  %v4561_v31 = vstv %s4560_s10 }
 0x3c5   :  { %11087 = vtanh.f32 %v4054_v42  ;;  %vm4550_vm1 = vcmp.lt.s32.totalorder %v13080_v47, %v4549_v55  ;;  %vm4562_vm2 = vcmp.eq.s32.totalorder %v13080_v47, %v4561_v31  ;;  %v11197_v55 = vld [vmem:[#allocation14 + $0x780] ss:$48 sps:$4 sm:$0xff]   ;;  %v11198_v31 = vld [vmem:[#allocation14 + $0x788] ss:$48 sps:$4 sm:$0xff]  }
 0x3c6   :  { %11089 = vtanh.f32 %v4056_v32 }
 0x3c7   :  { %11091 = vtanh.f32 %v4055_v43 }
 0x3c8   :  { %11093 = vtanh.f32 %v4057_v49 }
 0x3cf   :  { %v11088_v9 = vpop.eup %11087 }
 0x3d0   :  { %v11090_v11 = vpop.eup %11089  ;;  %v4066_v12 = vmul.f32 %v11088_v9, %v4062_v3 }
 0x3d1   :  { %v11092_v41 = vpop.eup %11091  ;;  %v4068_v14 = vmul.f32 %v11090_v11, %v4064_v63 }
 0x3d2   :  { %v11094_v60 = vpop.eup %11093  ;;  %v13282_v46 = vadd.f32 %v4070_v54, %v4066_v12  ;;  %v4067_v16 = vmul.f32 %v11092_v41, %v4063_v8 }
 0x3d3   :  { %v13285_v21 = vadd.f32 %v4072_v62, %v4068_v14  ;;  %v4069_v44 = vmul.f32 %v11094_v60, %v4065_v13 }
 0x3d4   :  { %v13287_v22 = vadd.f32 %v4071_v15, %v4067_v16  ;;  %v11181_v16 = vld [vmem:[#allocation14 + $0x600] ss:$48 sps:$4 sm:$0xff]  }
 0x3d5   :  { %v13289_v45 = vadd.f32 %v4073_v20, %v4069_v44  ;;  %v11182_v20 = vld [vmem:[#allocation14 + $0x608] ss:$48 sps:$4 sm:$0xff]   ;;  %v11183_v44 = vld [vmem:[#allocation14 + $0x664] ss:$48 sps:$4 sm:$0xff]  }
 0x3de   :  { %v9468_v23 = vpop.f32.mrb[16].mxu0  ;;  %v9490_v24 = vpop.f32.mrb[16].mxu1 }
 0x3df   :  { %v9469_v25 = vpop.f32.mrb[17].mxu0  ;;  %v9491_v26 = vpop.f32.mrb[17].mxu1 }
 0x3e0   :  { %v9470_v53 = vadd.f32 %v9469_v25, %v9468_v23  ;;  %v9471_v27 = vpop.f32.mrb[18].mxu0  ;;  %v9492_v57 = vadd.f32 %v9491_v26, %v9490_v24  ;;  %v9493_v38 = vpop.f32.mrb[18].mxu1  ;;  %v11184_v23 = vld [vmem:[#allocation14 + $0x66c] ss:$48 sps:$4 sm:$0xff]   ;;  %v11185_v24 = vld [vmem:[#allocation14 + $0x660] ss:$48 sps:$4 sm:$0xff]  }
 0x3e1   :  { %v9472_v28 = vpop.f32.mrb[19].mxu0  ;;  %v9494_v29 = vpop.f32.mrb[19].mxu1  ;;  %v11187_v25 = vld [vmem:[#allocation14 + $0x6c4] ss:$48 sps:$4 sm:$0xff]   ;;  %v11188_v26 = vld [vmem:[#allocation14 + $0x6cc] ss:$48 sps:$4 sm:$0xff]  }
 0x3e2   :  { %v4461_v30 = vadd.f32 %v9470_v53, %v9152_v4  ;;  %v11186_v4 = vld [vmem:[#allocation14 + $0x668] ss:$48 sps:$4 sm:$0xff]   ;;  %v11189_v53 = vld [vmem:[#allocation14 + $0x6c0] ss:$48 sps:$4 sm:$0xff]   ;;  %v11192_v38 = vld [vmem:[#allocation14 + $0x72c] ss:$48 sps:$4 sm:$0xff]  }
 0x3e3   :  { %v11190_v27 = vld [vmem:[#allocation14 + $0x6c8] ss:$48 sps:$4 sm:$0xff]   ;;  %v11193_v28 = vld [vmem:[#allocation14 + $0x720] ss:$48 sps:$4 sm:$0xff]  }
 0x3e4   :  { %v4501_v51 = vadd.f32 %v9492_v57, %v4461_v30  ;;  %v11191_v57 = vld [vmem:[#allocation14 + $0x724] ss:$48 sps:$4 sm:$0xff]   ;;  %v11194_v29 = vld [vmem:[#allocation14 + $0x728] ss:$48 sps:$4 sm:$0xff]  }
 0x3e5   :  { %v11195_v30 = vld [vmem:[#allocation14 + $0x784] ss:$48 sps:$4 sm:$0xff]  }
 0x3fe   :  { %v4540_v42 = vpop.f32.mrb[20].mxu0 }
 0x3ff   :  { %v4541_v32 = vadd.f32 %v4540_v42, %v4501_v51  ;;  %v9675_v43 = vpop.f32.mrb[21].mxu0  ;;  %v11196_v51 = vld [vmem:[#allocation14 + $0x78c] ss:$48 sps:$4 sm:$0xff]   ;;  %v11199_v42 = vld [vmem:[#allocation14 + $0x7e4] ss:$48 sps:$4 sm:$0xff]  }
 0x400   :  { %v4543_v49 = vpop.f32.mrb[22].mxu0  ;;  %v11201_v43 = vld [vmem:[#allocation14 + $0x7e0] ss:$48 sps:$4 sm:$0xff]  }
 0x401   :  { %v4553_v56 = vsel %vm4550_vm1, %v4541_v32, -inf  ;;  %v4565_v50 = vsel %vm4562_vm2, %v4541_v32, 0.0  ;;  %v9676_v33 = vpop.f32.mrb[23].mxu0  ;;  %v11200_v32 = vld [vmem:[#allocation14 + $0x7ec] ss:$48 sps:$4 sm:$0xff]  }
 0x402   :  { %v4554_v59 = vrot.slane %v4553_v56, 4  ;;  %v4566_v3 = vrot.slane %v4565_v50, 4  ;;  %v11202_v49 = vld [vmem:[#allocation14 + $0x7e8] ss:$48 sps:$4 sm:$0xff]   ;;  %v11205_v33 = vld [vmem:[#allocation14 + $0x840] ss:$48 sps:$4 sm:$0xff]  }
 0x404   :  { %v4555_v9 = vmax.f32 %v4553_v56, %v4554_v59  ;;  %v4567_v63 = vadd.f32 %v4566_v3, %v4565_v50  ;;  %v11203_v56 = vld [vmem:[#allocation14 + $0x844] ss:$48 sps:$4 sm:$0xff]   ;;  %v11204_v50 = vld [vmem:[#allocation14 + $0x84c] ss:$48 sps:$4 sm:$0xff]   ;;  %v11206_v59 = vld [vmem:[#allocation14 + $0x848] ss:$48 sps:$4 sm:$0xff]  }
 0x405   :  { %v4572_v3 = vld [vmem:[#allocation11] sm:$0x1] }
 0x406   :  { %v4556_v11 = vrot.slane %v4555_v9, 2  ;;  %v4568_v54 = vrot.slane %v4567_v63, 2 }
 0x408   :  { %v4557_v8 = vmax.f32 %v4555_v9, %v4556_v11  ;;  %v4569_v12 = vadd.f32 %v4568_v54, %v4567_v63  ;;  %v11207_v9 = vld [vmem:[#allocation14 + $0x8a4] ss:$48 sps:$4 sm:$0xff]   ;;  %v11208_v63 = vld [vmem:[#allocation14 + $0x8ac] ss:$48 sps:$4 sm:$0xff]  }
 0x409   :  { %v10823_v11 = vld [vmem:[#allocation14 + $0x14] ss:$48 sps:$4 sm:$0xff]   ;;  %v10826_v54 = vld [vmem:[#allocation14 + $0x1c] ss:$48 sps:$4 sm:$0xff]  }
 0x40a   :  { %v4558_v41 = vrot.slane %v4557_v8, 1  ;;  %v4570_v62 = vrot.slane %v4569_v12, 1 }
 0x40c   :  { %v4559_v13 = vmax.f32 %v4557_v8, %v4558_v41  ;;  %v4571_v14 = vadd.f32 %v4570_v62, %v4569_v12  ;;  %v13303_v8 = vpack.c.bf16 %v4572_v3, %v4572_v3  ;;  %v11209_v12 = vld [vmem:[#allocation14 + $0x8a0] ss:$48 sps:$4 sm:$0xff]   ;;  %v11210_v41 = vld [vmem:[#allocation14 + $0x8a8] ss:$48 sps:$4 sm:$0xff]  }
 0x40d   :  { %v10821_v62 = vld [vmem:[#allocation14 + $0x10] ss:$48 sps:$4 sm:$0xff]   ;;  %v10866_v3 = vld [vmem:[#allocation14 + $0x2b8] ss:$48 sps:$4 sm:$0xff]  }
 0x40e   :  { %v13293_v60 = vpack.c.bf16 %v4559_v13, %v4559_v13  ;;  %v13295_v15 = vpack.c.bf16 %v4571_v14, %v4571_v14  ;;  %v10824_v13 = vld [vmem:[#allocation14 + $0x18] ss:$48 sps:$4 sm:$0xff]   ;;  %v10829_v14 = vld [vmem:[#allocation14 + $0x74] ss:$48 sps:$4 sm:$0xff]  }
 0x410   :  { %5760 = vmatprep.mubr.bf16.mxu1 %v13295_v15  ;;  %5842 = vmatprep.mubr.bf16.mxu0 %v13295_v15 }
 0x411   :  { %5761 = vmatmul.mubr.bf16.vlgmr.msra.gmra.mrb[20].mxu1 %v13293_v60  ;;  %5843 = vmatmul.mubr.bf16.vlgmr.msra.gmra.mrb[24].mxu0 %v13293_v60 }
 0x412   :  { %5770 = vmatpush1.bf16.msra.mxu1 %v11181_v16  ;;  %5852 = vmatpush1.bf16.msra.mxu0 %v11182_v20  ;;  %v10832_v16 = vld [vmem:[#allocation14 + $0x7c] ss:$48 sps:$4 sm:$0xff]   ;;  %v10827_v20 = vld [vmem:[#allocation14 + $0x70] ss:$48 sps:$4 sm:$0xff]  }
 0x413   :  { %5771 = vmatprep.subr.bf16.mxu1 %v11183_v44  ;;  %5853 = vmatprep.subr.bf16.mxu0 %v11184_v23  ;;  %v10830_v44 = vld [vmem:[#allocation14 + $0x78] ss:$48 sps:$4 sm:$0xff]   ;;  %v10835_v23 = vld [vmem:[#allocation14 + $0xd4] ss:$48 sps:$4 sm:$0xff]  }
 0x414   :  { %5801 = vmatprep.mubr.bf16.mxu1 %v12780_v1  ;;  %5883 = vmatprep.mubr.bf16.mxu0 %v12780_v1 }
 0x416   :  { %5772 = vmatpush1.bf16.msra.mxu1 %v11185_v24  ;;  %5854 = vmatpush1.bf16.msra.mxu0 %v11186_v4  ;;  %v10838_v24 = vld [vmem:[#allocation14 + $0xdc] ss:$48 sps:$4 sm:$0xff]   ;;  %v10833_v4 = vld [vmem:[#allocation14 + $0xd0] ss:$48 sps:$4 sm:$0xff]  }
 0x417   :  { %5773 = vmatprep.subr.bf16.mxu1 %v11187_v25  ;;  %5855 = vmatprep.subr.bf16.mxu0 %v11188_v26  ;;  %v10836_v25 = vld [vmem:[#allocation14 + $0xd8] ss:$48 sps:$4 sm:$0xff]   ;;  %v10841_v26 = vld [vmem:[#allocation14 + $0x134] ss:$48 sps:$4 sm:$0xff]  }
 0x41a   :  { %5774 = vmatpush1.bf16.msra.mxu1 %v11189_v53  ;;  %5856 = vmatpush1.bf16.msra.mxu0 %v11190_v27  ;;  %v10844_v53 = vld [vmem:[#allocation14 + $0x13c] ss:$48 sps:$4 sm:$0xff]   ;;  %v10839_v27 = vld [vmem:[#allocation14 + $0x130] ss:$48 sps:$4 sm:$0xff]  }
 0x41b   :  { %5775 = vmatprep.subr.bf16.mxu1 %v11191_v57  ;;  %5857 = vmatprep.subr.bf16.mxu0 %v11192_v38  ;;  %v10842_v57 = vld [vmem:[#allocation14 + $0x138] ss:$48 sps:$4 sm:$0xff]   ;;  %v10847_v38 = vld [vmem:[#allocation14 + $0x194] ss:$48 sps:$4 sm:$0xff]  }
 0x41e   :  { %5776 = vmatpush1.bf16.msra.mxu1 %v11193_v28  ;;  %5858 = vmatpush1.bf16.msra.mxu0 %v11194_v29  ;;  %v10850_v28 = vld [vmem:[#allocation14 + $0x19c] ss:$48 sps:$4 sm:$0xff]   ;;  %v10845_v29 = vld [vmem:[#allocation14 + $0x190] ss:$48 sps:$4 sm:$0xff]  }
 0x41f   :  { %5777 = vmatprep.subr.bf16.mxu1 %v11195_v30  ;;  %5859 = vmatprep.subr.bf16.mxu0 %v11196_v51  ;;  %v10848_v30 = vld [vmem:[#allocation14 + $0x198] ss:$48 sps:$4 sm:$0xff]   ;;  %v10853_v51 = vld [vmem:[#allocation14 + $0x1f4] ss:$48 sps:$4 sm:$0xff]  }
 0x422   :  { %5778 = vmatpush1.bf16.msra.mxu1 %v11197_v55  ;;  %5860 = vmatpush1.bf16.msra.mxu0 %v11198_v31  ;;  %v10856_v55 = vld [vmem:[#allocation14 + $0x1fc] ss:$48 sps:$4 sm:$0xff]   ;;  %v10851_v31 = vld [vmem:[#allocation14 + $0x1f0] ss:$48 sps:$4 sm:$0xff]  }
 0x423   :  { %5779 = vmatprep.subr.bf16.mxu1 %v11199_v42  ;;  %5861 = vmatprep.subr.bf16.mxu0 %v11200_v32  ;;  %v10854_v42 = vld [vmem:[#allocation14 + $0x1f8] ss:$48 sps:$4 sm:$0xff]   ;;  %v10859_v32 = vld [vmem:[#allocation14 + $0x254] ss:$48 sps:$4 sm:$0xff]  }
 0x426   :  { %5780 = vmatpush1.bf16.msra.mxu1 %v11201_v43  ;;  %5862 = vmatpush1.bf16.msra.mxu0 %v11202_v49  ;;  %v10862_v43 = vld [vmem:[#allocation14 + $0x25c] ss:$48 sps:$4 sm:$0xff]   ;;  %v10857_v49 = vld [vmem:[#allocation14 + $0x250] ss:$48 sps:$4 sm:$0xff]  }
 0x427   :  { %5781 = vmatprep.subr.bf16.mxu1 %v11203_v56  ;;  %5863 = vmatprep.subr.bf16.mxu0 %v11204_v50  ;;  %v10860_v56 = vld [vmem:[#allocation14 + $0x258] ss:$48 sps:$4 sm:$0xff]   ;;  %v10865_v50 = vld [vmem:[#allocation14 + $0x2b4] ss:$48 sps:$4 sm:$0xff]  }
 0x42a   :  { %5782 = vmatpush1.bf16.msra.mxu1 %v11205_v33  ;;  %5864 = vmatpush1.bf16.msra.mxu0 %v11206_v59  ;;  %v10868_v33 = vld [vmem:[#allocation14 + $0x2bc] ss:$48 sps:$4 sm:$0xff]   ;;  %v10863_v59 = vld [vmem:[#allocation14 + $0x2b0] ss:$48 sps:$4 sm:$0xff]  }
 0x42b   :  { %5783 = vmatprep.subr.bf16.mxu1 %v11207_v9  ;;  %5865 = vmatprep.subr.bf16.mxu0 %v11208_v63  ;;  %v10871_v9 = vld [vmem:[#allocation14 + $0x314] ss:$48 sps:$4 sm:$0xff]   ;;  %v10874_v63 = vld [vmem:[#allocation14 + $0x31c] ss:$48 sps:$4 sm:$0xff]  }
 0x42e   :  { %5784 = vmatpush1.bf16.msra.mxu1 %v11209_v12  ;;  %5866 = vmatpush1.bf16.msra.mxu0 %v11210_v41  ;;  %v10877_v12 = vld [vmem:[#allocation14 + $0x374] ss:$48 sps:$4 sm:$0xff]   ;;  %v10880_v41 = vld [vmem:[#allocation14 + $0x37c] ss:$48 sps:$4 sm:$0xff]  }
 0x42f   :  { %5892 = vmatprep.subr.bf16.mxu1 %v10823_v11  ;;  %5974 = vmatprep.subr.bf16.mxu0 %v10826_v54  ;;  %v10869_v11 = vld [vmem:[#allocation14 + $0x310] ss:$48 sps:$4 sm:$0xff]   ;;  %v10872_v54 = vld [vmem:[#allocation14 + $0x318] ss:$48 sps:$4 sm:$0xff]  }
 0x431   :  { %5802 = vmatmul.mubr.bf16.vlgmr.msra.gmra.mrb[20].mxu1 %v13303_v8  ;;  %5884 = vmatmul.mubr.bf16.vlgmr.msra.gmra.mrb[24].mxu0 %v13303_v8 }
 0x432   :  { %5893 = vmatpush1.bf16.msra.mxu1 %v10821_v62  ;;  %5924 = vmatprep.mubr.bf16.mxu1 %v13295_v15  ;;  %v10875_v62 = vld [vmem:[#allocation14 + $0x370] ss:$48 sps:$4 sm:$0xff]  }
 0x433   :  { %5975 = vmatpush1.bf16.msra.mxu0 %v10824_v13  ;;  %6006 = vmatprep.mubr.bf16.mxu0 %v13295_v15  ;;  %v10878_v13 = vld [vmem:[#allocation14 + $0x378] ss:$48 sps:$4 sm:$0xff]  }
 0x434   :  { %5894 = vmatprep.subr.bf16.mxu1 %v10829_v14  ;;  %5976 = vmatprep.subr.bf16.mxu0 %v10832_v16  ;;  %v10883_v14 = vld [vmem:[#allocation14 + $0x3d4] ss:$48 sps:$4 sm:$0xff]   ;;  %v10886_v16 = vld [vmem:[#allocation14 + $0x3dc] ss:$48 sps:$4 sm:$0xff]  }
 0x436   :  { %5895 = vmatpush1.bf16.msra.mxu1 %v10827_v20  ;;  %v10881_v20 = vld [vmem:[#allocation14 + $0x3d0] ss:$48 sps:$4 sm:$0xff]  }
 0x437   :  { %5977 = vmatpush1.bf16.msra.mxu0 %v10830_v44  ;;  %5896 = vmatprep.subr.bf16.mxu1 %v10835_v23  ;;  %v10884_v44 = vld [vmem:[#allocation14 + $0x3d8] ss:$48 sps:$4 sm:$0xff]   ;;  %v10889_v23 = vld [vmem:[#allocation14 + $0x434] ss:$48 sps:$4 sm:$0xff]  }
 0x438   :  { %5978 = vmatprep.subr.bf16.mxu0 %v10838_v24  ;;  %v10892_v24 = vld [vmem:[#allocation14 + $0x43c] ss:$48 sps:$4 sm:$0xff]  }
 0x43a   :  { %5897 = vmatpush1.bf16.msra.mxu1 %v10833_v4  ;;  %v10887_v4 = vld [vmem:[#allocation14 + $0x430] ss:$48 sps:$4 sm:$0xff]  }
 0x43b   :  { %5979 = vmatpush1.bf16.msra.mxu0 %v10836_v25  ;;  %5898 = vmatprep.subr.bf16.mxu1 %v10841_v26  ;;  %v10890_v25 = vld [vmem:[#allocation14 + $0x438] ss:$48 sps:$4 sm:$0xff]   ;;  %v10895_v26 = vld [vmem:[#allocation14 + $0x494] ss:$48 sps:$4 sm:$0xff]  }
 0x43c   :  { %5980 = vmatprep.subr.bf16.mxu0 %v10844_v53  ;;  %v10898_v53 = vld [vmem:[#allocation14 + $0x49c] ss:$48 sps:$4 sm:$0xff]  }
 0x43e   :  { %5899 = vmatpush1.bf16.msra.mxu1 %v10839_v27  ;;  %v10893_v27 = vld [vmem:[#allocation14 + $0x490] ss:$48 sps:$4 sm:$0xff]  }
 0x43f   :  { %5981 = vmatpush1.bf16.msra.mxu0 %v10842_v57  ;;  %5900 = vmatprep.subr.bf16.mxu1 %v10847_v38  ;;  %v10896_v57 = vld [vmem:[#allocation14 + $0x498] ss:$48 sps:$4 sm:$0xff]   ;;  %v10901_v38 = vld [vmem:[#allocation14 + $0x4f4] ss:$48 sps:$4 sm:$0xff]  }
 0x440   :  { %5982 = vmatprep.subr.bf16.mxu0 %v10850_v28  ;;  %v10904_v28 = vld [vmem:[#allocation14 + $0x4fc] ss:$48 sps:$4 sm:$0xff]  }
 0x442   :  { %5901 = vmatpush1.bf16.msra.mxu1 %v10845_v29  ;;  %v10899_v29 = vld [vmem:[#allocation14 + $0x4f0] ss:$48 sps:$4 sm:$0xff]  }
 0x443   :  { %5983 = vmatpush1.bf16.msra.mxu0 %v10848_v30  ;;  %5902 = vmatprep.subr.bf16.mxu1 %v10853_v51  ;;  %v10902_v30 = vld [vmem:[#allocation14 + $0x4f8] ss:$48 sps:$4 sm:$0xff]   ;;  %v10907_v51 = vld [vmem:[#allocation14 + $0x554] ss:$48 sps:$4 sm:$0xff]  }
 0x444   :  { %5984 = vmatprep.subr.bf16.mxu0 %v10856_v55  ;;  %v10910_v55 = vld [vmem:[#allocation14 + $0x55c] ss:$48 sps:$4 sm:$0xff]  }
 0x446   :  { %5903 = vmatpush1.bf16.msra.mxu1 %v10851_v31  ;;  %v10905_v31 = vld [vmem:[#allocation14 + $0x550] ss:$48 sps:$4 sm:$0xff]  }
 0x447   :  { %5985 = vmatpush1.bf16.msra.mxu0 %v10854_v42  ;;  %5904 = vmatprep.subr.bf16.mxu1 %v10859_v32  ;;  %v10908_v42 = vld [vmem:[#allocation14 + $0x558] ss:$48 sps:$4 sm:$0xff]   ;;  %v10913_v32 = vld [vmem:[#allocation14 + $0x5b4] ss:$48 sps:$4 sm:$0xff]  }
 0x448   :  { %5986 = vmatprep.subr.bf16.mxu0 %v10862_v43  ;;  %v10916_v43 = vld [vmem:[#allocation14 + $0x5bc] ss:$48 sps:$4 sm:$0xff]  }
 0x44a   :  { %5905 = vmatpush1.bf16.msra.mxu1 %v10857_v49  ;;  %v10911_v49 = vld [vmem:[#allocation14 + $0x5b0] ss:$48 sps:$4 sm:$0xff]  }
 0x44b   :  { %5987 = vmatpush1.bf16.msra.mxu0 %v10860_v56  ;;  %5906 = vmatprep.subr.bf16.mxu1 %v10865_v50  ;;  %v10914_v56 = vld [vmem:[#allocation14 + $0x5b8] ss:$48 sps:$4 sm:$0xff]   ;;  %v11211_v50 = vld [vmem:[#allocation14 + $0x614] ss:$48 sps:$4 sm:$0xff]  }
 0x44c   :  { %5988 = vmatprep.subr.bf16.mxu0 %v10868_v33  ;;  %v11212_v33 = vld [vmem:[#allocation14 + $0x61c] ss:$48 sps:$4 sm:$0xff]  }
 0x44e   :  { %5907 = vmatpush1.bf16.msra.mxu1 %v10863_v59  ;;  %v11213_v59 = vld [vmem:[#allocation14 + $0x610] ss:$48 sps:$4 sm:$0xff]  }
 0x44f   :  { %5989 = vmatpush1.bf16.msra.mxu0 %v10866_v3  ;;  %5908 = vmatprep.subr.bf16.mxu1 %v10871_v9  ;;  %v11214_v3 = vld [vmem:[#allocation14 + $0x618] ss:$48 sps:$4 sm:$0xff]   ;;  %v11215_v9 = vld [vmem:[#allocation14 + $0x674] ss:$48 sps:$4 sm:$0xff]  }
 0x450   :  { %5990 = vmatprep.subr.bf16.mxu0 %v10874_v63  ;;  %v11216_v63 = vld [vmem:[#allocation14 + $0x67c] ss:$48 sps:$4 sm:$0xff]  }
 0x452   :  { %5909 = vmatpush1.bf16.msra.mxu1 %v10869_v11  ;;  %v11217_v11 = vld [vmem:[#allocation14 + $0x670] ss:$48 sps:$4 sm:$0xff]  }
 0x453   :  { %5991 = vmatpush1.bf16.msra.mxu0 %v10872_v54  ;;  %5910 = vmatprep.subr.bf16.mxu1 %v10877_v12  ;;  %v11218_v54 = vld [vmem:[#allocation14 + $0x678] ss:$48 sps:$4 sm:$0xff]   ;;  %v11219_v12 = vld [vmem:[#allocation14 + $0x6d4] ss:$48 sps:$4 sm:$0xff]  }
 0x454   :  { %5992 = vmatprep.subr.bf16.mxu0 %v10880_v41  ;;  %v11220_v41 = vld [vmem:[#allocation14 + $0x6dc] ss:$48 sps:$4 sm:$0xff]  }
 0x456   :  { %5911 = vmatpush1.bf16.msra.mxu1 %v10875_v62  ;;  %v11221_v62 = vld [vmem:[#allocation14 + $0x6d0] ss:$48 sps:$4 sm:$0xff]  }
 0x457   :  { %5993 = vmatpush1.bf16.msra.mxu0 %v10878_v13  ;;  %5912 = vmatprep.subr.bf16.mxu1 %v10883_v14  ;;  %v11222_v13 = vld [vmem:[#allocation14 + $0x6d8] ss:$48 sps:$4 sm:$0xff]   ;;  %v11223_v14 = vld [vmem:[#allocation14 + $0x734] ss:$48 sps:$4 sm:$0xff]  }
 0x458   :  { %5994 = vmatprep.subr.bf16.mxu0 %v10886_v16  ;;  %v11224_v16 = vld [vmem:[#allocation14 + $0x73c] ss:$48 sps:$4 sm:$0xff]  }
 0x45a   :  { %5913 = vmatpush1.bf16.msra.mxu1 %v10881_v20  ;;  %v11225_v20 = vld [vmem:[#allocation14 + $0x730] ss:$48 sps:$4 sm:$0xff]  }
 0x45b   :  { %5995 = vmatpush1.bf16.msra.mxu0 %v10884_v44  ;;  %5914 = vmatprep.subr.bf16.mxu1 %v10889_v23  ;;  %v11226_v44 = vld [vmem:[#allocation14 + $0x738] ss:$48 sps:$4 sm:$0xff]   ;;  %v11227_v23 = vld [vmem:[#allocation14 + $0x794] ss:$48 sps:$4 sm:$0xff]  }
 0x45c   :  { %5996 = vmatprep.subr.bf16.mxu0 %v10892_v24  ;;  %v11228_v24 = vld [vmem:[#allocation14 + $0x79c] ss:$48 sps:$4 sm:$0xff]  }
 0x45e   :  { %5915 = vmatpush1.bf16.msra.mxu1 %v10887_v4  ;;  %v11229_v4 = vld [vmem:[#allocation14 + $0x790] ss:$48 sps:$4 sm:$0xff]  }
 0x45f   :  { %5997 = vmatpush1.bf16.msra.mxu0 %v10890_v25  ;;  %5916 = vmatprep.subr.bf16.mxu1 %v10895_v26  ;;  %v11230_v25 = vld [vmem:[#allocation14 + $0x798] ss:$48 sps:$4 sm:$0xff]   ;;  %v11231_v26 = vld [vmem:[#allocation14 + $0x7f4] ss:$48 sps:$4 sm:$0xff]  }
 0x460   :  { %5998 = vmatprep.subr.bf16.mxu0 %v10898_v53  ;;  %v11232_v53 = vld [vmem:[#allocation14 + $0x7fc] ss:$48 sps:$4 sm:$0xff]  }
 0x462   :  { %5917 = vmatpush1.bf16.msra.mxu1 %v10893_v27  ;;  %v11233_v27 = vld [vmem:[#allocation14 + $0x7f0] ss:$48 sps:$4 sm:$0xff]  }
 0x463   :  { %5999 = vmatpush1.bf16.msra.mxu0 %v10896_v57  ;;  %5918 = vmatprep.subr.bf16.mxu1 %v10901_v38  ;;  %v11234_v57 = vld [vmem:[#allocation14 + $0x7f8] ss:$48 sps:$4 sm:$0xff]   ;;  %v11235_v38 = vld [vmem:[#allocation14 + $0x854] ss:$48 sps:$4 sm:$0xff]  }
 0x464   :  { %6000 = vmatprep.subr.bf16.mxu0 %v10904_v28  ;;  %v11236_v28 = vld [vmem:[#allocation14 + $0x85c] ss:$48 sps:$4 sm:$0xff]  }
 0x466   :  { %5919 = vmatpush1.bf16.msra.mxu1 %v10899_v29  ;;  %v11237_v29 = vld [vmem:[#allocation14 + $0x850] ss:$48 sps:$4 sm:$0xff]  }
 0x467   :  { %6001 = vmatpush1.bf16.msra.mxu0 %v10902_v30  ;;  %5920 = vmatprep.subr.bf16.mxu1 %v10907_v51  ;;  %v11238_v30 = vld [vmem:[#allocation14 + $0x858] ss:$48 sps:$4 sm:$0xff]   ;;  %v11239_v51 = vld [vmem:[#allocation14 + $0x8b4] ss:$48 sps:$4 sm:$0xff]  }
 0x468   :  { %6002 = vmatprep.subr.bf16.mxu0 %v10910_v55  ;;  %v10919_v55 = vld [vmem:[#allocation14 + $0x24] ss:$48 sps:$4 sm:$0xff]  }
 0x46a   :  { %5921 = vmatpush1.bf16.msra.mxu1 %v10905_v31  ;;  %v11240_v31 = vld [vmem:[#allocation14 + $0x8bc] ss:$48 sps:$4 sm:$0xff]  }
 0x46b   :  { %6003 = vmatpush1.bf16.msra.mxu0 %v10908_v42  ;;  %5922 = vmatprep.subr.bf16.mxu1 %v10913_v32  ;;  %v11241_v42 = vld [vmem:[#allocation14 + $0x8b0] ss:$48 sps:$4 sm:$0xff]  }
 0x46c   :  { %6004 = vmatprep.subr.bf16.mxu0 %v10916_v43  ;;  %v10917_v32 = vld [vmem:[#allocation14 + $0x20] ss:$48 sps:$4 sm:$0xff]   ;;  %v11242_v43 = vld [vmem:[#allocation14 + $0x8b8] ss:$48 sps:$4 sm:$0xff]  }
 0x46e   :  { %5923 = vmatpush1.bf16.msra.mxu1 %v10911_v49  ;;  %v11243_v49 = vld [vmem:[#allocation14 + $0x624] ss:$48 sps:$4 sm:$0xff]  }
 0x46f   :  { %6005 = vmatpush1.bf16.msra.mxu0 %v10914_v56  ;;  %5933 = vmatprep.subr.bf16.mxu1 %v11211_v50  ;;  %v10922_v56 = vld [vmem:[#allocation14 + $0x84] ss:$48 sps:$4 sm:$0xff]   ;;  %v10920_v50 = vld [vmem:[#allocation14 + $0x80] ss:$48 sps:$4 sm:$0xff]  }
 0x470   :  { %6015 = vmatprep.subr.bf16.mxu0 %v11212_v33  ;;  %v11244_v33 = vld [vmem:[#allocation14 + $0x620] ss:$48 sps:$4 sm:$0xff]  }
 0x471   :  { %5925 = vmatmul.mubr.bf16.vlgmr.msra.gmra.mrb[24].mxu1 %v13293_v60 }
 0x472   :  { %6007 = vmatmul.mubr.bf16.vlgmr.msra.gmra.mrb[28].mxu0 %v13293_v60  ;;  %5934 = vmatpush1.bf16.msra.mxu1 %v11213_v59  ;;  %v10925_v59 = vld [vmem:[#allocation14 + $0xe4] ss:$48 sps:$4 sm:$0xff]  }
 0x473   :  { %6016 = vmatpush1.bf16.msra.mxu0 %v11214_v3  ;;  %5935 = vmatprep.subr.bf16.mxu1 %v11215_v9  ;;  %v11245_v3 = vld [vmem:[#allocation14 + $0x684] ss:$48 sps:$4 sm:$0xff]   ;;  %v10923_v9 = vld [vmem:[#allocation14 + $0xe0] ss:$48 sps:$4 sm:$0xff]  }
 0x474   :  { %6017 = vmatprep.subr.bf16.mxu0 %v11216_v63  ;;  %5965 = vmatprep.mubr.bf16.mxu1 %v12780_v1  ;;  %v11246_v63 = vld [vmem:[#allocation14 + $0x680] ss:$48 sps:$4 sm:$0xff]  }
 0x475   :  { %6047 = vmatprep.mubr.bf16.mxu0 %v12780_v1 }
 0x476   :  { %5936 = vmatpush1.bf16.msra.mxu1 %v11217_v11  ;;  %v10928_v11 = vld [vmem:[#allocation14 + $0x144] ss:$48 sps:$4 sm:$0xff]  }
 0x477   :  { %6018 = vmatpush1.bf16.msra.mxu0 %v11218_v54  ;;  %5937 = vmatprep.subr.bf16.mxu1 %v11219_v12  ;;  %v11247_v54 = vld [vmem:[#allocation14 + $0x6e4] ss:$48 sps:$4 sm:$0xff]   ;;  %v10926_v12 = vld [vmem:[#allocation14 + $0x140] ss:$48 sps:$4 sm:$0xff]  }
 0x478   :  { %6019 = vmatprep.subr.bf16.mxu0 %v11220_v41  ;;  %v11248_v41 = vld [vmem:[#allocation14 + $0x6e0] ss:$48 sps:$4 sm:$0xff]  }
 0x47a   :  { %5938 = vmatpush1.bf16.msra.mxu1 %v11221_v62  ;;  %v10931_v62 = vld [vmem:[#allocation14 + $0x1a4] ss:$48 sps:$4 sm:$0xff]  }
 0x47b   :  { %6020 = vmatpush1.bf16.msra.mxu0 %v11222_v13  ;;  %5939 = vmatprep.subr.bf16.mxu1 %v11223_v14  ;;  %v11249_v13 = vld [vmem:[#allocation14 + $0x744] ss:$48 sps:$4 sm:$0xff]   ;;  %v10929_v14 = vld [vmem:[#allocation14 + $0x1a0] ss:$48 sps:$4 sm:$0xff]  }
 0x47c   :  { %6021 = vmatprep.subr.bf16.mxu0 %v11224_v16  ;;  %v11250_v16 = vld [vmem:[#allocation14 + $0x740] ss:$48 sps:$4 sm:$0xff]  }
 0x47e   :  { %5940 = vmatpush1.bf16.msra.mxu1 %v11225_v20  ;;  %v10934_v20 = vld [vmem:[#allocation14 + $0x204] ss:$48 sps:$4 sm:$0xff]  }
 0x47f   :  { %6022 = vmatpush1.bf16.msra.mxu0 %v11226_v44  ;;  %5941 = vmatprep.subr.bf16.mxu1 %v11227_v23  ;;  %v11251_v44 = vld [vmem:[#allocation14 + $0x7a4] ss:$48 sps:$4 sm:$0xff]   ;;  %v10932_v23 = vld [vmem:[#allocation14 + $0x200] ss:$48 sps:$4 sm:$0xff]  }
 0x480   :  { %6023 = vmatprep.subr.bf16.mxu0 %v11228_v24  ;;  %v11252_v24 = vld [vmem:[#allocation14 + $0x7a0] ss:$48 sps:$4 sm:$0xff]  }
 0x482   :  { %5942 = vmatpush1.bf16.msra.mxu1 %v11229_v4  ;;  %v10937_v4 = vld [vmem:[#allocation14 + $0x264] ss:$48 sps:$4 sm:$0xff]  }
 0x483   :  { %6024 = vmatpush1.bf16.msra.mxu0 %v11230_v25  ;;  %5943 = vmatprep.subr.bf16.mxu1 %v11231_v26  ;;  %v11253_v25 = vld [vmem:[#allocation14 + $0x804] ss:$48 sps:$4 sm:$0xff]   ;;  %v10935_v26 = vld [vmem:[#allocation14 + $0x260] ss:$48 sps:$4 sm:$0xff]  }
 0x484   :  { %6025 = vmatprep.subr.bf16.mxu0 %v11232_v53  ;;  %v11254_v53 = vld [vmem:[#allocation14 + $0x800] ss:$48 sps:$4 sm:$0xff]  }
 0x486   :  { %5944 = vmatpush1.bf16.msra.mxu1 %v11233_v27  ;;  %v10940_v27 = vld [vmem:[#allocation14 + $0x2c4] ss:$48 sps:$4 sm:$0xff]  }
 0x487   :  { %6026 = vmatpush1.bf16.msra.mxu0 %v11234_v57  ;;  %5945 = vmatprep.subr.bf16.mxu1 %v11235_v38  ;;  %v11255_v57 = vld [vmem:[#allocation14 + $0x864] ss:$48 sps:$4 sm:$0xff]   ;;  %v10938_v38 = vld [vmem:[#allocation14 + $0x2c0] ss:$48 sps:$4 sm:$0xff]  }
 0x488   :  { %6027 = vmatprep.subr.bf16.mxu0 %v11236_v28  ;;  %v11256_v28 = vld [vmem:[#allocation14 + $0x860] ss:$48 sps:$4 sm:$0xff]  }
 0x48a   :  { %5946 = vmatpush1.bf16.msra.mxu1 %v11237_v29  ;;  %v10943_v29 = vld [vmem:[#allocation14 + $0x324] ss:$48 sps:$4 sm:$0xff]  }
 0x48b   :  { %6028 = vmatpush1.bf16.msra.mxu0 %v11238_v30  ;;  %5947 = vmatprep.subr.bf16.mxu1 %v11239_v51  ;;  %v11257_v30 = vld [vmem:[#allocation14 + $0x8c4] ss:$48 sps:$4 sm:$0xff]   ;;  %v10946_v51 = vld [vmem:[#allocation14 + $0x2c] ss:$48 sps:$4 sm:$0xff]  }
 0x48c   :  { %6029 = vmatprep.subr.bf16.mxu0 %v11240_v31  ;;  %v11258_v31 = vld [vmem:[#allocation14 + $0x8c0] ss:$48 sps:$4 sm:$0xff]  }
 0x48e   :  { %5948 = vmatpush1.bf16.msra.mxu1 %v11241_v42  ;;  %v10944_v42 = vld [vmem:[#allocation14 + $0x28] ss:$48 sps:$4 sm:$0xff]  }
 0x48f   :  { %6030 = vmatpush1.bf16.msra.mxu0 %v11242_v43  ;;  %6056 = vmatprep.subr.bf16.mxu1 %v10919_v55  ;;  %v10941_v55 = vld [vmem:[#allocation14 + $0x320] ss:$48 sps:$4 sm:$0xff]   ;;  %v10952_v43 = vld [vmem:[#allocation14 + $0x8c] ss:$48 sps:$4 sm:$0xff]  }
 0x490   :  { %6097 = vmatprep.subr.bf16.mxu0 %v11243_v49  ;;  %v10947_v49 = vld [vmem:[#allocation14 + $0x380] ss:$48 sps:$4 sm:$0xff]  }
 0x491   :  { %5966 = vmatmul.mubr.bf16.vlgmr.msra.gmra.mrb[24].mxu1 %v13303_v8 }
 0x492   :  { %6048 = vmatmul.mubr.bf16.vlgmr.msra.gmra.mrb[28].mxu0 %v13303_v8  ;;  %6057 = vmatpush1.bf16.msra.mxu1 %v10917_v32  ;;  %v10949_v32 = vld [vmem:[#allocation14 + $0x384] ss:$48 sps:$4 sm:$0xff]  }
 0x493   :  { %6088 = vmatprep.mubr.bf16.mxu1 %v13295_v15  ;;  %6098 = vmatpush1.bf16.msra.mxu0 %v11244_v33  ;;  %v10958_v33 = vld [vmem:[#allocation14 + $0xec] ss:$48 sps:$4 sm:$0xff]  }
 0x494   :  { %6058 = vmatprep.subr.bf16.mxu1 %v10922_v56  ;;  %6099 = vmatprep.subr.bf16.mxu0 %v11245_v3  ;;  %v10950_v56 = vld [vmem:[#allocation14 + $0x88] ss:$48 sps:$4 sm:$0xff]  }
 0x495   :  { %6129 = vmatprep.mubr.bf16.mxu0 %v12780_v1  ;;  %v10956_v3 = vld [vmem:[#allocation14 + $0xe8] ss:$48 sps:$4 sm:$0xff]  }
 0x496   :  { %6059 = vmatpush1.bf16.msra.mxu1 %v10920_v50  ;;  %v10955_v50 = vld [vmem:[#allocation14 + $0x3e4] ss:$48 sps:$4 sm:$0xff]  }
 0x497   :  { %6100 = vmatpush1.bf16.msra.mxu0 %v11246_v63  ;;  %6060 = vmatprep.subr.bf16.mxu1 %v10925_v59  ;;  %v10953_v59 = vld [vmem:[#allocation14 + $0x3e0] ss:$48 sps:$4 sm:$0xff]   ;;  %v10964_v63 = vld [vmem:[#allocation14 + $0x14c] ss:$48 sps:$4 sm:$0xff]  }
 0x498   :  { %6101 = vmatprep.subr.bf16.mxu0 %v11247_v54  ;;  %v10962_v54 = vld [vmem:[#allocation14 + $0x148] ss:$48 sps:$4 sm:$0xff]  }
 0x49a   :  { %6061 = vmatpush1.bf16.msra.mxu1 %v10923_v9  ;;  %v10961_v9 = vld [vmem:[#allocation14 + $0x444] ss:$48 sps:$4 sm:$0xff]  }
 0x49b   :  { %6102 = vmatpush1.bf16.msra.mxu0 %v11248_v41  ;;  %6062 = vmatprep.subr.bf16.mxu1 %v10928_v11  ;;  %v10959_v11 = vld [vmem:[#allocation14 + $0x440] ss:$48 sps:$4 sm:$0xff]  }
 0x49c   :  { %6103 = vmatprep.subr.bf16.mxu0 %v11249_v13  ;;  %v10965_v41 = vld [vmem:[#allocation14 + $0x4a0] ss:$48 sps:$4 sm:$0xff]   ;;  %v10973_v13 = vld [vmem:[#allocation14 + $0x504] ss:$48 sps:$4 sm:$0xff]  }
 0x49e   :  { %6063 = vmatpush1.bf16.msra.mxu1 %v10926_v12  ;;  %v10967_v12 = vld [vmem:[#allocation14 + $0x4a4] ss:$48 sps:$4 sm:$0xff]  }
 0x49f   :  { %6104 = vmatpush1.bf16.msra.mxu0 %v11250_v16  ;;  %6064 = vmatprep.subr.bf16.mxu1 %v10931_v62  ;;  %v10968_v62 = vld [vmem:[#allocation14 + $0x1a8] ss:$48 sps:$4 sm:$0xff]   ;;  %v10971_v16 = vld [vmem:[#allocation14 + $0x500] ss:$48 sps:$4 sm:$0xff]  }
 0x4a0   :  { %6105 = vmatprep.subr.bf16.mxu0 %v11251_v44  ;;  %v10979_v44 = vld [vmem:[#allocation14 + $0x564] ss:$48 sps:$4 sm:$0xff]  }
 0x4a2   :  { %6065 = vmatpush1.bf16.msra.mxu1 %v10929_v14  ;;  %v10976_v14 = vld [vmem:[#allocation14 + $0x20c] ss:$48 sps:$4 sm:$0xff]  }
 0x4a3   :  { %6106 = vmatpush1.bf16.msra.mxu0 %v11252_v24  ;;  %6066 = vmatprep.subr.bf16.mxu1 %v10934_v20  ;;  %v10974_v20 = vld [vmem:[#allocation14 + $0x208] ss:$48 sps:$4 sm:$0xff]   ;;  %v10977_v24 = vld [vmem:[#allocation14 + $0x560] ss:$48 sps:$4 sm:$0xff]  }
 0x4a4   :  { %6107 = vmatprep.subr.bf16.mxu0 %v11253_v25  ;;  %v10985_v25 = vld [vmem:[#allocation14 + $0x5c4] ss:$48 sps:$4 sm:$0xff]  }
 0x4a6   :  { %6067 = vmatpush1.bf16.msra.mxu1 %v10932_v23  ;;  %v10982_v23 = vld [vmem:[#allocation14 + $0x26c] ss:$48 sps:$4 sm:$0xff]  }
 0x4a7   :  { %6108 = vmatpush1.bf16.msra.mxu0 %v11254_v53  ;;  %6068 = vmatprep.subr.bf16.mxu1 %v10937_v4  ;;  %v10980_v4 = vld [vmem:[#allocation14 + $0x268] ss:$48 sps:$4 sm:$0xff]   ;;  %v10983_v53 = vld [vmem:[#allocation14 + $0x5c0] ss:$48 sps:$4 sm:$0xff]  }
 0x4a8   :  { %6109 = vmatprep.subr.bf16.mxu0 %v11255_v57  ;;  %v10991_v57 = vld [vmem:[#allocation14 + $0x32c] ss:$48 sps:$4 sm:$0xff]  }
 0x4aa   :  { %6069 = vmatpush1.bf16.msra.mxu1 %v10935_v26  ;;  %v10988_v26 = vld [vmem:[#allocation14 + $0x2cc] ss:$48 sps:$4 sm:$0xff]  }
 0x4ab   :  { %6110 = vmatpush1.bf16.msra.mxu0 %v11256_v28  ;;  %6070 = vmatprep.subr.bf16.mxu1 %v10940_v27  ;;  %v10986_v27 = vld [vmem:[#allocation14 + $0x2c8] ss:$48 sps:$4 sm:$0xff]   ;;  %v11259_v28 = vld [vmem:[#allocation14 + $0x62c] ss:$48 sps:$4 sm:$0xff]  }
 0x4ac   :  { %6111 = vmatprep.subr.bf16.mxu0 %v11257_v30  ;;  %v11260_v30 = vld [vmem:[#allocation14 + $0x628] ss:$48 sps:$4 sm:$0xff]  }
 0x4ae   :  { %6071 = vmatpush1.bf16.msra.mxu1 %v10938_v38  ;;  %v10989_v38 = vld [vmem:[#allocation14 + $0x328] ss:$48 sps:$4 sm:$0xff]  }
 0x4af   :  { %6112 = vmatpush1.bf16.msra.mxu0 %v11258_v31  ;;  %6072 = vmatprep.subr.bf16.mxu1 %v10943_v29  ;;  %v10994_v29 = vld [vmem:[#allocation14 + $0x38c] ss:$48 sps:$4 sm:$0xff]  }
 0x4b0   :  { %6138 = vmatprep.subr.bf16.mxu0 %v10946_v51  ;;  %v10992_v51 = vld [vmem:[#allocation14 + $0x388] ss:$48 sps:$4 sm:$0xff]   ;;  %v10997_v31 = vld [vmem:[#allocation14 + $0x3ec] ss:$48 sps:$4 sm:$0xff]  }
 0x4b2   :  { %6130 = vmatmul.mubr.bf16.vlgmr.msra.gmra.mrb[32].mxu0 %v13303_v8  ;;  %6073 = vmatpush1.bf16.msra.mxu1 %v10941_v55  ;;  %v11261_v55 = vld [vmem:[#allocation14 + $0x68c] ss:$48 sps:$4 sm:$0xff]  }
 0x4b3   :  { %6139 = vmatpush1.bf16.msra.mxu0 %v10944_v42  ;;  %6170 = vmatprep.mubr.bf16.mxu0 %v13295_v15  ;;  %v10970_v15 = vld [vmem:[#allocation14 + $0x1ac] ss:$48 sps:$4 sm:$0xff]   ;;  %v11262_v42 = vld [vmem:[#allocation14 + $0x688] ss:$48 sps:$4 sm:$0xff]  }
 0x4b4   :  { %6074 = vmatprep.subr.bf16.mxu1 %v10949_v32  ;;  %6140 = vmatprep.subr.bf16.mxu0 %v10952_v43  ;;  %v10995_v32 = vld [vmem:[#allocation14 + $0x3e8] ss:$48 sps:$4 sm:$0xff]   ;;  %v11263_v43 = vld [vmem:[#allocation14 + $0x6ec] ss:$48 sps:$4 sm:$0xff]  }
 0x4b6   :  { %6075 = vmatpush1.bf16.msra.mxu1 %v10947_v49  ;;  %v11000_v49 = vld [vmem:[#allocation14 + $0x44c] ss:$48 sps:$4 sm:$0xff]  }
 0x4b7   :  { %6141 = vmatpush1.bf16.msra.mxu0 %v10950_v56  ;;  %6076 = vmatprep.subr.bf16.mxu1 %v10955_v50  ;;  %v11264_v56 = vld [vmem:[#allocation14 + $0x6e8] ss:$48 sps:$4 sm:$0xff]  }
 0x4b8   :  { %6142 = vmatprep.subr.bf16.mxu0 %v10958_v33  ;;  %v10998_v50 = vld [vmem:[#allocation14 + $0x448] ss:$48 sps:$4 sm:$0xff]   ;;  %v11265_v33 = vld [vmem:[#allocation14 + $0x74c] ss:$48 sps:$4 sm:$0xff]  }
 0x4ba   :  { %6077 = vmatpush1.bf16.msra.mxu1 %v10953_v59  ;;  %v11003_v59 = vld [vmem:[#allocation14 + $0x4ac] ss:$48 sps:$4 sm:$0xff]  }
 0x4bb   :  { %6143 = vmatpush1.bf16.msra.mxu0 %v10956_v3  ;;  %6078 = vmatprep.subr.bf16.mxu1 %v10961_v9  ;;  %v11266_v3 = vld [vmem:[#allocation14 + $0x748] ss:$48 sps:$4 sm:$0xff]  }
 0x4bc   :  { %6144 = vmatprep.subr.bf16.mxu0 %v10964_v63  ;;  %v11001_v9 = vld [vmem:[#allocation14 + $0x4a8] ss:$48 sps:$4 sm:$0xff]   ;;  %v11267_v63 = vld [vmem:[#allocation14 + $0x7ac] ss:$48 sps:$4 sm:$0xff]  }
 0x4be   :  { %6079 = vmatpush1.bf16.msra.mxu1 %v10959_v11  ;;  %v11006_v11 = vld [vmem:[#allocation14 + $0x50c] ss:$48 sps:$4 sm:$0xff]  }
 0x4bf   :  { %6145 = vmatpush1.bf16.msra.mxu0 %v10962_v54  ;;  %6080 = vmatprep.subr.bf16.mxu1 %v10967_v12  ;;  %v11268_v54 = vld [vmem:[#allocation14 + $0x7a8] ss:$48 sps:$4 sm:$0xff]  }
 0x4c0   :  { %6146 = vmatprep.subr.bf16.mxu0 %v10970_v15  ;;  %v11004_v12 = vld [vmem:[#allocation14 + $0x508] ss:$48 sps:$4 sm:$0xff]   ;;  %v11269_v15 = vld [vmem:[#allocation14 + $0x80c] ss:$48 sps:$4 sm:$0xff]  }
 0x4c2   :  { %6081 = vmatpush1.bf16.msra.mxu1 %v10965_v41  ;;  %v11009_v41 = vld [vmem:[#allocation14 + $0x56c] ss:$48 sps:$4 sm:$0xff]  }
 0x4c3   :  { %6147 = vmatpush1.bf16.msra.mxu0 %v10968_v62  ;;  %6082 = vmatprep.subr.bf16.mxu1 %v10973_v13  ;;  %v11270_v62 = vld [vmem:[#allocation14 + $0x808] ss:$48 sps:$4 sm:$0xff]  }
 0x4c4   :  { %6148 = vmatprep.subr.bf16.mxu0 %v10976_v14  ;;  %v11007_v13 = vld [vmem:[#allocation14 + $0x568] ss:$48 sps:$4 sm:$0xff]   ;;  %v11271_v14 = vld [vmem:[#allocation14 + $0x86c] ss:$48 sps:$4 sm:$0xff]  }
 0x4c6   :  { %6083 = vmatpush1.bf16.msra.mxu1 %v10971_v16  ;;  %v11012_v16 = vld [vmem:[#allocation14 + $0x5cc] ss:$48 sps:$4 sm:$0xff]  }
 0x4c7   :  { %6149 = vmatpush1.bf16.msra.mxu0 %v10974_v20  ;;  %6084 = vmatprep.subr.bf16.mxu1 %v10979_v44  ;;  %v11272_v20 = vld [vmem:[#allocation14 + $0x868] ss:$48 sps:$4 sm:$0xff]  }
 0x4c8   :  { %6150 = vmatprep.subr.bf16.mxu0 %v10982_v23  ;;  %v11010_v44 = vld [vmem:[#allocation14 + $0x5c8] ss:$48 sps:$4 sm:$0xff]   ;;  %v11273_v23 = vld [vmem:[#allocation14 + $0x8cc] ss:$48 sps:$4 sm:$0xff]  }
 0x4ca   :  { %6085 = vmatpush1.bf16.msra.mxu1 %v10977_v24  ;;  %v11274_v24 = vld [vmem:[#allocation14 + $0x8c8] ss:$48 sps:$4 sm:$0xff]  }
 0x4cb   :  { %6151 = vmatpush1.bf16.msra.mxu0 %v10980_v4  ;;  %6086 = vmatprep.subr.bf16.mxu1 %v10985_v25  ;;  %v11275_v4 = vld [vmem:[#allocation15 + $0x4] ss:$48 sps:$4 sm:$0xff]   ;;  %v11276_v25 = vld [vmem:[#allocation15 + $0xc] ss:$48 sps:$4 sm:$0xff]  }
 0x4cc   :  { %6152 = vmatprep.subr.bf16.mxu0 %v10988_v26  ;;  %v13324_v26 = vpack.c.bf16 %v13287_v22, %v13287_v22 }
 0x4ce   :  { %6087 = vmatpush1.bf16.msra.mxu1 %v10983_v53  ;;  %v11277_v53 = vld [vmem:[#allocation15] ss:$48 sps:$4 sm:$0xff]  }
 0x4cf   :  { %6153 = vmatpush1.bf16.msra.mxu0 %v10986_v27  ;;  %6179 = vmatprep.subr.bf16.mxu1 %v11259_v28  ;;  %v11278_v27 = vld [vmem:[#allocation15 + $0x8] ss:$48 sps:$4 sm:$0xff]   ;;  %v11281_v28 = vld [vmem:[#allocation15 + $0x60] ss:$48 sps:$4 sm:$0xff]  }
 0x4d0   :  { %6154 = vmatprep.subr.bf16.mxu0 %v10991_v57  ;;  %v11279_v57 = vld [vmem:[#allocation15 + $0x64] ss:$48 sps:$4 sm:$0xff]  }
 0x4d1   :  { %6089 = vmatmul.mubr.bf16.vlgmr.msra.gmra.mrb[28].mxu1 %v13293_v60 }
 0x4d2   :  { %6180 = vmatpush1.bf16.msra.mxu1 %v11260_v30  ;;  %6211 = vmatprep.mubr.bf16.mxu1 %v12780_v1  ;;  %v11284_v30 = vld [vmem:[#allocation15 + $0xcc] ss:$48 sps:$4 sm:$0xff]  }
 0x4d3   :  { %6155 = vmatpush1.bf16.msra.mxu0 %v10989_v38  ;;  %6181 = vmatprep.subr.bf16.mxu1 %v11261_v55  ;;  %v11280_v38 = vld [vmem:[#allocation15 + $0x6c] ss:$48 sps:$4 sm:$0xff]   ;;  %v11287_v55 = vld [vmem:[#allocation15 + $0x124] ss:$48 sps:$4 sm:$0xff]  }
 0x4d4   :  { %6156 = vmatprep.subr.bf16.mxu0 %v10994_v29  ;;  %v11283_v29 = vld [vmem:[#allocation15 + $0xc4] ss:$48 sps:$4 sm:$0xff]  }
 0x4d6   :  { %6182 = vmatpush1.bf16.msra.mxu1 %v11262_v42  ;;  %v11289_v42 = vld [vmem:[#allocation15 + $0x120] ss:$48 sps:$4 sm:$0xff]  }
 0x4d7   :  { %6157 = vmatpush1.bf16.msra.mxu0 %v10992_v51  ;;  %6183 = vmatprep.subr.bf16.mxu1 %v11263_v43  ;;  %v11286_v51 = vld [vmem:[#allocation15 + $0xc8] ss:$48 sps:$4 sm:$0xff]   ;;  %v11291_v43 = vld [vmem:[#allocation15 + $0x184] ss:$48 sps:$4 sm:$0xff]  }
 0x4d8   :  { %6158 = vmatprep.subr.bf16.mxu0 %v10997_v31  ;;  %v11288_v31 = vld [vmem:[#allocation15 + $0x12c] ss:$48 sps:$4 sm:$0xff]  }
 0x4da   :  { %6184 = vmatpush1.bf16.msra.mxu1 %v11264_v56  ;;  %v11293_v56 = vld [vmem:[#allocation15 + $0x180] ss:$48 sps:$4 sm:$0xff]  }
 0x4db   :  { %6159 = vmatpush1.bf16.msra.mxu0 %v10995_v32  ;;  %6185 = vmatprep.subr.bf16.mxu1 %v11265_v33  ;;  %v11290_v32 = vld [vmem:[#allocation15 + $0x128] ss:$48 sps:$4 sm:$0xff]   ;;  %v11295_v33 = vld [vmem:[#allocation15 + $0x1e4] ss:$48 sps:$4 sm:$0xff]  }
 0x4dc   :  { %6160 = vmatprep.subr.bf16.mxu0 %v11000_v49  ;;  %v11292_v49 = vld [vmem:[#allocation15 + $0x18c] ss:$48 sps:$4 sm:$0xff]  }
 0x4de   :  { %6186 = vmatpush1.bf16.msra.mxu1 %v11266_v3  ;;  %v11297_v3 = vld [vmem:[#allocation15 + $0x1e0] ss:$48 sps:$4 sm:$0xff]  }
 0x4df   :  { %6161 = vmatpush1.bf16.msra.mxu0 %v10998_v50  ;;  %6187 = vmatprep.subr.bf16.mxu1 %v11267_v63  ;;  %v11294_v50 = vld [vmem:[#allocation15 + $0x188] ss:$48 sps:$4 sm:$0xff]   ;;  %v11299_v63 = vld [vmem:[#allocation15 + $0x244] ss:$48 sps:$4 sm:$0xff]  }
 0x4e0   :  { %6162 = vmatprep.subr.bf16.mxu0 %v11003_v59  ;;  %v11296_v59 = vld [vmem:[#allocation15 + $0x1ec] ss:$48 sps:$4 sm:$0xff]  }
 0x4e2   :  { %6188 = vmatpush1.bf16.msra.mxu1 %v11268_v54  ;;  %v11301_v54 = vld [vmem:[#allocation15 + $0x240] ss:$48 sps:$4 sm:$0xff]  }
 0x4e3   :  { %6163 = vmatpush1.bf16.msra.mxu0 %v11001_v9  ;;  %6189 = vmatprep.subr.bf16.mxu1 %v11269_v15  ;;  %v11298_v9 = vld [vmem:[#allocation15 + $0x1e8] ss:$48 sps:$4 sm:$0xff]   ;;  %v11303_v15 = vld [vmem:[#allocation15 + $0x2a4] ss:$48 sps:$4 sm:$0xff]  }
 0x4e4   :  { %6164 = vmatprep.subr.bf16.mxu0 %v11006_v11  ;;  %v11300_v11 = vld [vmem:[#allocation15 + $0x24c] ss:$48 sps:$4 sm:$0xff]  }
 0x4e6   :  { %6190 = vmatpush1.bf16.msra.mxu1 %v11270_v62  ;;  %v11305_v62 = vld [vmem:[#allocation15 + $0x2a0] ss:$48 sps:$4 sm:$0xff]  }
 0x4e7   :  { %6165 = vmatpush1.bf16.msra.mxu0 %v11004_v12  ;;  %6191 = vmatprep.subr.bf16.mxu1 %v11271_v14  ;;  %v11302_v12 = vld [vmem:[#allocation15 + $0x248] ss:$48 sps:$4 sm:$0xff]   ;;  %v11307_v14 = vld [vmem:[#allocation15 + $0x304] ss:$48 sps:$4 sm:$0xff]  }
 0x4e8   :  { %6166 = vmatprep.subr.bf16.mxu0 %v11009_v41  ;;  %v11304_v41 = vld [vmem:[#allocation15 + $0x2ac] ss:$48 sps:$4 sm:$0xff]  }
 0x4ea   :  { %6192 = vmatpush1.bf16.msra.mxu1 %v11272_v20  ;;  %v11309_v20 = vld [vmem:[#allocation15 + $0x300] ss:$48 sps:$4 sm:$0xff]  }
 0x4eb   :  { %6167 = vmatpush1.bf16.msra.mxu0 %v11007_v13  ;;  %6193 = vmatprep.subr.bf16.mxu1 %v11273_v23  ;;  %v11306_v13 = vld [vmem:[#allocation15 + $0x2a8] ss:$48 sps:$4 sm:$0xff]   ;;  %v11311_v23 = vld [vmem:[#allocation15 + $0x364] ss:$48 sps:$4 sm:$0xff]  }
 0x4ec   :  { %6168 = vmatprep.subr.bf16.mxu0 %v11012_v16  ;;  %v11308_v16 = vld [vmem:[#allocation15 + $0x30c] ss:$48 sps:$4 sm:$0xff]  }
 0x4ee   :  { %6194 = vmatpush1.bf16.msra.mxu1 %v11274_v24  ;;  %v11312_v24 = vld [vmem:[#allocation15 + $0x36c] ss:$48 sps:$4 sm:$0xff]  }
 0x4ef   :  { %6169 = vmatpush1.bf16.msra.mxu0 %v11010_v44  ;;  %6224 = vmatprep.subr.bf16.mxu1 %v11275_v4  ;;  %v11310_v44 = vld [vmem:[#allocation15 + $0x308] ss:$48 sps:$4 sm:$0xff]   ;;  %v11313_v4 = vld [vmem:[#allocation15 + $0x360] ss:$48 sps:$4 sm:$0xff]  }
 0x4f0   :  { %6306 = vmatprep.subr.bf16.mxu0 %v11276_v25  ;;  %v11314_v25 = vld [vmem:[#allocation15 + $0x368] ss:$48 sps:$4 sm:$0xff]  }
 0x4f1   :  { %6212 = vmatmul.mubr.bf16.vlgmr.msra.gmra.mrb[32].mxu1 %v13303_v8  ;;  %v11282_v8 = vld [vmem:[#allocation15 + $0x68] ss:$48 sps:$4 sm:$0xff]  }
 0x4f2   :  { %6171 = vmatmul.mubr.bf16.vlgmr.msra.gmra.mrb[36].mxu0 %v13293_v60  ;;  %6225 = vmatpush1.bf16.msra.mxu1 %v11277_v53  ;;  %v11285_v60 = vld [vmem:[#allocation15 + $0xc0] ss:$48 sps:$4 sm:$0xff]   ;;  %v11315_v53 = vld [vmem:[#allocation15 + $0x3c4] ss:$48 sps:$4 sm:$0xff]  }
 0x4f3   :  { %6256 = vmatprep.mubr.bf16.mxu1 %v13324_v26  ;;  %6307 = vmatpush1.bf16.msra.mxu0 %v11278_v27  ;;  %v11316_v27 = vld [vmem:[#allocation15 + $0x3cc] ss:$48 sps:$4 sm:$0xff]  }
 0x4f4   :  { %6338 = vmatprep.mubr.bf16.mxu0 %v13324_v26  ;;  %6226 = vmatprep.subr.bf16.mxu1 %v11279_v57  ;;  %v11317_v57 = vld [vmem:[#allocation15 + $0x3c0] ss:$48 sps:$4 sm:$0xff]  }
 0x4f5   :  { %6308 = vmatprep.subr.bf16.mxu0 %v11280_v38  ;;  %v11318_v38 = vld [vmem:[#allocation15 + $0x3c8] ss:$48 sps:$4 sm:$0xff]  }
 0x4f6   :  { %6227 = vmatpush1.bf16.msra.mxu1 %v11281_v28  ;;  %v11319_v28 = vld [vmem:[#allocation15 + $0x424] ss:$48 sps:$4 sm:$0xff]  }
 0x4f7   :  { %6309 = vmatpush1.bf16.msra.mxu0 %v11282_v8  ;;  %6228 = vmatprep.subr.bf16.mxu1 %v11283_v29  ;;  %v11320_v8 = vld [vmem:[#allocation15 + $0x42c] ss:$48 sps:$4 sm:$0xff]   ;;  %v11321_v29 = vld [vmem:[#allocation15 + $0x420] ss:$48 sps:$4 sm:$0xff]  }
 0x4f8   :  { %6310 = vmatprep.subr.bf16.mxu0 %v11284_v30  ;;  %v11322_v30 = vld [vmem:[#allocation15 + $0x428] ss:$48 sps:$4 sm:$0xff]  }
 0x4fa   :  { %6229 = vmatpush1.bf16.msra.mxu1 %v11285_v60  ;;  %v11323_v60 = vld [vmem:[#allocation15 + $0x484] ss:$48 sps:$4 sm:$0xff]  }
 0x4fb   :  { %6311 = vmatpush1.bf16.msra.mxu0 %v11286_v51  ;;  %6230 = vmatprep.subr.bf16.mxu1 %v11287_v55  ;;  %v11324_v51 = vld [vmem:[#allocation15 + $0x48c] ss:$48 sps:$4 sm:$0xff]   ;;  %v11325_v55 = vld [vmem:[#allocation15 + $0x480] ss:$48 sps:$4 sm:$0xff]  }
 0x4fc   :  { %6312 = vmatprep.subr.bf16.mxu0 %v11288_v31  ;;  %v11326_v31 = vld [vmem:[#allocation15 + $0x488] ss:$48 sps:$4 sm:$0xff]  }
 0x4fe   :  { %6231 = vmatpush1.bf16.msra.mxu1 %v11289_v42  ;;  %v11327_v42 = vld [vmem:[#allocation15 + $0x4e4] ss:$48 sps:$4 sm:$0xff]  }
 0x4ff   :  { %6313 = vmatpush1.bf16.msra.mxu0 %v11290_v32  ;;  %6232 = vmatprep.subr.bf16.mxu1 %v11291_v43  ;;  %v11328_v32 = vld [vmem:[#allocation15 + $0x4ec] ss:$48 sps:$4 sm:$0xff]   ;;  %v11329_v43 = vld [vmem:[#allocation15 + $0x4e0] ss:$48 sps:$4 sm:$0xff]  }
 0x500   :  { %6314 = vmatprep.subr.bf16.mxu0 %v11292_v49  ;;  %v11330_v49 = vld [vmem:[#allocation15 + $0x4e8] ss:$48 sps:$4 sm:$0xff]  }
 0x502   :  { %6233 = vmatpush1.bf16.msra.mxu1 %v11293_v56  ;;  %v11331_v56 = vld [vmem:[#allocation15 + $0x544] ss:$48 sps:$4 sm:$0xff]  }
 0x503   :  { %6315 = vmatpush1.bf16.msra.mxu0 %v11294_v50  ;;  %6234 = vmatprep.subr.bf16.mxu1 %v11295_v33  ;;  %v11332_v50 = vld [vmem:[#allocation15 + $0x54c] ss:$48 sps:$4 sm:$0xff]   ;;  %v11333_v33 = vld [vmem:[#allocation15 + $0x540] ss:$48 sps:$4 sm:$0xff]  }
 0x504   :  { %6316 = vmatprep.subr.bf16.mxu0 %v11296_v59  ;;  %v11334_v59 = vld [vmem:[#allocation15 + $0x548] ss:$48 sps:$4 sm:$0xff]  }
 0x506   :  { %6235 = vmatpush1.bf16.msra.mxu1 %v11297_v3  ;;  %v11335_v3 = vld [vmem:[#allocation15 + $0x5a4] ss:$48 sps:$4 sm:$0xff]  }
 0x507   :  { %6317 = vmatpush1.bf16.msra.mxu0 %v11298_v9  ;;  %6236 = vmatprep.subr.bf16.mxu1 %v11299_v63  ;;  %v11336_v9 = vld [vmem:[#allocation15 + $0x5ac] ss:$48 sps:$4 sm:$0xff]   ;;  %v11337_v63 = vld [vmem:[#allocation15 + $0x5a0] ss:$48 sps:$4 sm:$0xff]  }
 0x508   :  { %6318 = vmatprep.subr.bf16.mxu0 %v11300_v11  ;;  %v11338_v11 = vld [vmem:[#allocation15 + $0x5a8] ss:$48 sps:$4 sm:$0xff]  }
 0x50a   :  { %6237 = vmatpush1.bf16.msra.mxu1 %v11301_v54  ;;  %v13331_v54 = vpack.c.bf16 %v13282_v46, %v13282_v46 }
 0x50b   :  { %6319 = vmatpush1.bf16.msra.mxu0 %v11302_v12  ;;  %6238 = vmatprep.subr.bf16.mxu1 %v11303_v15  ;;  %v11339_v12 = vld [vmem:[#allocation15 + $0x604] ss:$48 sps:$4 sm:$0xff]   ;;  %v11340_v15 = vld [vmem:[#allocation15 + $0x60c] ss:$48 sps:$4 sm:$0xff]  }
 0x50c   :  { %6320 = vmatprep.subr.bf16.mxu0 %v11304_v41  ;;  %v13336_v41 = vpack.c.bf16 %v13289_v45, %v13289_v45 }
 0x50e   :  { %6239 = vmatpush1.bf16.msra.mxu1 %v11305_v62  ;;  %v11341_v62 = vld [vmem:[#allocation15 + $0x600] ss:$48 sps:$4 sm:$0xff]  }
 0x50f   :  { %6321 = vmatpush1.bf16.msra.mxu0 %v11306_v13  ;;  %6240 = vmatprep.subr.bf16.mxu1 %v11307_v14  ;;  %v11342_v13 = vld [vmem:[#allocation15 + $0x608] ss:$48 sps:$4 sm:$0xff]   ;;  %v11343_v14 = vld [vmem:[#allocation15 + $0x664] ss:$48 sps:$4 sm:$0xff]  }
 0x510   :  { %6322 = vmatprep.subr.bf16.mxu0 %v11308_v16  ;;  %v11344_v16 = vld [vmem:[#allocation15 + $0x66c] ss:$48 sps:$4 sm:$0xff]  }
 0x512   :  { %6241 = vmatpush1.bf16.msra.mxu1 %v11309_v20  ;;  %v11345_v20 = vld [vmem:[#allocation15 + $0x660] ss:$48 sps:$4 sm:$0xff]  }
 0x513   :  { %6323 = vmatpush1.bf16.msra.mxu0 %v11310_v44  ;;  %6242 = vmatprep.subr.bf16.mxu1 %v11311_v23  ;;  %v11346_v44 = vld [vmem:[#allocation15 + $0x668] ss:$48 sps:$4 sm:$0xff]   ;;  %v11347_v23 = vld [vmem:[#allocation15 + $0x6c4] ss:$48 sps:$4 sm:$0xff]  }
 0x514   :  { %6324 = vmatprep.subr.bf16.mxu0 %v11312_v24  ;;  %v11348_v24 = vld [vmem:[#allocation15 + $0x6cc] ss:$48 sps:$4 sm:$0xff]  }
 0x516   :  { %6243 = vmatpush1.bf16.msra.mxu1 %v11313_v4  ;;  %v11349_v4 = vld [vmem:[#allocation15 + $0x6c0] ss:$48 sps:$4 sm:$0xff]  }
 0x517   :  { %6325 = vmatpush1.bf16.msra.mxu0 %v11314_v25  ;;  %6244 = vmatprep.subr.bf16.mxu1 %v11315_v53  ;;  %v11350_v25 = vld [vmem:[#allocation15 + $0x6c8] ss:$48 sps:$4 sm:$0xff]   ;;  %v11351_v53 = vld [vmem:[#allocation15 + $0x724] ss:$48 sps:$4 sm:$0xff]  }
 0x518   :  { %6326 = vmatprep.subr.bf16.mxu0 %v11316_v27  ;;  %v11352_v27 = vld [vmem:[#allocation15 + $0x72c] ss:$48 sps:$4 sm:$0xff]  }
 0x51a   :  { %6245 = vmatpush1.bf16.msra.mxu1 %v11317_v57  ;;  %v11353_v57 = vld [vmem:[#allocation15 + $0x720] ss:$48 sps:$4 sm:$0xff]  }
 0x51b   :  { %6327 = vmatpush1.bf16.msra.mxu0 %v11318_v38  ;;  %6246 = vmatprep.subr.bf16.mxu1 %v11319_v28  ;;  %v11354_v38 = vld [vmem:[#allocation15 + $0x728] ss:$48 sps:$4 sm:$0xff]   ;;  %v11355_v28 = vld [vmem:[#allocation15 + $0x784] ss:$48 sps:$4 sm:$0xff]  }
 0x51c   :  { %6328 = vmatprep.subr.bf16.mxu0 %v11320_v8  ;;  %v11356_v8 = vld [vmem:[#allocation15 + $0x78c] ss:$48 sps:$4 sm:$0xff]  }
 0x51e   :  { %6247 = vmatpush1.bf16.msra.mxu1 %v11321_v29  ;;  %v11357_v29 = vld [vmem:[#allocation15 + $0x780] ss:$48 sps:$4 sm:$0xff]  }
 0x51f   :  { %6329 = vmatpush1.bf16.msra.mxu0 %v11322_v30  ;;  %6248 = vmatprep.subr.bf16.mxu1 %v11323_v60  ;;  %v11358_v30 = vld [vmem:[#allocation15 + $0x788] ss:$48 sps:$4 sm:$0xff]   ;;  %v11359_v60 = vld [vmem:[#allocation15 + $0x7e4] ss:$48 sps:$4 sm:$0xff]  }
 0x520   :  { %6330 = vmatprep.subr.bf16.mxu0 %v11324_v51  ;;  %v11360_v51 = vld [vmem:[#allocation15 + $0x7ec] ss:$48 sps:$4 sm:$0xff]  }
 0x522   :  { %6249 = vmatpush1.bf16.msra.mxu1 %v11325_v55  ;;  %v11361_v55 = vld [vmem:[#allocation15 + $0x7e0] ss:$48 sps:$4 sm:$0xff]  }
 0x523   :  { %6331 = vmatpush1.bf16.msra.mxu0 %v11326_v31  ;;  %6250 = vmatprep.subr.bf16.mxu1 %v11327_v42  ;;  %v11362_v31 = vld [vmem:[#allocation15 + $0x7e8] ss:$48 sps:$4 sm:$0xff]   ;;  %v11363_v42 = vld [vmem:[#allocation15 + $0x844] ss:$48 sps:$4 sm:$0xff]  }
 0x524   :  { %6332 = vmatprep.subr.bf16.mxu0 %v11328_v32  ;;  %v11364_v32 = vld [vmem:[#allocation15 + $0x84c] ss:$48 sps:$4 sm:$0xff]  }
 0x526   :  { %6251 = vmatpush1.bf16.msra.mxu1 %v11329_v43  ;;  %v11365_v43 = vld [vmem:[#allocation15 + $0x840] ss:$48 sps:$4 sm:$0xff]  }
 0x527   :  { %6333 = vmatpush1.bf16.msra.mxu0 %v11330_v49  ;;  %6252 = vmatprep.subr.bf16.mxu1 %v11331_v56  ;;  %v11366_v49 = vld [vmem:[#allocation15 + $0x848] ss:$48 sps:$4 sm:$0xff]   ;;  %v11367_v56 = vld [vmem:[#allocation15 + $0x8a4] ss:$48 sps:$4 sm:$0xff]  }
 0x528   :  { %6334 = vmatprep.subr.bf16.mxu0 %v11332_v50  ;;  %v11368_v50 = vld [vmem:[#allocation15 + $0x8ac] ss:$48 sps:$4 sm:$0xff]  }
 0x52a   :  { %6253 = vmatpush1.bf16.msra.mxu1 %v11333_v33  ;;  %v11369_v33 = vld [vmem:[#allocation15 + $0x8a0] ss:$48 sps:$4 sm:$0xff]  }
 0x52b   :  { %6335 = vmatpush1.bf16.msra.mxu0 %v11334_v59  ;;  %6254 = vmatprep.subr.bf16.mxu1 %v11335_v3  ;;  %v11370_v59 = vld [vmem:[#allocation15 + $0x8a8] ss:$48 sps:$4 sm:$0xff]   ;;  %v11371_v3 = vld [vmem:[#allocation15 + $0x904] ss:$48 sps:$4 sm:$0xff]  }
 0x52c   :  { %6336 = vmatprep.subr.bf16.mxu0 %v11336_v9  ;;  %v11372_v9 = vld [vmem:[#allocation15 + $0x90c] ss:$48 sps:$4 sm:$0xff]  }
 0x52e   :  { %6255 = vmatpush1.bf16.msra.mxu1 %v11337_v63  ;;  %v11373_v63 = vld [vmem:[#allocation15 + $0x900] ss:$48 sps:$4 sm:$0xff]  }
 0x52f   :  { %6337 = vmatpush1.bf16.msra.mxu0 %v11338_v11  ;;  %6265 = vmatprep.subr.bf16.mxu1 %v11339_v12  ;;  %v11374_v11 = vld [vmem:[#allocation15 + $0x908] ss:$48 sps:$4 sm:$0xff]   ;;  %v11375_v12 = vld [vmem:[#allocation15 + $0x964] ss:$48 sps:$4 sm:$0xff]  }
 0x530   :  { %6347 = vmatprep.subr.bf16.mxu0 %v11340_v15  ;;  %v11376_v15 = vld [vmem:[#allocation15 + $0x96c] ss:$48 sps:$4 sm:$0xff]  }
 0x531   :  { %6257 = vmatmul.mubr.bf16.vlgmr.msra.gmra.mrb[20].mxu1 %v13331_v54 }
 0x532   :  { %6339 = vmatmul.mubr.bf16.vlgmr.msra.gmra.mrb[24].mxu0 %v13331_v54  ;;  %6266 = vmatpush1.bf16.msra.mxu1 %v11341_v62  ;;  %v11377_v62 = vld [vmem:[#allocation15 + $0x960] ss:$48 sps:$4 sm:$0xff]  }
 0x533   :  { %6297 = vmatprep.mubr.bf16.mxu1 %v13336_v41  ;;  %6348 = vmatpush1.bf16.msra.mxu0 %v11342_v13  ;;  %v11378_v13 = vld [vmem:[#allocation15 + $0x968] ss:$48 sps:$4 sm:$0xff]  }
 0x534   :  { %6379 = vmatprep.mubr.bf16.mxu0 %v13336_v41  ;;  %6267 = vmatprep.subr.bf16.mxu1 %v11343_v14  ;;  %v11379_v14 = vld [vmem:[#allocation15 + $0x9c4] ss:$48 sps:$4 sm:$0xff]  }
 0x535   :  { %6349 = vmatprep.subr.bf16.mxu0 %v11344_v16  ;;  %v11380_v16 = vld [vmem:[#allocation15 + $0x9cc] ss:$48 sps:$4 sm:$0xff]  }
 0x536   :  { %6268 = vmatpush1.bf16.msra.mxu1 %v11345_v20  ;;  %v11381_v20 = vld [vmem:[#allocation15 + $0x9c0] ss:$48 sps:$4 sm:$0xff]  }
 0x537   :  { %6350 = vmatpush1.bf16.msra.mxu0 %v11346_v44  ;;  %6269 = vmatprep.subr.bf16.mxu1 %v11347_v23  ;;  %v11382_v44 = vld [vmem:[#allocation15 + $0x9c8] ss:$48 sps:$4 sm:$0xff]   ;;  %v11383_v23 = vld [vmem:[#allocation15 + $0xa24] ss:$48 sps:$4 sm:$0xff]  }
 0x538   :  { %6351 = vmatprep.subr.bf16.mxu0 %v11348_v24  ;;  %v11384_v24 = vld [vmem:[#allocation15 + $0xa2c] ss:$48 sps:$4 sm:$0xff]  }
 0x53a   :  { %6270 = vmatpush1.bf16.msra.mxu1 %v11349_v4  ;;  %v11385_v4 = vld [vmem:[#allocation15 + $0xa20] ss:$48 sps:$4 sm:$0xff]  }
 0x53b   :  { %6352 = vmatpush1.bf16.msra.mxu0 %v11350_v25  ;;  %6271 = vmatprep.subr.bf16.mxu1 %v11351_v53  ;;  %v11386_v25 = vld [vmem:[#allocation15 + $0xa28] ss:$48 sps:$4 sm:$0xff]   ;;  %v11387_v53 = vld [vmem:[#allocation15 + $0xa84] ss:$48 sps:$4 sm:$0xff]  }
 0x53c   :  { %6353 = vmatprep.subr.bf16.mxu0 %v11352_v27  ;;  %v11388_v27 = vld [vmem:[#allocation15 + $0xa8c] ss:$48 sps:$4 sm:$0xff]  }
 0x53e   :  { %6272 = vmatpush1.bf16.msra.mxu1 %v11353_v57  ;;  %v11389_v57 = vld [vmem:[#allocation15 + $0xa80] ss:$48 sps:$4 sm:$0xff]  }
 0x53f   :  { %6354 = vmatpush1.bf16.msra.mxu0 %v11354_v38  ;;  %6273 = vmatprep.subr.bf16.mxu1 %v11355_v28  ;;  %v11390_v38 = vld [vmem:[#allocation15 + $0xa88] ss:$48 sps:$4 sm:$0xff]   ;;  %v11391_v28 = vld [vmem:[#allocation15 + $0xae4] ss:$48 sps:$4 sm:$0xff]  }
 0x540   :  { %6355 = vmatprep.subr.bf16.mxu0 %v11356_v8  ;;  %v11392_v8 = vld [vmem:[#allocation15 + $0xaec] ss:$48 sps:$4 sm:$0xff]  }
 0x542   :  { %6274 = vmatpush1.bf16.msra.mxu1 %v11357_v29  ;;  %v11393_v29 = vld [vmem:[#allocation15 + $0xae0] ss:$48 sps:$4 sm:$0xff]  }
 0x543   :  { %6356 = vmatpush1.bf16.msra.mxu0 %v11358_v30  ;;  %6275 = vmatprep.subr.bf16.mxu1 %v11359_v60  ;;  %v11394_v30 = vld [vmem:[#allocation15 + $0xae8] ss:$48 sps:$4 sm:$0xff]   ;;  %v11395_v60 = vld [vmem:[#allocation15 + $0xb44] ss:$48 sps:$4 sm:$0xff]  }
 0x544   :  { %6357 = vmatprep.subr.bf16.mxu0 %v11360_v51  ;;  %v11396_v51 = vld [vmem:[#allocation15 + $0xb4c] ss:$48 sps:$4 sm:$0xff]  }
 0x546   :  { %6276 = vmatpush1.bf16.msra.mxu1 %v11361_v55  ;;  %v11397_v55 = vld [vmem:[#allocation15 + $0xb40] ss:$48 sps:$4 sm:$0xff]  }
 0x547   :  { %6358 = vmatpush1.bf16.msra.mxu0 %v11362_v31  ;;  %6277 = vmatprep.subr.bf16.mxu1 %v11363_v42  ;;  %v11398_v31 = vld [vmem:[#allocation15 + $0xb48] ss:$48 sps:$4 sm:$0xff]   ;;  %v11399_v42 = vld [vmem:[#allocation15 + $0xba4] ss:$48 sps:$4 sm:$0xff]  }
 0x548   :  { %6359 = vmatprep.subr.bf16.mxu0 %v11364_v32  ;;  %v11400_v32 = vld [vmem:[#allocation15 + $0xbac] ss:$48 sps:$4 sm:$0xff]  }
 0x54a   :  { %6278 = vmatpush1.bf16.msra.mxu1 %v11365_v43  ;;  %v11401_v43 = vld [vmem:[#allocation15 + $0xba0] ss:$48 sps:$4 sm:$0xff]  }
 0x54b   :  { %6360 = vmatpush1.bf16.msra.mxu0 %v11366_v49  ;;  %6279 = vmatprep.subr.bf16.mxu1 %v11367_v56  ;;  %v11402_v49 = vld [vmem:[#allocation15 + $0xba8] ss:$48 sps:$4 sm:$0xff]   ;;  %v13343_v56 = vpack.c.bf16 %v13285_v21, %v13285_v21 }
 0x54c   :  { %6361 = vmatprep.subr.bf16.mxu0 %v11368_v50  ;;  %v11403_v50 = vld [vmem:[#allocation15 + $0x14] ss:$48 sps:$4 sm:$0xff]  }
 0x54e   :  { %6280 = vmatpush1.bf16.msra.mxu1 %v11369_v33  ;;  %v11404_v33 = vld [vmem:[#allocation15 + $0x1c] ss:$48 sps:$4 sm:$0xff]  }
 0x54f   :  { %6362 = vmatpush1.bf16.msra.mxu0 %v11370_v59  ;;  %6281 = vmatprep.subr.bf16.mxu1 %v11371_v3  ;;  %v11405_v59 = vld [vmem:[#allocation15 + $0x10] ss:$48 sps:$4 sm:$0xff]   ;;  %v11406_v3 = vld [vmem:[#allocation15 + $0x18] ss:$48 sps:$4 sm:$0xff]  }
 0x550   :  { %6363 = vmatprep.subr.bf16.mxu0 %v11372_v9  ;;  %v11407_v9 = vld [vmem:[#allocation15 + $0x74] ss:$48 sps:$4 sm:$0xff]  }
 0x552   :  { %6282 = vmatpush1.bf16.msra.mxu1 %v11373_v63  ;;  %v11408_v63 = vld [vmem:[#allocation15 + $0x7c] ss:$48 sps:$4 sm:$0xff]  }
 0x553   :  { %6364 = vmatpush1.bf16.msra.mxu0 %v11374_v11  ;;  %6283 = vmatprep.subr.bf16.mxu1 %v11375_v12  ;;  %v11409_v11 = vld [vmem:[#allocation15 + $0x70] ss:$48 sps:$4 sm:$0xff]   ;;  %v11410_v12 = vld [vmem:[#allocation15 + $0x78] ss:$48 sps:$4 sm:$0xff]  }
 0x554   :  { %6365 = vmatprep.subr.bf16.mxu0 %v11376_v15  ;;  %v11411_v15 = vld [vmem:[#allocation15 + $0xd4] ss:$48 sps:$4 sm:$0xff]  }
 0x556   :  { %6284 = vmatpush1.bf16.msra.mxu1 %v11377_v62  ;;  %v11412_v62 = vld [vmem:[#allocation15 + $0xdc] ss:$48 sps:$4 sm:$0xff]  }
 0x557   :  { %6366 = vmatpush1.bf16.msra.mxu0 %v11378_v13  ;;  %6285 = vmatprep.subr.bf16.mxu1 %v11379_v14  ;;  %v11413_v13 = vld [vmem:[#allocation15 + $0xd0] ss:$48 sps:$4 sm:$0xff]   ;;  %v11414_v14 = vld [vmem:[#allocation15 + $0xd8] ss:$48 sps:$4 sm:$0xff]  }
 0x558   :  { %6367 = vmatprep.subr.bf16.mxu0 %v11380_v16  ;;  %v11415_v16 = vld [vmem:[#allocation15 + $0x134] ss:$48 sps:$4 sm:$0xff]  }
 0x55a   :  { %6286 = vmatpush1.bf16.msra.mxu1 %v11381_v20  ;;  %v11416_v20 = vld [vmem:[#allocation15 + $0x13c] ss:$48 sps:$4 sm:$0xff]  }
 0x55b   :  { %6368 = vmatpush1.bf16.msra.mxu0 %v11382_v44  ;;  %6287 = vmatprep.subr.bf16.mxu1 %v11383_v23  ;;  %v11417_v44 = vld [vmem:[#allocation15 + $0x130] ss:$48 sps:$4 sm:$0xff]   ;;  %v11418_v23 = vld [vmem:[#allocation15 + $0x138] ss:$48 sps:$4 sm:$0xff]  }
 0x55c   :  { %6369 = vmatprep.subr.bf16.mxu0 %v11384_v24  ;;  %v11419_v24 = vld [vmem:[#allocation15 + $0x194] ss:$48 sps:$4 sm:$0xff]  }
 0x55e   :  { %6288 = vmatpush1.bf16.msra.mxu1 %v11385_v4  ;;  %v11420_v4 = vld [vmem:[#allocation15 + $0x19c] ss:$48 sps:$4 sm:$0xff]  }
 0x55f   :  { %6370 = vmatpush1.bf16.msra.mxu0 %v11386_v25  ;;  %6289 = vmatprep.subr.bf16.mxu1 %v11387_v53  ;;  %v11421_v25 = vld [vmem:[#allocation15 + $0x190] ss:$48 sps:$4 sm:$0xff]   ;;  %v11422_v53 = vld [vmem:[#allocation15 + $0x198] ss:$48 sps:$4 sm:$0xff]  }
 0x560   :  { %6371 = vmatprep.subr.bf16.mxu0 %v11388_v27  ;;  %v11423_v27 = vld [vmem:[#allocation15 + $0x1f4] ss:$48 sps:$4 sm:$0xff]  }
 0x562   :  { %6290 = vmatpush1.bf16.msra.mxu1 %v11389_v57  ;;  %v11424_v57 = vld [vmem:[#allocation15 + $0x1fc] ss:$48 sps:$4 sm:$0xff]  }
 0x563   :  { %6372 = vmatpush1.bf16.msra.mxu0 %v11390_v38  ;;  %6291 = vmatprep.subr.bf16.mxu1 %v11391_v28  ;;  %v11425_v28 = vld [vmem:[#allocation15 + $0x1f0] ss:$48 sps:$4 sm:$0xff]  }
 0x564   :  { %6373 = vmatprep.subr.bf16.mxu0 %v11392_v8 }
 0x566   :  { %6292 = vmatpush1.bf16.msra.mxu1 %v11393_v29  ;;  %v11426_v29 = vld [vmem:[#allocation15 + $0x1f8] ss:$48 sps:$4 sm:$0xff]  }
 0x567   :  { %6374 = vmatpush1.bf16.msra.mxu0 %v11394_v30  ;;  %6293 = vmatprep.subr.bf16.mxu1 %v11395_v60  ;;  %v11427_v30 = vld [vmem:[#allocation15 + $0x254] ss:$48 sps:$4 sm:$0xff]  }
 0x568   :  { %6375 = vmatprep.subr.bf16.mxu0 %v11396_v51  ;;  %v11428_v51 = vld [vmem:[#allocation15 + $0x25c] ss:$48 sps:$4 sm:$0xff]  }
 0x56a   :  { %6294 = vmatpush1.bf16.msra.mxu1 %v11397_v55 }
 0x56b   :  { %6376 = vmatpush1.bf16.msra.mxu0 %v11398_v31  ;;  %6295 = vmatprep.subr.bf16.mxu1 %v11399_v42  ;;  %v11429_v31 = vld [vmem:[#allocation15 + $0x250] ss:$48 sps:$4 sm:$0xff]   ;;  %v11430_v42 = vld [vmem:[#allocation15 + $0x258] ss:$48 sps:$4 sm:$0xff]  }
 0x56c   :  { %6377 = vmatprep.subr.bf16.mxu0 %v11400_v32  ;;  %v11431_v32 = vld [vmem:[#allocation15 + $0x2b4] ss:$48 sps:$4 sm:$0xff]  }
 0x56e   :  { %6296 = vmatpush1.bf16.msra.mxu1 %v11401_v43  ;;  %v11432_v43 = vld [vmem:[#allocation15 + $0x2bc] ss:$48 sps:$4 sm:$0xff]  }
 0x56f   :  { %6378 = vmatpush1.bf16.msra.mxu0 %v11402_v49  ;;  %6388 = vmatprep.subr.bf16.mxu1 %v11403_v50  ;;  %v11433_v49 = vld [vmem:[#allocation15 + $0x2b0] ss:$48 sps:$4 sm:$0xff]   ;;  %v11434_v50 = vld [vmem:[#allocation15 + $0x2b8] ss:$48 sps:$4 sm:$0xff]  }
 0x570   :  { %6470 = vmatprep.subr.bf16.mxu0 %v11404_v33  ;;  %v11435_v33 = vld [vmem:[#allocation15 + $0x314] ss:$48 sps:$4 sm:$0xff]  }
 0x571   :  { %6298 = vmatmul.mubr.bf16.vlgmr.msra.gmra.mrb[20].mxu1 %v13343_v56 }
 0x572   :  { %6380 = vmatmul.mubr.bf16.vlgmr.msra.gmra.mrb[24].mxu0 %v13343_v56  ;;  %6389 = vmatpush1.bf16.msra.mxu1 %v11405_v59  ;;  %v11436_v59 = vld [vmem:[#allocation15 + $0x31c] ss:$48 sps:$4 sm:$0xff]  }
 0x573   :  { %6420 = vmatprep.mubr.bf16.mxu1 %v13324_v26  ;;  %6471 = vmatpush1.bf16.msra.mxu0 %v11406_v3  ;;  %v11437_v3 = vld [vmem:[#allocation15 + $0x310] ss:$48 sps:$4 sm:$0xff]  }
 0x574   :  { %6502 = vmatprep.mubr.bf16.mxu0 %v13324_v26  ;;  %6390 = vmatprep.subr.bf16.mxu1 %v11407_v9  ;;  %v11438_v9 = vld [vmem:[#allocation15 + $0x318] ss:$48 sps:$4 sm:$0xff]  }
 0x575   :  { %6472 = vmatprep.subr.bf16.mxu0 %v11408_v63  ;;  %v11439_v63 = vld [vmem:[#allocation15 + $0x374] ss:$48 sps:$4 sm:$0xff]  }
 0x576   :  { %6391 = vmatpush1.bf16.msra.mxu1 %v11409_v11  ;;  %v11440_v11 = vld [vmem:[#allocation15 + $0x37c] ss:$48 sps:$4 sm:$0xff]  }
 0x577   :  { %6473 = vmatpush1.bf16.msra.mxu0 %v11410_v12  ;;  %6392 = vmatprep.subr.bf16.mxu1 %v11411_v15  ;;  %v11441_v12 = vld [vmem:[#allocation15 + $0x370] ss:$48 sps:$4 sm:$0xff]   ;;  %v11442_v15 = vld [vmem:[#allocation15 + $0x378] ss:$48 sps:$4 sm:$0xff]  }
 0x578   :  { %6474 = vmatprep.subr.bf16.mxu0 %v11412_v62  ;;  %v11443_v62 = vld [vmem:[#allocation15 + $0x3d4] ss:$48 sps:$4 sm:$0xff]  }
 0x57a   :  { %6393 = vmatpush1.bf16.msra.mxu1 %v11413_v13  ;;  %v11444_v13 = vld [vmem:[#allocation15 + $0x3dc] ss:$48 sps:$4 sm:$0xff]  }
 0x57b   :  { %6475 = vmatpush1.bf16.msra.mxu0 %v11414_v14  ;;  %6394 = vmatprep.subr.bf16.mxu1 %v11415_v16  ;;  %v11445_v14 = vld [vmem:[#allocation15 + $0x3d0] ss:$48 sps:$4 sm:$0xff]   ;;  %v11446_v16 = vld [vmem:[#allocation15 + $0x3d8] ss:$48 sps:$4 sm:$0xff]  }
 0x57c   :  { %6476 = vmatprep.subr.bf16.mxu0 %v11416_v20  ;;  %v11447_v20 = vld [vmem:[#allocation15 + $0x434] ss:$48 sps:$4 sm:$0xff]  }
 0x57e   :  { %6395 = vmatpush1.bf16.msra.mxu1 %v11417_v44  ;;  %v11448_v44 = vld [vmem:[#allocation15 + $0x43c] ss:$48 sps:$4 sm:$0xff]  }
 0x57f   :  { %6477 = vmatpush1.bf16.msra.mxu0 %v11418_v23  ;;  %6396 = vmatprep.subr.bf16.mxu1 %v11419_v24  ;;  %v11449_v23 = vld [vmem:[#allocation15 + $0x430] ss:$48 sps:$4 sm:$0xff]   ;;  %v11450_v24 = vld [vmem:[#allocation15 + $0x438] ss:$48 sps:$4 sm:$0xff]  }
 0x580   :  { %6478 = vmatprep.subr.bf16.mxu0 %v11420_v4  ;;  %v11451_v4 = vld [vmem:[#allocation15 + $0x494] ss:$48 sps:$4 sm:$0xff]  }
 0x582   :  { %6397 = vmatpush1.bf16.msra.mxu1 %v11421_v25  ;;  %v11452_v25 = vld [vmem:[#allocation15 + $0x49c] ss:$48 sps:$4 sm:$0xff]  }
 0x583   :  { %6479 = vmatpush1.bf16.msra.mxu0 %v11422_v53  ;;  %6398 = vmatprep.subr.bf16.mxu1 %v11423_v27  ;;  %v11453_v53 = vld [vmem:[#allocation15 + $0x490] ss:$48 sps:$4 sm:$0xff]   ;;  %v11454_v27 = vld [vmem:[#allocation15 + $0x498] ss:$48 sps:$4 sm:$0xff]  }
 0x584   :  { %6480 = vmatprep.subr.bf16.mxu0 %v11424_v57  ;;  %v11455_v57 = vld [vmem:[#allocation15 + $0x4f4] ss:$48 sps:$4 sm:$0xff]  }
 0x585   :  { %v13349_v38 = vpop.f32.mrb[32].mxu0 }
 0x586   :  { %6399 = vmatpush1.bf16.msra.mxu1 %v11425_v28  ;;  %v13351_v8 = vpop.f32.mrb[33].mxu0 }
 0x587   :  { %6481 = vmatpush1.bf16.msra.mxu0 %v11426_v29  ;;  %6400 = vmatprep.subr.bf16.mxu1 %v11427_v30  ;;  %v6135_v60 = vpop.f32.mrb[34].mxu0  ;;  %v11456_v29 = vld [vmem:[#allocation15 + $0x4fc] ss:$48 sps:$4 sm:$0xff]  }
 0x588   :  { %6482 = vmatprep.subr.bf16.mxu0 %v11428_v51  ;;  %v6136_v55 = vpop.f32.mrb[35].mxu0 }
 0x58a   :  { %6401 = vmatpush1.bf16.msra.mxu1 %v11429_v31  ;;  %v11457_v31 = vld [vmem:[#allocation15 + $0x4f0] ss:$48 sps:$4 sm:$0xff]  }
 0x58b   :  { %6483 = vmatpush1.bf16.msra.mxu0 %v11430_v42  ;;  %6402 = vmatprep.subr.bf16.mxu1 %v11431_v32  ;;  %v11458_v32 = vld [vmem:[#allocation15 + $0x4f8] ss:$48 sps:$4 sm:$0xff]  }
 0x58c   :  { %6484 = vmatprep.subr.bf16.mxu0 %v11432_v43 }
 0x58e   :  { %6403 = vmatpush1.bf16.msra.mxu1 %v11433_v49  ;;  %v11459_v49 = vld [vmem:[#allocation15 + $0x554] ss:$48 sps:$4 sm:$0xff]  }
 0x58f   :  { %6485 = vmatpush1.bf16.msra.mxu0 %v11434_v50  ;;  %6404 = vmatprep.subr.bf16.mxu1 %v11435_v33  ;;  %v11460_v33 = vld [vmem:[#allocation15 + $0x55c] ss:$48 sps:$4 sm:$0xff]  }
 0x590   :  { %6486 = vmatprep.subr.bf16.mxu0 %v11436_v59  ;;  %v11461_v59 = vld [vmem:[#allocation15 + $0x550] ss:$48 sps:$4 sm:$0xff]  }
 0x592   :  { %6405 = vmatpush1.bf16.msra.mxu1 %v11437_v3  ;;  %v11462_v3 = vld [vmem:[#allocation15 + $0x558] ss:$48 sps:$4 sm:$0xff]  }
 0x593   :  { %6487 = vmatpush1.bf16.msra.mxu0 %v11438_v9  ;;  %6406 = vmatprep.subr.bf16.mxu1 %v11439_v63  ;;  %v11463_v9 = vld [vmem:[#allocation15 + $0x5b4] ss:$48 sps:$4 sm:$0xff]   ;;  %v11464_v63 = vld [vmem:[#allocation15 + $0x5bc] ss:$48 sps:$4 sm:$0xff]  }
 0x594   :  { %6488 = vmatprep.subr.bf16.mxu0 %v11440_v11  ;;  %v11466_v11 = vld [vmem:[#allocation15 + $0x5b8] ss:$48 sps:$4 sm:$0xff]  }
 0x596   :  { %6407 = vmatpush1.bf16.msra.mxu1 %v11441_v12  ;;  %v11467_v12 = vld [vmem:[#allocation15 + $0x614] ss:$48 sps:$4 sm:$0xff]  }
 0x597   :  { %6489 = vmatpush1.bf16.msra.mxu0 %v11442_v15  ;;  %6408 = vmatprep.subr.bf16.mxu1 %v11443_v62  ;;  %v11468_v15 = vld [vmem:[#allocation15 + $0x61c] ss:$48 sps:$4 sm:$0xff]   ;;  %v11470_v62 = vld [vmem:[#allocation15 + $0x618] ss:$48 sps:$4 sm:$0xff]  }
 0x598   :  { %6490 = vmatprep.subr.bf16.mxu0 %v11444_v13  ;;  %v11471_v13 = vld [vmem:[#allocation15 + $0x674] ss:$48 sps:$4 sm:$0xff]  }
 0x59a   :  { %6409 = vmatpush1.bf16.msra.mxu1 %v11445_v14  ;;  %v11472_v14 = vld [vmem:[#allocation15 + $0x67c] ss:$48 sps:$4 sm:$0xff]  }
 0x59b   :  { %6491 = vmatpush1.bf16.msra.mxu0 %v11446_v16  ;;  %6410 = vmatprep.subr.bf16.mxu1 %v11447_v20  ;;  %v11473_v16 = vld [vmem:[#allocation15 + $0x670] ss:$48 sps:$4 sm:$0xff]   ;;  %v11474_v20 = vld [vmem:[#allocation15 + $0x678] ss:$48 sps:$4 sm:$0xff]  }
 0x59c   :  { %6492 = vmatprep.subr.bf16.mxu0 %v11448_v44  ;;  %v11475_v44 = vld [vmem:[#allocation15 + $0x6d4] ss:$48 sps:$4 sm:$0xff]  }
 0x59e   :  { %6411 = vmatpush1.bf16.msra.mxu1 %v11449_v23  ;;  %v11476_v23 = vld [vmem:[#allocation15 + $0x6dc] ss:$48 sps:$4 sm:$0xff]  }
 0x59f   :  { %6493 = vmatpush1.bf16.msra.mxu0 %v11450_v24  ;;  %6412 = vmatprep.subr.bf16.mxu1 %v11451_v4  ;;  %v11477_v24 = vld [vmem:[#allocation15 + $0x6d0] ss:$48 sps:$4 sm:$0xff]   ;;  %v11478_v4 = vld [vmem:[#allocation15 + $0x6d8] ss:$48 sps:$4 sm:$0xff]  }
 0x5a0   :  { %6494 = vmatprep.subr.bf16.mxu0 %v11452_v25  ;;  %v11479_v25 = vld [vmem:[#allocation15 + $0x734] ss:$48 sps:$4 sm:$0xff]  }
 0x5a2   :  { %6413 = vmatpush1.bf16.msra.mxu1 %v11453_v53  ;;  %v11480_v53 = vld [vmem:[#allocation15 + $0x73c] ss:$48 sps:$4 sm:$0xff]  }
 0x5a3   :  { %6495 = vmatpush1.bf16.msra.mxu0 %v11454_v27  ;;  %6414 = vmatprep.subr.bf16.mxu1 %v11455_v57  ;;  %v11481_v27 = vld [vmem:[#allocation15 + $0x730] ss:$48 sps:$4 sm:$0xff]   ;;  %v11482_v57 = vld [vmem:[#allocation15 + $0x738] ss:$48 sps:$4 sm:$0xff]  }
 0x5a4   :  { %v6090_v28 = vpop.f32.mrb[28].mxu1  ;;  %6496 = vmatprep.subr.bf16.mxu0 %v11456_v29  ;;  %v11484_v29 = vld [vmem:[#allocation15 + $0x79c] ss:$48 sps:$4 sm:$0xff]  }
 0x5a5   :  { %v6091_v30 = vadd.f32 %v6090_v28, %v13244_v34  ;;  %v6092_v60 = vpop.f32.mrb[29].mxu1  ;;  %v11483_v28 = vld [vmem:[#allocation15 + $0x794] ss:$48 sps:$4 sm:$0xff]  }
 0x5a6   :  { %v6093_v51 = vadd.f32 %v6092_v60, %v13262_v10  ;;  %v6094_v55 = vpop.f32.mrb[30].mxu1  ;;  %6415 = vmatpush1.bf16.msra.mxu1 %v11457_v31  ;;  %v11486_v60 = vld [vmem:[#allocation15 + $0x798] ss:$48 sps:$4 sm:$0xff]   ;;  %v11488_v31 = vld [vmem:[#allocation15 + $0x7fc] ss:$48 sps:$4 sm:$0xff]  }
 0x5a7   :  { %v13356_v42 = vadd.f32 %v13349_v38, %v6091_v30  ;;  %6497 = vmatpush1.bf16.msra.mxu0 %v11458_v32  ;;  %v6095_v43 = vpop.f32.mrb[31].mxu1  ;;  %6416 = vmatprep.subr.bf16.mxu1 %v11459_v49  ;;  %v11465_v38 = vld [vmem:[#allocation15 + $0x5b0] ss:$48 sps:$4 sm:$0xff]  }
 0x5a8   :  { %v13359_v50 = vadd.f32 %v13351_v8, %v6093_v51  ;;  %6498 = vmatprep.subr.bf16.mxu0 %v11460_v33  ;;  %v11469_v8 = vld [vmem:[#allocation15 + $0x610] ss:$48 sps:$4 sm:$0xff]   ;;  %v11487_v51 = vld [vmem:[#allocation15 + $0x7f4] ss:$48 sps:$4 sm:$0xff]  }
 0x5a9   :  { %v11485_v30 = vld [vmem:[#allocation15 + $0x790] ss:$48 sps:$4 sm:$0xff]  }
 0x5aa   :  { %6417 = vmatpush1.bf16.msra.mxu1 %v11461_v59 }
 0x5ab   :  { %6499 = vmatpush1.bf16.msra.mxu0 %v11462_v3  ;;  %6418 = vmatprep.subr.bf16.mxu1 %v11463_v9  ;;  %v11489_v3 = vld [vmem:[#allocation15 + $0x7f0] ss:$48 sps:$4 sm:$0xff]  }
 0x5ac   :  { %6500 = vmatprep.subr.bf16.mxu0 %v11464_v63 }
 0x5ae   :  { %6419 = vmatpush1.bf16.msra.mxu1 %v11465_v38  ;;  %v11490_v38 = vld [vmem:[#allocation15 + $0x7f8] ss:$48 sps:$4 sm:$0xff]  }
 0x5af   :  { %6501 = vmatpush1.bf16.msra.mxu0 %v11466_v11  ;;  %6429 = vmatprep.subr.bf16.mxu1 %v11467_v12  ;;  %v11491_v12 = vld [vmem:[#allocation15 + $0x854] ss:$48 sps:$4 sm:$0xff]  }
 0x5b0   :  { %6511 = vmatprep.subr.bf16.mxu0 %v11468_v15 }
 0x5b1   :  { %6421 = vmatmul.mubr.bf16.vlgmr.msra.gmra.mrb[24].mxu1 %v13331_v54 }
 0x5b2   :  { %6503 = vmatmul.mubr.bf16.vlgmr.msra.gmra.mrb[28].mxu0 %v13331_v54  ;;  %6430 = vmatpush1.bf16.msra.mxu1 %v11469_v8 }
 0x5b3   :  { %6461 = vmatprep.mubr.bf16.mxu1 %v13336_v41  ;;  %6512 = vmatpush1.bf16.msra.mxu0 %v11470_v62  ;;  %v11492_v62 = vld [vmem:[#allocation15 + $0x85c] ss:$48 sps:$4 sm:$0xff]  }
 0x5b4   :  { %6543 = vmatprep.mubr.bf16.mxu0 %v13336_v41  ;;  %6431 = vmatprep.subr.bf16.mxu1 %v11471_v13 }
 0x5b5   :  { %6513 = vmatprep.subr.bf16.mxu0 %v11472_v14  ;;  %v11493_v14 = vld [vmem:[#allocation15 + $0x850] ss:$48 sps:$4 sm:$0xff]  }
 0x5b6   :  { %6432 = vmatpush1.bf16.msra.mxu1 %v11473_v16  ;;  %v11494_v16 = vld [vmem:[#allocation15 + $0x858] ss:$48 sps:$4 sm:$0xff]  }
 0x5b7   :  { %6514 = vmatpush1.bf16.msra.mxu0 %v11474_v20  ;;  %6433 = vmatprep.subr.bf16.mxu1 %v11475_v44  ;;  %v11495_v20 = vld [vmem:[#allocation15 + $0x8b4] ss:$48 sps:$4 sm:$0xff]   ;;  %v11496_v44 = vld [vmem:[#allocation15 + $0x8bc] ss:$48 sps:$4 sm:$0xff]  }
 0x5b8   :  { %6515 = vmatprep.subr.bf16.mxu0 %v11476_v23  ;;  %v11497_v23 = vld [vmem:[#allocation15 + $0x8b0] ss:$48 sps:$4 sm:$0xff]  }
 0x5ba   :  { %6434 = vmatpush1.bf16.msra.mxu1 %v11477_v24  ;;  %v11498_v24 = vld [vmem:[#allocation15 + $0x8b8] ss:$48 sps:$4 sm:$0xff]  }
 0x5bb   :  { %6516 = vmatpush1.bf16.msra.mxu0 %v11478_v4  ;;  %6435 = vmatprep.subr.bf16.mxu1 %v11479_v25  ;;  %v11499_v4 = vld [vmem:[#allocation15 + $0x914] ss:$48 sps:$4 sm:$0xff]   ;;  %v11500_v25 = vld [vmem:[#allocation15 + $0x91c] ss:$48 sps:$4 sm:$0xff]  }
 0x5bc   :  { %6517 = vmatprep.subr.bf16.mxu0 %v11480_v53  ;;  %v11501_v53 = vld [vmem:[#allocation15 + $0x910] ss:$48 sps:$4 sm:$0xff]  }
 0x5be   :  { %6436 = vmatpush1.bf16.msra.mxu1 %v11481_v27  ;;  %v11502_v27 = vld [vmem:[#allocation15 + $0x918] ss:$48 sps:$4 sm:$0xff]  }
 0x5bf   :  { %6518 = vmatpush1.bf16.msra.mxu0 %v11482_v57  ;;  %6437 = vmatprep.subr.bf16.mxu1 %v11483_v28  ;;  %v11503_v57 = vld [vmem:[#allocation15 + $0x974] ss:$48 sps:$4 sm:$0xff]   ;;  %v11504_v28 = vld [vmem:[#allocation15 + $0x97c] ss:$48 sps:$4 sm:$0xff]  }
 0x5c0   :  { %6519 = vmatprep.subr.bf16.mxu0 %v11484_v29  ;;  %v11505_v29 = vld [vmem:[#allocation15 + $0x970] ss:$48 sps:$4 sm:$0xff]  }
 0x5c2   :  { %6438 = vmatpush1.bf16.msra.mxu1 %v11485_v30  ;;  %v11506_v30 = vld [vmem:[#allocation15 + $0x978] ss:$48 sps:$4 sm:$0xff]  }
 0x5c3   :  { %6520 = vmatpush1.bf16.msra.mxu0 %v11486_v60  ;;  %6439 = vmatprep.subr.bf16.mxu1 %v11487_v51  ;;  %v11507_v60 = vld [vmem:[#allocation15 + $0x9d4] ss:$48 sps:$4 sm:$0xff]   ;;  %v11508_v51 = vld [vmem:[#allocation15 + $0x9dc] ss:$48 sps:$4 sm:$0xff]  }
 0x5c4   :  { %v6213_v55 = vpop.f32.mrb[32].mxu1  ;;  %6521 = vmatprep.subr.bf16.mxu0 %v11488_v31  ;;  %v11510_v31 = vld [vmem:[#allocation15 + $0x9d8] ss:$48 sps:$4 sm:$0xff]  }
 0x5c5   :  { %v6172_v32 = vpop.f32.mrb[36].mxu0  ;;  %v6215_v43 = vpop.f32.mrb[33].mxu1 }
 0x5c6   :  { %v6173_v49 = vadd.f32 %v6172_v32, %v13253_v5  ;;  %v6174_v33 = vpop.f32.mrb[37].mxu0  ;;  %v6217_v59 = vpop.f32.mrb[34].mxu1  ;;  %6440 = vmatpush1.bf16.msra.mxu1 %v11489_v3  ;;  %v11511_v32 = vld [vmem:[#allocation15 + $0xa34] ss:$48 sps:$4 sm:$0xff]   ;;  %v11516_v3 = vld [vmem:[#allocation15 + $0xa9c] ss:$48 sps:$4 sm:$0xff]  }
 0x5c7   :  { %v6175_v9 = vadd.f32 %v6174_v33, %v13265_v40  ;;  %v6176_v63 = vpop.f32.mrb[38].mxu0  ;;  %6522 = vmatpush1.bf16.msra.mxu0 %v11490_v38  ;;  %v6218_v11 = vpop.f32.mrb[35].mxu1  ;;  %6441 = vmatprep.subr.bf16.mxu1 %v11491_v12  ;;  %v11514_v33 = vld [vmem:[#allocation15 + $0xa38] ss:$48 sps:$4 sm:$0xff]   ;;  %v11515_v59 = vld [vmem:[#allocation15 + $0xa94] ss:$48 sps:$4 sm:$0xff]  }
 0x5c8   :  { %v13367_v15 = vadd.f32 %v6213_v55, %v6173_v49  ;;  %v6177_v8 = vpop.f32.mrb[39].mxu0  ;;  %6523 = vmatprep.subr.bf16.mxu0 %v11492_v62  ;;  %v11509_v55 = vld [vmem:[#allocation15 + $0x9d0] ss:$48 sps:$4 sm:$0xff]   ;;  %v11518_v63 = vld [vmem:[#allocation15 + $0xa98] ss:$48 sps:$4 sm:$0xff]  }
 0x5c9   :  { %v13369_v13 = vadd.f32 %v6215_v43, %v6175_v9  ;;  %v11512_v43 = vld [vmem:[#allocation15 + $0xa3c] ss:$48 sps:$4 sm:$0xff]   ;;  %v11513_v49 = vld [vmem:[#allocation15 + $0xa30] ss:$48 sps:$4 sm:$0xff]   ;;  %v11519_v38 = vld [vmem:[#allocation15 + $0xaf4] ss:$48 sps:$4 sm:$0xff]  }
 0x5ca   :  { %6442 = vmatpush1.bf16.msra.mxu1 %v11493_v14  ;;  %v11517_v9 = vld [vmem:[#allocation15 + $0xa90] ss:$48 sps:$4 sm:$0xff]   ;;  %v11520_v11 = vld [vmem:[#allocation15 + $0xafc] ss:$48 sps:$4 sm:$0xff]   ;;  %v11522_v8 = vld [vmem:[#allocation15 + $0xaf8] ss:$48 sps:$4 sm:$0xff]  }
 0x5cb   :  { %6524 = vmatpush1.bf16.msra.mxu0 %v11494_v16  ;;  %6443 = vmatprep.subr.bf16.mxu1 %v11495_v20  ;;  %v11521_v12 = vld [vmem:[#allocation15 + $0xaf0] ss:$48 sps:$4 sm:$0xff]   ;;  %v11523_v62 = vld [vmem:[#allocation15 + $0xb54] ss:$48 sps:$4 sm:$0xff]   ;;  %v11524_v14 = vld [vmem:[#allocation15 + $0xb5c] ss:$48 sps:$4 sm:$0xff]  }
 0x5cc   :  { %6525 = vmatprep.subr.bf16.mxu0 %v11496_v44  ;;  %v11525_v16 = vld [vmem:[#allocation15 + $0xb50] ss:$48 sps:$4 sm:$0xff]   ;;  %v11526_v20 = vld [vmem:[#allocation15 + $0xb58] ss:$48 sps:$4 sm:$0xff]   ;;  %v11527_v44 = vld [vmem:[#allocation15 + $0xbb4] ss:$48 sps:$4 sm:$0xff]  }
 0x5ce   :  { %6444 = vmatpush1.bf16.msra.mxu1 %v11497_v23  ;;  %v11528_v23 = vld [vmem:[#allocation15 + $0xbbc] ss:$48 sps:$4 sm:$0xff]  }
 0x5cf   :  { %6526 = vmatpush1.bf16.msra.mxu0 %v11498_v24  ;;  %6445 = vmatprep.subr.bf16.mxu1 %v11499_v4  ;;  %v11529_v24 = vld [vmem:[#allocation15 + $0xbb0] ss:$48 sps:$4 sm:$0xff]   ;;  %v11530_v4 = vld [vmem:[#allocation15 + $0xbb8] ss:$48 sps:$4 sm:$0xff]  }
 0x5d0   :  { %6527 = vmatprep.subr.bf16.mxu0 %v11500_v25  ;;  %v11531_v25 = vld [vmem:[#allocation15 + $0x24] ss:$48 sps:$4 sm:$0xff]  }
 0x5d2   :  { %6446 = vmatpush1.bf16.msra.mxu1 %v11501_v53  ;;  %v11532_v53 = vld [vmem:[#allocation15 + $0x2c] ss:$48 sps:$4 sm:$0xff]  }
 0x5d3   :  { %6528 = vmatpush1.bf16.msra.mxu0 %v11502_v27  ;;  %6447 = vmatprep.subr.bf16.mxu1 %v11503_v57  ;;  %v11533_v27 = vld [vmem:[#allocation15 + $0x20] ss:$48 sps:$4 sm:$0xff]   ;;  %v11534_v57 = vld [vmem:[#allocation15 + $0x28] ss:$48 sps:$4 sm:$0xff]  }
 0x5d4   :  { %6529 = vmatprep.subr.bf16.mxu0 %v11504_v28  ;;  %v11535_v28 = vld [vmem:[#allocation15 + $0x84] ss:$48 sps:$4 sm:$0xff]  }
 0x5d6   :  { %6448 = vmatpush1.bf16.msra.mxu1 %v11505_v29  ;;  %v11536_v29 = vld [vmem:[#allocation15 + $0x8c] ss:$48 sps:$4 sm:$0xff]  }
 0x5d7   :  { %6530 = vmatpush1.bf16.msra.mxu0 %v11506_v30  ;;  %6449 = vmatprep.subr.bf16.mxu1 %v11507_v60  ;;  %v11537_v30 = vld [vmem:[#allocation15 + $0x80] ss:$48 sps:$4 sm:$0xff]   ;;  %v11538_v60 = vld [vmem:[#allocation15 + $0x88] ss:$48 sps:$4 sm:$0xff]  }
 0x5d8   :  { %6531 = vmatprep.subr.bf16.mxu0 %v11508_v51  ;;  %v11539_v51 = vld [vmem:[#allocation15 + $0xe4] ss:$48 sps:$4 sm:$0xff]  }
 0x5da   :  { %6450 = vmatpush1.bf16.msra.mxu1 %v11509_v55  ;;  %v11540_v55 = vld [vmem:[#allocation15 + $0xec] ss:$48 sps:$4 sm:$0xff]  }
 0x5db   :  { %6532 = vmatpush1.bf16.msra.mxu0 %v11510_v31  ;;  %6451 = vmatprep.subr.bf16.mxu1 %v11511_v32  ;;  %v11541_v31 = vld [vmem:[#allocation15 + $0xe0] ss:$48 sps:$4 sm:$0xff]   ;;  %v11542_v32 = vld [vmem:[#allocation15 + $0xe8] ss:$48 sps:$4 sm:$0xff]  }
 0x5dc   :  { %6533 = vmatprep.subr.bf16.mxu0 %v11512_v43  ;;  %v11543_v43 = vld [vmem:[#allocation15 + $0x144] ss:$48 sps:$4 sm:$0xff]  }
 0x5de   :  { %6452 = vmatpush1.bf16.msra.mxu1 %v11513_v49  ;;  %v11544_v49 = vld [vmem:[#allocation15 + $0x14c] ss:$48 sps:$4 sm:$0xff]  }
 0x5df   :  { %6534 = vmatpush1.bf16.msra.mxu0 %v11514_v33  ;;  %6453 = vmatprep.subr.bf16.mxu1 %v11515_v59  ;;  %v11546_v33 = vld [vmem:[#allocation15 + $0x148] ss:$48 sps:$4 sm:$0xff]   ;;  %v11547_v59 = vld [vmem:[#allocation15 + $0x1a4] ss:$48 sps:$4 sm:$0xff]  }
 0x5e0   :  { %6535 = vmatprep.subr.bf16.mxu0 %v11516_v3  ;;  %v11548_v3 = vld [vmem:[#allocation15 + $0x1ac] ss:$48 sps:$4 sm:$0xff]  }
 0x5e2   :  { %6454 = vmatpush1.bf16.msra.mxu1 %v11517_v9  ;;  %v11549_v9 = vld [vmem:[#allocation15 + $0x1a0] ss:$48 sps:$4 sm:$0xff]  }
 0x5e3   :  { %6536 = vmatpush1.bf16.msra.mxu0 %v11518_v63  ;;  %6455 = vmatprep.subr.bf16.mxu1 %v11519_v38  ;;  %v11550_v63 = vld [vmem:[#allocation15 + $0x1a8] ss:$48 sps:$4 sm:$0xff]   ;;  %v11551_v38 = vld [vmem:[#allocation15 + $0x204] ss:$48 sps:$4 sm:$0xff]  }
 0x5e4   :  { %6537 = vmatprep.subr.bf16.mxu0 %v11520_v11  ;;  %v11552_v11 = vld [vmem:[#allocation15 + $0x20c] ss:$48 sps:$4 sm:$0xff]  }
 0x5e6   :  { %6456 = vmatpush1.bf16.msra.mxu1 %v11521_v12  ;;  %v11553_v12 = vld [vmem:[#allocation15 + $0x200] ss:$48 sps:$4 sm:$0xff]  }
 0x5e7   :  { %6538 = vmatpush1.bf16.msra.mxu0 %v11522_v8  ;;  %6457 = vmatprep.subr.bf16.mxu1 %v11523_v62  ;;  %v11554_v8 = vld [vmem:[#allocation15 + $0x208] ss:$48 sps:$4 sm:$0xff]   ;;  %v11555_v62 = vld [vmem:[#allocation15 + $0x264] ss:$48 sps:$4 sm:$0xff]  }
 0x5e8   :  { %6539 = vmatprep.subr.bf16.mxu0 %v11524_v14  ;;  %v11556_v14 = vld [vmem:[#allocation15 + $0x26c] ss:$48 sps:$4 sm:$0xff]  }
 0x5ea   :  { %6458 = vmatpush1.bf16.msra.mxu1 %v11525_v16  ;;  %v11557_v16 = vld [vmem:[#allocation15 + $0x260] ss:$48 sps:$4 sm:$0xff]  }
 0x5eb   :  { %6540 = vmatpush1.bf16.msra.mxu0 %v11526_v20  ;;  %6459 = vmatprep.subr.bf16.mxu1 %v11527_v44  ;;  %v11558_v20 = vld [vmem:[#allocation15 + $0x268] ss:$48 sps:$4 sm:$0xff]   ;;  %v11559_v44 = vld [vmem:[#allocation15 + $0x2c4] ss:$48 sps:$4 sm:$0xff]  }
 0x5ec   :  { %6541 = vmatprep.subr.bf16.mxu0 %v11528_v23  ;;  %v11560_v23 = vld [vmem:[#allocation15 + $0x2cc] ss:$48 sps:$4 sm:$0xff]  }
 0x5ee   :  { %6460 = vmatpush1.bf16.msra.mxu1 %v11529_v24  ;;  %v11561_v24 = vld [vmem:[#allocation15 + $0x2c0] ss:$48 sps:$4 sm:$0xff]  }
 0x5ef   :  { %6542 = vmatpush1.bf16.msra.mxu0 %v11530_v4  ;;  %6552 = vmatprep.subr.bf16.mxu1 %v11531_v25  ;;  %v11562_v4 = vld [vmem:[#allocation15 + $0x2c8] ss:$48 sps:$4 sm:$0xff]   ;;  %v11563_v25 = vld [vmem:[#allocation15 + $0x324] ss:$48 sps:$4 sm:$0xff]  }
 0x5f0   :  { %6634 = vmatprep.subr.bf16.mxu0 %v11532_v53  ;;  %v11564_v53 = vld [vmem:[#allocation15 + $0x32c] ss:$48 sps:$4 sm:$0xff]  }
 0x5f1   :  { %6462 = vmatmul.mubr.bf16.vlgmr.msra.gmra.mrb[24].mxu1 %v13343_v56 }
 0x5f2   :  { %6544 = vmatmul.mubr.bf16.vlgmr.msra.gmra.mrb[28].mxu0 %v13343_v56  ;;  %6553 = vmatpush1.bf16.msra.mxu1 %v11533_v27  ;;  %v11565_v27 = vld [vmem:[#allocation15 + $0x320] ss:$48 sps:$4 sm:$0xff]  }
 0x5f3   :  { %6584 = vmatprep.mubr.bf16.mxu1 %v13324_v26  ;;  %6635 = vmatpush1.bf16.msra.mxu0 %v11534_v57  ;;  %v11566_v57 = vld [vmem:[#allocation15 + $0x328] ss:$48 sps:$4 sm:$0xff]  }
 0x5f4   :  { %6666 = vmatprep.mubr.bf16.mxu0 %v13324_v26  ;;  %6554 = vmatprep.subr.bf16.mxu1 %v11535_v28  ;;  %v11545_v26 = vld [vmem:[#allocation15 + $0x140] ss:$48 sps:$4 sm:$0xff]   ;;  %v11567_v28 = vld [vmem:[#allocation15 + $0x384] ss:$48 sps:$4 sm:$0xff]  }
 0x5f5   :  { %6636 = vmatprep.subr.bf16.mxu0 %v11536_v29  ;;  %v11568_v29 = vld [vmem:[#allocation15 + $0x38c] ss:$48 sps:$4 sm:$0xff]  }
 0x5f6   :  { %6555 = vmatpush1.bf16.msra.mxu1 %v11537_v30  ;;  %v11569_v30 = vld [vmem:[#allocation15 + $0x380] ss:$48 sps:$4 sm:$0xff]  }
 0x5f7   :  { %6637 = vmatpush1.bf16.msra.mxu0 %v11538_v60  ;;  %6556 = vmatprep.subr.bf16.mxu1 %v11539_v51  ;;  %v11570_v60 = vld [vmem:[#allocation15 + $0x388] ss:$48 sps:$4 sm:$0xff]   ;;  %v11571_v51 = vld [vmem:[#allocation15 + $0x3e4] ss:$48 sps:$4 sm:$0xff]  }
 0x5f8   :  { %6638 = vmatprep.subr.bf16.mxu0 %v11540_v55  ;;  %v11572_v55 = vld [vmem:[#allocation15 + $0x3ec] ss:$48 sps:$4 sm:$0xff]  }
 0x5fa   :  { %6557 = vmatpush1.bf16.msra.mxu1 %v11541_v31  ;;  %v11573_v31 = vld [vmem:[#allocation15 + $0x3e0] ss:$48 sps:$4 sm:$0xff]  }
 0x5fb   :  { %6639 = vmatpush1.bf16.msra.mxu0 %v11542_v32  ;;  %6558 = vmatprep.subr.bf16.mxu1 %v11543_v43  ;;  %v11574_v32 = vld [vmem:[#allocation15 + $0x3e8] ss:$48 sps:$4 sm:$0xff]   ;;  %v11575_v43 = vld [vmem:[#allocation15 + $0x444] ss:$48 sps:$4 sm:$0xff]  }
 0x5fc   :  { %6640 = vmatprep.subr.bf16.mxu0 %v11544_v49  ;;  %v11576_v49 = vld [vmem:[#allocation15 + $0x44c] ss:$48 sps:$4 sm:$0xff]  }
 0x5fe   :  { %6559 = vmatpush1.bf16.msra.mxu1 %v11545_v26  ;;  %v11577_v26 = vld [vmem:[#allocation15 + $0x440] ss:$48 sps:$4 sm:$0xff]  }
 0x5ff   :  { %6641 = vmatpush1.bf16.msra.mxu0 %v11546_v33  ;;  %6560 = vmatprep.subr.bf16.mxu1 %v11547_v59  ;;  %v11578_v33 = vld [vmem:[#allocation15 + $0x448] ss:$48 sps:$4 sm:$0xff]   ;;  %v11579_v59 = vld [vmem:[#allocation15 + $0x4a4] ss:$48 sps:$4 sm:$0xff]  }
 0x600   :  { %6642 = vmatprep.subr.bf16.mxu0 %v11548_v3  ;;  %v11580_v3 = vld [vmem:[#allocation15 + $0x4ac] ss:$48 sps:$4 sm:$0xff]  }
 0x602   :  { %6561 = vmatpush1.bf16.msra.mxu1 %v11549_v9  ;;  %v11581_v9 = vld [vmem:[#allocation15 + $0x4a0] ss:$48 sps:$4 sm:$0xff]  }
 0x603   :  { %6643 = vmatpush1.bf16.msra.mxu0 %v11550_v63  ;;  %6562 = vmatprep.subr.bf16.mxu1 %v11551_v38  ;;  %v11582_v63 = vld [vmem:[#allocation15 + $0x4a8] ss:$48 sps:$4 sm:$0xff]   ;;  %v11583_v38 = vld [vmem:[#allocation15 + $0x504] ss:$48 sps:$4 sm:$0xff]  }
 0x604   :  { %6644 = vmatprep.subr.bf16.mxu0 %v11552_v11  ;;  %v11584_v11 = vld [vmem:[#allocation15 + $0x50c] ss:$48 sps:$4 sm:$0xff]  }
 0x606   :  { %6563 = vmatpush1.bf16.msra.mxu1 %v11553_v12  ;;  %v11585_v12 = vld [vmem:[#allocation15 + $0x500] ss:$48 sps:$4 sm:$0xff]  }
 0x607   :  { %6645 = vmatpush1.bf16.msra.mxu0 %v11554_v8  ;;  %6564 = vmatprep.subr.bf16.mxu1 %v11555_v62  ;;  %v11586_v8 = vld [vmem:[#allocation15 + $0x508] ss:$48 sps:$4 sm:$0xff]   ;;  %v11587_v62 = vld [vmem:[#allocation15 + $0x564] ss:$48 sps:$4 sm:$0xff]  }
 0x608   :  { %6646 = vmatprep.subr.bf16.mxu0 %v11556_v14  ;;  %v11588_v14 = vld [vmem:[#allocation15 + $0x56c] ss:$48 sps:$4 sm:$0xff]  }
 0x60a   :  { %6565 = vmatpush1.bf16.msra.mxu1 %v11557_v16  ;;  %v11589_v16 = vld [vmem:[#allocation15 + $0x560] ss:$48 sps:$4 sm:$0xff]  }
 0x60b   :  { %6647 = vmatpush1.bf16.msra.mxu0 %v11558_v20  ;;  %6566 = vmatprep.subr.bf16.mxu1 %v11559_v44  ;;  %v11590_v20 = vld [vmem:[#allocation15 + $0x568] ss:$48 sps:$4 sm:$0xff]   ;;  %v11591_v44 = vld [vmem:[#allocation15 + $0x5c4] ss:$48 sps:$4 sm:$0xff]  }
 0x60c   :  { %6648 = vmatprep.subr.bf16.mxu0 %v11560_v23  ;;  %v11592_v23 = vld [vmem:[#allocation15 + $0x5cc] ss:$48 sps:$4 sm:$0xff]  }
 0x60e   :  { %6567 = vmatpush1.bf16.msra.mxu1 %v11561_v24  ;;  %v11593_v24 = vld [vmem:[#allocation15 + $0x5c0] ss:$48 sps:$4 sm:$0xff]  }
 0x60f   :  { %6649 = vmatpush1.bf16.msra.mxu0 %v11562_v4  ;;  %6568 = vmatprep.subr.bf16.mxu1 %v11563_v25  ;;  %v11594_v4 = vld [vmem:[#allocation15 + $0x5c8] ss:$48 sps:$4 sm:$0xff]   ;;  %v11595_v25 = vld [vmem:[#allocation15 + $0x624] ss:$48 sps:$4 sm:$0xff]  }
 0x610   :  { %6650 = vmatprep.subr.bf16.mxu0 %v11564_v53  ;;  %v11596_v53 = vld [vmem:[#allocation15 + $0x62c] ss:$48 sps:$4 sm:$0xff]  }
 0x612   :  { %6569 = vmatpush1.bf16.msra.mxu1 %v11565_v27  ;;  %v11597_v27 = vld [vmem:[#allocation15 + $0x620] ss:$48 sps:$4 sm:$0xff]  }
 0x613   :  { %6651 = vmatpush1.bf16.msra.mxu0 %v11566_v57  ;;  %6570 = vmatprep.subr.bf16.mxu1 %v11567_v28  ;;  %v11598_v57 = vld [vmem:[#allocation15 + $0x628] ss:$48 sps:$4 sm:$0xff]   ;;  %v11599_v28 = vld [vmem:[#allocation15 + $0x684] ss:$48 sps:$4 sm:$0xff]  }
 0x614   :  { %6652 = vmatprep.subr.bf16.mxu0 %v11568_v29  ;;  %v11600_v29 = vld [vmem:[#allocation15 + $0x68c] ss:$48 sps:$4 sm:$0xff]  }
 0x616   :  { %6571 = vmatpush1.bf16.msra.mxu1 %v11569_v30  ;;  %v11601_v30 = vld [vmem:[#allocation15 + $0x680] ss:$48 sps:$4 sm:$0xff]  }
 0x617   :  { %6653 = vmatpush1.bf16.msra.mxu0 %v11570_v60  ;;  %6572 = vmatprep.subr.bf16.mxu1 %v11571_v51  ;;  %v11602_v60 = vld [vmem:[#allocation15 + $0x688] ss:$48 sps:$4 sm:$0xff]   ;;  %v11603_v51 = vld [vmem:[#allocation15 + $0x6e4] ss:$48 sps:$4 sm:$0xff]  }
 0x618   :  { %6654 = vmatprep.subr.bf16.mxu0 %v11572_v55  ;;  %v11604_v55 = vld [vmem:[#allocation15 + $0x6ec] ss:$48 sps:$4 sm:$0xff]  }
 0x61a   :  { %6573 = vmatpush1.bf16.msra.mxu1 %v11573_v31  ;;  %v11606_v31 = vld [vmem:[#allocation15 + $0x6e8] ss:$48 sps:$4 sm:$0xff]  }
 0x61b   :  { %6655 = vmatpush1.bf16.msra.mxu0 %v11574_v32  ;;  %6574 = vmatprep.subr.bf16.mxu1 %v11575_v43  ;;  %v11607_v32 = vld [vmem:[#allocation15 + $0x744] ss:$48 sps:$4 sm:$0xff]   ;;  %v11608_v43 = vld [vmem:[#allocation15 + $0x74c] ss:$48 sps:$4 sm:$0xff]  }
 0x61c   :  { %6656 = vmatprep.subr.bf16.mxu0 %v11576_v49  ;;  %v11610_v49 = vld [vmem:[#allocation15 + $0x748] ss:$48 sps:$4 sm:$0xff]  }
 0x61e   :  { %6575 = vmatpush1.bf16.msra.mxu1 %v11577_v26  ;;  %v11611_v26 = vld [vmem:[#allocation15 + $0x7a4] ss:$48 sps:$4 sm:$0xff]  }
 0x61f   :  { %6657 = vmatpush1.bf16.msra.mxu0 %v11578_v33  ;;  %6576 = vmatprep.subr.bf16.mxu1 %v11579_v59  ;;  %v11612_v33 = vld [vmem:[#allocation15 + $0x7ac] ss:$48 sps:$4 sm:$0xff]   ;;  %v11613_v59 = vld [vmem:[#allocation15 + $0x7a0] ss:$48 sps:$4 sm:$0xff]  }
 0x620   :  { %6658 = vmatprep.subr.bf16.mxu0 %v11580_v3  ;;  %v11614_v3 = vld [vmem:[#allocation15 + $0x7a8] ss:$48 sps:$4 sm:$0xff]  }
 0x622   :  { %6577 = vmatpush1.bf16.msra.mxu1 %v11581_v9  ;;  %v11615_v9 = vld [vmem:[#allocation15 + $0x804] ss:$48 sps:$4 sm:$0xff]  }
 0x623   :  { %6659 = vmatpush1.bf16.msra.mxu0 %v11582_v63  ;;  %6578 = vmatprep.subr.bf16.mxu1 %v11583_v38  ;;  %v11616_v38 = vld [vmem:[#allocation15 + $0x80c] ss:$48 sps:$4 sm:$0xff]  }
 0x624   :  { %6660 = vmatprep.subr.bf16.mxu0 %v11584_v11 }
 0x626   :  { %6579 = vmatpush1.bf16.msra.mxu1 %v11585_v12 }
 0x627   :  { %6661 = vmatpush1.bf16.msra.mxu0 %v11586_v8  ;;  %6580 = vmatprep.subr.bf16.mxu1 %v11587_v62 }
 0x628   :  { %6662 = vmatprep.subr.bf16.mxu0 %v11588_v14  ;;  %v11617_v14 = vld [vmem:[#allocation15 + $0x800] ss:$48 sps:$4 sm:$0xff]  }
 0x62a   :  { %6581 = vmatpush1.bf16.msra.mxu1 %v11589_v16 }
 0x62b   :  { %6663 = vmatpush1.bf16.msra.mxu0 %v11590_v20  ;;  %6582 = vmatprep.subr.bf16.mxu1 %v11591_v44  ;;  %v11618_v20 = vld [vmem:[#allocation15 + $0x808] ss:$48 sps:$4 sm:$0xff]  }
 0x62c   :  { %6664 = vmatprep.subr.bf16.mxu0 %v11592_v23  ;;  %v11619_v23 = vld [vmem:[#allocation15 + $0x864] ss:$48 sps:$4 sm:$0xff]  }
 0x62e   :  { %6583 = vmatpush1.bf16.msra.mxu1 %v11593_v24 }
 0x62f   :  { %6665 = vmatpush1.bf16.msra.mxu0 %v11594_v4  ;;  %6593 = vmatprep.subr.bf16.mxu1 %v11595_v25  ;;  %v11620_v4 = vld [vmem:[#allocation15 + $0x86c] ss:$48 sps:$4 sm:$0xff]   ;;  %v11621_v25 = vld [vmem:[#allocation15 + $0x860] ss:$48 sps:$4 sm:$0xff]  }
 0x630   :  { %6675 = vmatprep.subr.bf16.mxu0 %v11596_v53  ;;  %v11622_v53 = vld [vmem:[#allocation15 + $0x868] ss:$48 sps:$4 sm:$0xff]  }
 0x631   :  { %6585 = vmatmul.mubr.bf16.vlgmr.msra.gmra.mrb[36].mxu1 %v13331_v54 }
 0x632   :  { %6667 = vmatmul.mubr.bf16.vlgmr.msra.gmra.mrb[40].mxu0 %v13331_v54  ;;  %6594 = vmatpush1.bf16.msra.mxu1 %v11597_v27  ;;  %v11605_v54 = vld [vmem:[#allocation15 + $0x6e0] ss:$48 sps:$4 sm:$0xff]   ;;  %v11623_v27 = vld [vmem:[#allocation15 + $0x8c4] ss:$48 sps:$4 sm:$0xff]  }
 0x633   :  { %6625 = vmatprep.mubr.bf16.mxu1 %v13336_v41  ;;  %6676 = vmatpush1.bf16.msra.mxu0 %v11598_v57  ;;  %v11624_v57 = vld [vmem:[#allocation15 + $0x8cc] ss:$48 sps:$4 sm:$0xff]  }
 0x634   :  { %6707 = vmatprep.mubr.bf16.mxu0 %v13336_v41  ;;  %6595 = vmatprep.subr.bf16.mxu1 %v11599_v28  ;;  %v11609_v41 = vld [vmem:[#allocation15 + $0x740] ss:$48 sps:$4 sm:$0xff]  }
 0x635   :  { %6677 = vmatprep.subr.bf16.mxu0 %v11600_v29  ;;  %v11625_v28 = vld [vmem:[#allocation15 + $0x8c0] ss:$48 sps:$4 sm:$0xff]   ;;  %v11626_v29 = vld [vmem:[#allocation15 + $0x8c8] ss:$48 sps:$4 sm:$0xff]  }
 0x636   :  { %6596 = vmatpush1.bf16.msra.mxu1 %v11601_v30  ;;  %v11627_v30 = vld [vmem:[#allocation15 + $0x924] ss:$48 sps:$4 sm:$0xff]  }
 0x637   :  { %6678 = vmatpush1.bf16.msra.mxu0 %v11602_v60  ;;  %6597 = vmatprep.subr.bf16.mxu1 %v11603_v51  ;;  %v11628_v60 = vld [vmem:[#allocation15 + $0x92c] ss:$48 sps:$4 sm:$0xff]   ;;  %v11629_v51 = vld [vmem:[#allocation15 + $0x920] ss:$48 sps:$4 sm:$0xff]  }
 0x638   :  { %6679 = vmatprep.subr.bf16.mxu0 %v11604_v55  ;;  %v11630_v55 = vld [vmem:[#allocation15 + $0x928] ss:$48 sps:$4 sm:$0xff]  }
 0x63a   :  { %6598 = vmatpush1.bf16.msra.mxu1 %v11605_v54  ;;  %v11631_v54 = vld [vmem:[#allocation15 + $0x984] ss:$48 sps:$4 sm:$0xff]  }
 0x63b   :  { %6680 = vmatpush1.bf16.msra.mxu0 %v11606_v31  ;;  %6599 = vmatprep.subr.bf16.mxu1 %v11607_v32  ;;  %v11632_v31 = vld [vmem:[#allocation15 + $0x98c] ss:$48 sps:$4 sm:$0xff]   ;;  %v11633_v32 = vld [vmem:[#allocation15 + $0x980] ss:$48 sps:$4 sm:$0xff]  }
 0x63c   :  { %6681 = vmatprep.subr.bf16.mxu0 %v11608_v43  ;;  %v11634_v43 = vld [vmem:[#allocation15 + $0x988] ss:$48 sps:$4 sm:$0xff]  }
 0x63e   :  { %6600 = vmatpush1.bf16.msra.mxu1 %v11609_v41  ;;  %v11635_v41 = vld [vmem:[#allocation15 + $0x9e4] ss:$48 sps:$4 sm:$0xff]  }
 0x63f   :  { %6682 = vmatpush1.bf16.msra.mxu0 %v11610_v49  ;;  %6601 = vmatprep.subr.bf16.mxu1 %v11611_v26  ;;  %v11636_v49 = vld [vmem:[#allocation15 + $0x9ec] ss:$48 sps:$4 sm:$0xff]   ;;  %v11637_v26 = vld [vmem:[#allocation15 + $0x9e0] ss:$48 sps:$4 sm:$0xff]  }
 0x640   :  { %6683 = vmatprep.subr.bf16.mxu0 %v11612_v33  ;;  %v11638_v33 = vld [vmem:[#allocation15 + $0x9e8] ss:$48 sps:$4 sm:$0xff]  }
 0x642   :  { %6602 = vmatpush1.bf16.msra.mxu1 %v11613_v59  ;;  %v11639_v59 = vld [vmem:[#allocation15 + $0xa44] ss:$48 sps:$4 sm:$0xff]  }
 0x643   :  { %6684 = vmatpush1.bf16.msra.mxu0 %v11614_v3  ;;  %6603 = vmatprep.subr.bf16.mxu1 %v11615_v9  ;;  %v11640_v3 = vld [vmem:[#allocation15 + $0xa4c] ss:$48 sps:$4 sm:$0xff]   ;;  %v11641_v9 = vld [vmem:[#allocation15 + $0xa40] ss:$48 sps:$4 sm:$0xff]  }
 0x644   :  { %v13379_v63 = vpop.f32.mrb[20].mxu1  ;;  %6685 = vmatprep.subr.bf16.mxu0 %v11616_v38  ;;  %v11642_v38 = vld [vmem:[#allocation15 + $0xa48] ss:$48 sps:$4 sm:$0xff]  }
 0x645   :  { %v13381_v11 = vpop.f32.mrb[24].mxu0  ;;  %v13383_v12 = vpop.f32.mrb[21].mxu1 }
 0x646   :  { %v13385_v8 = vpop.f32.mrb[25].mxu0  ;;  %v6303_v62 = vpop.f32.mrb[22].mxu1  ;;  %6604 = vmatpush1.bf16.msra.mxu1 %v11617_v14  ;;  %v11644_v14 = vld [vmem:[#allocation15 + $0xaac] ss:$48 sps:$4 sm:$0xff]  }
 0x647   :  { %v6385_v16 = vpop.f32.mrb[26].mxu0  ;;  %6686 = vmatpush1.bf16.msra.mxu0 %v11618_v20  ;;  %v6304_v44 = vpop.f32.mrb[23].mxu1  ;;  %6605 = vmatprep.subr.bf16.mxu1 %v11619_v23  ;;  %v11643_v62 = vld [vmem:[#allocation15 + $0xaa4] ss:$48 sps:$4 sm:$0xff]   ;;  %v11646_v20 = vld [vmem:[#allocation15 + $0xaa8] ss:$48 sps:$4 sm:$0xff]  }
 0x648   :  { %v6386_v24 = vpop.f32.mrb[27].mxu0  ;;  %6687 = vmatprep.subr.bf16.mxu0 %v11620_v4  ;;  %v11645_v16 = vld [vmem:[#allocation15 + $0xaa0] ss:$48 sps:$4 sm:$0xff]   ;;  %v11647_v44 = vld [vmem:[#allocation15 + $0xb04] ss:$48 sps:$4 sm:$0xff]  }
 0x649   :  { %v11648_v23 = vld [vmem:[#allocation15 + $0xb0c] ss:$48 sps:$4 sm:$0xff]   ;;  %v11649_v24 = vld [vmem:[#allocation15 + $0xb00] ss:$48 sps:$4 sm:$0xff]   ;;  %v11650_v4 = vld [vmem:[#allocation15 + $0xb08] ss:$48 sps:$4 sm:$0xff]  }
 0x64a   :  { %6606 = vmatpush1.bf16.msra.mxu1 %v11621_v25  ;;  %v11651_v25 = vld [vmem:[#allocation15 + $0xb64] ss:$48 sps:$4 sm:$0xff]  }
 0x64b   :  { %6688 = vmatpush1.bf16.msra.mxu0 %v11622_v53  ;;  %6607 = vmatprep.subr.bf16.mxu1 %v11623_v27  ;;  %v11652_v53 = vld [vmem:[#allocation15 + $0xb6c] ss:$48 sps:$4 sm:$0xff]   ;;  %v11653_v27 = vld [vmem:[#allocation15 + $0xb60] ss:$48 sps:$4 sm:$0xff]  }
 0x64c   :  { %6689 = vmatprep.subr.bf16.mxu0 %v11624_v57  ;;  %v11654_v57 = vld [vmem:[#allocation15 + $0xb68] ss:$48 sps:$4 sm:$0xff]  }
 0x64e   :  { %6608 = vmatpush1.bf16.msra.mxu1 %v11625_v28  ;;  %v11655_v28 = vld [vmem:[#allocation15 + $0xbc4] ss:$48 sps:$4 sm:$0xff]  }
 0x64f   :  { %6690 = vmatpush1.bf16.msra.mxu0 %v11626_v29  ;;  %6609 = vmatprep.subr.bf16.mxu1 %v11627_v30  ;;  %v11656_v29 = vld [vmem:[#allocation15 + $0xbcc] ss:$48 sps:$4 sm:$0xff]  }
 0x650   :  { %6691 = vmatprep.subr.bf16.mxu0 %v11628_v60  ;;  %v13387_v30 = vld [vmem:[#allocation12 + $0x14] sm:$0xff]  ;;  %v11657_v60 = vld [vmem:[#allocation15 + $0xbc0] ss:$48 sps:$4 sm:$0xff]  }
 0x652   :  { %6610 = vmatpush1.bf16.msra.mxu1 %v11629_v51  ;;  %v13389_v51 = vld [vmem:[#allocation12 + $0x1c] sm:$0xff] }
 0x653   :  { %6692 = vmatpush1.bf16.msra.mxu0 %v11630_v55  ;;  %6611 = vmatprep.subr.bf16.mxu1 %v11631_v54  ;;  %v11658_v55 = vld [vmem:[#allocation15 + $0xbc8] ss:$48 sps:$4 sm:$0xff]  }
 0x654   :  { %6693 = vmatprep.subr.bf16.mxu0 %v11632_v31  ;;  %v11659_v54 = vld [vmem:[#allocation20 + $0x40] sm:$0xff]  }
 0x655   :  { %v11660_v31 = vld [vmem:[#allocation20 + $0xc0] sm:$0xff]  }
 0x656   :  { %6612 = vmatpush1.bf16.msra.mxu1 %v11633_v32  ;;  %v9399_v32 = vcombine.high %v13387_v30, %v13387_v30 }
 0x657   :  { %6694 = vmatpush1.bf16.msra.mxu0 %v11634_v43  ;;  %6613 = vmatprep.subr.bf16.mxu1 %v11635_v41  ;;  %v9401_v43 = vcombine.high %v13389_v51, %v13389_v51  ;;  %v11661_v41 = vld [vmem:[#allocation20] sm:$0xff]  }
 0x658   :  { %6695 = vmatprep.subr.bf16.mxu0 %v11636_v49  ;;  %v11662_v49 = vld [vmem:[#allocation20 + $0x80] sm:$0xff]  }
 0x65a   :  { %6614 = vmatpush1.bf16.msra.mxu1 %v11637_v26  ;;  %v11663_v26 = vld [vmem:[#allocation20 + $0x48] sm:$0xff]  }
 0x65b   :  { %6696 = vmatpush1.bf16.msra.mxu0 %v11638_v33  ;;  %6615 = vmatprep.subr.bf16.mxu1 %v11639_v59  ;;  %v11664_v33 = vld [vmem:[#allocation20 + $0xc8] sm:$0xff]  }
 0x65c   :  { %6697 = vmatprep.subr.bf16.mxu0 %v11640_v3  ;;  %v11665_v59 = vld [vmem:[#allocation20 + $0x8] sm:$0xff]  }
 0x65d   :  { %v11666_v3 = vld [vmem:[#allocation20 + $0x88] sm:$0xff]  }
 0x65e   :  { %6616 = vmatpush1.bf16.msra.mxu1 %v11641_v9  ;;  %v11667_v9 = vld [vmem:[#allocation20 + $0x50] sm:$0xff]  }
 0x65f   :  { %6698 = vmatpush1.bf16.msra.mxu0 %v11642_v38  ;;  %6617 = vmatprep.subr.bf16.mxu1 %v11643_v62  ;;  %v11668_v38 = vld [vmem:[#allocation20 + $0xd0] sm:$0xff]  }
 0x660   :  { %6699 = vmatprep.subr.bf16.mxu0 %v11644_v14  ;;  %v11669_v62 = vld [vmem:[#allocation20 + $0x10] sm:$0xff]   ;;  %v11671_v14 = vld [vmem:[#allocation20 + $0x58] sm:$0xff]  }
 0x662   :  { %6618 = vmatpush1.bf16.msra.mxu1 %v11645_v16  ;;  %v11672_v16 = vld [vmem:[#allocation20 + $0xd8] sm:$0xff]  }
 0x663   :  { %6700 = vmatpush1.bf16.msra.mxu0 %v11646_v20  ;;  %6619 = vmatprep.subr.bf16.mxu1 %v11647_v44  ;;  %v11673_v20 = vld [vmem:[#allocation20 + $0x18] sm:$0xff]  }
 0x664   :  { %6701 = vmatprep.subr.bf16.mxu0 %v11648_v23  ;;  %v11674_v44 = vld [vmem:[#allocation20 + $0x98] sm:$0xff]   ;;  %v11675_v23 = vld [vmem:[#allocation20 + $0x60] sm:$0xff]  }
 0x666   :  { %6620 = vmatpush1.bf16.msra.mxu1 %v11649_v24  ;;  %v11676_v24 = vld [vmem:[#allocation20 + $0xe0] sm:$0xff]  }
 0x667   :  { %6702 = vmatpush1.bf16.msra.mxu0 %v11650_v4  ;;  %6621 = vmatprep.subr.bf16.mxu1 %v11651_v25  ;;  %v11677_v4 = vld [vmem:[#allocation20 + $0x20] sm:$0xff]  }
 0x668   :  { %6703 = vmatprep.subr.bf16.mxu0 %v11652_v53  ;;  %v11678_v25 = vld [vmem:[#allocation20 + $0xa0] sm:$0xff]   ;;  %v11679_v53 = vld [vmem:[#allocation20 + $0x68] sm:$0xff]  }
 0x66a   :  { %6622 = vmatpush1.bf16.msra.mxu1 %v11653_v27  ;;  %v11680_v27 = vld [vmem:[#allocation20 + $0xe8] sm:$0xff]  }
 0x66b   :  { %6704 = vmatpush1.bf16.msra.mxu0 %v11654_v57  ;;  %6623 = vmatprep.subr.bf16.mxu1 %v11655_v28  ;;  %v11681_v57 = vld [vmem:[#allocation20 + $0x28] sm:$0xff]  }
 0x66c   :  { %6705 = vmatprep.subr.bf16.mxu0 %v11656_v29  ;;  %v11682_v28 = vld [vmem:[#allocation20 + $0xa8] sm:$0xff]   ;;  %v11683_v29 = vld [vmem:[#allocation20 + $0x70] sm:$0xff]  }
 0x66e   :  { %6624 = vmatpush1.bf16.msra.mxu1 %v11657_v60  ;;  %v11684_v60 = vld [vmem:[#allocation20 + $0xf0] sm:$0xff]  }
 0x66f   :  { %6706 = vmatpush1.bf16.msra.mxu0 %v11658_v55  ;;  %9505 = vmatprep.subr.bf16.mxu1 %v11659_v54  ;;  %v11685_v55 = vld [vmem:[#allocation20 + $0x30] sm:$0xff]  }
 0x670   :  { %9527 = vmatprep.subr.bf16.mxu0 %v11660_v31  ;;  %v11686_v54 = vld [vmem:[#allocation20 + $0xb0] sm:$0xff]   ;;  %v11687_v31 = vld [vmem:[#allocation20 + $0x78] sm:$0xff]  }
 0x671   :  { %6626 = vmatmul.mubr.bf16.vlgmr.msra.gmra.mrb[36].mxu1 %v13343_v56 }
 0x672   :  { %6708 = vmatmul.mubr.bf16.vlgmr.msra.gmra.mrb[40].mxu0 %v13343_v56  ;;  %9506 = vmatpush3.bf16.msra.mxu1 %v11661_v41  ;;  %v11670_v56 = vld [vmem:[#allocation20 + $0x90] sm:$0xff]   ;;  %v11689_v41 = vld [vmem:[#allocation20 + $0x38] sm:$0xff]  }
 0x673   :  { %9528 = vmatpush3.bf16.msra.mxu0 %v11662_v49  ;;  %9507 = vmatprep.subr.bf16.mxu1 %v11663_v26  ;;  %v9400_v49 = vcombine.low %v13389_v51, %v13389_v51  ;;  %v11690_v26 = vld [vmem:[#allocation20 + $0xb8] sm:$0xff]   ;;  %v11695_v51 = vld [vmem:[#allocation20 + $0x108] sm:$0xff]  }
 0x674   :  { %9529 = vmatprep.subr.bf16.mxu0 %v11664_v33  ;;  %6854 = vmatprep.mubr.bf16.mxu1 %v9399_v32  ;;  %v11688_v32 = vld [vmem:[#allocation20 + $0xf8] sm:$0xff]  }
 0x675   :  { %6894 = vmatprep.mubr.bf16.mxu0 %v9401_v43  ;;  %v9398_v43 = vcombine.low %v13387_v30, %v13387_v30  ;;  %v11691_v33 = vld [vmem:[#allocation14 + $0x4] ss:$48 sps:$4 sm:$0xff]   ;;  %v11693_v30 = vld [vmem:[#allocation14] ss:$48 sps:$4 sm:$0xff]  }
 0x676   :  { %9508 = vmatpush3.bf16.msra.mxu1 %v11665_v59  ;;  %v11692_v59 = vld [vmem:[#allocation20 + $0x100] sm:$0xff]  }
 0x677   :  { %9530 = vmatpush3.bf16.msra.mxu0 %v11666_v3  ;;  %9509 = vmatprep.subr.bf16.mxu1 %v11667_v9  ;;  %v11694_v3 = vld [vmem:[#allocation14 + $0x64] ss:$48 sps:$4 sm:$0xff]   ;;  %v11696_v9 = vld [vmem:[#allocation14 + $0x60] ss:$48 sps:$4 sm:$0xff]  }
 0x678   :  { %9531 = vmatprep.subr.bf16.mxu0 %v11668_v38  ;;  %v11697_v38 = vld [vmem:[#allocation14 + $0xc4] ss:$48 sps:$4 sm:$0xff]  }
 0x67a   :  { %9510 = vmatpush3.bf16.msra.mxu1 %v11669_v62  ;;  %v11698_v62 = vld [vmem:[#allocation20 + $0x110] sm:$0xff]  }
 0x67b   :  { %9532 = vmatpush3.bf16.msra.mxu0 %v11670_v56  ;;  %9511 = vmatprep.subr.bf16.mxu1 %v11671_v14  ;;  %v11699_v56 = vld [vmem:[#allocation14 + $0xc0] ss:$48 sps:$4 sm:$0xff]   ;;  %v11700_v14 = vld [vmem:[#allocation14 + $0x124] ss:$48 sps:$4 sm:$0xff]  }
 0x67c   :  { %9533 = vmatprep.subr.bf16.mxu0 %v11672_v16  ;;  %v11701_v16 = vld [vmem:[#allocation20 + $0x118] sm:$0xff]  }
 0x67e   :  { %9512 = vmatpush3.bf16.msra.mxu1 %v11673_v20  ;;  %v11702_v20 = vld [vmem:[#allocation14 + $0x120] ss:$48 sps:$4 sm:$0xff]  }
 0x67f   :  { %9534 = vmatpush3.bf16.msra.mxu0 %v11674_v44  ;;  %9513 = vmatprep.subr.bf16.mxu1 %v11675_v23  ;;  %v11703_v44 = vld [vmem:[#allocation14 + $0x184] ss:$48 sps:$4 sm:$0xff]   ;;  %v11704_v23 = vld [vmem:[#allocation20 + $0x120] sm:$0xff]  }
 0x680   :  { %9535 = vmatprep.subr.bf16.mxu0 %v11676_v24  ;;  %v11705_v24 = vld [vmem:[#allocation14 + $0x180] ss:$48 sps:$4 sm:$0xff]  }
 0x682   :  { %9514 = vmatpush3.bf16.msra.mxu1 %v11677_v4  ;;  %v11706_v4 = vld [vmem:[#allocation14 + $0x1e4] ss:$48 sps:$4 sm:$0xff]  }
 0x683   :  { %9536 = vmatpush3.bf16.msra.mxu0 %v11678_v25  ;;  %9515 = vmatprep.subr.bf16.mxu1 %v11679_v53  ;;  %v11707_v25 = vld [vmem:[#allocation20 + $0x128] sm:$0xff]  }
 0x684   :  { %9537 = vmatprep.subr.bf16.mxu0 %v11680_v27  ;;  %v11708_v53 = vld [vmem:[#allocation14 + $0x1e0] ss:$48 sps:$4 sm:$0xff]   ;;  %v11709_v27 = vld [vmem:[#allocation14 + $0x244] ss:$48 sps:$4 sm:$0xff]  }
 0x686   :  { %9516 = vmatpush3.bf16.msra.mxu1 %v11681_v57  ;;  %v11710_v57 = vld [vmem:[#allocation20 + $0x130] sm:$0xff]  }
 0x687   :  { %9538 = vmatpush3.bf16.msra.mxu0 %v11682_v28  ;;  %9517 = vmatprep.subr.bf16.mxu1 %v11683_v29  ;;  %v11711_v28 = vld [vmem:[#allocation14 + $0x240] ss:$48 sps:$4 sm:$0xff]   ;;  %v11017_v29 = vld [vmem:[#allocation12 + $0x24] ss:$0 sps:$4 sm:$0xff]  }
 0x688   :  { %9539 = vmatprep.subr.bf16.mxu0 %v11684_v60  ;;  %v11712_v60 = vld [vmem:[#allocation14 + $0x2a4] ss:$48 sps:$4 sm:$0xff]  }
 0x68a   :  { %9518 = vmatpush3.bf16.msra.mxu1 %v11685_v55  ;;  %v11713_v55 = vld [vmem:[#allocation20 + $0x138] sm:$0xff]  }
 0x68b   :  { %9540 = vmatpush3.bf16.msra.mxu0 %v11686_v54  ;;  %9519 = vmatprep.subr.bf16.mxu1 %v11687_v31  ;;  %v11714_v54 = vld [vmem:[#allocation14 + $0xc] ss:$48 sps:$4 sm:$0xff]   ;;  %v11715_v31 = vld [vmem:[#allocation14 + $0x2a0] ss:$48 sps:$4 sm:$0xff]  }
 0x68c   :  { %9541 = vmatprep.subr.bf16.mxu0 %v11688_v32  ;;  %v11716_v32 = vld [vmem:[#allocation14 + $0x304] ss:$48 sps:$4 sm:$0xff]  }
 0x68e   :  { %9520 = vmatpush3.bf16.msra.mxu1 %v11689_v41  ;;  %v11718_v41 = vld [vmem:[#allocation14 + $0x6c] ss:$48 sps:$4 sm:$0xff]  }
 0x68f   :  { %9542 = vmatpush3.bf16.msra.mxu0 %v11690_v26  ;;  %9677 = vmatprep.subr.bf16.mxu1 %v12781_v36  ;;  %v11720_v26 = vld [vmem:[#allocation14 + $0x364] ss:$48 sps:$4 sm:$0xff]  }
 0x690   :  { %6970 = vmatprep.subr.bf16.mxu0 %v11691_v33  ;;  %v11721_v33 = vld [vmem:[#allocation14 + $0x68] ss:$48 sps:$4 sm:$0xff]  }
 0x691   :  { %6855 = vmatmul.mubr.bf16.vlgmr.msra.gmra.mrb[40].mxu1 %v9398_v43  ;;  %v11717_v43 = vld [vmem:[#allocation14 + $0x8] ss:$48 sps:$4 sm:$0xff]  }
 0x692   :  { %9678 = vmatpush3.bf16.msra.mxu1 %v11692_v59  ;;  %6895 = vmatmul.mubr.bf16.vlgmr.msra.gmra.mrb[44].mxu0 %v9400_v49  ;;  %v11719_v49 = vld [vmem:[#allocation14 + $0x300] ss:$48 sps:$4 sm:$0xff]   ;;  %v11722_v59 = vld [vmem:[#allocation14 + $0xcc] ss:$48 sps:$4 sm:$0xff]  }
 0x693   :  { %9679 = vmatprep.subr.bf16.mxu1 %v12781_v36  ;;  %9693 = vmatprep.mubr.msk.bf16.mxu1 %vm12782_vm0, %v12781_v36 }
 0x694   :  { %6971 = vmatpush1.bf16.msra.mxu0 %v11693_v30  ;;  %v11723_v30 = vld [vmem:[#allocation14 + $0x360] ss:$48 sps:$4 sm:$0xff]  }
 0x695   :  { %6972 = vmatprep.subr.bf16.mxu0 %v11694_v3  ;;  %v11724_v3 = vld [vmem:[#allocation14 + $0x3c4] ss:$48 sps:$4 sm:$0xff]  }
 0x696   :  { %9680 = vmatpush3.bf16.msra.mxu1 %v11695_v51  ;;  %v11725_v51 = vld [vmem:[#allocation14 + $0xc8] ss:$48 sps:$4 sm:$0xff]  }
 0x697   :  { %9681 = vmatprep.subr.bf16.mxu1 %v12781_v36 }
 0x698   :  { %6973 = vmatpush1.bf16.msra.mxu0 %v11696_v9  ;;  %v11726_v9 = vld [vmem:[#allocation14 + $0x12c] ss:$48 sps:$4 sm:$0xff]  }
 0x699   :  { %6974 = vmatprep.subr.bf16.mxu0 %v11697_v38  ;;  %v11727_v38 = vld [vmem:[#allocation14 + $0x3c0] ss:$48 sps:$4 sm:$0xff]  }
 0x69a   :  { %9682 = vmatpush3.bf16.msra.mxu1 %v11698_v62  ;;  %v11728_v62 = vld [vmem:[#allocation14 + $0x424] ss:$48 sps:$4 sm:$0xff]  }
 0x69b   :  { %9683 = vmatprep.subr.bf16.mxu1 %v12781_v36 }
 0x69c   :  { %6975 = vmatpush1.bf16.msra.mxu0 %v11699_v56  ;;  %v11729_v56 = vld [vmem:[#allocation14 + $0x128] ss:$48 sps:$4 sm:$0xff]  }
 0x69d   :  { %6976 = vmatprep.subr.bf16.mxu0 %v11700_v14  ;;  %v11730_v14 = vld [vmem:[#allocation14 + $0x18c] ss:$48 sps:$4 sm:$0xff]  }
 0x69e   :  { %9684 = vmatpush3.bf16.msra.mxu1 %v11701_v16  ;;  %v11731_v16 = vld [vmem:[#allocation14 + $0x420] ss:$48 sps:$4 sm:$0xff]  }
 0x69f   :  { %9685 = vmatprep.subr.bf16.mxu1 %v12781_v36 }
 0x6a0   :  { %6977 = vmatpush1.bf16.msra.mxu0 %v11702_v20  ;;  %v11732_v20 = vld [vmem:[#allocation14 + $0x484] ss:$48 sps:$4 sm:$0xff]  }
 0x6a1   :  { %6978 = vmatprep.subr.bf16.mxu0 %v11703_v44  ;;  %v11733_v44 = vld [vmem:[#allocation14 + $0x188] ss:$48 sps:$4 sm:$0xff]  }
 0x6a2   :  { %9686 = vmatpush3.bf16.msra.mxu1 %v11704_v23  ;;  %v11734_v23 = vld [vmem:[#allocation14 + $0x1ec] ss:$48 sps:$4 sm:$0xff]  }
 0x6a3   :  { %9687 = vmatprep.subr.bf16.mxu1 %v12781_v36 }
 0x6a4   :  { %6979 = vmatpush1.bf16.msra.mxu0 %v11705_v24 }
 0x6a5   :  { %6980 = vmatprep.subr.bf16.mxu0 %v11706_v4  ;;  %v11735_v4 = vld [vmem:[#allocation14 + $0x480] ss:$48 sps:$4 sm:$0xff]  }
 0x6a6   :  { %9688 = vmatpush3.bf16.msra.mxu1 %v11707_v25 }
 0x6a7   :  { %9689 = vmatprep.subr.bf16.mxu1 %v12781_v36 }
 0x6a8   :  { %6981 = vmatpush1.bf16.msra.mxu0 %v11708_v53 }
 0x6a9   :  { %6982 = vmatprep.subr.bf16.mxu0 %v11709_v27  ;;  %v11736_v27 = vld [vmem:[#allocation14 + $0x4e4] ss:$48 sps:$4 sm:$0xff]  }
 0x6aa   :  { %9690 = vmatpush3.bf16.msra.mxu1 %v11710_v57 }
 0x6ab   :  { %9691 = vmatprep.subr.bf16.mxu1 %v12781_v36 }
 0x6ac   :  { %6983 = vmatpush1.bf16.msra.mxu0 %v11711_v28 }
 0x6ad   :  { %6984 = vmatprep.subr.bf16.mxu0 %v11712_v60 }
 0x6ae   :  { %9692 = vmatpush3.bf16.msra.mxu1 %v11713_v55 }
 0x6af   :  { %7052 = vmatprep.subr.bf16.mxu1 %v11714_v54  ;;  %v11738_v54 = vld [vmem:[#allocation14 + $0x24c] ss:$48 sps:$4 sm:$0xff]  }
 0x6b0   :  { %6985 = vmatpush1.bf16.msra.mxu0 %v11715_v31 }
 0x6b1   :  { %9694 = vmatmul.mubr.bf16.vlgmr.msra.gmra.mrb[44].mxu1 %v11017_v29  ;;  %6986 = vmatprep.subr.bf16.mxu0 %v11716_v32  ;;  %v11737_v29 = vld [vmem:[#allocation14 + $0x1e8] ss:$48 sps:$4 sm:$0xff]   ;;  %v11739_v32 = vld [vmem:[#allocation14 + $0x4e0] ss:$48 sps:$4 sm:$0xff]  }
 0x6b2   :  { %7053 = vmatpush1.bf16.msra.mxu1 %v11717_v43  ;;  %v11740_v43 = vld [vmem:[#allocation14 + $0x544] ss:$48 sps:$4 sm:$0xff]  }
 0x6b3   :  { %7054 = vmatprep.subr.bf16.mxu1 %v11718_v41  ;;  %v11741_v41 = vld [vmem:[#allocation14 + $0x248] ss:$48 sps:$4 sm:$0xff]  }
 0x6b4   :  { %6987 = vmatpush1.bf16.msra.mxu0 %v11719_v49  ;;  %v11742_v49 = vld [vmem:[#allocation14 + $0x2ac] ss:$48 sps:$4 sm:$0xff]  }
 0x6b5   :  { %6988 = vmatprep.subr.bf16.mxu0 %v11720_v26  ;;  %v11743_v26 = vld [vmem:[#allocation14 + $0x540] ss:$48 sps:$4 sm:$0xff]  }
 0x6b6   :  { %7055 = vmatpush1.bf16.msra.mxu1 %v11721_v33  ;;  %v11744_v33 = vld [vmem:[#allocation14 + $0x5a4] ss:$48 sps:$4 sm:$0xff]  }
 0x6b7   :  { %7056 = vmatprep.subr.bf16.mxu1 %v11722_v59  ;;  %v11745_v59 = vld [vmem:[#allocation14 + $0x2a8] ss:$48 sps:$4 sm:$0xff]  }
 0x6b8   :  { %6989 = vmatpush1.bf16.msra.mxu0 %v11723_v30  ;;  %v11746_v30 = vld [vmem:[#allocation14 + $0x30c] ss:$48 sps:$4 sm:$0xff]  }
 0x6b9   :  { %6990 = vmatprep.subr.bf16.mxu0 %v11724_v3  ;;  %v11747_v3 = vld [vmem:[#allocation14 + $0x5a0] ss:$48 sps:$4 sm:$0xff]  }
 0x6ba   :  { %7057 = vmatpush1.bf16.msra.mxu1 %v11725_v51  ;;  %v11748_v51 = vld [vmem:[#allocation14 + $0x604] ss:$48 sps:$4 sm:$0xff]  }
 0x6bb   :  { %7058 = vmatprep.subr.bf16.mxu1 %v11726_v9  ;;  %v11749_v9 = vld [vmem:[#allocation14 + $0x308] ss:$48 sps:$4 sm:$0xff]  }
 0x6bc   :  { %6991 = vmatpush1.bf16.msra.mxu0 %v11727_v38  ;;  %v11750_v38 = vld [vmem:[#allocation14 + $0x36c] ss:$48 sps:$4 sm:$0xff]  }
 0x6bd   :  { %6992 = vmatprep.subr.bf16.mxu0 %v11728_v62  ;;  %v11751_v62 = vld [vmem:[#allocation14 + $0x368] ss:$48 sps:$4 sm:$0xff]  }
 0x6be   :  { %7059 = vmatpush1.bf16.msra.mxu1 %v11729_v56  ;;  %v11752_v56 = vld [vmem:[#allocation14 + $0x3cc] ss:$48 sps:$4 sm:$0xff]  }
 0x6bf   :  { %7060 = vmatprep.subr.bf16.mxu1 %v11730_v14  ;;  %v11753_v14 = vld [vmem:[#allocation14 + $0x3c8] ss:$48 sps:$4 sm:$0xff]  }
 0x6c0   :  { %6993 = vmatpush1.bf16.msra.mxu0 %v11731_v16  ;;  %v11754_v16 = vld [vmem:[#allocation14 + $0x42c] ss:$48 sps:$4 sm:$0xff]  }
 0x6c1   :  { %6994 = vmatprep.subr.bf16.mxu0 %v11732_v20  ;;  %v11755_v20 = vld [vmem:[#allocation14 + $0x428] ss:$48 sps:$4 sm:$0xff]  }
 0x6c2   :  { %7061 = vmatpush1.bf16.msra.mxu1 %v11733_v44  ;;  %v11756_v44 = vld [vmem:[#allocation14 + $0x48c] ss:$48 sps:$4 sm:$0xff]  }
 0x6c3   :  { %7062 = vmatprep.subr.bf16.mxu1 %v11734_v23  ;;  %v11757_v23 = vld [vmem:[#allocation14 + $0x488] ss:$48 sps:$4 sm:$0xff]  }
 0x6c4   :  { %v13411_v24 = vpop.f32.mrb[24].mxu1  ;;  %6995 = vmatpush1.bf16.msra.mxu0 %v11735_v4  ;;  %v11758_v4 = vld [vmem:[#allocation14 + $0x4ec] ss:$48 sps:$4 sm:$0xff]  }
 0x6c5   :  { %v13413_v25 = vpop.f32.mrb[28].mxu0  ;;  %v13415_v53 = vpop.f32.mrb[25].mxu1  ;;  %6996 = vmatprep.subr.bf16.mxu0 %v11736_v27  ;;  %v11759_v27 = vld [vmem:[#allocation14 + $0x4e8] ss:$48 sps:$4 sm:$0xff]  }
 0x6c6   :  { %v13417_v57 = vpop.f32.mrb[29].mxu0  ;;  %v6467_v28 = vpop.f32.mrb[26].mxu1  ;;  %7063 = vmatpush1.bf16.msra.mxu1 %v11737_v29  ;;  %v11761_v29 = vld [vmem:[#allocation14 + $0x548] ss:$48 sps:$4 sm:$0xff]  }
 0x6c7   :  { %v6549_v60 = vpop.f32.mrb[30].mxu0  ;;  %v6468_v55 = vpop.f32.mrb[27].mxu1  ;;  %7064 = vmatprep.subr.bf16.mxu1 %v11738_v54  ;;  %v11760_v28 = vld [vmem:[#allocation14 + $0x54c] ss:$48 sps:$4 sm:$0xff]  }
 0x6c8   :  { %v6550_v31 = vpop.f32.mrb[31].mxu0  ;;  %6997 = vmatpush1.bf16.msra.mxu0 %v11739_v32  ;;  %v11762_v60 = vld [vmem:[#allocation14 + $0x5ac] ss:$48 sps:$4 sm:$0xff]   ;;  %v11763_v55 = vld [vmem:[#allocation14 + $0x5a8] ss:$48 sps:$4 sm:$0xff]   ;;  %v9747_v32 = vadd.f32 %v13209_v37, %v13381_v11  ;;  %v9755_v11 = vadd.f32 %v13229_v48, %v13413_v25 }
 0x6c9   :  { %6998 = vmatprep.subr.bf16.mxu0 %v11740_v43  ;;  %v11764_v54 = vld [vmem:[#allocation14 + $0x60c] ss:$48 sps:$4 sm:$0xff]   ;;  %v9743_v31 = vadd.f32 %v13207_v35, %v13379_v63  ;;  %v9745_v43 = vadd.f32 %v13211_v58, %v13383_v12  ;;  %v9751_v63 = vadd.f32 %v13227_v17, %v13411_v24  ;;  %v9753_v12 = vadd.f32 %v13231_v18, %v13415_v53 }
 0x6ca   :  { %7065 = vmatpush1.bf16.msra.mxu1 %v11741_v41  ;;  %v9749_v41 = vadd.f32 %v13213_v61, %v13385_v8  ;;  %v9757_v8 = vadd.f32 %v13233_v19, %v13417_v57 }
 0x6cb   :  { %7066 = vmatprep.subr.bf16.mxu1 %v11742_v49  ;;  %v9390_v49 = vmul.f32 -1.442695, %v9743_v31 }
 0x6cc   :  { %6999 = vmatpush1.bf16.msra.mxu0 %v11743_v26  ;;  %v9392_v26 = vmul.f32 -1.442695, %v9747_v32 }
 0x6cd   :  { %7000 = vmatprep.subr.bf16.mxu0 %v11744_v33  ;;  %v9391_v33 = vmul.f32 -1.442695, %v9745_v43  ;;  %11095 = vpow2.f32 %v9390_v49 }
 0x6ce   :  { %7067 = vmatpush1.bf16.msra.mxu1 %v11745_v59  ;;  %v9393_v59 = vmul.f32 -1.442695, %v9749_v41  ;;  %11097 = vpow2.f32 %v9392_v26 }
 0x6cf   :  { %7068 = vmatprep.subr.bf16.mxu1 %v11746_v30  ;;  %11099 = vpow2.f32 %v9391_v33  ;;  %v9394_v30 = vmul.f32 -1.442695, %v9751_v63 }
 0x6d0   :  { %7001 = vmatpush1.bf16.msra.mxu0 %v11747_v3  ;;  %11101 = vpow2.f32 %v9393_v59  ;;  %v9396_v3 = vmul.f32 -1.442695, %v9755_v11 }
 0x6d1   :  { %7011 = vmatprep.subr.bf16.mxu0 %v11748_v51  ;;  %11103 = vpow2.f32 %v9394_v30 }
 0x6d2   :  { %7069 = vmatpush1.bf16.msra.mxu1 %v11749_v9  ;;  %v9395_v9 = vmul.f32 -1.442695, %v9753_v12  ;;  %11105 = vpow2.f32 %v9396_v3 }
 0x6d3   :  { %7070 = vmatprep.subr.bf16.mxu1 %v11750_v38 }
 0x6d4   :  { %11107 = vpow2.f32 %v9395_v9 }
 0x6d6   :  { %7071 = vmatpush1.bf16.msra.mxu1 %v11751_v62  ;;  %v9397_v62 = vmul.f32 -1.442695, %v9757_v8 }
 0x6d7   :  { %7072 = vmatprep.subr.bf16.mxu1 %v11752_v56  ;;  %v11096_v51 = vpop.eup %11095 }
 0x6d8   :  { %v11098_v38 = vpop.eup %11097  ;;  %11109 = vpow2.f32 %v9397_v62 }
 0x6d9   :  { %v11100_v56 = vpop.eup %11099  ;;  %v6734_v24 = vadd.f32 1.0, %v11098_v38 }
 0x6da   :  { %7073 = vmatpush1.bf16.msra.mxu1 %v11753_v14  ;;  %v11102_v14 = vpop.eup %11101  ;;  %v6733_v25 = vadd.f32 1.0, %v11100_v56 }
 0x6db   :  { %7074 = vmatprep.subr.bf16.mxu1 %v11754_v16  ;;  %v6732_v16 = vadd.f32 1.0, %v11096_v51  ;;  %v11104_v53 = vpop.eup %11103 }
 0x6dc   :  { %v11106_v57 = vpop.eup %11105 }
 0x6dd   :  { %11111 = vrcp.f32 %v6732_v16 }
 0x6de   :  { %7075 = vmatpush1.bf16.msra.mxu1 %v11755_v20  ;;  %v6735_v20 = vadd.f32 1.0, %v11102_v14  ;;  %11113 = vrcp.f32 %v6734_v24 }
 0x6df   :  { %7076 = vmatprep.subr.bf16.mxu1 %v11756_v44  ;;  %11115 = vrcp.f32 %v6733_v25  ;;  %v11108_v44 = vpop.eup %11107 }
 0x6e0   :  { %11117 = vrcp.f32 %v6735_v20 }
 0x6e2   :  { %7077 = vmatpush1.bf16.msra.mxu1 %v11757_v23  ;;  %v11110_v23 = vpop.eup %11109 }
 0x6e3   :  { %7078 = vmatprep.subr.bf16.mxu1 %v11758_v4  ;;  %v6760_v4 = vadd.f32 1.0, %v11104_v53  ;;  %v6763_v43 = vadd.f32 1.0, %v11110_v23 }
 0x6e5   :  { %11119 = vrcp.f32 %v6760_v4 }
 0x6e6   :  { %7079 = vmatpush1.bf16.msra.mxu1 %v11759_v27  ;;  %v6762_v27 = vadd.f32 1.0, %v11106_v57 }
 0x6e7   :  { %7080 = vmatprep.subr.bf16.mxu1 %v11760_v28 }
 0x6e8   :  { %11121 = vrcp.f32 %v6762_v27 }
 0x6ea   :  { %7081 = vmatpush1.bf16.msra.mxu1 %v11761_v29  ;;  %v11112_v29 = vpop.eup %11111 }
 0x6eb   :  { %7082 = vmatprep.subr.bf16.mxu1 %v11762_v60  ;;  %v6761_v60 = vadd.f32 1.0, %v11108_v44  ;;  %v11114_v32 = vpop.eup %11113 }
 0x6ec   :  { %v11116_v59 = vpop.eup %11115 }
 0x6ed   :  { %v11118_v30 = vpop.eup %11117  ;;  %11123 = vrcp.f32 %v6761_v60 }
 0x6ee   :  { %7083 = vmatpush1.bf16.msra.mxu1 %v11763_v55  ;;  %11125 = vrcp.f32 %v6763_v43 }
 0x6ef   :  { %7093 = vmatprep.subr.bf16.mxu1 %v11764_v54  ;;  %v11120_v24 = vpop.eup %11119 }
 0x6f0   :  { %v6784_v57 = vsub.f32 1.0, %v11120_v24  ;;  %v6792_v4 = vmul.f32 %v11120_v24, %v13282_v46 }
 0x6f2   :  { %v11122_v25 = vpop.eup %11121 }
 0x6f3   :  { %v6786_v23 = vsub.f32 1.0, %v11122_v25 }
 0x6f7   :  { %v11124_v20 = vpop.eup %11123 }
 0x6f8   :  { %v11126_v53 = vpop.eup %11125  ;;  %v6785_v27 = vsub.f32 1.0, %v11124_v20 }
 0x744   :  { %v6627_v28 = vpop.f32.mrb[36].mxu1 }
 0x745   :  { %v9758_v55 = vadd.f32 %v6627_v28, %v13247_v0  ;;  %v6709_v54 = vpop.f32.mrb[40].mxu0  ;;  %v6629_v31 = vpop.f32.mrb[37].mxu1 }
 0x746   :  { %v9760_v41 = vadd.f32 %v6709_v54, %v13250_v2  ;;  %v9759_v49 = vadd.f32 %v6629_v31, %v13256_v6  ;;  %v6711_v26 = vpop.f32.mrb[41].mxu0  ;;  %v6631_v33 = vpop.f32.mrb[38].mxu1 }
 0x747   :  { %v6772_v63 = vmul.f32 %v11112_v29, %v9758_v55  ;;  %v9761_v11 = vadd.f32 %v6711_v26, %v13259_v7  ;;  %v6713_v12 = vpop.f32.mrb[42].mxu0  ;;  %v6632_v8 = vpop.f32.mrb[39].mxu1  ;;  %v6787_v29 = vsub.f32 1.0, %v11126_v53  ;;  %v6793_v55 = vmul.f32 %v11124_v20, %v13287_v22 }
 0x748   :  { %v6774_v3 = vmul.f32 %v11114_v32, %v9760_v41  ;;  %v6773_v51 = vmul.f32 %v11116_v59, %v9759_v49  ;;  %v6714_v9 = vpop.f32.mrb[43].mxu0  ;;  %v6795_v32 = vmul.f32 %v11126_v53, %v13289_v45 }
 0x749   :  { %v6776_v38 = vadd.f32 %v6772_v63, %v13356_v42  ;;  %v6775_v62 = vmul.f32 %v11118_v30, %v9761_v11  ;;  %v11765_v30 = vld [vmem:[#allocation21] ss:$0 sm:$0xff]  ;;  %v6943_v9 = vstv %s9403_s8 }
 0x74a   :  { %v6778_v56 = vadd.f32 %v6774_v3, %v13367_v15  ;;  %v6777_v14 = vadd.f32 %v6773_v51, %v13359_v50  ;;  %v6794_v50 = vmul.f32 %v11122_v25, %v13285_v21  ;;  %vm6944_vm3 = vcmp.lt.s32.totalorder %v13080_v47, %v6943_v9  ;;  %v11782_v9 = vld [vmem:[#allocation14 + $0x780] ss:$48 sps:$4 sm:$0xff]  }
 0x74b   :  { %11127 = vtanh.f32 %v6776_v38  ;;  %v6779_v16 = vadd.f32 %v6775_v62, %v13369_v13  ;;  %v6955_v38 = vstv %s9404_s9 }
 0x74c   :  { %11129 = vtanh.f32 %v6778_v56  ;;  %vm6956_vm4 = vcmp.eq.s32.totalorder %v13080_v47, %v6955_v38  ;;  %v11783_v38 = vld [vmem:[#allocation14 + $0x788] ss:$48 sps:$4 sm:$0xff]  }
 0x74d   :  { %11131 = vtanh.f32 %v6777_v14 }
 0x74e   :  { %11133 = vtanh.f32 %v6779_v16 }
 0x755   :  { %v11128_v44 = vpop.eup %11127 }
 0x756   :  { %v11130_v42 = vpop.eup %11129  ;;  %v6788_v15 = vmul.f32 %v11128_v44, %v6784_v57 }
 0x757   :  { %v11132_v28 = vpop.eup %11131  ;;  %v6790_v13 = vmul.f32 %v11130_v42, %v6786_v23 }
 0x758   :  { %v11134_v60 = vpop.eup %11133  ;;  %v13446_v54 = vadd.f32 %v6792_v4, %v6788_v15  ;;  %v6789_v31 = vmul.f32 %v11132_v28, %v6785_v27 }
 0x759   :  { %v13449_v43 = vadd.f32 %v6794_v50, %v6790_v13  ;;  %v6791_v41 = vmul.f32 %v11134_v60, %v6787_v29 }
 0x75a   :  { %v13451_v49 = vadd.f32 %v6793_v55, %v6789_v31  ;;  %v11766_v31 = vld [vmem:[#allocation14 + $0x600] ss:$48 sps:$4 sm:$0xff]  }
 0x75b   :  { %v13453_v46 = vadd.f32 %v6795_v32, %v6791_v41  ;;  %v11767_v32 = vld [vmem:[#allocation14 + $0x608] ss:$48 sps:$4 sm:$0xff]   ;;  %v11768_v41 = vld [vmem:[#allocation14 + $0x664] ss:$48 sps:$4 sm:$0xff]  }
 0x764   :  { %v9521_v26 = vpop.f32.mrb[40].mxu1 }
 0x765   :  { %v9522_v33 = vpop.f32.mrb[41].mxu1  ;;  %v9543_v21 = vpop.f32.mrb[44].mxu0 }
 0x766   :  { %v9523_v59 = vadd.f32 %v9522_v33, %v9521_v26  ;;  %v9524_v63 = vpop.f32.mrb[42].mxu1  ;;  %v9544_v11 = vpop.f32.mrb[45].mxu0  ;;  %v11769_v26 = vld [vmem:[#allocation14 + $0x66c] ss:$48 sps:$4 sm:$0xff]   ;;  %v11770_v33 = vld [vmem:[#allocation14 + $0x660] ss:$48 sps:$4 sm:$0xff]  }
 0x767   :  { %v9525_v12 = vpop.f32.mrb[43].mxu1  ;;  %v9545_v22 = vadd.f32 %v9544_v11, %v9543_v21  ;;  %v9546_v8 = vpop.f32.mrb[46].mxu0  ;;  %v11771_v21 = vld [vmem:[#allocation14 + $0x668] ss:$48 sps:$4 sm:$0xff]   ;;  %v11773_v63 = vld [vmem:[#allocation14 + $0x6cc] ss:$48 sps:$4 sm:$0xff]  }
 0x768   :  { %v6857_v3 = vadd.f32 %v11765_v30, %v9523_v59  ;;  %v9547_v51 = vpop.f32.mrb[47].mxu0  ;;  %v11772_v59 = vld [vmem:[#allocation14 + $0x6c4] ss:$48 sps:$4 sm:$0xff]   ;;  %v11774_v11 = vld [vmem:[#allocation14 + $0x6c0] ss:$48 sps:$4 sm:$0xff]  }
 0x769   :  { %v11775_v12 = vld [vmem:[#allocation14 + $0x6c8] ss:$48 sps:$4 sm:$0xff]   ;;  %v11777_v8 = vld [vmem:[#allocation14 + $0x72c] ss:$48 sps:$4 sm:$0xff]   ;;  %v11778_v30 = vld [vmem:[#allocation14 + $0x720] ss:$48 sps:$4 sm:$0xff]  }
 0x76a   :  { %v6897_v45 = vadd.f32 %v9545_v22, %v6857_v3  ;;  %v11776_v22 = vld [vmem:[#allocation14 + $0x724] ss:$48 sps:$4 sm:$0xff]   ;;  %v11779_v3 = vld [vmem:[#allocation14 + $0x728] ss:$48 sps:$4 sm:$0xff]  }
 0x76b   :  { %v11780_v51 = vld [vmem:[#allocation14 + $0x784] ss:$48 sps:$4 sm:$0xff]  }
 0x784   :  { %v6936_v62 = vpop.f32.mrb[44].mxu1 }
 0x785   :  { %v6937_v56 = vadd.f32 %v6936_v62, %v6897_v45  ;;  %v9695_v14 = vpop.f32.mrb[45].mxu1  ;;  %v11781_v45 = vld [vmem:[#allocation14 + $0x78c] ss:$48 sps:$4 sm:$0xff]   ;;  %v11784_v62 = vld [vmem:[#allocation14 + $0x7e4] ss:$48 sps:$4 sm:$0xff]  }
 0x786   :  { %v6939_v16 = vpop.f32.mrb[46].mxu1  ;;  %v11786_v14 = vld [vmem:[#allocation14 + $0x7e0] ss:$48 sps:$4 sm:$0xff]  }
 0x787   :  { %v6947_v24 = vsel %vm6944_vm3, %v6937_v56, -inf  ;;  %v6959_v25 = vsel %vm6956_vm4, %v6937_v56, 0.0  ;;  %v9696_v20 = vpop.f32.mrb[47].mxu1  ;;  %v11785_v56 = vld [vmem:[#allocation14 + $0x7ec] ss:$48 sps:$4 sm:$0xff]  }
 0x788   :  { %v6948_v53 = vrot.slane %v6947_v24, 4  ;;  %v6960_v57 = vrot.slane %v6959_v25, 4  ;;  %v11787_v16 = vld [vmem:[#allocation14 + $0x7e8] ss:$48 sps:$4 sm:$0xff]   ;;  %v11790_v20 = vld [vmem:[#allocation14 + $0x840] ss:$48 sps:$4 sm:$0xff]  }
 0x78a   :  { %v6949_v44 = vmax.f32 %v6947_v24, %v6948_v53  ;;  %v6961_v23 = vadd.f32 %v6960_v57, %v6959_v25  ;;  %v11788_v24 = vld [vmem:[#allocation14 + $0x844] ss:$48 sps:$4 sm:$0xff]   ;;  %v11789_v25 = vld [vmem:[#allocation14 + $0x84c] ss:$48 sps:$4 sm:$0xff]   ;;  %v11791_v53 = vld [vmem:[#allocation14 + $0x848] ss:$48 sps:$4 sm:$0xff]  }
 0x78b   :  { %v6966_v57 = vld [vmem:[#allocation11 + $0x1] sm:$0x1] }
 0x78c   :  { %v6950_v42 = vrot.slane %v6949_v44, 2  ;;  %v6962_v4 = vrot.slane %v6961_v23, 2 }
 0x78e   :  { %v6951_v27 = vmax.f32 %v6949_v44, %v6950_v42  ;;  %v6963_v15 = vadd.f32 %v6962_v4, %v6961_v23  ;;  %v11792_v44 = vld [vmem:[#allocation14 + $0x8a4] ss:$48 sps:$4 sm:$0xff]   ;;  %v11793_v23 = vld [vmem:[#allocation14 + $0x8ac] ss:$48 sps:$4 sm:$0xff]   ;;  %v13467_v42 = vpack.c.bf16 %v6966_v57, %v6966_v57  ;;  %v11794_v4 = vld [vmem:[#allocation14 + $0x8a0] ss:$48 sps:$4 sm:$0xff]  }
 0x78f   :  { %v11827_v57 = vld [vmem:[#allocation14 + $0x2b8] ss:$48 sps:$4 sm:$0xff]  }
 0x790   :  { %v6952_v28 = vrot.slane %v6951_v27, 1  ;;  %v6964_v50 = vrot.slane %v6963_v15, 1 }
 0x792   :  { %v6953_v29 = vmax.f32 %v6951_v27, %v6952_v28  ;;  %v6965_v13 = vadd.f32 %v6964_v50, %v6963_v15  ;;  %v11795_v27 = vld [vmem:[#allocation14 + $0x8a8] ss:$48 sps:$4 sm:$0xff]   ;;  %v11796_v15 = vld [vmem:[#allocation14 + $0x14] ss:$48 sps:$4 sm:$0xff]   ;;  %v11797_v28 = vld [vmem:[#allocation14 + $0x1c] ss:$48 sps:$4 sm:$0xff]  }
 0x793   :  { %v11798_v50 = vld [vmem:[#allocation14 + $0x10] ss:$48 sps:$4 sm:$0xff]  }
 0x794   :  { %v13457_v60 = vpack.c.bf16 %v6953_v29, %v6953_v29  ;;  %v13459_v55 = vpack.c.bf16 %v6965_v13, %v6965_v13  ;;  %v11799_v29 = vld [vmem:[#allocation14 + $0x18] ss:$48 sps:$4 sm:$0xff]   ;;  %v11800_v13 = vld [vmem:[#allocation14 + $0x74] ss:$48 sps:$4 sm:$0xff]  }
 0x796   :  { %7002 = vmatprep.mubr.bf16.mxu0 %v13459_v55  ;;  %7084 = vmatprep.mubr.bf16.mxu1 %v13459_v55 }
 0x797   :  { %7003 = vmatmul.mubr.bf16.vlgmr.msra.gmra.mrb[48].mxu0 %v13457_v60  ;;  %7085 = vmatmul.mubr.bf16.vlgmr.msra.gmra.mrb[48].mxu1 %v13457_v60 }
 0x798   :  { %7012 = vmatpush1.bf16.msra.mxu0 %v11766_v31  ;;  %7094 = vmatpush1.bf16.msra.mxu1 %v11767_v32  ;;  %v11801_v31 = vld [vmem:[#allocation14 + $0x7c] ss:$48 sps:$4 sm:$0xff]   ;;  %v11802_v32 = vld [vmem:[#allocation14 + $0x70] ss:$48 sps:$4 sm:$0xff]  }
 0x799   :  { %7013 = vmatprep.subr.bf16.mxu0 %v11768_v41  ;;  %7095 = vmatprep.subr.bf16.mxu1 %v11769_v26  ;;  %v11803_v41 = vld [vmem:[#allocation14 + $0x78] ss:$48 sps:$4 sm:$0xff]   ;;  %v11804_v26 = vld [vmem:[#allocation14 + $0xd4] ss:$48 sps:$4 sm:$0xff]  }
 0x79a   :  { %7043 = vmatprep.mubr.bf16.mxu0 %v12780_v1  ;;  %7125 = vmatprep.mubr.bf16.mxu1 %v12780_v1 }
 0x79c   :  { %7014 = vmatpush1.bf16.msra.mxu0 %v11770_v33  ;;  %7096 = vmatpush1.bf16.msra.mxu1 %v11771_v21  ;;  %v11805_v33 = vld [vmem:[#allocation14 + $0xdc] ss:$48 sps:$4 sm:$0xff]   ;;  %v11806_v21 = vld [vmem:[#allocation14 + $0xd0] ss:$48 sps:$4 sm:$0xff]  }
 0x79d   :  { %7015 = vmatprep.subr.bf16.mxu0 %v11772_v59  ;;  %7097 = vmatprep.subr.bf16.mxu1 %v11773_v63  ;;  %v11807_v59 = vld [vmem:[#allocation14 + $0xd8] ss:$48 sps:$4 sm:$0xff]   ;;  %v11808_v63 = vld [vmem:[#allocation14 + $0x134] ss:$48 sps:$4 sm:$0xff]  }
 0x7a0   :  { %7016 = vmatpush1.bf16.msra.mxu0 %v11774_v11  ;;  %7098 = vmatpush1.bf16.msra.mxu1 %v11775_v12  ;;  %v11809_v11 = vld [vmem:[#allocation14 + $0x13c] ss:$48 sps:$4 sm:$0xff]   ;;  %v11810_v12 = vld [vmem:[#allocation14 + $0x130] ss:$48 sps:$4 sm:$0xff]  }
 0x7a1   :  { %7017 = vmatprep.subr.bf16.mxu0 %v11776_v22  ;;  %7099 = vmatprep.subr.bf16.mxu1 %v11777_v8  ;;  %v11811_v22 = vld [vmem:[#allocation14 + $0x138] ss:$48 sps:$4 sm:$0xff]   ;;  %v11812_v8 = vld [vmem:[#allocation14 + $0x194] ss:$48 sps:$4 sm:$0xff]  }
 0x7a4   :  { %7018 = vmatpush1.bf16.msra.mxu0 %v11778_v30  ;;  %7100 = vmatpush1.bf16.msra.mxu1 %v11779_v3  ;;  %v11813_v30 = vld [vmem:[#allocation14 + $0x19c] ss:$48 sps:$4 sm:$0xff]   ;;  %v11814_v3 = vld [vmem:[#allocation14 + $0x190] ss:$48 sps:$4 sm:$0xff]  }
 0x7a5   :  { %7019 = vmatprep.subr.bf16.mxu0 %v11780_v51  ;;  %7101 = vmatprep.subr.bf16.mxu1 %v11781_v45  ;;  %v11815_v51 = vld [vmem:[#allocation14 + $0x198] ss:$48 sps:$4 sm:$0xff]   ;;  %v11816_v45 = vld [vmem:[#allocation14 + $0x1f4] ss:$48 sps:$4 sm:$0xff]  }
 0x7a8   :  { %7020 = vmatpush1.bf16.msra.mxu0 %v11782_v9  ;;  %7102 = vmatpush1.bf16.msra.mxu1 %v11783_v38  ;;  %v11817_v9 = vld [vmem:[#allocation14 + $0x1fc] ss:$48 sps:$4 sm:$0xff]   ;;  %v11818_v38 = vld [vmem:[#allocation14 + $0x1f0] ss:$48 sps:$4 sm:$0xff]  }
 0x7a9   :  { %7021 = vmatprep.subr.bf16.mxu0 %v11784_v62  ;;  %7103 = vmatprep.subr.bf16.mxu1 %v11785_v56  ;;  %v11819_v62 = vld [vmem:[#allocation14 + $0x1f8] ss:$48 sps:$4 sm:$0xff]   ;;  %v11820_v56 = vld [vmem:[#allocation14 + $0x254] ss:$48 sps:$4 sm:$0xff]  }
 0x7ac   :  { %7022 = vmatpush1.bf16.msra.mxu0 %v11786_v14  ;;  %7104 = vmatpush1.bf16.msra.mxu1 %v11787_v16  ;;  %v11821_v14 = vld [vmem:[#allocation14 + $0x25c] ss:$48 sps:$4 sm:$0xff]   ;;  %v11822_v16 = vld [vmem:[#allocation14 + $0x250] ss:$48 sps:$4 sm:$0xff]  }
 0x7ad   :  { %7023 = vmatprep.subr.bf16.mxu0 %v11788_v24  ;;  %7105 = vmatprep.subr.bf16.mxu1 %v11789_v25  ;;  %v11823_v24 = vld [vmem:[#allocation14 + $0x258] ss:$48 sps:$4 sm:$0xff]   ;;  %v11824_v25 = vld [vmem:[#allocation14 + $0x2b4] ss:$48 sps:$4 sm:$0xff]  }
 0x7b0   :  { %7024 = vmatpush1.bf16.msra.mxu0 %v11790_v20  ;;  %7106 = vmatpush1.bf16.msra.mxu1 %v11791_v53  ;;  %v11825_v20 = vld [vmem:[#allocation14 + $0x2bc] ss:$48 sps:$4 sm:$0xff]   ;;  %v11826_v53 = vld [vmem:[#allocation14 + $0x2b0] ss:$48 sps:$4 sm:$0xff]  }
 0x7b1   :  { %7025 = vmatprep.subr.bf16.mxu0 %v11792_v44  ;;  %7107 = vmatprep.subr.bf16.mxu1 %v11793_v23  ;;  %v11828_v44 = vld [vmem:[#allocation14 + $0x314] ss:$48 sps:$4 sm:$0xff]   ;;  %v11829_v23 = vld [vmem:[#allocation14 + $0x31c] ss:$48 sps:$4 sm:$0xff]  }
 0x7b4   :  { %7026 = vmatpush1.bf16.msra.mxu0 %v11794_v4  ;;  %7108 = vmatpush1.bf16.msra.mxu1 %v11795_v27  ;;  %v11830_v4 = vld [vmem:[#allocation14 + $0x310] ss:$48 sps:$4 sm:$0xff]   ;;  %v11831_v27 = vld [vmem:[#allocation14 + $0x318] ss:$48 sps:$4 sm:$0xff]  }
 0x7b5   :  { %7134 = vmatprep.subr.bf16.mxu0 %v11796_v15  ;;  %7216 = vmatprep.subr.bf16.mxu1 %v11797_v28  ;;  %v11832_v15 = vld [vmem:[#allocation14 + $0x374] ss:$48 sps:$4 sm:$0xff]   ;;  %v11833_v28 = vld [vmem:[#allocation14 + $0x37c] ss:$48 sps:$4 sm:$0xff]  }
 0x7b7   :  { %7044 = vmatmul.mubr.bf16.vlgmr.msra.gmra.mrb[48].mxu0 %v13467_v42  ;;  %7126 = vmatmul.mubr.bf16.vlgmr.msra.gmra.mrb[48].mxu1 %v13467_v42 }
 0x7b8   :  { %7135 = vmatpush1.bf16.msra.mxu0 %v11798_v50  ;;  %7166 = vmatprep.mubr.bf16.mxu0 %v13459_v55  ;;  %v11834_v50 = vld [vmem:[#allocation14 + $0x370] ss:$48 sps:$4 sm:$0xff]  }
 0x7b9   :  { %7217 = vmatpush1.bf16.msra.mxu1 %v11799_v29  ;;  %7248 = vmatprep.mubr.bf16.mxu1 %v13459_v55  ;;  %v11835_v29 = vld [vmem:[#allocation14 + $0x378] ss:$48 sps:$4 sm:$0xff]  }
 0x7ba   :  { %7136 = vmatprep.subr.bf16.mxu0 %v11800_v13  ;;  %7218 = vmatprep.subr.bf16.mxu1 %v11801_v31  ;;  %v11836_v13 = vld [vmem:[#allocation14 + $0x3d4] ss:$48 sps:$4 sm:$0xff]   ;;  %v11837_v31 = vld [vmem:[#allocation14 + $0x3dc] ss:$48 sps:$4 sm:$0xff]  }
 0x7bc   :  { %7137 = vmatpush1.bf16.msra.mxu0 %v11802_v32  ;;  %v11838_v32 = vld [vmem:[#allocation14 + $0x3d0] ss:$48 sps:$4 sm:$0xff]  }
 0x7bd   :  { %7219 = vmatpush1.bf16.msra.mxu1 %v11803_v41  ;;  %7138 = vmatprep.subr.bf16.mxu0 %v11804_v26  ;;  %v11839_v41 = vld [vmem:[#allocation14 + $0x3d8] ss:$48 sps:$4 sm:$0xff]   ;;  %v11840_v26 = vld [vmem:[#allocation14 + $0x434] ss:$48 sps:$4 sm:$0xff]  }
 0x7be   :  { %7220 = vmatprep.subr.bf16.mxu1 %v11805_v33  ;;  %v11841_v33 = vld [vmem:[#allocation14 + $0x43c] ss:$48 sps:$4 sm:$0xff]  }
 0x7c0   :  { %7139 = vmatpush1.bf16.msra.mxu0 %v11806_v21  ;;  %v11842_v21 = vld [vmem:[#allocation14 + $0x430] ss:$48 sps:$4 sm:$0xff]  }
 0x7c1   :  { %7221 = vmatpush1.bf16.msra.mxu1 %v11807_v59  ;;  %7140 = vmatprep.subr.bf16.mxu0 %v11808_v63  ;;  %v11843_v59 = vld [vmem:[#allocation14 + $0x438] ss:$48 sps:$4 sm:$0xff]   ;;  %v11844_v63 = vld [vmem:[#allocation14 + $0x494] ss:$48 sps:$4 sm:$0xff]  }
 0x7c2   :  { %7222 = vmatprep.subr.bf16.mxu1 %v11809_v11  ;;  %v11845_v11 = vld [vmem:[#allocation14 + $0x49c] ss:$48 sps:$4 sm:$0xff]  }
 0x7c4   :  { %7141 = vmatpush1.bf16.msra.mxu0 %v11810_v12  ;;  %v11846_v12 = vld [vmem:[#allocation14 + $0x490] ss:$48 sps:$4 sm:$0xff]  }
 0x7c5   :  { %7223 = vmatpush1.bf16.msra.mxu1 %v11811_v22  ;;  %7142 = vmatprep.subr.bf16.mxu0 %v11812_v8  ;;  %v11847_v22 = vld [vmem:[#allocation14 + $0x498] ss:$48 sps:$4 sm:$0xff]   ;;  %v11848_v8 = vld [vmem:[#allocation14 + $0x4f4] ss:$48 sps:$4 sm:$0xff]  }
 0x7c6   :  { %7224 = vmatprep.subr.bf16.mxu1 %v11813_v30  ;;  %v11849_v30 = vld [vmem:[#allocation14 + $0x4fc] ss:$48 sps:$4 sm:$0xff]  }
 0x7c8   :  { %7143 = vmatpush1.bf16.msra.mxu0 %v11814_v3  ;;  %v11850_v3 = vld [vmem:[#allocation14 + $0x4f0] ss:$48 sps:$4 sm:$0xff]  }
 0x7c9   :  { %7225 = vmatpush1.bf16.msra.mxu1 %v11815_v51  ;;  %7144 = vmatprep.subr.bf16.mxu0 %v11816_v45  ;;  %v11851_v51 = vld [vmem:[#allocation14 + $0x4f8] ss:$48 sps:$4 sm:$0xff]   ;;  %v11852_v45 = vld [vmem:[#allocation14 + $0x554] ss:$48 sps:$4 sm:$0xff]  }
 0x7ca   :  { %7226 = vmatprep.subr.bf16.mxu1 %v11817_v9  ;;  %v11853_v9 = vld [vmem:[#allocation14 + $0x55c] ss:$48 sps:$4 sm:$0xff]  }
 0x7cc   :  { %7145 = vmatpush1.bf16.msra.mxu0 %v11818_v38  ;;  %v11854_v38 = vld [vmem:[#allocation14 + $0x550] ss:$48 sps:$4 sm:$0xff]  }
 0x7cd   :  { %7227 = vmatpush1.bf16.msra.mxu1 %v11819_v62  ;;  %7146 = vmatprep.subr.bf16.mxu0 %v11820_v56  ;;  %v11855_v62 = vld [vmem:[#allocation14 + $0x558] ss:$48 sps:$4 sm:$0xff]   ;;  %v11856_v56 = vld [vmem:[#allocation14 + $0x5b4] ss:$48 sps:$4 sm:$0xff]  }
 0x7ce   :  { %7228 = vmatprep.subr.bf16.mxu1 %v11821_v14  ;;  %v11857_v14 = vld [vmem:[#allocation14 + $0x5bc] ss:$48 sps:$4 sm:$0xff]  }
 0x7d0   :  { %7147 = vmatpush1.bf16.msra.mxu0 %v11822_v16  ;;  %v11858_v16 = vld [vmem:[#allocation14 + $0x5b0] ss:$48 sps:$4 sm:$0xff]  }
 0x7d1   :  { %7229 = vmatpush1.bf16.msra.mxu1 %v11823_v24  ;;  %7148 = vmatprep.subr.bf16.mxu0 %v11824_v25  ;;  %v11859_v24 = vld [vmem:[#allocation14 + $0x5b8] ss:$48 sps:$4 sm:$0xff]   ;;  %v11860_v25 = vld [vmem:[#allocation14 + $0x614] ss:$48 sps:$4 sm:$0xff]  }
 0x7d2   :  { %7230 = vmatprep.subr.bf16.mxu1 %v11825_v20  ;;  %v11861_v20 = vld [vmem:[#allocation14 + $0x61c] ss:$48 sps:$4 sm:$0xff]  }
 0x7d4   :  { %7149 = vmatpush1.bf16.msra.mxu0 %v11826_v53  ;;  %v11862_v53 = vld [vmem:[#allocation14 + $0x610] ss:$48 sps:$4 sm:$0xff]  }
 0x7d5   :  { %7231 = vmatpush1.bf16.msra.mxu1 %v11827_v57  ;;  %7150 = vmatprep.subr.bf16.mxu0 %v11828_v44  ;;  %v11863_v57 = vld [vmem:[#allocation14 + $0x618] ss:$48 sps:$4 sm:$0xff]   ;;  %v11864_v44 = vld [vmem:[#allocation14 + $0x674] ss:$48 sps:$4 sm:$0xff]  }
 0x7d6   :  { %7232 = vmatprep.subr.bf16.mxu1 %v11829_v23  ;;  %v11865_v23 = vld [vmem:[#allocation14 + $0x67c] ss:$48 sps:$4 sm:$0xff]  }
 0x7d8   :  { %7151 = vmatpush1.bf16.msra.mxu0 %v11830_v4  ;;  %v11866_v4 = vld [vmem:[#allocation14 + $0x670] ss:$48 sps:$4 sm:$0xff]  }
 0x7d9   :  { %7233 = vmatpush1.bf16.msra.mxu1 %v11831_v27  ;;  %7152 = vmatprep.subr.bf16.mxu0 %v11832_v15  ;;  %v11867_v27 = vld [vmem:[#allocation14 + $0x678] ss:$48 sps:$4 sm:$0xff]   ;;  %v11868_v15 = vld [vmem:[#allocation14 + $0x6d4] ss:$48 sps:$4 sm:$0xff]  }
 0x7da   :  { %7234 = vmatprep.subr.bf16.mxu1 %v11833_v28  ;;  %v11869_v28 = vld [vmem:[#allocation14 + $0x6dc] ss:$48 sps:$4 sm:$0xff]  }
 0x7dc   :  { %7153 = vmatpush1.bf16.msra.mxu0 %v11834_v50  ;;  %v11870_v50 = vld [vmem:[#allocation14 + $0x6d0] ss:$48 sps:$4 sm:$0xff]  }
 0x7dd   :  { %7235 = vmatpush1.bf16.msra.mxu1 %v11835_v29  ;;  %7154 = vmatprep.subr.bf16.mxu0 %v11836_v13  ;;  %v11871_v29 = vld [vmem:[#allocation14 + $0x6d8] ss:$48 sps:$4 sm:$0xff]   ;;  %v11872_v13 = vld [vmem:[#allocation14 + $0x734] ss:$48 sps:$4 sm:$0xff]  }
 0x7de   :  { %7236 = vmatprep.subr.bf16.mxu1 %v11837_v31  ;;  %v11873_v31 = vld [vmem:[#allocation14 + $0x73c] ss:$48 sps:$4 sm:$0xff]  }
 0x7e0   :  { %7155 = vmatpush1.bf16.msra.mxu0 %v11838_v32  ;;  %v11874_v32 = vld [vmem:[#allocation14 + $0x730] ss:$48 sps:$4 sm:$0xff]  }
 0x7e1   :  { %7237 = vmatpush1.bf16.msra.mxu1 %v11839_v41  ;;  %7156 = vmatprep.subr.bf16.mxu0 %v11840_v26  ;;  %v11875_v41 = vld [vmem:[#allocation14 + $0x738] ss:$48 sps:$4 sm:$0xff]   ;;  %v11876_v26 = vld [vmem:[#allocation14 + $0x794] ss:$48 sps:$4 sm:$0xff]  }
 0x7e2   :  { %7238 = vmatprep.subr.bf16.mxu1 %v11841_v33  ;;  %v11877_v33 = vld [vmem:[#allocation14 + $0x79c] ss:$48 sps:$4 sm:$0xff]  }
 0x7e4   :  { %7157 = vmatpush1.bf16.msra.mxu0 %v11842_v21  ;;  %v11878_v21 = vld [vmem:[#allocation14 + $0x790] ss:$48 sps:$4 sm:$0xff]  }
 0x7e5   :  { %7239 = vmatpush1.bf16.msra.mxu1 %v11843_v59  ;;  %7158 = vmatprep.subr.bf16.mxu0 %v11844_v63  ;;  %v11879_v59 = vld [vmem:[#allocation14 + $0x798] ss:$48 sps:$4 sm:$0xff]   ;;  %v11880_v63 = vld [vmem:[#allocation14 + $0x7f4] ss:$48 sps:$4 sm:$0xff]  }
 0x7e6   :  { %7240 = vmatprep.subr.bf16.mxu1 %v11845_v11  ;;  %v11881_v11 = vld [vmem:[#allocation14 + $0x7fc] ss:$48 sps:$4 sm:$0xff]  }
 0x7e8   :  { %7159 = vmatpush1.bf16.msra.mxu0 %v11846_v12  ;;  %v11882_v12 = vld [vmem:[#allocation14 + $0x7f0] ss:$48 sps:$4 sm:$0xff]  }
 0x7e9   :  { %7241 = vmatpush1.bf16.msra.mxu1 %v11847_v22  ;;  %7160 = vmatprep.subr.bf16.mxu0 %v11848_v8  ;;  %v11883_v22 = vld [vmem:[#allocation14 + $0x7f8] ss:$48 sps:$4 sm:$0xff]   ;;  %v11884_v8 = vld [vmem:[#allocation14 + $0x854] ss:$48 sps:$4 sm:$0xff]  }
 0x7ea   :  { %7242 = vmatprep.subr.bf16.mxu1 %v11849_v30  ;;  %v11885_v30 = vld [vmem:[#allocation14 + $0x85c] ss:$48 sps:$4 sm:$0xff]  }
 0x7ec   :  { %7161 = vmatpush1.bf16.msra.mxu0 %v11850_v3  ;;  %v11886_v3 = vld [vmem:[#allocation14 + $0x850] ss:$48 sps:$4 sm:$0xff]  }
 0x7ed   :  { %7243 = vmatpush1.bf16.msra.mxu1 %v11851_v51  ;;  %7162 = vmatprep.subr.bf16.mxu0 %v11852_v45  ;;  %v11887_v51 = vld [vmem:[#allocation14 + $0x858] ss:$48 sps:$4 sm:$0xff]   ;;  %v11888_v45 = vld [vmem:[#allocation14 + $0x8b4] ss:$48 sps:$4 sm:$0xff]  }
 0x7ee   :  { %7244 = vmatprep.subr.bf16.mxu1 %v11853_v9  ;;  %v11889_v9 = vld [vmem:[#allocation14 + $0x8bc] ss:$48 sps:$4 sm:$0xff]  }
 0x7f0   :  { %7163 = vmatpush1.bf16.msra.mxu0 %v11854_v38  ;;  %v11890_v38 = vld [vmem:[#allocation14 + $0x8b0] ss:$48 sps:$4 sm:$0xff]  }
 0x7f1   :  { %7245 = vmatpush1.bf16.msra.mxu1 %v11855_v62  ;;  %7164 = vmatprep.subr.bf16.mxu0 %v11856_v56  ;;  %v11891_v62 = vld [vmem:[#allocation14 + $0x8b8] ss:$48 sps:$4 sm:$0xff]   ;;  %v11892_v56 = vld [vmem:[#allocation14 + $0x24] ss:$48 sps:$4 sm:$0xff]  }
 0x7f2   :  { %7246 = vmatprep.subr.bf16.mxu1 %v11857_v14  ;;  %v11893_v14 = vld [vmem:[#allocation14 + $0x624] ss:$48 sps:$4 sm:$0xff]  }
 0x7f4   :  { %7165 = vmatpush1.bf16.msra.mxu0 %v11858_v16  ;;  %v11894_v16 = vld [vmem:[#allocation14 + $0x20] ss:$48 sps:$4 sm:$0xff]  }
 0x7f5   :  { %7247 = vmatpush1.bf16.msra.mxu1 %v11859_v24  ;;  %7175 = vmatprep.subr.bf16.mxu0 %v11860_v25  ;;  %v11895_v24 = vld [vmem:[#allocation14 + $0x620] ss:$48 sps:$4 sm:$0xff]   ;;  %v11896_v25 = vld [vmem:[#allocation14 + $0x84] ss:$48 sps:$4 sm:$0xff]  }
 0x7f6   :  { %7257 = vmatprep.subr.bf16.mxu1 %v11861_v20  ;;  %v11897_v20 = vld [vmem:[#allocation14 + $0x684] ss:$48 sps:$4 sm:$0xff]  }
 0x7f7   :  { %7167 = vmatmul.mubr.bf16.vlgmr.msra.gmra.mrb[52].mxu0 %v13457_v60 }
 0x7f8   :  { %7249 = vmatmul.mubr.bf16.vlgmr.msra.gmra.mrb[52].mxu1 %v13457_v60  ;;  %7176 = vmatpush1.bf16.msra.mxu0 %v11862_v53  ;;  %v11898_v53 = vld [vmem:[#allocation14 + $0x80] ss:$48 sps:$4 sm:$0xff]  }
 0x7f9   :  { %7258 = vmatpush1.bf16.msra.mxu1 %v11863_v57  ;;  %7177 = vmatprep.subr.bf16.mxu0 %v11864_v44  ;;  %v11899_v57 = vld [vmem:[#allocation14 + $0x680] ss:$48 sps:$4 sm:$0xff]   ;;  %v11900_v44 = vld [vmem:[#allocation14 + $0xe4] ss:$48 sps:$4 sm:$0xff]  }
 0x7fa   :  { %7259 = vmatprep.subr.bf16.mxu1 %v11865_v23  ;;  %7207 = vmatprep.mubr.bf16.mxu0 %v12780_v1  ;;  %v11901_v23 = vld [vmem:[#allocation14 + $0x6e4] ss:$48 sps:$4 sm:$0xff]  }
 0x7fb   :  { %7289 = vmatprep.mubr.bf16.mxu1 %v12780_v1 }
 0x7fc   :  { %7178 = vmatpush1.bf16.msra.mxu0 %v11866_v4  ;;  %v11902_v4 = vld [vmem:[#allocation14 + $0xe0] ss:$48 sps:$4 sm:$0xff]  }
 0x7fd   :  { %7260 = vmatpush1.bf16.msra.mxu1 %v11867_v27  ;;  %7179 = vmatprep.subr.bf16.mxu0 %v11868_v15  ;;  %v11903_v27 = vld [vmem:[#allocation14 + $0x6e0] ss:$48 sps:$4 sm:$0xff]   ;;  %v11904_v15 = vld [vmem:[#allocation14 + $0x144] ss:$48 sps:$4 sm:$0xff]  }
 0x7fe   :  { %7261 = vmatprep.subr.bf16.mxu1 %v11869_v28  ;;  %v11905_v28 = vld [vmem:[#allocation14 + $0x744] ss:$48 sps:$4 sm:$0xff]  }
 0x800   :  { %7180 = vmatpush1.bf16.msra.mxu0 %v11870_v50  ;;  %v11906_v50 = vld [vmem:[#allocation14 + $0x140] ss:$48 sps:$4 sm:$0xff]  }
 0x801   :  { %7262 = vmatpush1.bf16.msra.mxu1 %v11871_v29  ;;  %7181 = vmatprep.subr.bf16.mxu0 %v11872_v13  ;;  %v11907_v29 = vld [vmem:[#allocation14 + $0x740] ss:$48 sps:$4 sm:$0xff]   ;;  %v11908_v13 = vld [vmem:[#allocation14 + $0x1a4] ss:$48 sps:$4 sm:$0xff]  }
 0x802   :  { %7263 = vmatprep.subr.bf16.mxu1 %v11873_v31  ;;  %v11909_v31 = vld [vmem:[#allocation14 + $0x7a4] ss:$48 sps:$4 sm:$0xff]  }
 0x804   :  { %7182 = vmatpush1.bf16.msra.mxu0 %v11874_v32  ;;  %v11910_v32 = vld [vmem:[#allocation14 + $0x1a0] ss:$48 sps:$4 sm:$0xff]  }
 0x805   :  { %7264 = vmatpush1.bf16.msra.mxu1 %v11875_v41  ;;  %7183 = vmatprep.subr.bf16.mxu0 %v11876_v26  ;;  %v11911_v41 = vld [vmem:[#allocation14 + $0x7a0] ss:$48 sps:$4 sm:$0xff]   ;;  %v11912_v26 = vld [vmem:[#allocation14 + $0x204] ss:$48 sps:$4 sm:$0xff]  }
 0x806   :  { %7265 = vmatprep.subr.bf16.mxu1 %v11877_v33  ;;  %v11913_v33 = vld [vmem:[#allocation14 + $0x804] ss:$48 sps:$4 sm:$0xff]  }
 0x808   :  { %7184 = vmatpush1.bf16.msra.mxu0 %v11878_v21  ;;  %v11914_v21 = vld [vmem:[#allocation14 + $0x200] ss:$48 sps:$4 sm:$0xff]  }
 0x809   :  { %7266 = vmatpush1.bf16.msra.mxu1 %v11879_v59  ;;  %7185 = vmatprep.subr.bf16.mxu0 %v11880_v63  ;;  %v11915_v59 = vld [vmem:[#allocation14 + $0x800] ss:$48 sps:$4 sm:$0xff]   ;;  %v11916_v63 = vld [vmem:[#allocation14 + $0x264] ss:$48 sps:$4 sm:$0xff]  }
 0x80a   :  { %7267 = vmatprep.subr.bf16.mxu1 %v11881_v11  ;;  %v11917_v11 = vld [vmem:[#allocation14 + $0x864] ss:$48 sps:$4 sm:$0xff]  }
 0x80c   :  { %7186 = vmatpush1.bf16.msra.mxu0 %v11882_v12  ;;  %v11918_v12 = vld [vmem:[#allocation14 + $0x260] ss:$48 sps:$4 sm:$0xff]  }
 0x80d   :  { %7268 = vmatpush1.bf16.msra.mxu1 %v11883_v22  ;;  %7187 = vmatprep.subr.bf16.mxu0 %v11884_v8  ;;  %v11919_v22 = vld [vmem:[#allocation14 + $0x860] ss:$48 sps:$4 sm:$0xff]   ;;  %v11920_v8 = vld [vmem:[#allocation14 + $0x2c4] ss:$48 sps:$4 sm:$0xff]  }
 0x80e   :  { %7269 = vmatprep.subr.bf16.mxu1 %v11885_v30  ;;  %v11921_v30 = vld [vmem:[#allocation14 + $0x8c4] ss:$48 sps:$4 sm:$0xff]  }
 0x810   :  { %7188 = vmatpush1.bf16.msra.mxu0 %v11886_v3  ;;  %v11922_v3 = vld [vmem:[#allocation14 + $0x2c0] ss:$48 sps:$4 sm:$0xff]  }
 0x811   :  { %7270 = vmatpush1.bf16.msra.mxu1 %v11887_v51  ;;  %7189 = vmatprep.subr.bf16.mxu0 %v11888_v45  ;;  %v11923_v51 = vld [vmem:[#allocation14 + $0x8c0] ss:$48 sps:$4 sm:$0xff]   ;;  %v11924_v45 = vld [vmem:[#allocation14 + $0x324] ss:$48 sps:$4 sm:$0xff]  }
 0x812   :  { %7271 = vmatprep.subr.bf16.mxu1 %v11889_v9  ;;  %v11925_v9 = vld [vmem:[#allocation14 + $0x2c] ss:$48 sps:$4 sm:$0xff]  }
 0x814   :  { %7190 = vmatpush1.bf16.msra.mxu0 %v11890_v38  ;;  %v11926_v38 = vld [vmem:[#allocation14 + $0x320] ss:$48 sps:$4 sm:$0xff]  }
 0x815   :  { %7272 = vmatpush1.bf16.msra.mxu1 %v11891_v62  ;;  %7298 = vmatprep.subr.bf16.mxu0 %v11892_v56  ;;  %v11927_v62 = vld [vmem:[#allocation14 + $0x28] ss:$48 sps:$4 sm:$0xff]   ;;  %v11928_v56 = vld [vmem:[#allocation14 + $0x384] ss:$48 sps:$4 sm:$0xff]  }
 0x816   :  { %7339 = vmatprep.subr.bf16.mxu1 %v11893_v14  ;;  %v11929_v14 = vld [vmem:[#allocation14 + $0x8c] ss:$48 sps:$4 sm:$0xff]  }
 0x817   :  { %7208 = vmatmul.mubr.bf16.vlgmr.msra.gmra.mrb[52].mxu0 %v13467_v42 }
 0x818   :  { %7290 = vmatmul.mubr.bf16.vlgmr.msra.gmra.mrb[52].mxu1 %v13467_v42  ;;  %7299 = vmatpush1.bf16.msra.mxu0 %v11894_v16  ;;  %v11930_v16 = vld [vmem:[#allocation14 + $0x380] ss:$48 sps:$4 sm:$0xff]  }
 0x819   :  { %7330 = vmatprep.mubr.bf16.mxu0 %v13459_v55  ;;  %7340 = vmatpush1.bf16.msra.mxu1 %v11895_v24  ;;  %v11931_v24 = vld [vmem:[#allocation14 + $0x88] ss:$48 sps:$4 sm:$0xff]  }
 0x81a   :  { %7300 = vmatprep.subr.bf16.mxu0 %v11896_v25  ;;  %7341 = vmatprep.subr.bf16.mxu1 %v11897_v20  ;;  %v11932_v25 = vld [vmem:[#allocation14 + $0x3e4] ss:$48 sps:$4 sm:$0xff]   ;;  %v11933_v20 = vld [vmem:[#allocation14 + $0xec] ss:$48 sps:$4 sm:$0xff]  }
 0x81b   :  { %7371 = vmatprep.mubr.bf16.mxu1 %v12780_v1 }
 0x81c   :  { %7301 = vmatpush1.bf16.msra.mxu0 %v11898_v53  ;;  %v11934_v53 = vld [vmem:[#allocation14 + $0x3e0] ss:$48 sps:$4 sm:$0xff]  }
 0x81d   :  { %7342 = vmatpush1.bf16.msra.mxu1 %v11899_v57  ;;  %7302 = vmatprep.subr.bf16.mxu0 %v11900_v44  ;;  %v11935_v57 = vld [vmem:[#allocation14 + $0xe8] ss:$48 sps:$4 sm:$0xff]   ;;  %v11936_v44 = vld [vmem:[#allocation14 + $0x444] ss:$48 sps:$4 sm:$0xff]  }
 0x81e   :  { %7343 = vmatprep.subr.bf16.mxu1 %v11901_v23  ;;  %v11937_v23 = vld [vmem:[#allocation14 + $0x14c] ss:$48 sps:$4 sm:$0xff]  }
 0x820   :  { %7303 = vmatpush1.bf16.msra.mxu0 %v11902_v4  ;;  %v11939_v4 = vld [vmem:[#allocation14 + $0x148] ss:$48 sps:$4 sm:$0xff]  }
 0x821   :  { %7344 = vmatpush1.bf16.msra.mxu1 %v11903_v27  ;;  %7304 = vmatprep.subr.bf16.mxu0 %v11904_v15  ;;  %v11940_v27 = vld [vmem:[#allocation14 + $0x4a4] ss:$48 sps:$4 sm:$0xff]   ;;  %v11941_v15 = vld [vmem:[#allocation14 + $0x1ac] ss:$48 sps:$4 sm:$0xff]  }
 0x822   :  { %7345 = vmatprep.subr.bf16.mxu1 %v11905_v28  ;;  %v11942_v28 = vld [vmem:[#allocation14 + $0x4a0] ss:$48 sps:$4 sm:$0xff]  }
 0x824   :  { %7305 = vmatpush1.bf16.msra.mxu0 %v11906_v50  ;;  %v11943_v50 = vld [vmem:[#allocation14 + $0x1a8] ss:$48 sps:$4 sm:$0xff]  }
 0x825   :  { %7346 = vmatpush1.bf16.msra.mxu1 %v11907_v29  ;;  %7306 = vmatprep.subr.bf16.mxu0 %v11908_v13  ;;  %v11944_v29 = vld [vmem:[#allocation14 + $0x504] ss:$48 sps:$4 sm:$0xff]   ;;  %v11945_v13 = vld [vmem:[#allocation14 + $0x20c] ss:$48 sps:$4 sm:$0xff]  }
 0x826   :  { %7347 = vmatprep.subr.bf16.mxu1 %v11909_v31  ;;  %v11946_v31 = vld [vmem:[#allocation14 + $0x500] ss:$48 sps:$4 sm:$0xff]  }
 0x828   :  { %7307 = vmatpush1.bf16.msra.mxu0 %v11910_v32  ;;  %v11947_v32 = vld [vmem:[#allocation14 + $0x208] ss:$48 sps:$4 sm:$0xff]  }
 0x829   :  { %7348 = vmatpush1.bf16.msra.mxu1 %v11911_v41  ;;  %7308 = vmatprep.subr.bf16.mxu0 %v11912_v26  ;;  %v11948_v41 = vld [vmem:[#allocation14 + $0x564] ss:$48 sps:$4 sm:$0xff]   ;;  %v11949_v26 = vld [vmem:[#allocation14 + $0x26c] ss:$48 sps:$4 sm:$0xff]  }
 0x82a   :  { %7349 = vmatprep.subr.bf16.mxu1 %v11913_v33  ;;  %v11950_v33 = vld [vmem:[#allocation14 + $0x560] ss:$48 sps:$4 sm:$0xff]  }
 0x82c   :  { %7309 = vmatpush1.bf16.msra.mxu0 %v11914_v21  ;;  %v11951_v21 = vld [vmem:[#allocation14 + $0x268] ss:$48 sps:$4 sm:$0xff]  }
 0x82d   :  { %7350 = vmatpush1.bf16.msra.mxu1 %v11915_v59  ;;  %7310 = vmatprep.subr.bf16.mxu0 %v11916_v63  ;;  %v11952_v59 = vld [vmem:[#allocation14 + $0x5c4] ss:$48 sps:$4 sm:$0xff]   ;;  %v11953_v63 = vld [vmem:[#allocation14 + $0x2cc] ss:$48 sps:$4 sm:$0xff]  }
 0x82e   :  { %7351 = vmatprep.subr.bf16.mxu1 %v11917_v11  ;;  %v11954_v11 = vld [vmem:[#allocation14 + $0x5c0] ss:$48 sps:$4 sm:$0xff]  }
 0x830   :  { %7311 = vmatpush1.bf16.msra.mxu0 %v11918_v12  ;;  %v11955_v12 = vld [vmem:[#allocation14 + $0x2c8] ss:$48 sps:$4 sm:$0xff]  }
 0x831   :  { %7352 = vmatpush1.bf16.msra.mxu1 %v11919_v22  ;;  %7312 = vmatprep.subr.bf16.mxu0 %v11920_v8  ;;  %v11956_v22 = vld [vmem:[#allocation14 + $0x62c] ss:$48 sps:$4 sm:$0xff]  }
 0x832   :  { %7353 = vmatprep.subr.bf16.mxu1 %v11921_v30  ;;  %v11957_v8 = vld [vmem:[#allocation14 + $0x32c] ss:$48 sps:$4 sm:$0xff]   ;;  %v11958_v30 = vld [vmem:[#allocation14 + $0x628] ss:$48 sps:$4 sm:$0xff]  }
 0x834   :  { %7313 = vmatpush1.bf16.msra.mxu0 %v11922_v3  ;;  %v11959_v3 = vld [vmem:[#allocation14 + $0x328] ss:$48 sps:$4 sm:$0xff]  }
 0x835   :  { %7354 = vmatpush1.bf16.msra.mxu1 %v11923_v51  ;;  %7314 = vmatprep.subr.bf16.mxu0 %v11924_v45  ;;  %v11960_v51 = vld [vmem:[#allocation14 + $0x68c] ss:$48 sps:$4 sm:$0xff]  }
 0x836   :  { %7380 = vmatprep.subr.bf16.mxu1 %v11925_v9  ;;  %v11961_v45 = vld [vmem:[#allocation14 + $0x38c] ss:$48 sps:$4 sm:$0xff]   ;;  %v11962_v9 = vld [vmem:[#allocation14 + $0x688] ss:$48 sps:$4 sm:$0xff]  }
 0x838   :  { %7372 = vmatmul.mubr.bf16.vlgmr.msra.gmra.mrb[56].mxu1 %v13467_v42  ;;  %7315 = vmatpush1.bf16.msra.mxu0 %v11926_v38  ;;  %v11963_v38 = vld [vmem:[#allocation14 + $0x388] ss:$48 sps:$4 sm:$0xff]  }
 0x839   :  { %7381 = vmatpush1.bf16.msra.mxu1 %v11927_v62  ;;  %7412 = vmatprep.mubr.bf16.mxu1 %v13459_v55  ;;  %v11938_v55 = vld [vmem:[#allocation14 + $0x440] ss:$48 sps:$4 sm:$0xff]   ;;  %v11964_v62 = vld [vmem:[#allocation14 + $0x6ec] ss:$48 sps:$4 sm:$0xff]  }
 0x83a   :  { %7316 = vmatprep.subr.bf16.mxu0 %v11928_v56  ;;  %7382 = vmatprep.subr.bf16.mxu1 %v11929_v14  ;;  %v11965_v56 = vld [vmem:[#allocation14 + $0x3ec] ss:$48 sps:$4 sm:$0xff]   ;;  %v11966_v14 = vld [vmem:[#allocation14 + $0x6e8] ss:$48 sps:$4 sm:$0xff]  }
 0x83c   :  { %7317 = vmatpush1.bf16.msra.mxu0 %v11930_v16  ;;  %v11967_v16 = vld [vmem:[#allocation14 + $0x3e8] ss:$48 sps:$4 sm:$0xff]  }
 0x83d   :  { %7383 = vmatpush1.bf16.msra.mxu1 %v11931_v24  ;;  %7318 = vmatprep.subr.bf16.mxu0 %v11932_v25  ;;  %v11968_v24 = vld [vmem:[#allocation14 + $0x74c] ss:$48 sps:$4 sm:$0xff]   ;;  %v11970_v25 = vld [vmem:[#allocation14 + $0x748] ss:$48 sps:$4 sm:$0xff]  }
 0x83e   :  { %7384 = vmatprep.subr.bf16.mxu1 %v11933_v20  ;;  %v11971_v20 = vld [vmem:[#allocation14 + $0x448] ss:$48 sps:$4 sm:$0xff]  }
 0x840   :  { %7319 = vmatpush1.bf16.msra.mxu0 %v11934_v53  ;;  %v11972_v53 = vld [vmem:[#allocation14 + $0x7ac] ss:$48 sps:$4 sm:$0xff]  }
 0x841   :  { %7385 = vmatpush1.bf16.msra.mxu1 %v11935_v57  ;;  %7320 = vmatprep.subr.bf16.mxu0 %v11936_v44  ;;  %v11973_v57 = vld [vmem:[#allocation14 + $0x4ac] ss:$48 sps:$4 sm:$0xff]   ;;  %v11974_v44 = vld [vmem:[#allocation14 + $0x7a8] ss:$48 sps:$4 sm:$0xff]  }
 0x842   :  { %7386 = vmatprep.subr.bf16.mxu1 %v11937_v23  ;;  %v11975_v23 = vld [vmem:[#allocation14 + $0x4a8] ss:$48 sps:$4 sm:$0xff]  }
 0x844   :  { %7321 = vmatpush1.bf16.msra.mxu0 %v11938_v55  ;;  %v11976_v55 = vld [vmem:[#allocation14 + $0x80c] ss:$48 sps:$4 sm:$0xff]  }
 0x845   :  { %7387 = vmatpush1.bf16.msra.mxu1 %v11939_v4  ;;  %7322 = vmatprep.subr.bf16.mxu0 %v11940_v27  ;;  %v11977_v4 = vld [vmem:[#allocation14 + $0x50c] ss:$48 sps:$4 sm:$0xff]   ;;  %v11978_v27 = vld [vmem:[#allocation14 + $0x808] ss:$48 sps:$4 sm:$0xff]  }
 0x846   :  { %7388 = vmatprep.subr.bf16.mxu1 %v11941_v15  ;;  %v11979_v15 = vld [vmem:[#allocation14 + $0x508] ss:$48 sps:$4 sm:$0xff]  }
 0x848   :  { %7323 = vmatpush1.bf16.msra.mxu0 %v11942_v28  ;;  %v11980_v28 = vld [vmem:[#allocation14 + $0x86c] ss:$48 sps:$4 sm:$0xff]  }
 0x849   :  { %7389 = vmatpush1.bf16.msra.mxu1 %v11943_v50  ;;  %7324 = vmatprep.subr.bf16.mxu0 %v11944_v29  ;;  %v11981_v50 = vld [vmem:[#allocation14 + $0x56c] ss:$48 sps:$4 sm:$0xff]   ;;  %v11982_v29 = vld [vmem:[#allocation14 + $0x868] ss:$48 sps:$4 sm:$0xff]  }
 0x84a   :  { %7390 = vmatprep.subr.bf16.mxu1 %v11945_v13  ;;  %v11983_v13 = vld [vmem:[#allocation14 + $0x568] ss:$48 sps:$4 sm:$0xff]  }
 0x84c   :  { %7325 = vmatpush1.bf16.msra.mxu0 %v11946_v31  ;;  %v11984_v31 = vld [vmem:[#allocation14 + $0x8cc] ss:$48 sps:$4 sm:$0xff]  }
 0x84d   :  { %7391 = vmatpush1.bf16.msra.mxu1 %v11947_v32  ;;  %7326 = vmatprep.subr.bf16.mxu0 %v11948_v41  ;;  %v11985_v32 = vld [vmem:[#allocation14 + $0x5cc] ss:$48 sps:$4 sm:$0xff]   ;;  %v11986_v41 = vld [vmem:[#allocation14 + $0x8c8] ss:$48 sps:$4 sm:$0xff]  }
 0x84e   :  { %7392 = vmatprep.subr.bf16.mxu1 %v11949_v26  ;;  %v11987_v26 = vld [vmem:[#allocation14 + $0x5c8] ss:$48 sps:$4 sm:$0xff]  }
 0x850   :  { %7327 = vmatpush1.bf16.msra.mxu0 %v11950_v33  ;;  %v11988_v33 = vld [vmem:[#allocation15 + $0x4] ss:$48 sps:$4 sm:$0xff]  }
 0x851   :  { %7393 = vmatpush1.bf16.msra.mxu1 %v11951_v21  ;;  %7328 = vmatprep.subr.bf16.mxu0 %v11952_v59  ;;  %v11989_v21 = vld [vmem:[#allocation15 + $0xc] ss:$48 sps:$4 sm:$0xff]   ;;  %v13488_v59 = vpack.c.bf16 %v13451_v49, %v13451_v49 }
 0x852   :  { %7394 = vmatprep.subr.bf16.mxu1 %v11953_v63  ;;  %v11990_v63 = vld [vmem:[#allocation15] ss:$48 sps:$4 sm:$0xff]  }
 0x854   :  { %7329 = vmatpush1.bf16.msra.mxu0 %v11954_v11  ;;  %v11991_v11 = vld [vmem:[#allocation15 + $0x8] ss:$48 sps:$4 sm:$0xff]  }
 0x855   :  { %7395 = vmatpush1.bf16.msra.mxu1 %v11955_v12  ;;  %7421 = vmatprep.subr.bf16.mxu0 %v11956_v22  ;;  %v11992_v12 = vld [vmem:[#allocation15 + $0x64] ss:$48 sps:$4 sm:$0xff]   ;;  %v11993_v22 = vld [vmem:[#allocation15 + $0x6c] ss:$48 sps:$4 sm:$0xff]  }
 0x856   :  { %7396 = vmatprep.subr.bf16.mxu1 %v11957_v8  ;;  %v11994_v8 = vld [vmem:[#allocation15 + $0x60] ss:$48 sps:$4 sm:$0xff]  }
 0x857   :  { %7331 = vmatmul.mubr.bf16.vlgmr.msra.gmra.mrb[56].mxu0 %v13457_v60 }
 0x858   :  { %7422 = vmatpush1.bf16.msra.mxu0 %v11958_v30  ;;  %7453 = vmatprep.mubr.bf16.mxu0 %v12780_v1  ;;  %v11969_v1 = vld [vmem:[#allocation14 + $0x44c] ss:$48 sps:$4 sm:$0xff]   ;;  %v11996_v30 = vld [vmem:[#allocation15 + $0xc4] ss:$48 sps:$4 sm:$0xff]  }
 0x859   :  { %7397 = vmatpush1.bf16.msra.mxu1 %v11959_v3  ;;  %7423 = vmatprep.subr.bf16.mxu0 %v11960_v51  ;;  %v11997_v3 = vld [vmem:[#allocation15 + $0xcc] ss:$48 sps:$4 sm:$0xff]   ;;  %v11999_v51 = vld [vmem:[#allocation15 + $0xc8] ss:$48 sps:$4 sm:$0xff]  }
 0x85a   :  { %7398 = vmatprep.subr.bf16.mxu1 %v11961_v45  ;;  %v12000_v45 = vld [vmem:[#allocation15 + $0x124] ss:$48 sps:$4 sm:$0xff]  }
 0x85c   :  { %7424 = vmatpush1.bf16.msra.mxu0 %v11962_v9  ;;  %v12001_v9 = vld [vmem:[#allocation15 + $0x12c] ss:$48 sps:$4 sm:$0xff]  }
 0x85d   :  { %7399 = vmatpush1.bf16.msra.mxu1 %v11963_v38  ;;  %7425 = vmatprep.subr.bf16.mxu0 %v11964_v62  ;;  %v12002_v38 = vld [vmem:[#allocation15 + $0x120] ss:$48 sps:$4 sm:$0xff]   ;;  %v12003_v62 = vld [vmem:[#allocation15 + $0x128] ss:$48 sps:$4 sm:$0xff]  }
 0x85e   :  { %7400 = vmatprep.subr.bf16.mxu1 %v11965_v56  ;;  %v12004_v56 = vld [vmem:[#allocation15 + $0x184] ss:$48 sps:$4 sm:$0xff]  }
 0x860   :  { %7426 = vmatpush1.bf16.msra.mxu0 %v11966_v14  ;;  %v12005_v14 = vld [vmem:[#allocation15 + $0x18c] ss:$48 sps:$4 sm:$0xff]  }
 0x861   :  { %7401 = vmatpush1.bf16.msra.mxu1 %v11967_v16  ;;  %7427 = vmatprep.subr.bf16.mxu0 %v11968_v24  ;;  %v12006_v16 = vld [vmem:[#allocation15 + $0x180] ss:$48 sps:$4 sm:$0xff]   ;;  %v12007_v24 = vld [vmem:[#allocation15 + $0x188] ss:$48 sps:$4 sm:$0xff]  }
 0x862   :  { %7402 = vmatprep.subr.bf16.mxu1 %v11969_v1  ;;  %v12008_v1 = vld [vmem:[#allocation15 + $0x1e4] ss:$48 sps:$4 sm:$0xff]  }
 0x864   :  { %7428 = vmatpush1.bf16.msra.mxu0 %v11970_v25  ;;  %v12009_v25 = vld [vmem:[#allocation15 + $0x1ec] ss:$48 sps:$4 sm:$0xff]  }
 0x865   :  { %7403 = vmatpush1.bf16.msra.mxu1 %v11971_v20  ;;  %7429 = vmatprep.subr.bf16.mxu0 %v11972_v53  ;;  %v12010_v20 = vld [vmem:[#allocation15 + $0x1e0] ss:$48 sps:$4 sm:$0xff]   ;;  %v12011_v53 = vld [vmem:[#allocation15 + $0x1e8] ss:$48 sps:$4 sm:$0xff]  }
 0x866   :  { %7404 = vmatprep.subr.bf16.mxu1 %v11973_v57  ;;  %v12012_v57 = vld [vmem:[#allocation15 + $0x244] ss:$48 sps:$4 sm:$0xff]  }
 0x868   :  { %7430 = vmatpush1.bf16.msra.mxu0 %v11974_v44  ;;  %v12013_v44 = vld [vmem:[#allocation15 + $0x24c] ss:$48 sps:$4 sm:$0xff]  }
 0x869   :  { %7405 = vmatpush1.bf16.msra.mxu1 %v11975_v23  ;;  %7431 = vmatprep.subr.bf16.mxu0 %v11976_v55  ;;  %v12014_v23 = vld [vmem:[#allocation15 + $0x240] ss:$48 sps:$4 sm:$0xff]   ;;  %v12015_v55 = vld [vmem:[#allocation15 + $0x248] ss:$48 sps:$4 sm:$0xff]  }
 0x86a   :  { %7406 = vmatprep.subr.bf16.mxu1 %v11977_v4  ;;  %v12016_v4 = vld [vmem:[#allocation15 + $0x2a4] ss:$48 sps:$4 sm:$0xff]  }
 0x86c   :  { %7432 = vmatpush1.bf16.msra.mxu0 %v11978_v27  ;;  %v12017_v27 = vld [vmem:[#allocation15 + $0x2ac] ss:$48 sps:$4 sm:$0xff]  }
 0x86d   :  { %7407 = vmatpush1.bf16.msra.mxu1 %v11979_v15  ;;  %7433 = vmatprep.subr.bf16.mxu0 %v11980_v28  ;;  %v12018_v15 = vld [vmem:[#allocation15 + $0x2a0] ss:$48 sps:$4 sm:$0xff]   ;;  %v12019_v28 = vld [vmem:[#allocation15 + $0x2a8] ss:$48 sps:$4 sm:$0xff]  }
 0x86e   :  { %7408 = vmatprep.subr.bf16.mxu1 %v11981_v50  ;;  %v12020_v50 = vld [vmem:[#allocation15 + $0x304] ss:$48 sps:$4 sm:$0xff]  }
 0x870   :  { %7434 = vmatpush1.bf16.msra.mxu0 %v11982_v29  ;;  %v12021_v29 = vld [vmem:[#allocation15 + $0x30c] ss:$48 sps:$4 sm:$0xff]  }
 0x871   :  { %7409 = vmatpush1.bf16.msra.mxu1 %v11983_v13  ;;  %7435 = vmatprep.subr.bf16.mxu0 %v11984_v31  ;;  %v12022_v13 = vld [vmem:[#allocation15 + $0x300] ss:$48 sps:$4 sm:$0xff]   ;;  %v12023_v31 = vld [vmem:[#allocation15 + $0x308] ss:$48 sps:$4 sm:$0xff]  }
 0x872   :  { %7410 = vmatprep.subr.bf16.mxu1 %v11985_v32  ;;  %v12024_v32 = vld [vmem:[#allocation15 + $0x364] ss:$48 sps:$4 sm:$0xff]  }
 0x874   :  { %7436 = vmatpush1.bf16.msra.mxu0 %v11986_v41  ;;  %v12025_v41 = vld [vmem:[#allocation15 + $0x36c] ss:$48 sps:$4 sm:$0xff]  }
 0x875   :  { %7411 = vmatpush1.bf16.msra.mxu1 %v11987_v26  ;;  %7466 = vmatprep.subr.bf16.mxu0 %v11988_v33  ;;  %v12026_v26 = vld [vmem:[#allocation15 + $0x360] ss:$48 sps:$4 sm:$0xff]   ;;  %v12027_v33 = vld [vmem:[#allocation15 + $0x368] ss:$48 sps:$4 sm:$0xff]  }
 0x876   :  { %7548 = vmatprep.subr.bf16.mxu1 %v11989_v21  ;;  %v12028_v21 = vld [vmem:[#allocation15 + $0x3c4] ss:$48 sps:$4 sm:$0xff]  }
 0x877   :  { %7454 = vmatmul.mubr.bf16.vlgmr.msra.gmra.mrb[60].mxu0 %v13467_v42  ;;  %v11995_v42 = vld [vmem:[#allocation15 + $0x68] ss:$48 sps:$4 sm:$0xff]  }
 0x878   :  { %7413 = vmatmul.mubr.bf16.vlgmr.msra.gmra.mrb[60].mxu1 %v13457_v60  ;;  %7467 = vmatpush1.bf16.msra.mxu0 %v11990_v63  ;;  %v11998_v60 = vld [vmem:[#allocation15 + $0xc0] ss:$48 sps:$4 sm:$0xff]   ;;  %v12029_v63 = vld [vmem:[#allocation15 + $0x3cc] ss:$48 sps:$4 sm:$0xff]  }
 0x879   :  { %7498 = vmatprep.mubr.bf16.mxu0 %v13488_v59  ;;  %7549 = vmatpush1.bf16.msra.mxu1 %v11991_v11  ;;  %v12030_v11 = vld [vmem:[#allocation15 + $0x3c0] ss:$48 sps:$4 sm:$0xff]  }
 0x87a   :  { %7580 = vmatprep.mubr.bf16.mxu1 %v13488_v59  ;;  %7468 = vmatprep.subr.bf16.mxu0 %v11992_v12  ;;  %v12031_v12 = vld [vmem:[#allocation15 + $0x3c8] ss:$48 sps:$4 sm:$0xff]  }
 0x87b   :  { %7550 = vmatprep.subr.bf16.mxu1 %v11993_v22  ;;  %v12032_v22 = vld [vmem:[#allocation15 + $0x424] ss:$48 sps:$4 sm:$0xff]  }
 0x87c   :  { %7469 = vmatpush1.bf16.msra.mxu0 %v11994_v8  ;;  %v12033_v8 = vld [vmem:[#allocation15 + $0x42c] ss:$48 sps:$4 sm:$0xff]  }
 0x87d   :  { %7551 = vmatpush1.bf16.msra.mxu1 %v11995_v42  ;;  %7470 = vmatprep.subr.bf16.mxu0 %v11996_v30  ;;  %v12034_v42 = vld [vmem:[#allocation15 + $0x420] ss:$48 sps:$4 sm:$0xff]   ;;  %v12035_v30 = vld [vmem:[#allocation15 + $0x428] ss:$48 sps:$4 sm:$0xff]  }
 0x87e   :  { %7552 = vmatprep.subr.bf16.mxu1 %v11997_v3  ;;  %v12036_v3 = vld [vmem:[#allocation15 + $0x484] ss:$48 sps:$4 sm:$0xff]  }
 0x880   :  { %7471 = vmatpush1.bf16.msra.mxu0 %v11998_v60  ;;  %v12037_v60 = vld [vmem:[#allocation15 + $0x48c] ss:$48 sps:$4 sm:$0xff]  }
 0x881   :  { %7553 = vmatpush1.bf16.msra.mxu1 %v11999_v51  ;;  %7472 = vmatprep.subr.bf16.mxu0 %v12000_v45  ;;  %v12038_v51 = vld [vmem:[#allocation15 + $0x480] ss:$48 sps:$4 sm:$0xff]   ;;  %v12039_v45 = vld [vmem:[#allocation15 + $0x488] ss:$48 sps:$4 sm:$0xff]  }
 0x882   :  { %7554 = vmatprep.subr.bf16.mxu1 %v12001_v9  ;;  %v12040_v9 = vld [vmem:[#allocation15 + $0x4e4] ss:$48 sps:$4 sm:$0xff]  }
 0x884   :  { %7473 = vmatpush1.bf16.msra.mxu0 %v12002_v38  ;;  %v12041_v38 = vld [vmem:[#allocation15 + $0x4ec] ss:$48 sps:$4 sm:$0xff]  }
 0x885   :  { %7555 = vmatpush1.bf16.msra.mxu1 %v12003_v62  ;;  %7474 = vmatprep.subr.bf16.mxu0 %v12004_v56  ;;  %v12042_v62 = vld [vmem:[#allocation15 + $0x4e0] ss:$48 sps:$4 sm:$0xff]   ;;  %v12043_v56 = vld [vmem:[#allocation15 + $0x4e8] ss:$48 sps:$4 sm:$0xff]  }
 0x886   :  { %7556 = vmatprep.subr.bf16.mxu1 %v12005_v14  ;;  %v12044_v14 = vld [vmem:[#allocation15 + $0x544] ss:$48 sps:$4 sm:$0xff]  }
 0x888   :  { %7475 = vmatpush1.bf16.msra.mxu0 %v12006_v16  ;;  %v12045_v16 = vld [vmem:[#allocation15 + $0x54c] ss:$48 sps:$4 sm:$0xff]  }
 0x889   :  { %7557 = vmatpush1.bf16.msra.mxu1 %v12007_v24  ;;  %7476 = vmatprep.subr.bf16.mxu0 %v12008_v1  ;;  %v12046_v24 = vld [vmem:[#allocation15 + $0x540] ss:$48 sps:$4 sm:$0xff]   ;;  %v12047_v1 = vld [vmem:[#allocation15 + $0x548] ss:$48 sps:$4 sm:$0xff]  }
 0x88a   :  { %7558 = vmatprep.subr.bf16.mxu1 %v12009_v25  ;;  %v12048_v25 = vld [vmem:[#allocation15 + $0x5a4] ss:$48 sps:$4 sm:$0xff]  }
 0x88c   :  { %7477 = vmatpush1.bf16.msra.mxu0 %v12010_v20  ;;  %v12049_v20 = vld [vmem:[#allocation15 + $0x5ac] ss:$48 sps:$4 sm:$0xff]  }
 0x88d   :  { %7559 = vmatpush1.bf16.msra.mxu1 %v12011_v53  ;;  %7478 = vmatprep.subr.bf16.mxu0 %v12012_v57  ;;  %v12050_v53 = vld [vmem:[#allocation15 + $0x5a0] ss:$48 sps:$4 sm:$0xff]   ;;  %v12051_v57 = vld [vmem:[#allocation15 + $0x5a8] ss:$48 sps:$4 sm:$0xff]  }
 0x88e   :  { %7560 = vmatprep.subr.bf16.mxu1 %v12013_v44  ;;  %v13495_v44 = vpack.c.bf16 %v13446_v54, %v13446_v54 }
 0x890   :  { %7479 = vmatpush1.bf16.msra.mxu0 %v12014_v23  ;;  %v12052_v23 = vld [vmem:[#allocation15 + $0x604] ss:$48 sps:$4 sm:$0xff]  }
 0x891   :  { %7561 = vmatpush1.bf16.msra.mxu1 %v12015_v55  ;;  %7480 = vmatprep.subr.bf16.mxu0 %v12016_v4  ;;  %v12053_v55 = vld [vmem:[#allocation15 + $0x60c] ss:$48 sps:$4 sm:$0xff]   ;;  %v13500_v4 = vpack.c.bf16 %v13453_v46, %v13453_v46 }
 0x892   :  { %7562 = vmatprep.subr.bf16.mxu1 %v12017_v27  ;;  %v12054_v27 = vld [vmem:[#allocation15 + $0x600] ss:$48 sps:$4 sm:$0xff]  }
 0x894   :  { %7481 = vmatpush1.bf16.msra.mxu0 %v12018_v15  ;;  %v12055_v15 = vld [vmem:[#allocation15 + $0x608] ss:$48 sps:$4 sm:$0xff]  }
 0x895   :  { %7563 = vmatpush1.bf16.msra.mxu1 %v12019_v28  ;;  %7482 = vmatprep.subr.bf16.mxu0 %v12020_v50  ;;  %v12056_v28 = vld [vmem:[#allocation15 + $0x664] ss:$48 sps:$4 sm:$0xff]   ;;  %v12057_v50 = vld [vmem:[#allocation15 + $0x66c] ss:$48 sps:$4 sm:$0xff]  }
 0x896   :  { %7564 = vmatprep.subr.bf16.mxu1 %v12021_v29  ;;  %v12058_v29 = vld [vmem:[#allocation15 + $0x660] ss:$48 sps:$4 sm:$0xff]  }
 0x898   :  { %7483 = vmatpush1.bf16.msra.mxu0 %v12022_v13  ;;  %v12059_v13 = vld [vmem:[#allocation15 + $0x668] ss:$48 sps:$4 sm:$0xff]  }
 0x899   :  { %7565 = vmatpush1.bf16.msra.mxu1 %v12023_v31  ;;  %7484 = vmatprep.subr.bf16.mxu0 %v12024_v32  ;;  %v12060_v31 = vld [vmem:[#allocation15 + $0x6c4] ss:$48 sps:$4 sm:$0xff]   ;;  %v12061_v32 = vld [vmem:[#allocation15 + $0x6cc] ss:$48 sps:$4 sm:$0xff]  }
 0x89a   :  { %7566 = vmatprep.subr.bf16.mxu1 %v12025_v41  ;;  %v12062_v41 = vld [vmem:[#allocation15 + $0x6c0] ss:$48 sps:$4 sm:$0xff]  }
 0x89c   :  { %7485 = vmatpush1.bf16.msra.mxu0 %v12026_v26  ;;  %v12063_v26 = vld [vmem:[#allocation15 + $0x6c8] ss:$48 sps:$4 sm:$0xff]  }
 0x89d   :  { %7567 = vmatpush1.bf16.msra.mxu1 %v12027_v33  ;;  %7486 = vmatprep.subr.bf16.mxu0 %v12028_v21  ;;  %v12064_v33 = vld [vmem:[#allocation15 + $0x724] ss:$48 sps:$4 sm:$0xff]   ;;  %v12065_v21 = vld [vmem:[#allocation15 + $0x72c] ss:$48 sps:$4 sm:$0xff]  }
 0x89e   :  { %7568 = vmatprep.subr.bf16.mxu1 %v12029_v63  ;;  %v12066_v63 = vld [vmem:[#allocation15 + $0x720] ss:$48 sps:$4 sm:$0xff]  }
 0x8a0   :  { %7487 = vmatpush1.bf16.msra.mxu0 %v12030_v11  ;;  %v12067_v11 = vld [vmem:[#allocation15 + $0x728] ss:$48 sps:$4 sm:$0xff]  }
 0x8a1   :  { %7569 = vmatpush1.bf16.msra.mxu1 %v12031_v12  ;;  %7488 = vmatprep.subr.bf16.mxu0 %v12032_v22  ;;  %v12068_v12 = vld [vmem:[#allocation15 + $0x784] ss:$48 sps:$4 sm:$0xff]   ;;  %v12069_v22 = vld [vmem:[#allocation15 + $0x78c] ss:$48 sps:$4 sm:$0xff]  }
 0x8a2   :  { %7570 = vmatprep.subr.bf16.mxu1 %v12033_v8  ;;  %v12070_v8 = vld [vmem:[#allocation15 + $0x780] ss:$48 sps:$4 sm:$0xff]  }
 0x8a4   :  { %7489 = vmatpush1.bf16.msra.mxu0 %v12034_v42  ;;  %v12071_v42 = vld [vmem:[#allocation15 + $0x788] ss:$48 sps:$4 sm:$0xff]  }
 0x8a5   :  { %7571 = vmatpush1.bf16.msra.mxu1 %v12035_v30  ;;  %7490 = vmatprep.subr.bf16.mxu0 %v12036_v3  ;;  %v12072_v30 = vld [vmem:[#allocation15 + $0x7e4] ss:$48 sps:$4 sm:$0xff]   ;;  %v12073_v3 = vld [vmem:[#allocation15 + $0x7ec] ss:$48 sps:$4 sm:$0xff]  }
 0x8a6   :  { %7572 = vmatprep.subr.bf16.mxu1 %v12037_v60  ;;  %v12074_v60 = vld [vmem:[#allocation15 + $0x7e0] ss:$48 sps:$4 sm:$0xff]  }
 0x8a8   :  { %7491 = vmatpush1.bf16.msra.mxu0 %v12038_v51  ;;  %v12075_v51 = vld [vmem:[#allocation15 + $0x7e8] ss:$48 sps:$4 sm:$0xff]  }
 0x8a9   :  { %7573 = vmatpush1.bf16.msra.mxu1 %v12039_v45  ;;  %7492 = vmatprep.subr.bf16.mxu0 %v12040_v9  ;;  %v12076_v45 = vld [vmem:[#allocation15 + $0x844] ss:$48 sps:$4 sm:$0xff]   ;;  %v12077_v9 = vld [vmem:[#allocation15 + $0x84c] ss:$48 sps:$4 sm:$0xff]  }
 0x8aa   :  { %7574 = vmatprep.subr.bf16.mxu1 %v12041_v38  ;;  %v12078_v38 = vld [vmem:[#allocation15 + $0x840] ss:$48 sps:$4 sm:$0xff]  }
 0x8ac   :  { %7493 = vmatpush1.bf16.msra.mxu0 %v12042_v62  ;;  %v12079_v62 = vld [vmem:[#allocation15 + $0x848] ss:$48 sps:$4 sm:$0xff]  }
 0x8ad   :  { %7575 = vmatpush1.bf16.msra.mxu1 %v12043_v56  ;;  %7494 = vmatprep.subr.bf16.mxu0 %v12044_v14  ;;  %v12080_v56 = vld [vmem:[#allocation15 + $0x8a4] ss:$48 sps:$4 sm:$0xff]   ;;  %v12081_v14 = vld [vmem:[#allocation15 + $0x8ac] ss:$48 sps:$4 sm:$0xff]  }
 0x8ae   :  { %7576 = vmatprep.subr.bf16.mxu1 %v12045_v16  ;;  %v12082_v16 = vld [vmem:[#allocation15 + $0x8a0] ss:$48 sps:$4 sm:$0xff]  }
 0x8b0   :  { %7495 = vmatpush1.bf16.msra.mxu0 %v12046_v24  ;;  %v12083_v24 = vld [vmem:[#allocation15 + $0x8a8] ss:$48 sps:$4 sm:$0xff]  }
 0x8b1   :  { %7577 = vmatpush1.bf16.msra.mxu1 %v12047_v1  ;;  %7496 = vmatprep.subr.bf16.mxu0 %v12048_v25  ;;  %v12084_v1 = vld [vmem:[#allocation15 + $0x904] ss:$48 sps:$4 sm:$0xff]   ;;  %v12085_v25 = vld [vmem:[#allocation15 + $0x90c] ss:$48 sps:$4 sm:$0xff]  }
 0x8b2   :  { %7578 = vmatprep.subr.bf16.mxu1 %v12049_v20  ;;  %v12086_v20 = vld [vmem:[#allocation15 + $0x900] ss:$48 sps:$4 sm:$0xff]  }
 0x8b4   :  { %7497 = vmatpush1.bf16.msra.mxu0 %v12050_v53  ;;  %v12087_v53 = vld [vmem:[#allocation15 + $0x908] ss:$48 sps:$4 sm:$0xff]  }
 0x8b5   :  { %7579 = vmatpush1.bf16.msra.mxu1 %v12051_v57  ;;  %7507 = vmatprep.subr.bf16.mxu0 %v12052_v23  ;;  %v12088_v57 = vld [vmem:[#allocation15 + $0x964] ss:$48 sps:$4 sm:$0xff]   ;;  %v12089_v23 = vld [vmem:[#allocation15 + $0x96c] ss:$48 sps:$4 sm:$0xff]  }
 0x8b6   :  { %7589 = vmatprep.subr.bf16.mxu1 %v12053_v55  ;;  %v12090_v55 = vld [vmem:[#allocation15 + $0x960] ss:$48 sps:$4 sm:$0xff]  }
 0x8b7   :  { %7499 = vmatmul.mubr.bf16.vlgmr.msra.gmra.mrb[48].mxu0 %v13495_v44 }
 0x8b8   :  { %7581 = vmatmul.mubr.bf16.vlgmr.msra.gmra.mrb[48].mxu1 %v13495_v44  ;;  %7508 = vmatpush1.bf16.msra.mxu0 %v12054_v27  ;;  %v12091_v27 = vld [vmem:[#allocation15 + $0x968] ss:$48 sps:$4 sm:$0xff]  }
 0x8b9   :  { %7539 = vmatprep.mubr.bf16.mxu0 %v13500_v4  ;;  %7590 = vmatpush1.bf16.msra.mxu1 %v12055_v15  ;;  %v12092_v15 = vld [vmem:[#allocation15 + $0x9c4] ss:$48 sps:$4 sm:$0xff]  }
 0x8ba   :  { %7621 = vmatprep.mubr.bf16.mxu1 %v13500_v4  ;;  %7509 = vmatprep.subr.bf16.mxu0 %v12056_v28  ;;  %v12093_v28 = vld [vmem:[#allocation15 + $0x9cc] ss:$48 sps:$4 sm:$0xff]  }
 0x8bb   :  { %7591 = vmatprep.subr.bf16.mxu1 %v12057_v50  ;;  %v12094_v50 = vld [vmem:[#allocation15 + $0x9c0] ss:$48 sps:$4 sm:$0xff]  }
 0x8bc   :  { %7510 = vmatpush1.bf16.msra.mxu0 %v12058_v29  ;;  %v12095_v29 = vld [vmem:[#allocation15 + $0x9c8] ss:$48 sps:$4 sm:$0xff]  }
 0x8bd   :  { %7592 = vmatpush1.bf16.msra.mxu1 %v12059_v13  ;;  %7511 = vmatprep.subr.bf16.mxu0 %v12060_v31  ;;  %v12096_v13 = vld [vmem:[#allocation15 + $0xa24] ss:$48 sps:$4 sm:$0xff]   ;;  %v12097_v31 = vld [vmem:[#allocation15 + $0xa2c] ss:$48 sps:$4 sm:$0xff]  }
 0x8be   :  { %7593 = vmatprep.subr.bf16.mxu1 %v12061_v32  ;;  %v12098_v32 = vld [vmem:[#allocation15 + $0xa20] ss:$48 sps:$4 sm:$0xff]  }
 0x8c0   :  { %7512 = vmatpush1.bf16.msra.mxu0 %v12062_v41  ;;  %v12099_v41 = vld [vmem:[#allocation15 + $0xa28] ss:$48 sps:$4 sm:$0xff]  }
 0x8c1   :  { %7594 = vmatpush1.bf16.msra.mxu1 %v12063_v26  ;;  %7513 = vmatprep.subr.bf16.mxu0 %v12064_v33  ;;  %v12100_v26 = vld [vmem:[#allocation15 + $0xa84] ss:$48 sps:$4 sm:$0xff]   ;;  %v12101_v33 = vld [vmem:[#allocation15 + $0xa8c] ss:$48 sps:$4 sm:$0xff]  }
 0x8c2   :  { %7595 = vmatprep.subr.bf16.mxu1 %v12065_v21  ;;  %v12102_v21 = vld [vmem:[#allocation15 + $0xa80] ss:$48 sps:$4 sm:$0xff]  }
 0x8c4   :  { %7514 = vmatpush1.bf16.msra.mxu0 %v12066_v63  ;;  %v12103_v63 = vld [vmem:[#allocation15 + $0xa88] ss:$48 sps:$4 sm:$0xff]  }
 0x8c5   :  { %7596 = vmatpush1.bf16.msra.mxu1 %v12067_v11  ;;  %7515 = vmatprep.subr.bf16.mxu0 %v12068_v12  ;;  %v12104_v11 = vld [vmem:[#allocation15 + $0xae4] ss:$48 sps:$4 sm:$0xff]   ;;  %v12105_v12 = vld [vmem:[#allocation15 + $0xaec] ss:$48 sps:$4 sm:$0xff]  }
 0x8c6   :  { %7597 = vmatprep.subr.bf16.mxu1 %v12069_v22  ;;  %v12106_v22 = vld [vmem:[#allocation15 + $0xae0] ss:$48 sps:$4 sm:$0xff]  }
 0x8c8   :  { %7516 = vmatpush1.bf16.msra.mxu0 %v12070_v8  ;;  %v12107_v8 = vld [vmem:[#allocation15 + $0xae8] ss:$48 sps:$4 sm:$0xff]  }
 0x8c9   :  { %7598 = vmatpush1.bf16.msra.mxu1 %v12071_v42  ;;  %7517 = vmatprep.subr.bf16.mxu0 %v12072_v30  ;;  %v12108_v42 = vld [vmem:[#allocation15 + $0xb44] ss:$48 sps:$4 sm:$0xff]   ;;  %v12109_v30 = vld [vmem:[#allocation15 + $0xb4c] ss:$48 sps:$4 sm:$0xff]  }
 0x8ca   :  { %7599 = vmatprep.subr.bf16.mxu1 %v12073_v3  ;;  %v12110_v3 = vld [vmem:[#allocation15 + $0xb40] ss:$48 sps:$4 sm:$0xff]  }
 0x8cc   :  { %7518 = vmatpush1.bf16.msra.mxu0 %v12074_v60  ;;  %v12111_v60 = vld [vmem:[#allocation15 + $0xb48] ss:$48 sps:$4 sm:$0xff]  }
 0x8cd   :  { %7600 = vmatpush1.bf16.msra.mxu1 %v12075_v51  ;;  %7519 = vmatprep.subr.bf16.mxu0 %v12076_v45  ;;  %v12112_v51 = vld [vmem:[#allocation15 + $0xba4] ss:$48 sps:$4 sm:$0xff]   ;;  %v12113_v45 = vld [vmem:[#allocation15 + $0xbac] ss:$48 sps:$4 sm:$0xff]  }
 0x8ce   :  { %7601 = vmatprep.subr.bf16.mxu1 %v12077_v9  ;;  %v12114_v9 = vld [vmem:[#allocation15 + $0xba0] ss:$48 sps:$4 sm:$0xff]  }
 0x8d0   :  { %7520 = vmatpush1.bf16.msra.mxu0 %v12078_v38  ;;  %v12115_v38 = vld [vmem:[#allocation15 + $0xba8] ss:$48 sps:$4 sm:$0xff]  }
 0x8d1   :  { %7602 = vmatpush1.bf16.msra.mxu1 %v12079_v62  ;;  %7521 = vmatprep.subr.bf16.mxu0 %v12080_v56  ;;  %v13507_v62 = vpack.c.bf16 %v13449_v43, %v13449_v43  ;;  %v12116_v56 = vld [vmem:[#allocation15 + $0x14] ss:$48 sps:$4 sm:$0xff]  }
 0x8d2   :  { %7603 = vmatprep.subr.bf16.mxu1 %v12081_v14  ;;  %v12117_v14 = vld [vmem:[#allocation15 + $0x1c] ss:$48 sps:$4 sm:$0xff]  }
 0x8d4   :  { %7522 = vmatpush1.bf16.msra.mxu0 %v12082_v16  ;;  %v12118_v16 = vld [vmem:[#allocation15 + $0x10] ss:$48 sps:$4 sm:$0xff]  }
 0x8d5   :  { %7604 = vmatpush1.bf16.msra.mxu1 %v12083_v24  ;;  %7523 = vmatprep.subr.bf16.mxu0 %v12084_v1  ;;  %v12119_v24 = vld [vmem:[#allocation15 + $0x18] ss:$48 sps:$4 sm:$0xff]   ;;  %v12120_v1 = vld [vmem:[#allocation15 + $0x74] ss:$48 sps:$4 sm:$0xff]  }
 0x8d6   :  { %7605 = vmatprep.subr.bf16.mxu1 %v12085_v25  ;;  %v12121_v25 = vld [vmem:[#allocation15 + $0x7c] ss:$48 sps:$4 sm:$0xff]  }
 0x8d8   :  { %7524 = vmatpush1.bf16.msra.mxu0 %v12086_v20  ;;  %v12122_v20 = vld [vmem:[#allocation15 + $0x70] ss:$48 sps:$4 sm:$0xff]  }
 0x8d9   :  { %7606 = vmatpush1.bf16.msra.mxu1 %v12087_v53  ;;  %7525 = vmatprep.subr.bf16.mxu0 %v12088_v57  ;;  %v12123_v53 = vld [vmem:[#allocation15 + $0x78] ss:$48 sps:$4 sm:$0xff]   ;;  %v12124_v57 = vld [vmem:[#allocation15 + $0xd4] ss:$48 sps:$4 sm:$0xff]  }
 0x8da   :  { %7607 = vmatprep.subr.bf16.mxu1 %v12089_v23  ;;  %v12125_v23 = vld [vmem:[#allocation15 + $0xdc] ss:$48 sps:$4 sm:$0xff]  }
 0x8dc   :  { %7526 = vmatpush1.bf16.msra.mxu0 %v12090_v55  ;;  %v12126_v55 = vld [vmem:[#allocation15 + $0xd0] ss:$48 sps:$4 sm:$0xff]  }
 0x8dd   :  { %7608 = vmatpush1.bf16.msra.mxu1 %v12091_v27  ;;  %7527 = vmatprep.subr.bf16.mxu0 %v12092_v15  ;;  %v12127_v27 = vld [vmem:[#allocation15 + $0xd8] ss:$48 sps:$4 sm:$0xff]   ;;  %v12128_v15 = vld [vmem:[#allocation15 + $0x134] ss:$48 sps:$4 sm:$0xff]  }
 0x8de   :  { %7609 = vmatprep.subr.bf16.mxu1 %v12093_v28  ;;  %v12129_v28 = vld [vmem:[#allocation15 + $0x13c] ss:$48 sps:$4 sm:$0xff]  }
 0x8e0   :  { %7528 = vmatpush1.bf16.msra.mxu0 %v12094_v50  ;;  %v12130_v50 = vld [vmem:[#allocation15 + $0x130] ss:$48 sps:$4 sm:$0xff]  }
 0x8e1   :  { %7610 = vmatpush1.bf16.msra.mxu1 %v12095_v29  ;;  %7529 = vmatprep.subr.bf16.mxu0 %v12096_v13  ;;  %v12131_v29 = vld [vmem:[#allocation15 + $0x138] ss:$48 sps:$4 sm:$0xff]   ;;  %v12132_v13 = vld [vmem:[#allocation15 + $0x194] ss:$48 sps:$4 sm:$0xff]  }
 0x8e2   :  { %7611 = vmatprep.subr.bf16.mxu1 %v12097_v31  ;;  %v12133_v31 = vld [vmem:[#allocation15 + $0x19c] ss:$48 sps:$4 sm:$0xff]  }
 0x8e4   :  { %7530 = vmatpush1.bf16.msra.mxu0 %v12098_v32  ;;  %v12134_v32 = vld [vmem:[#allocation15 + $0x190] ss:$48 sps:$4 sm:$0xff]  }
 0x8e5   :  { %7612 = vmatpush1.bf16.msra.mxu1 %v12099_v41  ;;  %7531 = vmatprep.subr.bf16.mxu0 %v12100_v26  ;;  %v12135_v41 = vld [vmem:[#allocation15 + $0x198] ss:$48 sps:$4 sm:$0xff]   ;;  %v12136_v26 = vld [vmem:[#allocation15 + $0x1f4] ss:$48 sps:$4 sm:$0xff]  }
 0x8e6   :  { %7613 = vmatprep.subr.bf16.mxu1 %v12101_v33  ;;  %v12137_v33 = vld [vmem:[#allocation15 + $0x1fc] ss:$48 sps:$4 sm:$0xff]  }
 0x8e8   :  { %7532 = vmatpush1.bf16.msra.mxu0 %v12102_v21 }
 0x8e9   :  { %7614 = vmatpush1.bf16.msra.mxu1 %v12103_v63  ;;  %7533 = vmatprep.subr.bf16.mxu0 %v12104_v11  ;;  %v12138_v11 = vld [vmem:[#allocation15 + $0x1f0] ss:$48 sps:$4 sm:$0xff]  }
 0x8ea   :  { %7615 = vmatprep.subr.bf16.mxu1 %v12105_v12 }
 0x8ec   :  { %7534 = vmatpush1.bf16.msra.mxu0 %v12106_v22  ;;  %v12139_v22 = vld [vmem:[#allocation15 + $0x1f8] ss:$48 sps:$4 sm:$0xff]  }
 0x8ed   :  { %7616 = vmatpush1.bf16.msra.mxu1 %v12107_v8  ;;  %7535 = vmatprep.subr.bf16.mxu0 %v12108_v42  ;;  %v12140_v8 = vld [vmem:[#allocation15 + $0x254] ss:$48 sps:$4 sm:$0xff]  }
 0x8ee   :  { %7617 = vmatprep.subr.bf16.mxu1 %v12109_v30  ;;  %v12141_v30 = vld [vmem:[#allocation15 + $0x25c] ss:$48 sps:$4 sm:$0xff]  }
 0x8f0   :  { %7536 = vmatpush1.bf16.msra.mxu0 %v12110_v3  ;;  %v12142_v3 = vld [vmem:[#allocation15 + $0x250] ss:$48 sps:$4 sm:$0xff]  }
 0x8f1   :  { %7618 = vmatpush1.bf16.msra.mxu1 %v12111_v60  ;;  %7537 = vmatprep.subr.bf16.mxu0 %v12112_v51  ;;  %v12143_v60 = vld [vmem:[#allocation15 + $0x258] ss:$48 sps:$4 sm:$0xff]   ;;  %v12144_v51 = vld [vmem:[#allocation15 + $0x2b4] ss:$48 sps:$4 sm:$0xff]  }
 0x8f2   :  { %7619 = vmatprep.subr.bf16.mxu1 %v12113_v45  ;;  %v12145_v45 = vld [vmem:[#allocation15 + $0x2bc] ss:$48 sps:$4 sm:$0xff]  }
 0x8f4   :  { %7538 = vmatpush1.bf16.msra.mxu0 %v12114_v9  ;;  %v12146_v9 = vld [vmem:[#allocation15 + $0x2b0] ss:$48 sps:$4 sm:$0xff]  }
 0x8f5   :  { %7620 = vmatpush1.bf16.msra.mxu1 %v12115_v38  ;;  %7630 = vmatprep.subr.bf16.mxu0 %v12116_v56  ;;  %v12147_v38 = vld [vmem:[#allocation15 + $0x2b8] ss:$48 sps:$4 sm:$0xff]   ;;  %v12148_v56 = vld [vmem:[#allocation15 + $0x314] ss:$48 sps:$4 sm:$0xff]  }
 0x8f6   :  { %7712 = vmatprep.subr.bf16.mxu1 %v12117_v14  ;;  %v12149_v14 = vld [vmem:[#allocation15 + $0x31c] ss:$48 sps:$4 sm:$0xff]  }
 0x8f7   :  { %7540 = vmatmul.mubr.bf16.vlgmr.msra.gmra.mrb[48].mxu0 %v13507_v62 }
 0x8f8   :  { %7622 = vmatmul.mubr.bf16.vlgmr.msra.gmra.mrb[48].mxu1 %v13507_v62  ;;  %7631 = vmatpush1.bf16.msra.mxu0 %v12118_v16  ;;  %v12150_v16 = vld [vmem:[#allocation15 + $0x310] ss:$48 sps:$4 sm:$0xff]  }
 0x8f9   :  { %7662 = vmatprep.mubr.bf16.mxu0 %v13488_v59  ;;  %7713 = vmatpush1.bf16.msra.mxu1 %v12119_v24  ;;  %v12151_v24 = vld [vmem:[#allocation15 + $0x318] ss:$48 sps:$4 sm:$0xff]  }
 0x8fa   :  { %7744 = vmatprep.mubr.bf16.mxu1 %v13488_v59  ;;  %7632 = vmatprep.subr.bf16.mxu0 %v12120_v1  ;;  %v12152_v1 = vld [vmem:[#allocation15 + $0x374] ss:$48 sps:$4 sm:$0xff]  }
 0x8fb   :  { %7714 = vmatprep.subr.bf16.mxu1 %v12121_v25  ;;  %v12153_v25 = vld [vmem:[#allocation15 + $0x37c] ss:$48 sps:$4 sm:$0xff]  }
 0x8fc   :  { %7633 = vmatpush1.bf16.msra.mxu0 %v12122_v20  ;;  %v12154_v20 = vld [vmem:[#allocation15 + $0x370] ss:$48 sps:$4 sm:$0xff]  }
 0x8fd   :  { %7715 = vmatpush1.bf16.msra.mxu1 %v12123_v53  ;;  %7634 = vmatprep.subr.bf16.mxu0 %v12124_v57  ;;  %v12155_v53 = vld [vmem:[#allocation15 + $0x378] ss:$48 sps:$4 sm:$0xff]   ;;  %v12156_v57 = vld [vmem:[#allocation15 + $0x3d4] ss:$48 sps:$4 sm:$0xff]  }
 0x8fe   :  { %7716 = vmatprep.subr.bf16.mxu1 %v12125_v23  ;;  %v12157_v23 = vld [vmem:[#allocation15 + $0x3dc] ss:$48 sps:$4 sm:$0xff]  }
 0x900   :  { %7635 = vmatpush1.bf16.msra.mxu0 %v12126_v55  ;;  %v12158_v55 = vld [vmem:[#allocation15 + $0x3d0] ss:$48 sps:$4 sm:$0xff]  }
 0x901   :  { %7717 = vmatpush1.bf16.msra.mxu1 %v12127_v27  ;;  %7636 = vmatprep.subr.bf16.mxu0 %v12128_v15  ;;  %v12159_v27 = vld [vmem:[#allocation15 + $0x3d8] ss:$48 sps:$4 sm:$0xff]   ;;  %v12160_v15 = vld [vmem:[#allocation15 + $0x434] ss:$48 sps:$4 sm:$0xff]  }
 0x902   :  { %7718 = vmatprep.subr.bf16.mxu1 %v12129_v28  ;;  %v12161_v28 = vld [vmem:[#allocation15 + $0x43c] ss:$48 sps:$4 sm:$0xff]  }
 0x904   :  { %7637 = vmatpush1.bf16.msra.mxu0 %v12130_v50  ;;  %v12162_v50 = vld [vmem:[#allocation15 + $0x430] ss:$48 sps:$4 sm:$0xff]  }
 0x905   :  { %7719 = vmatpush1.bf16.msra.mxu1 %v12131_v29  ;;  %7638 = vmatprep.subr.bf16.mxu0 %v12132_v13  ;;  %v12163_v29 = vld [vmem:[#allocation15 + $0x438] ss:$48 sps:$4 sm:$0xff]   ;;  %v12164_v13 = vld [vmem:[#allocation15 + $0x494] ss:$48 sps:$4 sm:$0xff]  }
 0x906   :  { %7720 = vmatprep.subr.bf16.mxu1 %v12133_v31  ;;  %v12165_v31 = vld [vmem:[#allocation15 + $0x49c] ss:$48 sps:$4 sm:$0xff]  }
 0x908   :  { %7639 = vmatpush1.bf16.msra.mxu0 %v12134_v32  ;;  %v12166_v32 = vld [vmem:[#allocation15 + $0x490] ss:$48 sps:$4 sm:$0xff]  }
 0x909   :  { %7721 = vmatpush1.bf16.msra.mxu1 %v12135_v41  ;;  %7640 = vmatprep.subr.bf16.mxu0 %v12136_v26  ;;  %v12167_v41 = vld [vmem:[#allocation15 + $0x498] ss:$48 sps:$4 sm:$0xff]   ;;  %v12168_v26 = vld [vmem:[#allocation15 + $0x4f4] ss:$48 sps:$4 sm:$0xff]  }
 0x90a   :  { %7722 = vmatprep.subr.bf16.mxu1 %v12137_v33 }
 0x90b   :  { %v13513_v21 = vpop.f32.mrb[56].mxu1 }
 0x90c   :  { %v13515_v63 = vpop.f32.mrb[57].mxu1  ;;  %7641 = vmatpush1.bf16.msra.mxu0 %v12138_v11  ;;  %v12169_v11 = vld [vmem:[#allocation15 + $0x4fc] ss:$48 sps:$4 sm:$0xff]  }
 0x90d   :  { %v7377_v12 = vpop.f32.mrb[58].mxu1  ;;  %7723 = vmatpush1.bf16.msra.mxu1 %v12139_v22  ;;  %7642 = vmatprep.subr.bf16.mxu0 %v12140_v8 }
 0x90e   :  { %v7378_v42 = vpop.f32.mrb[59].mxu1  ;;  %7724 = vmatprep.subr.bf16.mxu1 %v12141_v30  ;;  %v12170_v30 = vld [vmem:[#allocation15 + $0x4f0] ss:$48 sps:$4 sm:$0xff]  }
 0x910   :  { %7643 = vmatpush1.bf16.msra.mxu0 %v12142_v3 }
 0x911   :  { %7725 = vmatpush1.bf16.msra.mxu1 %v12143_v60  ;;  %7644 = vmatprep.subr.bf16.mxu0 %v12144_v51  ;;  %v12171_v60 = vld [vmem:[#allocation15 + $0x4f8] ss:$48 sps:$4 sm:$0xff]  }
 0x912   :  { %7726 = vmatprep.subr.bf16.mxu1 %v12145_v45  ;;  %v12172_v45 = vld [vmem:[#allocation15 + $0x554] ss:$48 sps:$4 sm:$0xff]  }
 0x914   :  { %7645 = vmatpush1.bf16.msra.mxu0 %v12146_v9 }
 0x915   :  { %7727 = vmatpush1.bf16.msra.mxu1 %v12147_v38  ;;  %7646 = vmatprep.subr.bf16.mxu0 %v12148_v56  ;;  %v12173_v38 = vld [vmem:[#allocation15 + $0x55c] ss:$48 sps:$4 sm:$0xff]   ;;  %v12175_v56 = vld [vmem:[#allocation15 + $0x558] ss:$48 sps:$4 sm:$0xff]  }
 0x916   :  { %7728 = vmatprep.subr.bf16.mxu1 %v12149_v14  ;;  %v12177_v14 = vld [vmem:[#allocation15 + $0x5bc] ss:$48 sps:$4 sm:$0xff]  }
 0x918   :  { %7647 = vmatpush1.bf16.msra.mxu0 %v12150_v16  ;;  %v12179_v16 = vld [vmem:[#allocation15 + $0x5b8] ss:$48 sps:$4 sm:$0xff]  }
 0x919   :  { %7729 = vmatpush1.bf16.msra.mxu1 %v12151_v24  ;;  %7648 = vmatprep.subr.bf16.mxu0 %v12152_v1  ;;  %v12180_v24 = vld [vmem:[#allocation15 + $0x614] ss:$48 sps:$4 sm:$0xff]   ;;  %v12181_v1 = vld [vmem:[#allocation15 + $0x61c] ss:$48 sps:$4 sm:$0xff]  }
 0x91a   :  { %7730 = vmatprep.subr.bf16.mxu1 %v12153_v25  ;;  %v12183_v25 = vld [vmem:[#allocation15 + $0x618] ss:$48 sps:$4 sm:$0xff]  }
 0x91c   :  { %7649 = vmatpush1.bf16.msra.mxu0 %v12154_v20  ;;  %v12184_v20 = vld [vmem:[#allocation15 + $0x674] ss:$48 sps:$4 sm:$0xff]  }
 0x91d   :  { %7731 = vmatpush1.bf16.msra.mxu1 %v12155_v53  ;;  %7650 = vmatprep.subr.bf16.mxu0 %v12156_v57  ;;  %v12185_v53 = vld [vmem:[#allocation15 + $0x67c] ss:$48 sps:$4 sm:$0xff]   ;;  %v12186_v57 = vld [vmem:[#allocation15 + $0x670] ss:$48 sps:$4 sm:$0xff]  }
 0x91e   :  { %7732 = vmatprep.subr.bf16.mxu1 %v12157_v23  ;;  %v12187_v23 = vld [vmem:[#allocation15 + $0x678] ss:$48 sps:$4 sm:$0xff]  }
 0x920   :  { %7651 = vmatpush1.bf16.msra.mxu0 %v12158_v55  ;;  %v12188_v55 = vld [vmem:[#allocation15 + $0x6d4] ss:$48 sps:$4 sm:$0xff]  }
 0x921   :  { %7733 = vmatpush1.bf16.msra.mxu1 %v12159_v27  ;;  %7652 = vmatprep.subr.bf16.mxu0 %v12160_v15  ;;  %v12189_v27 = vld [vmem:[#allocation15 + $0x6dc] ss:$48 sps:$4 sm:$0xff]   ;;  %v12190_v15 = vld [vmem:[#allocation15 + $0x6d0] ss:$48 sps:$4 sm:$0xff]  }
 0x922   :  { %7734 = vmatprep.subr.bf16.mxu1 %v12161_v28  ;;  %v12191_v28 = vld [vmem:[#allocation15 + $0x6d8] ss:$48 sps:$4 sm:$0xff]  }
 0x924   :  { %7653 = vmatpush1.bf16.msra.mxu0 %v12162_v50  ;;  %v12192_v50 = vld [vmem:[#allocation15 + $0x734] ss:$48 sps:$4 sm:$0xff]  }
 0x925   :  { %7735 = vmatpush1.bf16.msra.mxu1 %v12163_v29  ;;  %7654 = vmatprep.subr.bf16.mxu0 %v12164_v13  ;;  %v12193_v29 = vld [vmem:[#allocation15 + $0x73c] ss:$48 sps:$4 sm:$0xff]   ;;  %v12194_v13 = vld [vmem:[#allocation15 + $0x730] ss:$48 sps:$4 sm:$0xff]  }
 0x926   :  { %7736 = vmatprep.subr.bf16.mxu1 %v12165_v31  ;;  %v12195_v31 = vld [vmem:[#allocation15 + $0x738] ss:$48 sps:$4 sm:$0xff]  }
 0x928   :  { %7655 = vmatpush1.bf16.msra.mxu0 %v12166_v32  ;;  %v12196_v32 = vld [vmem:[#allocation15 + $0x794] ss:$48 sps:$4 sm:$0xff]  }
 0x929   :  { %7737 = vmatpush1.bf16.msra.mxu1 %v12167_v41  ;;  %7656 = vmatprep.subr.bf16.mxu0 %v12168_v26  ;;  %v12197_v41 = vld [vmem:[#allocation15 + $0x79c] ss:$48 sps:$4 sm:$0xff]   ;;  %v12198_v26 = vld [vmem:[#allocation15 + $0x790] ss:$48 sps:$4 sm:$0xff]  }
 0x92a   :  { %v7332_v33 = vpop.f32.mrb[56].mxu0  ;;  %7738 = vmatprep.subr.bf16.mxu1 %v12169_v11  ;;  %v12200_v11 = vld [vmem:[#allocation15 + $0x7f4] ss:$48 sps:$4 sm:$0xff]  }
 0x92b   :  { %v7333_v12 = vadd.f32 %v7332_v33, %v13244_v34  ;;  %v7334_v22 = vpop.f32.mrb[57].mxu0  ;;  %v12174_v34 = vld [vmem:[#allocation15 + $0x550] ss:$48 sps:$4 sm:$0xff]   ;;  %v12199_v33 = vld [vmem:[#allocation15 + $0x798] ss:$48 sps:$4 sm:$0xff]  }
 0x92c   :  { %v7335_v8 = vadd.f32 %v7334_v22, %v13262_v10  ;;  %v7336_v42 = vpop.f32.mrb[58].mxu0  ;;  %7657 = vmatpush1.bf16.msra.mxu0 %v12170_v30  ;;  %v12176_v10 = vld [vmem:[#allocation15 + $0x5b4] ss:$48 sps:$4 sm:$0xff]   ;;  %v12201_v22 = vld [vmem:[#allocation15 + $0x7fc] ss:$48 sps:$4 sm:$0xff]  }
 0x92d   :  { %v13520_v3 = vadd.f32 %v13513_v21, %v7333_v12  ;;  %7739 = vmatpush1.bf16.msra.mxu1 %v12171_v60  ;;  %v7337_v51 = vpop.f32.mrb[59].mxu0  ;;  %7658 = vmatprep.subr.bf16.mxu0 %v12172_v45  ;;  %v12178_v21 = vld [vmem:[#allocation15 + $0x5b0] ss:$48 sps:$4 sm:$0xff]  }
 0x92e   :  { %v13523_v9 = vadd.f32 %v13515_v63, %v7335_v8  ;;  %7740 = vmatprep.subr.bf16.mxu1 %v12173_v38  ;;  %v12182_v63 = vld [vmem:[#allocation15 + $0x610] ss:$48 sps:$4 sm:$0xff]  }
 0x92f   :  { %v12202_v45 = vld [vmem:[#allocation15 + $0x7f0] ss:$48 sps:$4 sm:$0xff]  }
 0x930   :  { %7659 = vmatpush1.bf16.msra.mxu0 %v12174_v34 }
 0x931   :  { %7741 = vmatpush1.bf16.msra.mxu1 %v12175_v56  ;;  %7660 = vmatprep.subr.bf16.mxu0 %v12176_v10  ;;  %v12203_v56 = vld [vmem:[#allocation15 + $0x7f8] ss:$48 sps:$4 sm:$0xff]  }
 0x932   :  { %7742 = vmatprep.subr.bf16.mxu1 %v12177_v14  ;;  %v12204_v14 = vld [vmem:[#allocation15 + $0x854] ss:$48 sps:$4 sm:$0xff]  }
 0x934   :  { %7661 = vmatpush1.bf16.msra.mxu0 %v12178_v21 }
 0x935   :  { %7743 = vmatpush1.bf16.msra.mxu1 %v12179_v16  ;;  %7671 = vmatprep.subr.bf16.mxu0 %v12180_v24  ;;  %v12205_v24 = vld [vmem:[#allocation15 + $0x85c] ss:$48 sps:$4 sm:$0xff]  }
 0x936   :  { %7753 = vmatprep.subr.bf16.mxu1 %v12181_v1 }
 0x937   :  { %7663 = vmatmul.mubr.bf16.vlgmr.msra.gmra.mrb[52].mxu0 %v13495_v44 }
 0x938   :  { %7745 = vmatmul.mubr.bf16.vlgmr.msra.gmra.mrb[52].mxu1 %v13495_v44  ;;  %7672 = vmatpush1.bf16.msra.mxu0 %v12182_v63  ;;  %v12207_v63 = vld [vmem:[#allocation15 + $0x858] ss:$48 sps:$4 sm:$0xff]  }
 0x939   :  { %7703 = vmatprep.mubr.bf16.mxu0 %v13500_v4  ;;  %7754 = vmatpush1.bf16.msra.mxu1 %v12183_v25  ;;  %v12208_v25 = vld [vmem:[#allocation15 + $0x8b4] ss:$48 sps:$4 sm:$0xff]  }
 0x93a   :  { %7785 = vmatprep.mubr.bf16.mxu1 %v13500_v4  ;;  %7673 = vmatprep.subr.bf16.mxu0 %v12184_v20  ;;  %v12210_v20 = vld [vmem:[#allocation15 + $0x8b0] ss:$48 sps:$4 sm:$0xff]  }
 0x93b   :  { %7755 = vmatprep.subr.bf16.mxu1 %v12185_v53  ;;  %v12211_v53 = vld [vmem:[#allocation15 + $0x8b8] ss:$48 sps:$4 sm:$0xff]  }
 0x93c   :  { %7674 = vmatpush1.bf16.msra.mxu0 %v12186_v57  ;;  %v12212_v57 = vld [vmem:[#allocation15 + $0x914] ss:$48 sps:$4 sm:$0xff]  }
 0x93d   :  { %7756 = vmatpush1.bf16.msra.mxu1 %v12187_v23  ;;  %7675 = vmatprep.subr.bf16.mxu0 %v12188_v55  ;;  %v12213_v23 = vld [vmem:[#allocation15 + $0x91c] ss:$48 sps:$4 sm:$0xff]   ;;  %v12214_v55 = vld [vmem:[#allocation15 + $0x910] ss:$48 sps:$4 sm:$0xff]  }
 0x93e   :  { %7757 = vmatprep.subr.bf16.mxu1 %v12189_v27  ;;  %v12215_v27 = vld [vmem:[#allocation15 + $0x918] ss:$48 sps:$4 sm:$0xff]  }
 0x940   :  { %7676 = vmatpush1.bf16.msra.mxu0 %v12190_v15  ;;  %v12216_v15 = vld [vmem:[#allocation15 + $0x974] ss:$48 sps:$4 sm:$0xff]  }
 0x941   :  { %7758 = vmatpush1.bf16.msra.mxu1 %v12191_v28  ;;  %7677 = vmatprep.subr.bf16.mxu0 %v12192_v50  ;;  %v12217_v28 = vld [vmem:[#allocation15 + $0x97c] ss:$48 sps:$4 sm:$0xff]   ;;  %v12218_v50 = vld [vmem:[#allocation15 + $0x970] ss:$48 sps:$4 sm:$0xff]  }
 0x942   :  { %7759 = vmatprep.subr.bf16.mxu1 %v12193_v29  ;;  %v12219_v29 = vld [vmem:[#allocation15 + $0x978] ss:$48 sps:$4 sm:$0xff]  }
 0x944   :  { %7678 = vmatpush1.bf16.msra.mxu0 %v12194_v13  ;;  %v12220_v13 = vld [vmem:[#allocation15 + $0x9d4] ss:$48 sps:$4 sm:$0xff]  }
 0x945   :  { %7760 = vmatpush1.bf16.msra.mxu1 %v12195_v31  ;;  %7679 = vmatprep.subr.bf16.mxu0 %v12196_v32  ;;  %v12221_v31 = vld [vmem:[#allocation15 + $0x9dc] ss:$48 sps:$4 sm:$0xff]   ;;  %v12222_v32 = vld [vmem:[#allocation15 + $0x9d0] ss:$48 sps:$4 sm:$0xff]  }
 0x946   :  { %7761 = vmatprep.subr.bf16.mxu1 %v12197_v41  ;;  %v12223_v41 = vld [vmem:[#allocation15 + $0x9d8] ss:$48 sps:$4 sm:$0xff]  }
 0x948   :  { %7680 = vmatpush1.bf16.msra.mxu0 %v12198_v26  ;;  %v12224_v26 = vld [vmem:[#allocation15 + $0xa34] ss:$48 sps:$4 sm:$0xff]  }
 0x949   :  { %7762 = vmatpush1.bf16.msra.mxu1 %v12199_v33  ;;  %7681 = vmatprep.subr.bf16.mxu0 %v12200_v11  ;;  %v12225_v33 = vld [vmem:[#allocation15 + $0xa3c] ss:$48 sps:$4 sm:$0xff]   ;;  %v12226_v11 = vld [vmem:[#allocation15 + $0xa30] ss:$48 sps:$4 sm:$0xff]  }
 0x94a   :  { %v7455_v12 = vpop.f32.mrb[60].mxu0  ;;  %7763 = vmatprep.subr.bf16.mxu1 %v12201_v22  ;;  %v12228_v22 = vld [vmem:[#allocation15 + $0xa94] ss:$48 sps:$4 sm:$0xff]  }
 0x94b   :  { %v7414_v8 = vpop.f32.mrb[60].mxu1  ;;  %v7457_v42 = vpop.f32.mrb[61].mxu0 }
 0x94c   :  { %v7415_v30 = vadd.f32 %v7414_v8, %v13253_v5  ;;  %v7416_v60 = vpop.f32.mrb[61].mxu1  ;;  %v7459_v51 = vpop.f32.mrb[62].mxu0  ;;  %7682 = vmatpush1.bf16.msra.mxu0 %v12202_v45  ;;  %v12206_v5 = vld [vmem:[#allocation15 + $0x850] ss:$48 sps:$4 sm:$0xff]   ;;  %v12229_v8 = vld [vmem:[#allocation15 + $0xa9c] ss:$48 sps:$4 sm:$0xff]  }
 0x94d   :  { %v7417_v38 = vadd.f32 %v7416_v60, %v13265_v40  ;;  %v7418_v34 = vpop.f32.mrb[62].mxu1  ;;  %7764 = vmatpush1.bf16.msra.mxu1 %v12203_v56  ;;  %v7460_v10 = vpop.f32.mrb[63].mxu0  ;;  %7683 = vmatprep.subr.bf16.mxu0 %v12204_v14  ;;  %v12209_v40 = vld [vmem:[#allocation15 + $0x8bc] ss:$48 sps:$4 sm:$0xff]   ;;  %v12232_v60 = vld [vmem:[#allocation15 + $0xaf4] ss:$48 sps:$4 sm:$0xff]  }
 0x94e   :  { %v13531_v21 = vadd.f32 %v7455_v12, %v7415_v30  ;;  %v7419_v16 = vpop.f32.mrb[63].mxu1  ;;  %7765 = vmatprep.subr.bf16.mxu1 %v12205_v24  ;;  %v12227_v12 = vld [vmem:[#allocation15 + $0xa38] ss:$48 sps:$4 sm:$0xff]   ;;  %v12233_v51 = vld [vmem:[#allocation15 + $0xafc] ss:$48 sps:$4 sm:$0xff]  }
 0x94f   :  { %v13533_v1 = vadd.f32 %v7457_v42, %v7417_v38  ;;  %v12230_v42 = vld [vmem:[#allocation15 + $0xa90] ss:$48 sps:$4 sm:$0xff]   ;;  %v12231_v30 = vld [vmem:[#allocation15 + $0xa98] ss:$48 sps:$4 sm:$0xff]   ;;  %v12236_v34 = vld [vmem:[#allocation15 + $0xb54] ss:$48 sps:$4 sm:$0xff]  }
 0x950   :  { %7684 = vmatpush1.bf16.msra.mxu0 %v12206_v5  ;;  %v12234_v45 = vld [vmem:[#allocation15 + $0xaf0] ss:$48 sps:$4 sm:$0xff]   ;;  %v12235_v38 = vld [vmem:[#allocation15 + $0xaf8] ss:$48 sps:$4 sm:$0xff]   ;;  %v12237_v56 = vld [vmem:[#allocation15 + $0xb5c] ss:$48 sps:$4 sm:$0xff]  }
 0x951   :  { %7766 = vmatpush1.bf16.msra.mxu1 %v12207_v63  ;;  %7685 = vmatprep.subr.bf16.mxu0 %v12208_v25  ;;  %v12238_v10 = vld [vmem:[#allocation15 + $0xb50] ss:$48 sps:$4 sm:$0xff]   ;;  %v12239_v14 = vld [vmem:[#allocation15 + $0xb58] ss:$48 sps:$4 sm:$0xff]   ;;  %v12240_v16 = vld [vmem:[#allocation15 + $0xbb4] ss:$48 sps:$4 sm:$0xff]  }
 0x952   :  { %7767 = vmatprep.subr.bf16.mxu1 %v12209_v40  ;;  %v12241_v24 = vld [vmem:[#allocation15 + $0xbbc] ss:$48 sps:$4 sm:$0xff]   ;;  %v12242_v5 = vld [vmem:[#allocation15 + $0xbb0] ss:$48 sps:$4 sm:$0xff]   ;;  %v12243_v63 = vld [vmem:[#allocation15 + $0xbb8] ss:$48 sps:$4 sm:$0xff]  }
 0x953   :  { %v12244_v25 = vld [vmem:[#allocation15 + $0x24] ss:$48 sps:$4 sm:$0xff]   ;;  %v12245_v40 = vld [vmem:[#allocation15 + $0x2c] ss:$48 sps:$4 sm:$0xff]  }
 0x954   :  { %7686 = vmatpush1.bf16.msra.mxu0 %v12210_v20  ;;  %v12246_v20 = vld [vmem:[#allocation15 + $0x20] ss:$48 sps:$4 sm:$0xff]  }
 0x955   :  { %7768 = vmatpush1.bf16.msra.mxu1 %v12211_v53  ;;  %7687 = vmatprep.subr.bf16.mxu0 %v12212_v57  ;;  %v12247_v53 = vld [vmem:[#allocation15 + $0x28] ss:$48 sps:$4 sm:$0xff]   ;;  %v12248_v57 = vld [vmem:[#allocation15 + $0x84] ss:$48 sps:$4 sm:$0xff]  }
 0x956   :  { %7769 = vmatprep.subr.bf16.mxu1 %v12213_v23  ;;  %v12249_v23 = vld [vmem:[#allocation15 + $0x8c] ss:$48 sps:$4 sm:$0xff]  }
 0x958   :  { %7688 = vmatpush1.bf16.msra.mxu0 %v12214_v55  ;;  %v12250_v55 = vld [vmem:[#allocation15 + $0x80] ss:$48 sps:$4 sm:$0xff]  }
 0x959   :  { %7770 = vmatpush1.bf16.msra.mxu1 %v12215_v27  ;;  %7689 = vmatprep.subr.bf16.mxu0 %v12216_v15  ;;  %v12251_v27 = vld [vmem:[#allocation15 + $0x88] ss:$48 sps:$4 sm:$0xff]   ;;  %v12252_v15 = vld [vmem:[#allocation15 + $0xe4] ss:$48 sps:$4 sm:$0xff]  }
 0x95a   :  { %7771 = vmatprep.subr.bf16.mxu1 %v12217_v28  ;;  %v12253_v28 = vld [vmem:[#allocation15 + $0xec] ss:$48 sps:$4 sm:$0xff]  }
 0x95c   :  { %7690 = vmatpush1.bf16.msra.mxu0 %v12218_v50  ;;  %v12254_v50 = vld [vmem:[#allocation15 + $0xe0] ss:$48 sps:$4 sm:$0xff]  }
 0x95d   :  { %7772 = vmatpush1.bf16.msra.mxu1 %v12219_v29  ;;  %7691 = vmatprep.subr.bf16.mxu0 %v12220_v13  ;;  %v12255_v29 = vld [vmem:[#allocation15 + $0xe8] ss:$48 sps:$4 sm:$0xff]   ;;  %v12256_v13 = vld [vmem:[#allocation15 + $0x144] ss:$48 sps:$4 sm:$0xff]  }
 0x95e   :  { %7773 = vmatprep.subr.bf16.mxu1 %v12221_v31  ;;  %v12257_v31 = vld [vmem:[#allocation15 + $0x14c] ss:$48 sps:$4 sm:$0xff]  }
 0x960   :  { %7692 = vmatpush1.bf16.msra.mxu0 %v12222_v32  ;;  %v12259_v32 = vld [vmem:[#allocation15 + $0x148] ss:$48 sps:$4 sm:$0xff]  }
 0x961   :  { %7774 = vmatpush1.bf16.msra.mxu1 %v12223_v41  ;;  %7693 = vmatprep.subr.bf16.mxu0 %v12224_v26  ;;  %v12260_v41 = vld [vmem:[#allocation15 + $0x1a4] ss:$48 sps:$4 sm:$0xff]   ;;  %v12261_v26 = vld [vmem:[#allocation15 + $0x1ac] ss:$48 sps:$4 sm:$0xff]  }
 0x962   :  { %7775 = vmatprep.subr.bf16.mxu1 %v12225_v33  ;;  %v12262_v33 = vld [vmem:[#allocation15 + $0x1a0] ss:$48 sps:$4 sm:$0xff]  }
 0x964   :  { %7694 = vmatpush1.bf16.msra.mxu0 %v12226_v11  ;;  %v12263_v11 = vld [vmem:[#allocation15 + $0x1a8] ss:$48 sps:$4 sm:$0xff]  }
 0x965   :  { %7776 = vmatpush1.bf16.msra.mxu1 %v12227_v12  ;;  %7695 = vmatprep.subr.bf16.mxu0 %v12228_v22  ;;  %v12264_v12 = vld [vmem:[#allocation15 + $0x204] ss:$48 sps:$4 sm:$0xff]   ;;  %v12265_v22 = vld [vmem:[#allocation15 + $0x20c] ss:$48 sps:$4 sm:$0xff]  }
 0x966   :  { %7777 = vmatprep.subr.bf16.mxu1 %v12229_v8  ;;  %v12266_v8 = vld [vmem:[#allocation15 + $0x200] ss:$48 sps:$4 sm:$0xff]  }
 0x968   :  { %7696 = vmatpush1.bf16.msra.mxu0 %v12230_v42  ;;  %v12267_v42 = vld [vmem:[#allocation15 + $0x208] ss:$48 sps:$4 sm:$0xff]  }
 0x969   :  { %7778 = vmatpush1.bf16.msra.mxu1 %v12231_v30  ;;  %7697 = vmatprep.subr.bf16.mxu0 %v12232_v60  ;;  %v12268_v30 = vld [vmem:[#allocation15 + $0x264] ss:$48 sps:$4 sm:$0xff]   ;;  %v12269_v60 = vld [vmem:[#allocation15 + $0x26c] ss:$48 sps:$4 sm:$0xff]  }
 0x96a   :  { %7779 = vmatprep.subr.bf16.mxu1 %v12233_v51  ;;  %v12270_v51 = vld [vmem:[#allocation15 + $0x260] ss:$48 sps:$4 sm:$0xff]  }
 0x96c   :  { %7698 = vmatpush1.bf16.msra.mxu0 %v12234_v45  ;;  %v12271_v45 = vld [vmem:[#allocation15 + $0x268] ss:$48 sps:$4 sm:$0xff]  }
 0x96d   :  { %7780 = vmatpush1.bf16.msra.mxu1 %v12235_v38  ;;  %7699 = vmatprep.subr.bf16.mxu0 %v12236_v34  ;;  %v12272_v38 = vld [vmem:[#allocation15 + $0x2c4] ss:$48 sps:$4 sm:$0xff]   ;;  %v12273_v34 = vld [vmem:[#allocation15 + $0x2cc] ss:$48 sps:$4 sm:$0xff]  }
 0x96e   :  { %7781 = vmatprep.subr.bf16.mxu1 %v12237_v56  ;;  %v12274_v56 = vld [vmem:[#allocation15 + $0x2c0] ss:$48 sps:$4 sm:$0xff]  }
 0x970   :  { %7700 = vmatpush1.bf16.msra.mxu0 %v12238_v10  ;;  %v12275_v10 = vld [vmem:[#allocation15 + $0x2c8] ss:$48 sps:$4 sm:$0xff]  }
 0x971   :  { %7782 = vmatpush1.bf16.msra.mxu1 %v12239_v14  ;;  %7701 = vmatprep.subr.bf16.mxu0 %v12240_v16  ;;  %v12276_v14 = vld [vmem:[#allocation15 + $0x324] ss:$48 sps:$4 sm:$0xff]   ;;  %v12277_v16 = vld [vmem:[#allocation15 + $0x32c] ss:$48 sps:$4 sm:$0xff]  }
 0x972   :  { %7783 = vmatprep.subr.bf16.mxu1 %v12241_v24  ;;  %v12278_v24 = vld [vmem:[#allocation15 + $0x320] ss:$48 sps:$4 sm:$0xff]  }
 0x974   :  { %7702 = vmatpush1.bf16.msra.mxu0 %v12242_v5  ;;  %v12279_v5 = vld [vmem:[#allocation15 + $0x328] ss:$48 sps:$4 sm:$0xff]  }
 0x975   :  { %7784 = vmatpush1.bf16.msra.mxu1 %v12243_v63  ;;  %7794 = vmatprep.subr.bf16.mxu0 %v12244_v25  ;;  %v12280_v63 = vld [vmem:[#allocation15 + $0x384] ss:$48 sps:$4 sm:$0xff]   ;;  %v12281_v25 = vld [vmem:[#allocation15 + $0x38c] ss:$48 sps:$4 sm:$0xff]  }
 0x976   :  { %7876 = vmatprep.subr.bf16.mxu1 %v12245_v40  ;;  %v12282_v40 = vld [vmem:[#allocation15 + $0x380] ss:$48 sps:$4 sm:$0xff]  }
 0x977   :  { %7704 = vmatmul.mubr.bf16.vlgmr.msra.gmra.mrb[52].mxu0 %v13507_v62 }
 0x978   :  { %7786 = vmatmul.mubr.bf16.vlgmr.msra.gmra.mrb[52].mxu1 %v13507_v62  ;;  %7795 = vmatpush1.bf16.msra.mxu0 %v12246_v20  ;;  %v12283_v20 = vld [vmem:[#allocation15 + $0x388] ss:$48 sps:$4 sm:$0xff]  }
 0x979   :  { %7826 = vmatprep.mubr.bf16.mxu0 %v13488_v59  ;;  %7877 = vmatpush1.bf16.msra.mxu1 %v12247_v53  ;;  %v12284_v53 = vld [vmem:[#allocation15 + $0x3e4] ss:$48 sps:$4 sm:$0xff]  }
 0x97a   :  { %7908 = vmatprep.mubr.bf16.mxu1 %v13488_v59  ;;  %7796 = vmatprep.subr.bf16.mxu0 %v12248_v57  ;;  %v12258_v59 = vld [vmem:[#allocation15 + $0x140] ss:$48 sps:$4 sm:$0xff]   ;;  %v12285_v57 = vld [vmem:[#allocation15 + $0x3ec] ss:$48 sps:$4 sm:$0xff]  }
 0x97b   :  { %7878 = vmatprep.subr.bf16.mxu1 %v12249_v23  ;;  %v12286_v23 = vld [vmem:[#allocation15 + $0x3e0] ss:$48 sps:$4 sm:$0xff]  }
 0x97c   :  { %7797 = vmatpush1.bf16.msra.mxu0 %v12250_v55  ;;  %v12287_v55 = vld [vmem:[#allocation15 + $0x3e8] ss:$48 sps:$4 sm:$0xff]  }
 0x97d   :  { %7879 = vmatpush1.bf16.msra.mxu1 %v12251_v27  ;;  %7798 = vmatprep.subr.bf16.mxu0 %v12252_v15  ;;  %v12288_v27 = vld [vmem:[#allocation15 + $0x444] ss:$48 sps:$4 sm:$0xff]   ;;  %v12289_v15 = vld [vmem:[#allocation15 + $0x44c] ss:$48 sps:$4 sm:$0xff]  }
 0x97e   :  { %7880 = vmatprep.subr.bf16.mxu1 %v12253_v28  ;;  %v12290_v28 = vld [vmem:[#allocation15 + $0x440] ss:$48 sps:$4 sm:$0xff]  }
 0x980   :  { %7799 = vmatpush1.bf16.msra.mxu0 %v12254_v50  ;;  %v12291_v50 = vld [vmem:[#allocation15 + $0x448] ss:$48 sps:$4 sm:$0xff]  }
 0x981   :  { %7881 = vmatpush1.bf16.msra.mxu1 %v12255_v29  ;;  %7800 = vmatprep.subr.bf16.mxu0 %v12256_v13  ;;  %v12292_v29 = vld [vmem:[#allocation15 + $0x4a4] ss:$48 sps:$4 sm:$0xff]   ;;  %v12293_v13 = vld [vmem:[#allocation15 + $0x4ac] ss:$48 sps:$4 sm:$0xff]  }
 0x982   :  { %7882 = vmatprep.subr.bf16.mxu1 %v12257_v31  ;;  %v12294_v31 = vld [vmem:[#allocation15 + $0x4a0] ss:$48 sps:$4 sm:$0xff]  }
 0x984   :  { %7801 = vmatpush1.bf16.msra.mxu0 %v12258_v59  ;;  %v12295_v59 = vld [vmem:[#allocation15 + $0x4a8] ss:$48 sps:$4 sm:$0xff]  }
 0x985   :  { %7883 = vmatpush1.bf16.msra.mxu1 %v12259_v32  ;;  %7802 = vmatprep.subr.bf16.mxu0 %v12260_v41  ;;  %v12296_v32 = vld [vmem:[#allocation15 + $0x504] ss:$48 sps:$4 sm:$0xff]   ;;  %v12297_v41 = vld [vmem:[#allocation15 + $0x50c] ss:$48 sps:$4 sm:$0xff]  }
 0x986   :  { %7884 = vmatprep.subr.bf16.mxu1 %v12261_v26  ;;  %v12298_v26 = vld [vmem:[#allocation15 + $0x500] ss:$48 sps:$4 sm:$0xff]  }
 0x988   :  { %7803 = vmatpush1.bf16.msra.mxu0 %v12262_v33  ;;  %v12299_v33 = vld [vmem:[#allocation15 + $0x508] ss:$48 sps:$4 sm:$0xff]  }
 0x989   :  { %7885 = vmatpush1.bf16.msra.mxu1 %v12263_v11  ;;  %7804 = vmatprep.subr.bf16.mxu0 %v12264_v12  ;;  %v12300_v11 = vld [vmem:[#allocation15 + $0x564] ss:$48 sps:$4 sm:$0xff]   ;;  %v12301_v12 = vld [vmem:[#allocation15 + $0x56c] ss:$48 sps:$4 sm:$0xff]  }
 0x98a   :  { %7886 = vmatprep.subr.bf16.mxu1 %v12265_v22  ;;  %v12302_v22 = vld [vmem:[#allocation15 + $0x560] ss:$48 sps:$4 sm:$0xff]  }
 0x98c   :  { %7805 = vmatpush1.bf16.msra.mxu0 %v12266_v8  ;;  %v12303_v8 = vld [vmem:[#allocation15 + $0x568] ss:$48 sps:$4 sm:$0xff]  }
 0x98d   :  { %7887 = vmatpush1.bf16.msra.mxu1 %v12267_v42  ;;  %7806 = vmatprep.subr.bf16.mxu0 %v12268_v30  ;;  %v12304_v42 = vld [vmem:[#allocation15 + $0x5c4] ss:$48 sps:$4 sm:$0xff]   ;;  %v12305_v30 = vld [vmem:[#allocation15 + $0x5cc] ss:$48 sps:$4 sm:$0xff]  }
 0x98e   :  { %7888 = vmatprep.subr.bf16.mxu1 %v12269_v60  ;;  %v12306_v60 = vld [vmem:[#allocation15 + $0x5c0] ss:$48 sps:$4 sm:$0xff]  }
 0x990   :  { %7807 = vmatpush1.bf16.msra.mxu0 %v12270_v51  ;;  %v12307_v51 = vld [vmem:[#allocation15 + $0x5c8] ss:$48 sps:$4 sm:$0xff]  }
 0x991   :  { %7889 = vmatpush1.bf16.msra.mxu1 %v12271_v45  ;;  %7808 = vmatprep.subr.bf16.mxu0 %v12272_v38  ;;  %v12308_v45 = vld [vmem:[#allocation15 + $0x624] ss:$48 sps:$4 sm:$0xff]   ;;  %v12309_v38 = vld [vmem:[#allocation15 + $0x62c] ss:$48 sps:$4 sm:$0xff]  }
 0x992   :  { %7890 = vmatprep.subr.bf16.mxu1 %v12273_v34  ;;  %v12310_v34 = vld [vmem:[#allocation15 + $0x620] ss:$48 sps:$4 sm:$0xff]  }
 0x994   :  { %7809 = vmatpush1.bf16.msra.mxu0 %v12274_v56  ;;  %v12311_v56 = vld [vmem:[#allocation15 + $0x628] ss:$48 sps:$4 sm:$0xff]  }
 0x995   :  { %7891 = vmatpush1.bf16.msra.mxu1 %v12275_v10  ;;  %7810 = vmatprep.subr.bf16.mxu0 %v12276_v14  ;;  %v12312_v10 = vld [vmem:[#allocation15 + $0x684] ss:$48 sps:$4 sm:$0xff]   ;;  %v12313_v14 = vld [vmem:[#allocation15 + $0x68c] ss:$48 sps:$4 sm:$0xff]  }
 0x996   :  { %7892 = vmatprep.subr.bf16.mxu1 %v12277_v16  ;;  %v12314_v16 = vld [vmem:[#allocation15 + $0x680] ss:$48 sps:$4 sm:$0xff]  }
 0x998   :  { %7811 = vmatpush1.bf16.msra.mxu0 %v12278_v24  ;;  %v12315_v24 = vld [vmem:[#allocation15 + $0x688] ss:$48 sps:$4 sm:$0xff]  }
 0x999   :  { %7893 = vmatpush1.bf16.msra.mxu1 %v12279_v5  ;;  %7812 = vmatprep.subr.bf16.mxu0 %v12280_v63  ;;  %v12316_v5 = vld [vmem:[#allocation15 + $0x6e4] ss:$48 sps:$4 sm:$0xff]   ;;  %v12317_v63 = vld [vmem:[#allocation15 + $0x6ec] ss:$48 sps:$4 sm:$0xff]  }
 0x99a   :  { %7894 = vmatprep.subr.bf16.mxu1 %v12281_v25  ;;  %v12319_v25 = vld [vmem:[#allocation15 + $0x6e8] ss:$48 sps:$4 sm:$0xff]  }
 0x99c   :  { %7813 = vmatpush1.bf16.msra.mxu0 %v12282_v40  ;;  %v12320_v40 = vld [vmem:[#allocation15 + $0x744] ss:$48 sps:$4 sm:$0xff]  }
 0x99d   :  { %7895 = vmatpush1.bf16.msra.mxu1 %v12283_v20  ;;  %7814 = vmatprep.subr.bf16.mxu0 %v12284_v53  ;;  %v12321_v20 = vld [vmem:[#allocation15 + $0x74c] ss:$48 sps:$4 sm:$0xff]   ;;  %v12323_v53 = vld [vmem:[#allocation15 + $0x748] ss:$48 sps:$4 sm:$0xff]  }
 0x99e   :  { %7896 = vmatprep.subr.bf16.mxu1 %v12285_v57  ;;  %v12324_v57 = vld [vmem:[#allocation15 + $0x7a4] ss:$48 sps:$4 sm:$0xff]  }
 0x9a0   :  { %7815 = vmatpush1.bf16.msra.mxu0 %v12286_v23  ;;  %v12325_v23 = vld [vmem:[#allocation15 + $0x7ac] ss:$48 sps:$4 sm:$0xff]  }
 0x9a1   :  { %7897 = vmatpush1.bf16.msra.mxu1 %v12287_v55  ;;  %7816 = vmatprep.subr.bf16.mxu0 %v12288_v27  ;;  %v12326_v55 = vld [vmem:[#allocation15 + $0x7a0] ss:$48 sps:$4 sm:$0xff]   ;;  %v12327_v27 = vld [vmem:[#allocation15 + $0x7a8] ss:$48 sps:$4 sm:$0xff]  }
 0x9a2   :  { %7898 = vmatprep.subr.bf16.mxu1 %v12289_v15  ;;  %v12328_v15 = vld [vmem:[#allocation15 + $0x804] ss:$48 sps:$4 sm:$0xff]  }
 0x9a4   :  { %7817 = vmatpush1.bf16.msra.mxu0 %v12290_v28 }
 0x9a5   :  { %7899 = vmatpush1.bf16.msra.mxu1 %v12291_v50  ;;  %7818 = vmatprep.subr.bf16.mxu0 %v12292_v29  ;;  %v12329_v50 = vld [vmem:[#allocation15 + $0x80c] ss:$48 sps:$4 sm:$0xff]  }
 0x9a6   :  { %7900 = vmatprep.subr.bf16.mxu1 %v12293_v13 }
 0x9a8   :  { %7819 = vmatpush1.bf16.msra.mxu0 %v12294_v31 }
 0x9a9   :  { %7901 = vmatpush1.bf16.msra.mxu1 %v12295_v59  ;;  %7820 = vmatprep.subr.bf16.mxu0 %v12296_v32  ;;  %v12330_v32 = vld [vmem:[#allocation15 + $0x800] ss:$48 sps:$4 sm:$0xff]  }
 0x9aa   :  { %7902 = vmatprep.subr.bf16.mxu1 %v12297_v41 }
 0x9ac   :  { %7821 = vmatpush1.bf16.msra.mxu0 %v12298_v26  ;;  %v12331_v26 = vld [vmem:[#allocation15 + $0x808] ss:$48 sps:$4 sm:$0xff]  }
 0x9ad   :  { %7903 = vmatpush1.bf16.msra.mxu1 %v12299_v33  ;;  %7822 = vmatprep.subr.bf16.mxu0 %v12300_v11  ;;  %v12332_v11 = vld [vmem:[#allocation15 + $0x864] ss:$48 sps:$4 sm:$0xff]  }
 0x9ae   :  { %7904 = vmatprep.subr.bf16.mxu1 %v12301_v12 }
 0x9b0   :  { %7823 = vmatpush1.bf16.msra.mxu0 %v12302_v22  ;;  %v12333_v22 = vld [vmem:[#allocation15 + $0x86c] ss:$48 sps:$4 sm:$0xff]  }
 0x9b1   :  { %7905 = vmatpush1.bf16.msra.mxu1 %v12303_v8  ;;  %7824 = vmatprep.subr.bf16.mxu0 %v12304_v42  ;;  %v12334_v8 = vld [vmem:[#allocation15 + $0x860] ss:$48 sps:$4 sm:$0xff]   ;;  %v12335_v42 = vld [vmem:[#allocation15 + $0x868] ss:$48 sps:$4 sm:$0xff]  }
 0x9b2   :  { %7906 = vmatprep.subr.bf16.mxu1 %v12305_v30  ;;  %v12336_v30 = vld [vmem:[#allocation15 + $0x8c4] ss:$48 sps:$4 sm:$0xff]  }
 0x9b4   :  { %7825 = vmatpush1.bf16.msra.mxu0 %v12306_v60  ;;  %v12337_v60 = vld [vmem:[#allocation15 + $0x8cc] ss:$48 sps:$4 sm:$0xff]  }
 0x9b5   :  { %7907 = vmatpush1.bf16.msra.mxu1 %v12307_v51  ;;  %7835 = vmatprep.subr.bf16.mxu0 %v12308_v45  ;;  %v12338_v51 = vld [vmem:[#allocation15 + $0x8c0] ss:$48 sps:$4 sm:$0xff]   ;;  %v12339_v45 = vld [vmem:[#allocation15 + $0x8c8] ss:$48 sps:$4 sm:$0xff]  }
 0x9b6   :  { %7917 = vmatprep.subr.bf16.mxu1 %v12309_v38  ;;  %v12340_v38 = vld [vmem:[#allocation15 + $0x924] ss:$48 sps:$4 sm:$0xff]  }
 0x9b7   :  { %7827 = vmatmul.mubr.bf16.vlgmr.msra.gmra.mrb[64].mxu0 %v13495_v44 }
 0x9b8   :  { %7909 = vmatmul.mubr.bf16.vlgmr.msra.gmra.mrb[64].mxu1 %v13495_v44  ;;  %7836 = vmatpush1.bf16.msra.mxu0 %v12310_v34  ;;  %v12318_v44 = vld [vmem:[#allocation15 + $0x6e0] ss:$48 sps:$4 sm:$0xff]   ;;  %v12341_v34 = vld [vmem:[#allocation15 + $0x92c] ss:$48 sps:$4 sm:$0xff]  }
 0x9b9   :  { %7867 = vmatprep.mubr.bf16.mxu0 %v13500_v4  ;;  %7918 = vmatpush1.bf16.msra.mxu1 %v12311_v56  ;;  %v12342_v56 = vld [vmem:[#allocation15 + $0x920] ss:$48 sps:$4 sm:$0xff]  }
 0x9ba   :  { %7949 = vmatprep.mubr.bf16.mxu1 %v13500_v4  ;;  %7837 = vmatprep.subr.bf16.mxu0 %v12312_v10  ;;  %v12322_v4 = vld [vmem:[#allocation15 + $0x740] ss:$48 sps:$4 sm:$0xff]   ;;  %v12343_v10 = vld [vmem:[#allocation15 + $0x928] ss:$48 sps:$4 sm:$0xff]  }
 0x9bb   :  { %7919 = vmatprep.subr.bf16.mxu1 %v12313_v14  ;;  %v12344_v14 = vld [vmem:[#allocation15 + $0x984] ss:$48 sps:$4 sm:$0xff]  }
 0x9bc   :  { %7838 = vmatpush1.bf16.msra.mxu0 %v12314_v16  ;;  %v12345_v16 = vld [vmem:[#allocation15 + $0x98c] ss:$48 sps:$4 sm:$0xff]  }
 0x9bd   :  { %7920 = vmatpush1.bf16.msra.mxu1 %v12315_v24  ;;  %7839 = vmatprep.subr.bf16.mxu0 %v12316_v5  ;;  %v12346_v24 = vld [vmem:[#allocation15 + $0x980] ss:$48 sps:$4 sm:$0xff]   ;;  %v12347_v5 = vld [vmem:[#allocation15 + $0x988] ss:$48 sps:$4 sm:$0xff]  }
 0x9be   :  { %7921 = vmatprep.subr.bf16.mxu1 %v12317_v63  ;;  %v12348_v63 = vld [vmem:[#allocation15 + $0x9e4] ss:$48 sps:$4 sm:$0xff]  }
 0x9c0   :  { %7840 = vmatpush1.bf16.msra.mxu0 %v12318_v44  ;;  %v12349_v44 = vld [vmem:[#allocation15 + $0x9ec] ss:$48 sps:$4 sm:$0xff]  }
 0x9c1   :  { %7922 = vmatpush1.bf16.msra.mxu1 %v12319_v25  ;;  %7841 = vmatprep.subr.bf16.mxu0 %v12320_v40  ;;  %v12350_v25 = vld [vmem:[#allocation15 + $0x9e0] ss:$48 sps:$4 sm:$0xff]   ;;  %v12351_v40 = vld [vmem:[#allocation15 + $0x9e8] ss:$48 sps:$4 sm:$0xff]  }
 0x9c2   :  { %7923 = vmatprep.subr.bf16.mxu1 %v12321_v20  ;;  %v12352_v20 = vld [vmem:[#allocation15 + $0xa44] ss:$48 sps:$4 sm:$0xff]  }
 0x9c4   :  { %7842 = vmatpush1.bf16.msra.mxu0 %v12322_v4  ;;  %v12353_v4 = vld [vmem:[#allocation15 + $0xa4c] ss:$48 sps:$4 sm:$0xff]  }
 0x9c5   :  { %7924 = vmatpush1.bf16.msra.mxu1 %v12323_v53  ;;  %7843 = vmatprep.subr.bf16.mxu0 %v12324_v57  ;;  %v12354_v53 = vld [vmem:[#allocation15 + $0xa40] ss:$48 sps:$4 sm:$0xff]   ;;  %v12355_v57 = vld [vmem:[#allocation15 + $0xa48] ss:$48 sps:$4 sm:$0xff]  }
 0x9c6   :  { %7925 = vmatprep.subr.bf16.mxu1 %v12325_v23  ;;  %v12356_v23 = vld [vmem:[#allocation15 + $0xaa4] ss:$48 sps:$4 sm:$0xff]  }
 0x9c8   :  { %7844 = vmatpush1.bf16.msra.mxu0 %v12326_v55  ;;  %v12357_v55 = vld [vmem:[#allocation15 + $0xaac] ss:$48 sps:$4 sm:$0xff]  }
 0x9c9   :  { %7926 = vmatpush1.bf16.msra.mxu1 %v12327_v27  ;;  %7845 = vmatprep.subr.bf16.mxu0 %v12328_v15  ;;  %v12358_v27 = vld [vmem:[#allocation15 + $0xaa0] ss:$48 sps:$4 sm:$0xff]   ;;  %v12359_v15 = vld [vmem:[#allocation15 + $0xaa8] ss:$48 sps:$4 sm:$0xff]  }
 0x9ca   :  { %v13543_v28 = vpop.f32.mrb[48].mxu0  ;;  %7927 = vmatprep.subr.bf16.mxu1 %v12329_v50  ;;  %v12360_v50 = vld [vmem:[#allocation15 + $0xb04] ss:$48 sps:$4 sm:$0xff]  }
 0x9cb   :  { %v13545_v29 = vpop.f32.mrb[48].mxu1  ;;  %v13547_v13 = vpop.f32.mrb[49].mxu0 }
 0x9cc   :  { %v13549_v31 = vpop.f32.mrb[49].mxu1  ;;  %v7545_v59 = vpop.f32.mrb[50].mxu0  ;;  %7846 = vmatpush1.bf16.msra.mxu0 %v12330_v32  ;;  %v12362_v32 = vld [vmem:[#allocation15 + $0xb00] ss:$48 sps:$4 sm:$0xff]  }
 0x9cd   :  { %v7627_v41 = vpop.f32.mrb[50].mxu1  ;;  %7928 = vmatpush1.bf16.msra.mxu1 %v12331_v26  ;;  %v7546_v33 = vpop.f32.mrb[51].mxu0  ;;  %7847 = vmatprep.subr.bf16.mxu0 %v12332_v11  ;;  %v12361_v59 = vld [vmem:[#allocation15 + $0xb0c] ss:$48 sps:$4 sm:$0xff]   ;;  %v12364_v26 = vld [vmem:[#allocation15 + $0xb64] ss:$48 sps:$4 sm:$0xff]  }
 0x9ce   :  { %v7628_v12 = vpop.f32.mrb[51].mxu1  ;;  %7929 = vmatprep.subr.bf16.mxu1 %v12333_v22  ;;  %v12363_v41 = vld [vmem:[#allocation15 + $0xb08] ss:$48 sps:$4 sm:$0xff]   ;;  %v12365_v33 = vld [vmem:[#allocation15 + $0xb6c] ss:$48 sps:$4 sm:$0xff]  }
 0x9cf   :  { %v12366_v11 = vld [vmem:[#allocation15 + $0xb60] ss:$48 sps:$4 sm:$0xff]   ;;  %v12367_v12 = vld [vmem:[#allocation15 + $0xb68] ss:$48 sps:$4 sm:$0xff]   ;;  %v12368_v22 = vld [vmem:[#allocation15 + $0xbc4] ss:$48 sps:$4 sm:$0xff]  }
 0x9d0   :  { %7848 = vmatpush1.bf16.msra.mxu0 %v12334_v8  ;;  %v12369_v8 = vld [vmem:[#allocation15 + $0xbcc] ss:$48 sps:$4 sm:$0xff]  }
 0x9d1   :  { %7930 = vmatpush1.bf16.msra.mxu1 %v12335_v42  ;;  %7849 = vmatprep.subr.bf16.mxu0 %v12336_v30  ;;  %v13551_v42 = vld [vmem:[#allocation12 + $0x28] sm:$0xff] }
 0x9d2   :  { %7931 = vmatprep.subr.bf16.mxu1 %v12337_v60  ;;  %v12370_v30 = vld [vmem:[#allocation15 + $0xbc0] ss:$48 sps:$4 sm:$0xff]   ;;  %v13553_v60 = vld [vmem:[#allocation12 + $0x30] sm:$0xff] }
 0x9d4   :  { %7850 = vmatpush1.bf16.msra.mxu0 %v12338_v51  ;;  %v12371_v51 = vld [vmem:[#allocation15 + $0xbc8] ss:$48 sps:$4 sm:$0xff]  }
 0x9d5   :  { %7932 = vmatpush1.bf16.msra.mxu1 %v12339_v45  ;;  %7851 = vmatprep.subr.bf16.mxu0 %v12340_v38  ;;  %v12372_v45 = vld [vmem:[#allocation20 + $0x40] sm:$0xff]  }
 0x9d6   :  { %7933 = vmatprep.subr.bf16.mxu1 %v12341_v34  ;;  %v12373_v38 = vld [vmem:[#allocation20 + $0xc0] sm:$0xff]   ;;  %v9414_v34 = vcombine.high %v13551_v42, %v13551_v42 }
 0x9d8   :  { %7852 = vmatpush1.bf16.msra.mxu0 %v12342_v56  ;;  %v9416_v56 = vcombine.high %v13553_v60, %v13553_v60 }
 0x9d9   :  { %7934 = vmatpush1.bf16.msra.mxu1 %v12343_v10  ;;  %7853 = vmatprep.subr.bf16.mxu0 %v12344_v14  ;;  %v12374_v10 = vld [vmem:[#allocation20] sm:$0xff]   ;;  %v12375_v14 = vld [vmem:[#allocation20 + $0x48] sm:$0xff]  }
 0x9da   :  { %7935 = vmatprep.subr.bf16.mxu1 %v12345_v16  ;;  %v12376_v16 = vld [vmem:[#allocation20 + $0x80] sm:$0xff]  }
 0x9dc   :  { %7854 = vmatpush1.bf16.msra.mxu0 %v12346_v24  ;;  %v12377_v24 = vld [vmem:[#allocation20 + $0xc8] sm:$0xff]  }
 0x9dd   :  { %7936 = vmatpush1.bf16.msra.mxu1 %v12347_v5  ;;  %7855 = vmatprep.subr.bf16.mxu0 %v12348_v63  ;;  %v12378_v5 = vld [vmem:[#allocation20 + $0x8] sm:$0xff]   ;;  %v12379_v63 = vld [vmem:[#allocation20 + $0x50] sm:$0xff]  }
 0x9de   :  { %7937 = vmatprep.subr.bf16.mxu1 %v12349_v44  ;;  %v12380_v44 = vld [vmem:[#allocation20 + $0x88] sm:$0xff]  }
 0x9e0   :  { %7856 = vmatpush1.bf16.msra.mxu0 %v12350_v25  ;;  %v12381_v25 = vld [vmem:[#allocation20 + $0xd0] sm:$0xff]  }
 0x9e1   :  { %7938 = vmatpush1.bf16.msra.mxu1 %v12351_v40  ;;  %7857 = vmatprep.subr.bf16.mxu0 %v12352_v20  ;;  %v12382_v40 = vld [vmem:[#allocation20 + $0x10] sm:$0xff]  }
 0x9e2   :  { %7939 = vmatprep.subr.bf16.mxu1 %v12353_v4  ;;  %v12384_v20 = vld [vmem:[#allocation20 + $0x90] sm:$0xff]   ;;  %v12385_v4 = vld [vmem:[#allocation20 + $0xd8] sm:$0xff]  }
 0x9e4   :  { %7858 = vmatpush1.bf16.msra.mxu0 %v12354_v53  ;;  %v12386_v53 = vld [vmem:[#allocation20 + $0x18] sm:$0xff]  }
 0x9e5   :  { %7940 = vmatpush1.bf16.msra.mxu1 %v12355_v57  ;;  %7859 = vmatprep.subr.bf16.mxu0 %v12356_v23  ;;  %v12387_v57 = vld [vmem:[#allocation20 + $0x60] sm:$0xff]   ;;  %v12388_v23 = vld [vmem:[#allocation20 + $0x98] sm:$0xff]  }
 0x9e6   :  { %7941 = vmatprep.subr.bf16.mxu1 %v12357_v55  ;;  %v12389_v55 = vld [vmem:[#allocation20 + $0xe0] sm:$0xff]  }
 0x9e8   :  { %7860 = vmatpush1.bf16.msra.mxu0 %v12358_v27  ;;  %v12390_v27 = vld [vmem:[#allocation20 + $0x20] sm:$0xff]  }
 0x9e9   :  { %7942 = vmatpush1.bf16.msra.mxu1 %v12359_v15  ;;  %7861 = vmatprep.subr.bf16.mxu0 %v12360_v50  ;;  %v12391_v15 = vld [vmem:[#allocation20 + $0x68] sm:$0xff]   ;;  %v12392_v50 = vld [vmem:[#allocation20 + $0xa0] sm:$0xff]  }
 0x9ea   :  { %7943 = vmatprep.subr.bf16.mxu1 %v12361_v59  ;;  %v12393_v59 = vld [vmem:[#allocation20 + $0xe8] sm:$0xff]  }
 0x9ec   :  { %7862 = vmatpush1.bf16.msra.mxu0 %v12362_v32  ;;  %v12394_v32 = vld [vmem:[#allocation20 + $0x28] sm:$0xff]  }
 0x9ed   :  { %7944 = vmatpush1.bf16.msra.mxu1 %v12363_v41  ;;  %7863 = vmatprep.subr.bf16.mxu0 %v12364_v26  ;;  %v12395_v41 = vld [vmem:[#allocation20 + $0x70] sm:$0xff]   ;;  %v12396_v26 = vld [vmem:[#allocation20 + $0xa8] sm:$0xff]  }
 0x9ee   :  { %7945 = vmatprep.subr.bf16.mxu1 %v12365_v33  ;;  %v12397_v33 = vld [vmem:[#allocation20 + $0xf0] sm:$0xff]  }
 0x9f0   :  { %7864 = vmatpush1.bf16.msra.mxu0 %v12366_v11  ;;  %v12398_v11 = vld [vmem:[#allocation20 + $0x30] sm:$0xff]  }
 0x9f1   :  { %7946 = vmatpush1.bf16.msra.mxu1 %v12367_v12  ;;  %7865 = vmatprep.subr.bf16.mxu0 %v12368_v22  ;;  %v12399_v12 = vld [vmem:[#allocation20 + $0x78] sm:$0xff]   ;;  %v12400_v22 = vld [vmem:[#allocation20 + $0xb0] sm:$0xff]  }
 0x9f2   :  { %7947 = vmatprep.subr.bf16.mxu1 %v12369_v8  ;;  %v12401_v8 = vld [vmem:[#allocation20 + $0xf8] sm:$0xff]  }
 0x9f4   :  { %7866 = vmatpush1.bf16.msra.mxu0 %v12370_v30  ;;  %v11023_v30 = vld [vmem:[#allocation23 + $0x40] sm:$0xff]  }
 0x9f5   :  { %7948 = vmatpush1.bf16.msra.mxu1 %v12371_v51  ;;  %9558 = vmatprep.subr.bf16.mxu0 %v12372_v45  ;;  %v9413_v51 = vcombine.low %v13551_v42, %v13551_v42  ;;  %v12402_v45 = vld [vmem:[#allocation20 + $0x38] sm:$0xff]   ;;  %v11029_v42 = vld [vmem:[#allocation23 + $0x8] sm:$0xff]  }
 0x9f6   :  { %9580 = vmatprep.subr.bf16.mxu1 %v12373_v38  ;;  %v9415_v38 = vcombine.low %v13553_v60, %v13553_v60  ;;  %v12405_v60 = vld [vmem:[#allocation20 + $0x108] sm:$0xff]  }
 0x9f7   :  { %7868 = vmatmul.mubr.bf16.vlgmr.msra.gmra.mrb[64].mxu0 %v13507_v62 }
 0x9f8   :  { %7950 = vmatmul.mubr.bf16.vlgmr.msra.gmra.mrb[64].mxu1 %v13507_v62  ;;  %9559 = vmatpush3.bf16.msra.mxu0 %v12374_v10  ;;  %v12383_v62 = vld [vmem:[#allocation20 + $0x58] sm:$0xff]   ;;  %v11027_v10 = vld [vmem:[#allocation23 + $0x48] sm:$0xff]  }
 0x9f9   :  { %9560 = vmatprep.subr.bf16.mxu0 %v12375_v14  ;;  %9581 = vmatpush3.bf16.msra.mxu1 %v12376_v16  ;;  %v12404_v14 = vld [vmem:[#allocation20 + $0x100] sm:$0xff]   ;;  %v12406_v16 = vld [vmem:[#allocation20 + $0x110] sm:$0xff]  }
 0x9fa   :  { %9582 = vmatprep.subr.bf16.mxu1 %v12377_v24  ;;  %8096 = vmatprep.mubr.bf16.mxu0 %v9414_v34  ;;  %v12403_v34 = vld [vmem:[#allocation20 + $0xb8] sm:$0xff]  }
 0x9fb   :  { %8136 = vmatprep.mubr.bf16.mxu1 %v9416_v56  ;;  %v11025_v56 = vld [vmem:[#allocation23] sm:$0xff]   ;;  %v12407_v24 = vld [vmem:[#allocation20 + $0x118] sm:$0xff]  }
 0x9fc   :  { %9561 = vmatpush3.bf16.msra.mxu0 %v12378_v5  ;;  %v12408_v5 = vld [vmem:[#allocation20 + $0x120] sm:$0xff]  }
 0x9fd   :  { %9562 = vmatprep.subr.bf16.mxu0 %v12379_v63  ;;  %9583 = vmatpush3.bf16.msra.mxu1 %v12380_v44  ;;  %v12409_v63 = vld [vmem:[#allocation20 + $0x128] sm:$0xff]   ;;  %v12410_v44 = vld [vmem:[#allocation20 + $0x130] sm:$0xff]  }
 0x9fe   :  { %9584 = vmatprep.subr.bf16.mxu1 %v12381_v25  ;;  %v11024_v25 = vld [vmem:[#allocation23 + $0xc0] sm:$0xff]  }
 0xa00   :  { %9563 = vmatpush3.bf16.msra.mxu0 %v12382_v40  ;;  %v11022_v40 = vld [vmem:[#allocation12 + $0x38] ss:$0 sps:$4 sm:$0xff]  }
 0xa01   :  { %9564 = vmatprep.subr.bf16.mxu0 %v12383_v62  ;;  %9585 = vmatpush3.bf16.msra.mxu1 %v12384_v20  ;;  %v12411_v62 = vld [vmem:[#allocation20 + $0x138] sm:$0xff]   ;;  %v11026_v20 = vld [vmem:[#allocation23 + $0x80] sm:$0xff]  }
 0xa02   :  { %9586 = vmatprep.subr.bf16.mxu1 %v12385_v4  ;;  %v11028_v4 = vld [vmem:[#allocation23 + $0xc8] sm:$0xff]  }
 0xa04   :  { %9565 = vmatpush3.bf16.msra.mxu0 %v12386_v53  ;;  %v11030_v53 = vld [vmem:[#allocation23 + $0x88] sm:$0xff]  }
 0xa05   :  { %9566 = vmatprep.subr.bf16.mxu0 %v12387_v57  ;;  %9587 = vmatpush3.bf16.msra.mxu1 %v12388_v23 }
 0xa06   :  { %9588 = vmatprep.subr.bf16.mxu1 %v12389_v55 }
 0xa08   :  { %9567 = vmatpush3.bf16.msra.mxu0 %v12390_v27 }
 0xa09   :  { %9568 = vmatprep.subr.bf16.mxu0 %v12391_v15  ;;  %9589 = vmatpush3.bf16.msra.mxu1 %v12392_v50  ;;  %v11031_v50 = vld [vmem:[#allocation23 + $0x50] sm:$0xff]  }
 0xa0a   :  { %9590 = vmatprep.subr.bf16.mxu1 %v12393_v59  ;;  %v11032_v59 = vld [vmem:[#allocation23 + $0xd0] sm:$0xff]  }
 0xa0c   :  { %9569 = vmatpush3.bf16.msra.mxu0 %v12394_v32 }
 0xa0d   :  { %9570 = vmatprep.subr.bf16.mxu0 %v12395_v41  ;;  %9591 = vmatpush3.bf16.msra.mxu1 %v12396_v26  ;;  %v11033_v26 = vld [vmem:[#allocation23 + $0x10] sm:$0xff]  }
 0xa0e   :  { %9592 = vmatprep.subr.bf16.mxu1 %v12397_v33  ;;  %v11034_v33 = vld [vmem:[#allocation23 + $0x90] sm:$0xff]  }
 0xa10   :  { %9571 = vmatpush3.bf16.msra.mxu0 %v12398_v11 }
 0xa11   :  { %9572 = vmatprep.subr.bf16.mxu0 %v12399_v12  ;;  %9593 = vmatpush3.bf16.msra.mxu1 %v12400_v22  ;;  %v11035_v12 = vld [vmem:[#allocation23 + $0x58] sm:$0xff]  }
 0xa12   :  { %9594 = vmatprep.subr.bf16.mxu1 %v12401_v8  ;;  %v11036_v22 = vld [vmem:[#allocation23 + $0xd8] sm:$0xff]  }
 0xa13   :  { %v11037_v8 = vld [vmem:[#allocation23 + $0x18] sm:$0xff]  }
 0xa14   :  { %9573 = vmatpush3.bf16.msra.mxu0 %v12402_v45  ;;  %v11040_v45 = vld [vmem:[#allocation23 + $0xe0] sm:$0xff]  }
 0xa15   :  { %9697 = vmatprep.subr.bf16.mxu0 %v12781_v36  ;;  %9595 = vmatpush3.bf16.msra.mxu1 %v12403_v34  ;;  %v11042_v34 = vld [vmem:[#allocation23 + $0xa0] sm:$0xff]  }
 0xa16   :  { %9611 = vmatprep.subr.bf16.mxu1 %v11023_v30  ;;  %v11038_v30 = vld [vmem:[#allocation23 + $0x98] sm:$0xff]  }
 0xa17   :  { %8097 = vmatmul.mubr.bf16.vlgmr.msra.gmra.mrb[68].mxu0 %v9413_v51  ;;  %v11039_v51 = vld [vmem:[#allocation23 + $0x60] sm:$0xff]  }
 0xa18   :  { %9698 = vmatpush3.bf16.msra.mxu0 %v12404_v14  ;;  %8137 = vmatmul.mubr.bf16.vlgmr.msra.gmra.mrb[68].mxu1 %v9415_v38  ;;  %v11041_v38 = vld [vmem:[#allocation23 + $0x20] sm:$0xff]   ;;  %v11045_v14 = vld [vmem:[#allocation23 + $0x28] sm:$0xff]  }
 0xa19   :  { %9699 = vmatprep.subr.bf16.mxu0 %v12781_v36  ;;  %9713 = vmatprep.mubr.msk.bf16.mxu0 %vm12782_vm0, %v12781_v36 }
 0xa1a   :  { %9612 = vmatpush3.bf16.msra.mxu1 %v11025_v56  ;;  %v11043_v56 = vld [vmem:[#allocation23 + $0x68] sm:$0xff]  }
 0xa1b   :  { %9613 = vmatprep.subr.bf16.mxu1 %v11027_v10  ;;  %v11044_v10 = vld [vmem:[#allocation23 + $0xe8] sm:$0xff]  }
 0xa1c   :  { %9700 = vmatpush3.bf16.msra.mxu0 %v12405_v60  ;;  %v11047_v60 = vld [vmem:[#allocation23 + $0x70] sm:$0xff]  }
 0xa1d   :  { %9701 = vmatprep.subr.bf16.mxu0 %v12781_v36 }
 0xa1e   :  { %9614 = vmatpush3.bf16.msra.mxu1 %v11029_v42  ;;  %v11046_v42 = vld [vmem:[#allocation23 + $0xa8] sm:$0xff]  }
 0xa1f   :  { %9615 = vmatprep.subr.bf16.mxu1 %v11031_v50 }
 0xa20   :  { %9702 = vmatpush3.bf16.msra.mxu0 %v12406_v16  ;;  %v11048_v16 = vld [vmem:[#allocation23 + $0xf0] sm:$0xff]  }
 0xa21   :  { %9703 = vmatprep.subr.bf16.mxu0 %v12781_v36 }
 0xa22   :  { %9616 = vmatpush3.bf16.msra.mxu1 %v11033_v26 }
 0xa23   :  { %9617 = vmatprep.subr.bf16.mxu1 %v11035_v12 }
 0xa24   :  { %9704 = vmatpush3.bf16.msra.mxu0 %v12407_v24  ;;  %v11049_v24 = vld [vmem:[#allocation23 + $0x30] sm:$0xff]  }
 0xa25   :  { %9705 = vmatprep.subr.bf16.mxu0 %v12781_v36 }
 0xa26   :  { %9618 = vmatpush3.bf16.msra.mxu1 %v11037_v8 }
 0xa27   :  { %9619 = vmatprep.subr.bf16.mxu1 %v11039_v51 }
 0xa28   :  { %9706 = vmatpush3.bf16.msra.mxu0 %v12408_v5  ;;  %v11050_v5 = vld [vmem:[#allocation23 + $0xb0] sm:$0xff]  }
 0xa29   :  { %9707 = vmatprep.subr.bf16.mxu0 %v12781_v36 }
 0xa2a   :  { %9620 = vmatpush3.bf16.msra.mxu1 %v11041_v38 }
 0xa2b   :  { %9621 = vmatprep.subr.bf16.mxu1 %v11043_v56 }
 0xa2c   :  { %9708 = vmatpush3.bf16.msra.mxu0 %v12409_v63  ;;  %v11051_v63 = vld [vmem:[#allocation23 + $0x78] sm:$0xff]  }
 0xa2d   :  { %9709 = vmatprep.subr.bf16.mxu0 %v12781_v36 }
 0xa2e   :  { %9622 = vmatpush3.bf16.msra.mxu1 %v11045_v14 }
 0xa2f   :  { %9623 = vmatprep.subr.bf16.mxu1 %v11047_v60 }
 0xa30   :  { %9710 = vmatpush3.bf16.msra.mxu0 %v12410_v44  ;;  %v11052_v44 = vld [vmem:[#allocation23 + $0xf8] sm:$0xff]  }
 0xa31   :  { %9711 = vmatprep.subr.bf16.mxu0 %v12781_v36 }
 0xa32   :  { %9624 = vmatpush3.bf16.msra.mxu1 %v11049_v24 }
 0xa33   :  { %9625 = vmatprep.subr.bf16.mxu1 %v11051_v63 }
 0xa34   :  { %9712 = vmatpush3.bf16.msra.mxu0 %v12411_v62  ;;  %v9763_v62 = vadd.f32 %v13207_v35, %v13543_v28 }
 0xa35   :  { %9633 = vmatprep.subr.bf16.mxu0 %v11024_v25  ;;  %v11053_v25 = vld [vmem:[#allocation23 + $0x38] sm:$0xff]  }
 0xa36   :  { %9626 = vmatpush3.bf16.msra.mxu1 %v11053_v25 }
 0xa37   :  { %9714 = vmatmul.mubr.bf16.vlgmr.msra.gmra.mrb[72].mxu0 %v11022_v40  ;;  %v11054_v40 = vld [vmem:[#allocation23 + $0xb8] sm:$0xff]   ;;  %9717 = vmatprep.subr.mxu1 %v12781_v36 }
 0xa38   :  { %9634 = vmatpush3.bf16.msra.mxu0 %v11026_v20  ;;  %v9767_v20 = vadd.f32 %v13209_v37, %v13545_v29 }
 0xa39   :  { %9635 = vmatprep.subr.bf16.mxu0 %v11028_v4  ;;  %v9765_v4 = vadd.f32 %v13211_v58, %v13547_v13 }
 0xa3a   :  { %v9407_v50 = vmul.f32 -1.442695, %v9767_v20 }
 0xa3c   :  { %9636 = vmatpush3.bf16.msra.mxu0 %v11030_v53  ;;  %v9769_v53 = vadd.f32 %v13213_v61, %v13549_v31 }
 0xa3d   :  { %9637 = vmatprep.subr.bf16.mxu0 %v11032_v59  ;;  %v9406_v59 = vmul.f32 -1.442695, %v9765_v4 }
 0xa40   :  { %9638 = vmatpush3.bf16.msra.mxu0 %v11034_v33 }
 0xa41   :  { %9639 = vmatprep.subr.bf16.mxu0 %v11036_v22 }
 0xa44   :  { %9640 = vmatpush3.bf16.msra.mxu0 %v11038_v30 }
 0xa45   :  { %9641 = vmatprep.subr.bf16.mxu0 %v11040_v45 }
 0xa48   :  { %9642 = vmatpush3.bf16.msra.mxu0 %v11042_v34 }
 0xa49   :  { %9643 = vmatprep.subr.bf16.mxu0 %v11044_v10 }
 0xa4a   :  { %v13575_v57 = vpop.f32.mrb[52].mxu0 }
 0xa4b   :  { %v13577_v23 = vpop.f32.mrb[52].mxu1  ;;  %v13579_v55 = vpop.f32.mrb[53].mxu0  ;;  %v9771_v35 = vadd.f32 %v13227_v17, %v13575_v57 }
 0xa4c   :  { %v13581_v27 = vpop.f32.mrb[53].mxu1  ;;  %v7709_v15 = vpop.f32.mrb[54].mxu0  ;;  %9644 = vmatpush3.bf16.msra.mxu0 %v11046_v42  ;;  %v9775_v37 = vadd.f32 %v13229_v48, %v13577_v23  ;;  %v9773_v58 = vadd.f32 %v13231_v18, %v13579_v55 }
 0xa4d   :  { %v7791_v32 = vpop.f32.mrb[54].mxu1  ;;  %v7710_v41 = vpop.f32.mrb[55].mxu0  ;;  %9645 = vmatprep.subr.bf16.mxu0 %v11048_v16  ;;  %v9405_v15 = vmul.f32 -1.442695, %v9763_v62  ;;  %v9777_v61 = vadd.f32 %v13233_v19, %v13581_v27  ;;  %v9409_v28 = vmul.f32 -1.442695, %v9771_v35 }
 0xa4e   :  { %v7792_v11 = vpop.f32.mrb[55].mxu1  ;;  %v9408_v32 = vmul.f32 -1.442695, %v9769_v53  ;;  %v9411_v29 = vmul.f32 -1.442695, %v9775_v37 }
 0xa4f   :  { %11135 = vpow2.f32 %v9405_v15  ;;  %v9410_v31 = vmul.f32 -1.442695, %v9773_v58  ;;  %v9412_v26 = vmul.f32 -1.442695, %v9777_v61 }
 0xa50   :  { %9646 = vmatpush3.bf16.msra.mxu0 %v11050_v5  ;;  %11137 = vpow2.f32 %v9407_v50 }
 0xa51   :  { %9647 = vmatprep.subr.bf16.mxu0 %v11052_v44  ;;  %11139 = vpow2.f32 %v9406_v59 }
 0xa52   :  { %11141 = vpow2.f32 %v9408_v32 }
 0xa53   :  { %11143 = vpow2.f32 %v9409_v28 }
 0xa54   :  { %9648 = vmatpush3.bf16.msra.mxu0 %v11054_v40  ;;  %11145 = vpow2.f32 %v9411_v29 }
 0xa55   :  { %11147 = vpow2.f32 %v9410_v31 }
 0xa56   :  { %11149 = vpow2.f32 %v9412_v26 }
 0xa59   :  { %v11136_v13 = vpop.eup %11135 }
 0xa5a   :  { %v11138_v41 = vpop.eup %11137  ;;  %v7974_v12 = vadd.f32 1.0, %v11136_v13 }
 0xa5b   :  { %v11140_v33 = vpop.eup %11139  ;;  %v7976_v17 = vadd.f32 1.0, %v11138_v41 }
 0xa5c   :  { %v11142_v11 = vpop.eup %11141  ;;  %v7975_v48 = vadd.f32 1.0, %v11140_v33  ;;  %11151 = vrcp.f32 %v7974_v12 }
 0xa5d   :  { %v7977_v57 = vadd.f32 1.0, %v11142_v11  ;;  %11153 = vrcp.f32 %v7976_v17  ;;  %v11144_v18 = vpop.eup %11143 }
 0xa5e   :  { %11155 = vrcp.f32 %v7975_v48  ;;  %v11146_v19 = vpop.eup %11145  ;;  %v8002_v27 = vadd.f32 1.0, %v11144_v18 }
 0xa5f   :  { %11157 = vrcp.f32 %v7977_v57  ;;  %v11148_v23 = vpop.eup %11147  ;;  %v8004_v22 = vadd.f32 1.0, %v11146_v19 }
 0xa60   :  { %v11150_v55 = vpop.eup %11149  ;;  %v8003_v51 = vadd.f32 1.0, %v11148_v23  ;;  %11159 = vrcp.f32 %v8002_v27 }
 0xa61   :  { %v8005_v10 = vadd.f32 1.0, %v11150_v55  ;;  %11161 = vrcp.f32 %v8004_v22 }
 0xa62   :  { %11163 = vrcp.f32 %v8003_v51 }
 0xa63   :  { %11165 = vrcp.f32 %v8005_v10 }
 0xa66   :  { %v11152_v30 = vpop.eup %11151 }
 0xa67   :  { %v11154_v56 = vpop.eup %11153 }
 0xa68   :  { %v11156_v24 = vpop.eup %11155 }
 0xa69   :  { %v11158_v40 = vpop.eup %11157 }
 0xaca   :  { %v7869_v8 = vpop.f32.mrb[64].mxu0 }
 0xacb   :  { %v9778_v45 = vadd.f32 %v7869_v8, %v13247_v0  ;;  %v7951_v38 = vpop.f32.mrb[64].mxu1  ;;  %v7871_v34 = vpop.f32.mrb[65].mxu0 }
 0xacc   :  { %v9780_v14 = vadd.f32 %v7951_v38, %v13250_v2  ;;  %v9779_v42 = vadd.f32 %v7871_v34, %v13256_v6  ;;  %v7953_v60 = vpop.f32.mrb[65].mxu1  ;;  %v7873_v16 = vpop.f32.mrb[66].mxu0 }
 0xacd   :  { %v8014_v5 = vmul.f32 %v11152_v30, %v9778_v45  ;;  %v9781_v63 = vadd.f32 %v7953_v60, %v13259_v7  ;;  %v7955_v44 = vpop.f32.mrb[66].mxu1  ;;  %v7874_v25 = vpop.f32.mrb[67].mxu0  ;;  %v12412_v45 = vld [vmem:[#allocation21] ss:$0 sm:$0xff] }
 0xace   :  { %v8016_v0 = vmul.f32 %v11154_v56, %v9780_v14  ;;  %v8015_v62 = vmul.f32 %v11156_v24, %v9779_v42  ;;  %v7956_v20 = vpop.f32.mrb[67].mxu1  ;;  %v11160_v7 = vpop.eup %11159 }
 0xacf   :  { %v8018_v4 = vadd.f32 %v8014_v5, %v13520_v3  ;;  %v8017_v2 = vmul.f32 %v11158_v40, %v9781_v63  ;;  %v11162_v50 = vpop.eup %11161  ;;  %v8026_v35 = vsub.f32 1.0, %v11160_v7 }
 0xad0   :  { %v8020_v6 = vadd.f32 %v8016_v0, %v13531_v21  ;;  %v8019_v53 = vadd.f32 %v8015_v62, %v13523_v9  ;;  %v11164_v59 = vpop.eup %11163  ;;  %v8028_v58 = vsub.f32 1.0, %v11162_v50  ;;  %v8034_v21 = vmul.f32 %v11160_v7, %v13446_v54  ;;  %v8537_v0 = vld [vmem:[#allocation26] sm:$0x3] }
 0xad1   :  { %11167 = vtanh.f32 %v8018_v4  ;;  %v8021_v15 = vadd.f32 %v8017_v2, %v13533_v1  ;;  %v11166_v32 = vpop.eup %11165  ;;  %v8027_v61 = vsub.f32 1.0, %v11164_v59  ;;  %v8036_v1 = vmul.f32 %v11162_v50, %v13449_v43  ;;  %v8264_v4 = vld [vmem:[#allocation24] sm:$0x1] }
 0xad2   :  { %11169 = vtanh.f32 %v8020_v6  ;;  %v8029_v9 = vsub.f32 1.0, %v11166_v32  ;;  %v8035_v26 = vmul.f32 %v11164_v59, %v13451_v49  ;;  %v8037_v12 = vmul.f32 %v11166_v32, %v13453_v46 }
 0xad3   :  { %11171 = vtanh.f32 %v8019_v53  ;;  %v8546_v50 = vrot.slane %v8537_v0, %v13083_v52  ;;  %v8557_v52 = vld [vmem:[#allocation5] sm:$0x1] }
 0xad4   :  { %11173 = vtanh.f32 %v8021_v15 }
 0xadb   :  { %v11168_v37 = vpop.eup %11167 }
 0xadc   :  { %v11170_v3 = vpop.eup %11169  ;;  %v8030_v28 = vmul.f32 %v11168_v37, %v8026_v35 }
 0xadd   :  { %v11172_v29 = vpop.eup %11171  ;;  %v8032_v13 = vmul.f32 %v11170_v3, %v8028_v58  ;;  %v8542_v58 = vrot.slane %v8537_v0, %v13098_v39 }
 0xade   :  { %v11174_v31 = vpop.eup %11173  ;;  %v8031_v41 = vmul.f32 %v11172_v29, %v8027_v61  ;;  %v8038_v33 = vadd.f32 %v8034_v21, %v8030_v28 }
 0xadf   :  { %v8033_v11 = vmul.f32 %v11174_v31, %v8029_v9  ;;  %v8040_v17 = vadd.f32 %v8036_v1, %v8032_v13 }
 0xae0   :  { %v8039_v48 = vadd.f32 %v8035_v26, %v8031_v41  ;;  %v8196_v23 = vpack.c.bf16 %v8038_v33, %v8038_v33 }
 0xae1   :  { %v8041_v57 = vadd.f32 %v8037_v12, %v8033_v11  ;;  %v8198_v54 = vpack.c.bf16 %v8040_v17, %v8040_v17 }
 0xae2   :  { %v8197_v18 = vpack.c.bf16 %v8039_v48, %v8039_v48 }
 0xae3   :  { %v8199_v19 = vpack.c.bf16 %v8041_v57, %v8041_v57 }
 0xae4   :  { %8489 = vmatprep.mubr.bf16.mxu1 %v8197_v18 }
 0xae5   :  { %8529 = vmatprep.mubr.bf16.mxu0 %v8199_v19  ;;  %8490 = vmatmul.mubr.bf16.vlgmr.msra.gmra.mrb[72].mxu1 %v8196_v23 }
 0xae6   :  { %8530 = vmatmul.mubr.bf16.vlgmr.msra.gmra.mrb[76].mxu0 %v8198_v54  ;;  %9719 = vmatprep.mubr.msk.f32.mxu1 %vm12782_vm0, %v12781_v36  ;;  %v8185_v36 = vstv %s9418_s13 }
 0xae7   :  { %vm8186_vm5 = vcmp.lt.s32.totalorder %v13080_v47, %v8185_v36 }
 0xaea   :  { %v9574_v43 = vpop.f32.mrb[68].mxu0 }
 0xaeb   :  { %v9575_v49 = vpop.f32.mrb[69].mxu0  ;;  %v9596_v55 = vpop.f32.mrb[68].mxu1 }
 0xaec   :  { %v9576_v27 = vadd.f32 %v9575_v49, %v9574_v43  ;;  %v9597_v22 = vpop.f32.mrb[69].mxu1  ;;  %v9577_v46 = vpop.f32.mrb[70].mxu0 }
 0xaed   :  { %v9598_v8 = vadd.f32 %v9597_v22, %v9596_v55  ;;  %v9578_v30 = vpop.f32.mrb[71].mxu0  ;;  %v9599_v51 = vpop.f32.mrb[70].mxu1 }
 0xaee   :  { %v8099_v38 = vadd.f32 %v12412_v45, %v9576_v27  ;;  %v9600_v34 = vpop.f32.mrb[71].mxu1 }
 0xaf0   :  { %v8139_v56 = vadd.f32 %v9598_v8, %v8099_v38 }
 0xb0a   :  { %v8178_v10 = vpop.f32.mrb[72].mxu0 }
 0xb0b   :  { %v8179_v14 = vadd.f32 %v8178_v10, %v8139_v56  ;;  %v9715_v42 = vpop.f32.mrb[73].mxu0 }
 0xb0c   :  { %v8181_v60 = vpop.f32.mrb[74].mxu0 }
 0xb0d   :  { %9718 = vmatpush3.xpose.msra.mxu1 %v8179_v14  ;;  %v9716_v16 = vpop.f32.mrb[75].mxu0  ;;  %v8189_v24 = vsel %vm8186_vm5, %v8179_v14, -inf }
 0xb0e   :  { %v8190_v5 = vrot.slane %v8189_v24, 4 }
 0xb10   :  { %v8191_v63 = vmax.f32 %v8189_v24, %v8190_v5 }
 0xb12   :  { %v8192_v44 = vrot.slane %v8191_v63, 2 }
 0xb14   :  { %v8193_v25 = vmax.f32 %v8191_v63, %v8192_v44 }
 0xb16   :  { %v8194_v40 = vrot.slane %v8193_v25, 1 }
 0xb18   :  { %v8195_v7 = vmax.f32 %v8193_v25, %v8194_v40 }
 0xb1a   :  { %v8550_v61 = vmul.f32 %v8546_v50, %v8195_v7 }
 0xb1c   :  { %v8553_v29 = vsel %vm8551_vm6, %v8550_v61, 0.0 }
 0xbb8   :  { %v9627_v62 = vpop.f32.mrb[72].mxu1 }
 0xbb9   :  { %v9649_v20 = vpop.f32.mrb[76].mxu0  ;;  %v9628_v2 = vpop.f32.mrb[73].mxu1 }
 0xbba   :  { %v9629_v6 = vadd.f32 %v9628_v2, %v9627_v62  ;;  %v9650_v53 = vpop.f32.mrb[77].mxu0  ;;  %v9630_v15 = vpop.f32.mrb[74].mxu1 }
 0xbbb   :  { %v9651_v59 = vadd.f32 %v9650_v53, %v9649_v20  ;;  %v9652_v32 = vpop.f32.mrb[78].mxu0  ;;  %v9631_v47 = vpop.f32.mrb[75].mxu1 }
 0xbbc   :  { %v8492_v35 = vadd.f32 %v9629_v6, %v8264_v4  ;;  %v9653_v37 = vpop.f32.mrb[79].mxu0 }
 0xbbe   :  { %v8532_v3 = vadd.f32 %v9651_v59, %v8492_v35 }
 0xbc0   :  { %9720 = vmatmul.mubr.f32.vlgmr.msra.gmra.mrb[76].mxu1 %v8532_v3  ;;  %v8549_v28 = vmul.f32 %v8542_v58, %v8532_v3 }
 0xbc2   :  { %v8552_v21 = vsel %vm8551_vm6, %v8549_v28, 0.0 }
 0xbc3   :  { %v8554_v9 = vadd.f32 %v8553_v29, %v8552_v21 }
 0xbc5   :  { %8555 = vadd.xlane.f32.xlu0 %v8554_v9 }
 0xc52   :  { %v8556_v31 = vpop.xlane.xlu0 %8555 }
 0xc53   :  { %v8558_v41 = vadd.f32 %v8557_v52, %v8556_v31 }
 0xc93   :  { %v8625_v13 = vpop.f32.mrb[76].mxu1 }
 0xc94   :  { %v9721_v1 = vpop.f32.mrb[77].mxu1  ;;  %8630 = vrot.lane.b32.xlu0 %v8625_v13, %s12783_s15 }
 0xd06   :  { %v8631_v26 = vpop.permute.xlu0 %8630 }
 0xd07   :  { %v8634_v33 = vsel %vm8633_vm7, %v8558_v41, %v8631_v26 }
 0xd08   :  { %v9451_v39 = vmul.f32 -1.442695, %v8634_v33 }
 0xd0a   :  { %11175 = vpow2.f32 %v9451_v39 }
 0xd14   :  { %v11176_v11 = vpop.eup %11175 }
 0xd15   :  { %v8638_v12 = vadd.f32 1.0, %v11176_v11 }
 0xd17   :  { %11177 = vrcp.f32 %v8638_v12 }
 0xd21   :  { %v11178_v17 = vpop.eup %11177 }
 0xd22   :  { %8642 = vst.msk [vmem:[#allocation27] sm:$0x1] %vm8641_vm8, %v11178_v17 }
 0xd23   :  { %12730 = shalt.err (!%p12727_p2)
}
 0xd24   :  { %s12731_s26 = scalar_lea.hbm %s13643_s16, 16 }
 0xd25   :  { %p12732_p3 = scmp.ne.s32.totalorder %s13643_s16, %s12731_s26  ;;  %p12735_p4 = scmp.lt.u32.totalorder %s12731_s26, %s13643_s16 }
 0xd27   :  { %p12737_p5 = pnand %p12735_p4, %p12732_p3 }
 0xd29   :  { %12740 = shalt.err (!%p12737_p5)
}
 0xd2a   :  { %8652 = dma.vmem_to_hbm [thread:$0]  %s8650_s27, 16, %s13643_s16, [#allocation8]  }
 0xd2b   :  { %12757 = dma.done.wait [#allocation8], 16  }
 0xd2c   :  { %12758 = vsyncadd [#allocation8], 4294967280 }
 0xd2d   :  { %8656 = vsyncpa [#allocation7], 1 }
 0xd2e   :  { %8657 = vsyncpa [#allocation10], 1 }
 0xd2f   :  { %8658 = vsyncpa [#allocation13], 1 }
 0xd30   :  { %8659 = vsyncpa [#allocation16], 1 }
 0xd31   :  { %8660 = vsyncpa [#allocation19], 1 }
 0xd32   :  { %8661 = vsyncpa [#allocation22], 1 }
 0xd33   :  { %8662 = vsyncpa [#allocation25], 1 }
 0xd34   :  { %8663 = vsyncpa [#allocation8], 1 }

</bundles_post_ra>
